<compile_context>
chip_gen: v6e
topology: v6e:2x2x1
jax: 0.10.0
libtpu: 0.0.40
codegen_flags: <defaults>
</compile_context>

<pallas_src>
import functools

import numpy as np
import jax
import jax.numpy as jnp
from jax.experimental import pallas as pl
from jax.experimental.pallas import tpu as pltpu

PAD = 0          # Constants.PAD
_NEG = -1e9      # additive mask value for blocked positions


def _pick_vmem_limit():
    # v5e/v6e: 128 MiB physical VMEM -> allow 96 MiB; v7x: 64 MiB -> stay at 48 MiB.
    try:
        cap = getattr(pltpu.get_tpu_info(), "vmem_capacity_bytes", 0) or 0
        if cap >= 100 * 1024 * 1024:
            return 96 * 1024 * 1024
    except Exception:
        pass
    return 48 * 1024 * 1024


_VMEM_LIMIT = _pick_vmem_limit()


# -----------------------------------------------------------------------------
# In-kernel helpers (operate on loaded values, not refs)
# -----------------------------------------------------------------------------

def _dot_qkT(q, k):
    """Q @ K^T without an explicit transpose: contract dim 1 of both operands."""
    return jax.lax.dot_general(q, k, (((1,), (1,)), ((), ())),
                               preferred_element_type=jnp.float32)


def _softmax(s):
    """Row softmax on f32 scores that already include the additive mask."""
    s = s - jnp.max(s, axis=-1, keepdims=True)
    e = jnp.exp(s)
    return e * pl.reciprocal(jnp.sum(e, axis=-1, keepdims=True), approx=True)


def _layer_norm(x, g, b):
    mu = jnp.mean(x, axis=-1, keepdims=True)
    var = jnp.mean(jnp.square(x - mu), axis=-1, keepdims=True)
    return (x - mu) * jax.lax.rsqrt(var + 1e-5) * g + b


# -----------------------------------------------------------------------------
# Fused encoder STACK kernel (all layers of TrfEncoder / SynTrfEncoder in one call)
# -----------------------------------------------------------------------------

def _enc_stack_kernel(n_layer, n_head, d_k, d_v, return_attns, *args):
    if return_attns:
        ins = args[:-2]
        o_ref, attn_ref = args[-2:]
    else:
        ins = args[:-1]
        o_ref, attn_ref = args[-1], None
    (x_ref, bias_ref, np_ref,
     wqkv_ref, bqkv_ref, wfc_ref, bfc_ref, g1_ref, bln1_ref,
     w1_ref, b1_ref, w2_ref, b2_ref, g2_ref, bln2_ref) = ins

    x = x_ref[0]              # (L, D) f32
    bias = bias_ref[0]        # (Mq, Lk) f32 additive (-1e9 == blocked), Mq in {1, L}
    nonpad = np_ref[0]        # (L, 1) f32
    L, D = x.shape
    koff = n_head * d_k
    voff = 2 * n_head * d_k

    for l in range(n_layer):                       # layers stay VMEM / vreg resident
        # ---- self attention (fused QKV, per-head W_fc accumulation) ----
        xb = x.astype(jnp.bfloat16)
        qkv = jnp.dot(xb, wqkv_ref[l], preferred_element_type=jnp.float32) + bqkv_ref[l]
        qkv_b = qkv.astype(jnp.bfloat16)           # single cast per sub-layer
        w_fc = wfc_ref[l]                          # (H*dv, D) bf16, loaded once per layer
        ctx = jnp.zeros((L, D), jnp.float32)
        for h in range(n_head):
            qh = qkv_b[:, h * d_k:(h + 1) * d_k]                   # scale folded in weights
            kh = qkv_b[:, koff + h * d_k: koff + (h + 1) * d_k]
            vh = qkv_b[:, voff + h * d_v: voff + (h + 1) * d_v]
            p = _softmax(_dot_qkT(qh, kh) + bias)
            if attn_ref is not None:
                attn_ref[0, l * n_head + h] = p
            hv = jnp.dot(p.astype(jnp.bfloat16), vh, preferred_element_type=jnp.float32)
            ctx = ctx + jnp.dot(hv.astype(jnp.bfloat16), w_fc[h * d_v:(h + 1) * d_v, :],
                                preferred_element_type=jnp.float32)
        x1 = _layer_norm(ctx + bfc_ref[l] + x, g1_ref[l], bln1_ref[l]) * nonpad

        # ---- position-wise FFN (1x1 conv == matmul) + add&LN ----
        x1b = x1.astype(jnp.bfloat16)
        hdn = jnp.maximum(
            jnp.dot(x1b, w1_ref[l], preferred_element_type=jnp.float32) + b1_ref[l], 0.0)
        y = jnp.dot(hdn.astype(jnp.bfloat16), w2_ref[l],
                    preferred_element_type=jnp.float32) + b2_ref[l]
        x = _layer_norm(y + x1, g2_ref[l], bln2_ref[l]) * nonpad

    o_ref[0] = x.astype(o_ref.dtype)


# -----------------------------------------------------------------------------
# Fused decoder STACK kernel (all MultiEncDecoder layers in one call)
# -----------------------------------------------------------------------------

def _dec_stack_kernel(n_layer, n_head, n_txt, n_syn, d_k, d_v, return_attns, *args):
    if return_attns:
        ins = args[:-4]
        o_ref, a_slf_ref, a_txt_ref, a_syn_ref = args[-4:]
    else:
        ins = args[:-1]
        o_ref = args[-1]
        a_slf_ref = a_txt_ref = a_syn_ref = None
    (x_ref, txt_ref, syn_ref, slf_kp_ref, txt_kp_ref, syn_kp_ref, np_ref,
     s_wqkv_ref, s_bqkv_ref, s_wfc_ref, s_bfc_ref, s_g_ref, s_b_ref,
     c_wq_ref, c_bq_ref, c_wkvt_ref, c_bkvt_ref, c_wkvs_ref, c_bkvs_ref,
     c_wfc_ref, c_bfc_ref, c_g_ref, c_b_ref,
     f_w1_ref, f_b1_ref, f_w2_ref, f_b2_ref, f_g_ref, f_b_ref) = ins

    x = x_ref[0]              # (Lt, D) f32
    txt_b = txt_ref[0]        # (Ltxt, D) bf16 (encoder output)
    syn_b = syn_ref[0]        # (Lsyn, D) bf16
    nonpad = np_ref[0]        # (Lt, 1) f32
    Lt, D = x.shape

    # Additive masks: causal mask built in-kernel, key-pad masks are (1, Lk) vectors.
    row = jax.lax.broadcasted_iota(jnp.int32, (Lt, Lt), 0)
    col = jax.lax.broadcasted_iota(jnp.int32, (Lt, Lt), 1)
    causal = jnp.where(col > row, _NEG, 0.0).astype(jnp.float32)
    slf_bias = causal + slf_kp_ref[0]              # (Lt, Lt) + (1, Lt)
    txt_bias = txt_kp_ref[0]                       # (1, Ltxt)
    syn_bias = syn_kp_ref[0]                       # (1, Lsyn)

    koff = n_head * d_k
    voff = 2 * n_head * d_k

    for l in range(n_layer):
        # ---- masked self attention + add&LN ----
        xb = x.astype(jnp.bfloat16)
        qkv = jnp.dot(xb, s_wqkv_ref[l], preferred_element_type=jnp.float32) + s_bqkv_ref[l]
        qkv_b = qkv.astype(jnp.bfloat16)
        s_wfc = s_wfc_ref[l]
        ctx = jnp.zeros((Lt, D), jnp.float32)
        for h in range(n_head):
            qh = qkv_b[:, h * d_k:(h + 1) * d_k]
            kh = qkv_b[:, koff + h * d_k: koff + (h + 1) * d_k]
            vh = qkv_b[:, voff + h * d_v: voff + (h + 1) * d_v]
            p = _softmax(_dot_qkT(qh, kh) + slf_bias)
            if a_slf_ref is not None:
                a_slf_ref[0, l * n_head + h] = p
            hv = jnp.dot(p.astype(jnp.bfloat16), vh, preferred_element_type=jnp.float32)
            ctx = ctx + jnp.dot(hv.astype(jnp.bfloat16), s_wfc[h * d_v:(h + 1) * d_v, :],
                                preferred_element_type=jnp.float32)
        x1 = _layer_norm(ctx + s_bfc_ref[l] + x, s_g_ref[l], s_b_ref[l]) * nonpad

        # ---- multi-source cross attention (txt heads + syn heads) + add&LN ----
        x1b = x1.astype(jnp.bfloat16)
        q_all = (jnp.dot(x1b, c_wq_ref[l], preferred_element_type=jnp.float32)
                 + c_bq_ref[l]).astype(jnp.bfloat16)
        kv_t = (jnp.dot(txt_b, c_wkvt_ref[l], preferred_element_type=jnp.float32)
                + c_bkvt_ref[l]).astype(jnp.bfloat16)
        kv_s = (jnp.dot(syn_b, c_wkvs_ref[l], preferred_element_type=jnp.float32)
                + c_bkvs_ref[l]).astype(jnp.bfloat16)
        c_wfc = c_wfc_ref[l]
        ctx = jnp.zeros((Lt, D), jnp.float32)
        for h in range(n_txt):
            qh = q_all[:, h * d_k:(h + 1) * d_k]
            kh = kv_t[:, h * d_k:(h + 1) * d_k]
            vh = kv_t[:, n_txt * d_k + h * d_v: n_txt * d_k + (h + 1) * d_v]
            p = _softmax(_dot_qkT(qh, kh) + txt_bias)
            if a_txt_ref is not None:
                a_txt_ref[0, l * n_txt + h] = p
            hv = jnp.dot(p.astype(jnp.bfloat16), vh, preferred_element_type=jnp.float32)
            ctx = ctx + jnp.dot(hv.astype(jnp.bfloat16), c_wfc[h * d_v:(h + 1) * d_v, :],
                                preferred_element_type=jnp.float32)
        for h in range(n_syn):
            qh = q_all[:, (n_txt + h) * d_k:(n_txt + h + 1) * d_k]
            kh = kv_s[:, h * d_k:(h + 1) * d_k]
            vh = kv_s[:, n_syn * d_k + h * d_v: n_syn * d_k + (h + 1) * d_v]
            p = _softmax(_dot_qkT(qh, kh) + syn_bias)
            if a_syn_ref is not None:
                a_syn_ref[0, l * n_syn + h] = p
            hv = jnp.dot(p.astype(jnp.bfloat16), vh, preferred_element_type=jnp.float32)
            ctx = ctx + jnp.dot(
                hv.astype(jnp.bfloat16), c_wfc[(n_txt + h) * d_v:(n_txt + h + 1) * d_v, :],
                preferred_element_type=jnp.float32)
        x2 = _layer_norm(ctx + c_bfc_ref[l] + x1, c_g_ref[l], c_b_ref[l]) * nonpad

        # ---- position-wise FFN + add&LN ----
        x2b = x2.astype(jnp.bfloat16)
        hdn = jnp.maximum(
            jnp.dot(x2b, f_w1_ref[l], preferred_element_type=jnp.float32) + f_b1_ref[l], 0.0)
        y = jnp.dot(hdn.astype(jnp.bfloat16), f_w2_ref[l],
                    preferred_element_type=jnp.float32) + f_b2_ref[l]
        x = _layer_norm(y + x2, f_g_ref[l], f_b_ref[l]) * nonpad

    o_ref[0] = x.astype(o_ref.dtype)


# -----------------------------------------------------------------------------
# pallas_call wrappers
# -----------------------------------------------------------------------------

def _inv(arr):
    """Grid-invariant whole-array block (weights / biases): DMA'd once, stays in VMEM."""
    nd = arr.ndim
    return pl.BlockSpec(arr.shape, lambda *args, _nd=nd: (0,) * _nd)


_ENC_WEIGHT_KEYS = ("w_qkv", "b_qkv", "w_fc", "b_fc", "ln1_g", "ln1_b",
                    "w1", "b1", "w2", "b2", "ln2_g", "ln2_b")

_DEC_WEIGHT_KEYS = ("w_qkv", "b_qkv", "w_fc", "b_fc", "ln1_g", "ln1_b",
                    "c_wq", "c_bq", "c_wkv_t", "c_bkv_t", "c_wkv_s", "c_bkv_s",
                    "c_wfc", "c_bfc", "c_ln_g", "c_ln_b",
                    "w1", "b1", "w2", "b2", "ln2_g", "ln2_b")


def encoder_stack(x, attn_bias, non_pad, p, cfg, return_attns=True):
    B, L, D = x.shape
    Mq, Lk = attn_bias.shape[1], attn_bias.shape[2]
    n_layer = p["w_qkv"].shape[0]
    H, dk, dv = cfg["n_head"], cfg["d_k"], cfg["d_v"]
    kernel = functools.partial(_enc_stack_kernel, n_layer, H, dk, dv, return_attns)
    weights = [p[k] for k in _ENC_WEIGHT_KEYS]
    in_specs = ([pl.BlockSpec((1, L, D), lambda b: (b, 0, 0)),
                 pl.BlockSpec((1, Mq, Lk), lambda b: (b, 0, 0)),
                 pl.BlockSpec((1, L, 1), lambda b: (b, 0, 0))]
                + [_inv(w) for w in weights])
    out_specs = [pl.BlockSpec((1, L, D), lambda b: (b, 0, 0))]
    out_shape = [jax.ShapeDtypeStruct((B, L, D), jnp.bfloat16)]
    if return_attns:
        out_specs.append(pl.BlockSpec((1, n_layer * H, L, Lk), lambda b: (b, 0, 0, 0)))
        out_shape.append(jax.ShapeDtypeStruct((B, n_layer * H, L, Lk), jnp.float32))
    res = pl.pallas_call(
        kernel, grid=(B,), in_specs=in_specs, out_specs=out_specs, out_shape=out_shape,
        compiler_params=pltpu.CompilerParams(dimension_semantics=("parallel",),
                                             vmem_limit_bytes=_VMEM_LIMIT),
    )(x, attn_bias, non_pad, *weights)
    return res[0], (res[1] if return_attns else None)


def decoder_stack(x, txt_enc, syn_enc, slf_kp, txt_kp, syn_kp, non_pad, p, cfg,
                  return_attns=True):
    B, Lt, D = x.shape
    Ltxt, Lsyn = txt_enc.shape[1], syn_enc.shape[1]
    n_layer = p["w_qkv"].shape[0]
    H, nt, ns = cfg["n_head"], cfg["n_txt_attn_head"], cfg["n_syn_attn_head"]
    dk, dv = cfg["d_k"], cfg["d_v"]
    kernel = functools.partial(_dec_stack_kernel, n_layer, H, nt, ns, dk, dv, return_attns)
    weights = [p[k] for k in _DEC_WEIGHT_KEYS]
    in_specs = ([pl.BlockSpec((1, Lt, D), lambda b: (b, 0, 0)),
                 pl.BlockSpec((1, Ltxt, D), lambda b: (b, 0, 0)),
                 pl.BlockSpec((1, Lsyn, D), lambda b: (b, 0, 0)),
                 pl.BlockSpec((1, 1, Lt), lambda b: (b, 0, 0)),
                 pl.BlockSpec((1, 1, Ltxt), lambda b: (b, 0, 0)),
                 pl.BlockSpec((1, 1, Lsyn), lambda b: (b, 0, 0)),
                 pl.BlockSpec((1, Lt, 1), lambda b: (b, 0, 0))]
                + [_inv(w) for w in weights])
    out_specs = [pl.BlockSpec((1, Lt, D), lambda b: (b, 0, 0))]
    out_shape = [jax.ShapeDtypeStruct((B, Lt, D), jnp.bfloat16)]
    if return_attns:
        out_specs += [pl.BlockSpec((1, n_layer * H, Lt, Lt), lambda b: (b, 0, 0, 0)),
                      pl.BlockSpec((1, n_layer * nt, Lt, Ltxt), lambda b: (b, 0, 0, 0)),
                      pl.BlockSpec((1, n_layer * ns, Lt, Lsyn), lambda b: (b, 0, 0, 0))]
        out_shape += [jax.ShapeDtypeStruct((B, n_layer * H, Lt, Lt), jnp.float32),
                      jax.ShapeDtypeStruct((B, n_layer * nt, Lt, Ltxt), jnp.float32),
                      jax.ShapeDtypeStruct((B, n_layer * ns, Lt, Lsyn), jnp.float32)]
    res = pl.pallas_call(
        kernel, grid=(B,), in_specs=in_specs, out_specs=out_specs, out_shape=out_shape,
        compiler_params=pltpu.CompilerParams(dimension_semantics=("parallel",),
                                             vmem_limit_bytes=_VMEM_LIMIT),
    )(x, txt_enc, syn_enc, slf_kp, txt_kp, syn_kp, non_pad, *weights)
    if return_attns:
        return res[0], res[1], res[2], res[3]
    return res[0], None, None, None


# -----------------------------------------------------------------------------
# Tied-weight output projection: logits = (x @ emb^T) * scale, tiled over rows / vocab
# -----------------------------------------------------------------------------

def _logits_kernel(scale, x_ref, emb_ref, o_ref):
    o_ref[...] = jax.lax.dot_general(
        x_ref[...].astype(jnp.bfloat16), emb_ref[...].astype(jnp.bfloat16),
        dimension_numbers=(((1,), (1,)), ((), ())),      # contract emb dim 1 (no transpose)
        preferred_element_type=jnp.float32) * scale


def _pick_tile(n, candidates):
    for c in candidates:
        if n % c == 0:
            return c
    return n


def tied_logits(x2d, emb, scale):
    M, D = x2d.shape
    V = emb.shape[0]
    tm = _pick_tile(M, (512, 256, 128))
    tv = _pick_tile(V, (2048, 1024, 512, 256, 128))
    return pl.pallas_call(
        functools.partial(_logits_kernel, float(scale)),
        grid=(M // tm, V // tv),
        in_specs=[pl.BlockSpec((tm, D), lambda i, j: (i, 0)),
                  pl.BlockSpec((tv, D), lambda i, j: (j, 0))],
        out_specs=pl.BlockSpec((tm, tv), lambda i, j: (i, j)),
        out_shape=jax.ShapeDtypeStruct((M, V), jnp.float32),
        compiler_params=pltpu.CompilerParams(dimension_semantics=("parallel", "parallel"),
                                             vmem_limit_bytes=_VMEM_LIMIT),
    )(x2d, emb)


# -----------------------------------------------------------------------------
# Plain-JAX glue: additive masks, embeddings, position table
# -----------------------------------------------------------------------------

def get_non_pad_mask(seq):
    return (seq != PAD).astype(jnp.float32)[:, :, None]


def key_pad_additive(seq_k):
    """(B, Lk) token ids -> (B, 1, Lk) additive bias (0 keep / -1e9 blocked)."""
    return jnp.where(seq_k == PAD, _NEG, 0.0).astype(jnp.float32)[:, None, :]


def syn_self_attn_bias(syn_seq, path_mask):
    """Combined key-pad + path mask as a (B, Lsyn, Lsyn) additive bias."""
    blocked = (syn_seq == PAD)[:, None, :] | (path_mask > 0)
    return jnp.where(blocked, _NEG, 0.0).astype(jnp.float32)


def sinusoid_table(n_position, d_model):
    pos = np.arange(n_position)[:, None].astype(np.float64)
    i = np.arange(d_model)[None, :].astype(np.float64)
    angle = pos / np.power(10000.0, 2.0 * (i // 2) / d_model)
    table = np.zeros((n_position, d_model), np.float64)
    table[:, 0::2] = np.sin(angle[:, 0::2])
    table[:, 1::2] = np.cos(angle[:, 1::2])
    table[PAD] = 0.0
    return jnp.asarray(table, jnp.float32)


def _split_attn(a, n_head):
    """(B, n_layer*H, Lq, Lk) -> list of per-layer (B, H, Lq, Lk)."""
    if a is None:
        return []
    B, LH, Lq, Lk = a.shape
    n_layer = LH // n_head
    a = a.reshape(B, n_layer, n_head, Lq, Lk)
    return [a[:, l] for l in range(n_layer)]


# -----------------------------------------------------------------------------
# Encoders / decoder / full forward
# -----------------------------------------------------------------------------

def txt_encoder(params, cfg, token_seq, pos_seq, return_attns=True):
    bias = key_pad_additive(token_seq)                      # (B, 1, L)
    non_pad = get_non_pad_mask(token_seq)
    x = params["txt_emb"][token_seq] + params["txt_pos_table"][pos_seq]
    out, attn = encoder_stack(x, bias, non_pad, params["txt_enc"], cfg, return_attns)
    return out, _split_attn(attn, cfg["n_head"])


def syn_encoder(params, cfg, syn_seq, lvl_seq, pos_seq, path_mask, return_attns=True):
    bias = syn_self_attn_bias(syn_seq, path_mask)           # (B, Lsyn, Lsyn)
    non_pad = get_non_pad_mask(syn_seq)
    x = (params["syn_emb"][syn_seq] + params["lvl_emb"][lvl_seq]
         + params["syn_pos_table"][pos_seq])
    out, attn = encoder_stack(x, bias, non_pad, params["syn_enc"], cfg, return_attns)
    return out, _split_attn(attn, cfg["n_head"])


def multi_enc_decoder(params, cfg, tgt_seq, tgt_pos_seq, src_txt_seq, src_syn_seq,
                      txt_enc_output, syn_enc_output, return_attns=True):
    slf_kp = key_pad_additive(tgt_seq)
    txt_kp = key_pad_additive(src_txt_seq)
    syn_kp = key_pad_additive(src_syn_seq)
    non_pad = get_non_pad_mask(tgt_seq)
    x = params["txt_emb"][tgt_seq] + params["txt_pos_table"][tgt_pos_seq]
    out, a_slf, a_txt, a_syn = decoder_stack(
        x, txt_enc_output, syn_enc_output, slf_kp, txt_kp, syn_kp, non_pad,
        params["dec"], cfg, return_attns)
    return out, (_split_attn(a_slf, cfg["n_head"]),
                 _split_attn(a_txt, cfg["n_txt_attn_head"]),
                 _split_attn(a_syn, cfg["n_syn_attn_head"]))


def multi_enc_transformer_forward(params, cfg, src_txt_seqs, syn_seqs, lvl_seqs,
                                  tgt_txt_seqs, src_pos_seqs, tgt_pos_seqs,
                                  syn_pos_seqs, path_mask, return_attns=True):
    tgt_txt_seqs = tgt_txt_seqs[:, :-1]
    tgt_pos_seqs = tgt_pos_seqs[:, :-1]

    syn_enc_output, syn_enc_attn = syn_encoder(params, cfg, syn_seqs, lvl_seqs,
                                               syn_pos_seqs, path_mask, return_attns)
    txt_enc_output, txt_enc_attn = txt_encoder(params, cfg, src_txt_seqs, src_pos_seqs,
                                               return_attns)
    dec_output, (dec_slf_attn, dec_txt_attn, dec_syn_attn) = multi_enc_decoder(
        params, cfg, tgt_txt_seqs, tgt_pos_seqs, src_txt_seqs, syn_seqs,
        txt_enc_output, syn_enc_output, return_attns)

    B, Lt, D = dec_output.shape
    # tgt_emb_prj_weight_sharing=True => projection weight == txt_token_emb.weight,
    # scaled by d_model ** -0.5; contraction against emb dim 1 done in-kernel.
    x_logit_scale = float(cfg["d_model"]) ** (-0.5)
    logits = tied_logits(dec_output.reshape(B * Lt, D), params["txt_emb"], x_logit_scale)
    return logits, (syn_enc_attn, txt_enc_attn, dec_slf_attn, dec_txt_attn, dec_syn_attn)


# -----------------------------------------------------------------------------
# Deterministic parameter init (per-layer weights stacked along a leading n_layer axis,
# packed into fused bf16 layouts; 1/sqrt(d_k) folded into the Q weights)
# -----------------------------------------------------------------------------

def _normal(key, shape, scale=0.05):
    return scale * jax.random.normal(key, shape, jnp.float32)


def _init_enc_stack(key, n_layer, d_model, d_inner, n_head, d_k, d_v):
    ks = jax.random.split(key, 4)
    nqkv = n_head * (2 * d_k + d_v)
    q_scale = float(d_k) ** (-0.5)
    w_qkv = _normal(ks[0], (n_layer, d_model, nqkv))
    w_qkv = w_qkv.at[..., : n_head * d_k].multiply(q_scale)     # fold 1/sqrt(d_k) into Q
    return dict(
        w_qkv=w_qkv.astype(jnp.bfloat16),
        b_qkv=jnp.zeros((n_layer, 1, nqkv), jnp.float32),       # (Q bias would be scaled too)
        w_fc=_normal(ks[1], (n_layer, n_head * d_v, d_model)).astype(jnp.bfloat16),
        b_fc=jnp.zeros((n_layer, 1, d_model), jnp.float32),
        ln1_g=jnp.ones((n_layer, 1, d_model), jnp.float32),
        ln1_b=jnp.zeros((n_layer, 1, d_model), jnp.float32),
        w1=_normal(ks[2], (n_layer, d_model, d_inner)).astype(jnp.bfloat16),
        b1=jnp.zeros((n_layer, 1, d_inner), jnp.float32),
        w2=_normal(ks[3], (n_layer, d_inner, d_model)).astype(jnp.bfloat16),
        b2=jnp.zeros((n_layer, 1, d_model), jnp.float32),
        ln2_g=jnp.ones((n_layer, 1, d_model), jnp.float32),
        ln2_b=jnp.zeros((n_layer, 1, d_model), jnp.float32),
    )


def _init_dec_stack(key, n_layer, d_model, d_inner, n_head, n_txt, n_syn, d_k, d_v):
    k_base, k_cross = jax.random.split(key)
    p = _init_enc_stack(k_base, n_layer, d_model, d_inner, n_head, d_k, d_v)
    ks = jax.random.split(k_cross, 4)
    q_scale = float(d_k) ** (-0.5)
    c_wq = _normal(ks[0], (n_layer, d_model, (n_txt + n_syn) * d_k)) * q_scale
    p.update(dict(
        c_wq=c_wq.astype(jnp.bfloat16),
        c_bq=jnp.zeros((n_layer, 1, (n_txt + n_syn) * d_k), jnp.float32),
        c_wkv_t=_normal(ks[1], (n_layer, d_model, n_txt * (d_k + d_v))).astype(jnp.bfloat16),
        c_bkv_t=jnp.zeros((n_layer, 1, n_txt * (d_k + d_v)), jnp.float32),
        c_wkv_s=_normal(ks[2], (n_layer, d_model, n_syn * (d_k + d_v))).astype(jnp.bfloat16),
        c_bkv_s=jnp.zeros((n_layer, 1, n_syn * (d_k + d_v)), jnp.float32),
        c_wfc=_normal(ks[3], (n_layer, (n_txt + n_syn) * d_v, d_model)).astype(jnp.bfloat16),
        c_bfc=jnp.zeros((n_layer, 1, d_model), jnp.float32),
        c_ln_g=jnp.ones((n_layer, 1, d_model), jnp.float32),
        c_ln_b=jnp.zeros((n_layer, 1, d_model), jnp.float32),
    ))
    return p


def init_params(key, cfg):
    keys = jax.random.split(key, 6)
    D, Di = cfg["d_model"], cfg["d_inner"]
    txt_emb = _normal(keys[0], (cfg["n_txt_token"], D), 1.0).at[PAD].set(0.0)
    syn_emb = _normal(keys[1], (cfg["n_syn_token"], D), 1.0).at[PAD].set(0.0)
    lvl_emb = _normal(keys[2], (cfg["n_lvl_token"], D), 1.0).at[PAD].set(0.0)
    return dict(
        txt_emb=txt_emb, syn_emb=syn_emb, lvl_emb=lvl_emb,
        txt_pos_table=sinusoid_table(cfg["max_txt_len"] + 1, D),
        syn_pos_table=sinusoid_table(cfg["max_syn_len"] + 1, D),
        txt_enc=_init_enc_stack(keys[3], cfg["n_trf_txt_enc_layer"], D, Di,
                                cfg["n_head"], cfg["d_k"], cfg["d_v"]),
        syn_enc=_init_enc_stack(keys[4], cfg["n_trf_syn_enc_layer"], D, Di,
                                cfg["n_head"], cfg["d_k"], cfg["d_v"]),
        dec=_init_dec_stack(keys[5], cfg["n_trf_dec_layer"], D, Di, cfg["n_head"],
                            cfg["n_txt_attn_head"], cfg["n_syn_attn_head"],
                            cfg["d_k"], cfg["d_v"]),
    )


# -----------------------------------------------------------------------------
# Main
# -----------------------------------------------------------------------------

if __name__ == "__main__":
    cfg = dict(
        n_txt_token=40, n_syn_token=24, n_lvl_token=8,
        max_txt_len=8, max_syn_len=8,
        d_model=32, d_inner=64, d_k=16, d_v=16,
        n_trf_txt_enc_layer=2, n_trf_syn_enc_layer=2, n_trf_dec_layer=2,
        n_txt_attn_head=2, n_syn_attn_head=2,
    )
    cfg["n_head"] = cfg["n_txt_attn_head"] + cfg["n_syn_attn_head"]

    B, Ltxt, Lsyn = 2, 8, 8
    key = jax.random.PRNGKey(0)
    kp, k1, k2, k3, k4, k5 = jax.random.split(key, 6)
    params = init_params(kp, cfg)

    def make_seq(k, B, L, vocab, n_pad_last):
        s = jax.random.randint(k, (B, L), 1, vocab)
        if n_pad_last > 0:
            s = s.at[:, L - n_pad_last:].set(PAD)
        pos = jnp.where(s != PAD, jnp.arange(1, L + 1)[None, :], 0)
        return s.astype(jnp.int32), pos.astype(jnp.int32)

    src_txt_seqs, src_pos_seqs = make_seq(k1, B, Ltxt, cfg["n_txt_token"], 1)
    tgt_txt_seqs, tgt_pos_seqs = make_seq(k2, B, Ltxt, cfg["n_txt_token"], 1)
    syn_seqs, syn_pos_seqs = make_seq(k3, B, Lsyn, cfg["n_syn_token"], 1)
    lvl_seqs = jnp.where(syn_seqs != PAD,
                         jax.random.randint(k4, (B, Lsyn), 1, cfg["n_lvl_token"]),
                         PAD).astype(jnp.int32)
    # path_mask: 1.0 => attention blocked; keep the diagonal open.
    path_mask = (jax.random.uniform(k5, (B, Lsyn, Lsyn)) < 0.3).astype(jnp.float32)
    path_mask = path_mask * (1.0 - jnp.eye(Lsyn)[None, :, :])

    @jax.jit
    def fwd(params, src_txt_seqs, syn_seqs, lvl_seqs, tgt_txt_seqs,
            src_pos_seqs, tgt_pos_seqs, syn_pos_seqs, path_mask):
        return multi_enc_transformer_forward(
            params, cfg, src_txt_seqs, syn_seqs, lvl_seqs, tgt_txt_seqs,
            src_pos_seqs, tgt_pos_seqs, syn_pos_seqs, path_mask, return_attns=True)

    logits, attn_bundle = fwd(params, src_txt_seqs, syn_seqs, lvl_seqs, tgt_txt_seqs,
                              src_pos_seqs, tgt_pos_seqs, syn_pos_seqs, path_mask)

    logits = jax.block_until_ready(logits)
    jax.tree_util.tree_map(jax.block_until_ready, attn_bundle)

    expected_shape = (B * (Ltxt - 1), cfg["n_txt_token"])
    assert logits.shape == expected_shape, (logits.shape, expected_shape)
    assert bool(jnp.all(jnp.isfinite(logits)))
    print("KERNEL_OK")
</pallas_src>

<mosaic_0001>
module attributes {stable_mosaic.version = 11 : i64} {
  func.func @_enc_stack_kernel(%arg0: i32, %arg1: memref<1x8x32xf32, #tpu.memory_space<vmem>>, %arg2: memref<1x1x8xf32, #tpu.memory_space<vmem>>, %arg3: memref<1x8x1xf32, #tpu.memory_space<vmem>>, %arg4: memref<2x32x192xbf16, #tpu.memory_space<vmem>>, %arg5: memref<2x1x192xf32, #tpu.memory_space<vmem>>, %arg6: memref<2x64x32xbf16, #tpu.memory_space<vmem>>, %arg7: memref<2x1x32xf32, #tpu.memory_space<vmem>>, %arg8: memref<2x1x32xf32, #tpu.memory_space<vmem>>, %arg9: memref<2x1x32xf32, #tpu.memory_space<vmem>>, %arg10: memref<2x32x64xbf16, #tpu.memory_space<vmem>>, %arg11: memref<2x1x64xf32, #tpu.memory_space<vmem>>, %arg12: memref<2x64x32xbf16, #tpu.memory_space<vmem>>, %arg13: memref<2x1x32xf32, #tpu.memory_space<vmem>>, %arg14: memref<2x1x32xf32, #tpu.memory_space<vmem>>, %arg15: memref<2x1x32xf32, #tpu.memory_space<vmem>>, %arg16: memref<1x8x32xbf16, #tpu.memory_space<vmem>>, %arg17: memref<1x8x8x8xf32, #tpu.memory_space<vmem>>) attributes {dimension_semantics = [#tpu.dimension_semantics<parallel>], iteration_bounds = array<i64: 2>, scalar_prefetch = 0 : i64, scratch_operands = 0 : i64, tpu.core_type = #tpu.core_type<tc>, window_params = [{transform_indices = @transform_0, window_bounds = array<i64: 1, 8, 32>}, {transform_indices = @transform_1, window_bounds = array<i64: 1, 1, 8>}, {transform_indices = @transform_2, window_bounds = array<i64: 1, 8, 1>}, {pipeline_mode = #tpu.pipeline_mode<synchronous>, transform_indices = @transform_3, window_bounds = array<i64: 2, 32, 192>}, {pipeline_mode = #tpu.pipeline_mode<synchronous>, transform_indices = @transform_4, window_bounds = array<i64: 2, 1, 192>}, {pipeline_mode = #tpu.pipeline_mode<synchronous>, transform_indices = @transform_5, window_bounds = array<i64: 2, 64, 32>}, {pipeline_mode = #tpu.pipeline_mode<synchronous>, transform_indices = @transform_6, window_bounds = array<i64: 2, 1, 32>}, {pipeline_mode = #tpu.pipeline_mode<synchronous>, transform_indices = @transform_7, window_bounds = array<i64: 2, 1, 32>}, {pipeline_mode = #tpu.pipeline_mode<synchronous>, transform_indices = @transform_8, window_bounds = array<i64: 2, 1, 32>}, {pipeline_mode = #tpu.pipeline_mode<synchronous>, transform_indices = @transform_9, window_bounds = array<i64: 2, 32, 64>}, {pipeline_mode = #tpu.pipeline_mode<synchronous>, transform_indices = @transform_10, window_bounds = array<i64: 2, 1, 64>}, {pipeline_mode = #tpu.pipeline_mode<synchronous>, transform_indices = @transform_11, window_bounds = array<i64: 2, 64, 32>}, {pipeline_mode = #tpu.pipeline_mode<synchronous>, transform_indices = @transform_12, window_bounds = array<i64: 2, 1, 32>}, {pipeline_mode = #tpu.pipeline_mode<synchronous>, transform_indices = @transform_13, window_bounds = array<i64: 2, 1, 32>}, {pipeline_mode = #tpu.pipeline_mode<synchronous>, transform_indices = @transform_14, window_bounds = array<i64: 2, 1, 32>}, {transform_indices = @transform_15, window_bounds = array<i64: 1, 8, 32>}, {transform_indices = @transform_16, window_bounds = array<i64: 1, 8, 8, 8>}]} {
    %c0 = arith.constant 0 : index
    %c0_0 = arith.constant 0 : index
    %c0_1 = arith.constant 0 : index
    %0 = vector.load %arg1[%c0, %c0_0, %c0_1] : memref<1x8x32xf32, #tpu.memory_space<vmem>>, vector<1x8x32xf32>
    %1 = vector.shape_cast %0 : vector<1x8x32xf32> to vector<8x32xf32>
    %c0_2 = arith.constant 0 : index
    %c0_3 = arith.constant 0 : index
    %c0_4 = arith.constant 0 : index
    %2 = vector.load %arg2[%c0_2, %c0_3, %c0_4] : memref<1x1x8xf32, #tpu.memory_space<vmem>>, vector<1x1x8xf32>
    %3 = vector.shape_cast %2 : vector<1x1x8xf32> to vector<1x8xf32>
    %c0_5 = arith.constant 0 : index
    %c0_6 = arith.constant 0 : index
    %c0_7 = arith.constant 0 : index
    %4 = vector.load %arg3[%c0_5, %c0_6, %c0_7] : memref<1x8x1xf32, #tpu.memory_space<vmem>>, vector<1x8x1xf32>
    %5 = vector.shape_cast %4 : vector<1x8x1xf32> to vector<8x1xf32>
    %6 = arith.truncf %1 : vector<8x32xf32> to vector<8x32xbf16>
    %c0_8 = arith.constant 0 : index
    %c0_9 = arith.constant 0 : index
    %c0_10 = arith.constant 0 : index
    %7 = vector.load %arg4[%c0_8, %c0_9, %c0_10] : memref<2x32x192xbf16, #tpu.memory_space<vmem>>, vector<1x32x192xbf16>
    %8 = vector.shape_cast %7 : vector<1x32x192xbf16> to vector<32x192xbf16>
    %cst = arith.constant dense<0.000000e+00> : vector<8x192xf32>
    %9 = tpu.matmul %6, %8, %cst {dimension_numbers = #tpu.dot_dimension_numbers<[1], [0], [0], [1], [0, 0, 1, 1], [], []>} : vector<8x32xbf16>, vector<32x192xbf16>, vector<8x192xf32> -> vector<8x192xf32>
    %c0_11 = arith.constant 0 : index
    %c0_12 = arith.constant 0 : index
    %c0_13 = arith.constant 0 : index
    %10 = vector.load %arg5[%c0_11, %c0_12, %c0_13] : memref<2x1x192xf32, #tpu.memory_space<vmem>>, vector<1x1x192xf32>
    %11 = vector.shape_cast %10 : vector<1x1x192xf32> to vector<1x192xf32>
    %12 = vector.broadcast %11 : vector<1x192xf32> to vector<8x192xf32>
    %13 = arith.addf %9, %12 : vector<8x192xf32>
    %14 = arith.truncf %13 : vector<8x192xf32> to vector<8x192xbf16>
    %c0_14 = arith.constant 0 : index
    %c0_15 = arith.constant 0 : index
    %c0_16 = arith.constant 0 : index
    %15 = vector.load %arg6[%c0_14, %c0_15, %c0_16] : memref<2x64x32xbf16, #tpu.memory_space<vmem>>, vector<1x64x32xbf16>
    %16 = vector.shape_cast %15 : vector<1x64x32xbf16> to vector<64x32xbf16>
    %cst_17 = arith.constant 0.000000e+00 : f32
    %17 = vector.broadcast %cst_17 : f32 to vector<8x32xf32>
    %18 = vector.extract_strided_slice %14 {offsets = [0, 0], sizes = [8, 16], strides = [1, 1]} : vector<8x192xbf16> to vector<8x16xbf16>
    %19 = vector.extract_strided_slice %14 {offsets = [0, 64], sizes = [8, 16], strides = [1, 1]} : vector<8x192xbf16> to vector<8x16xbf16>
    %20 = vector.extract_strided_slice %14 {offsets = [0, 128], sizes = [8, 16], strides = [1, 1]} : vector<8x192xbf16> to vector<8x16xbf16>
    %cst_18 = arith.constant dense<0.000000e+00> : vector<8x8xf32>
    %21 = tpu.matmul %18, %19, %cst_18 {dimension_numbers = #tpu.dot_dimension_numbers<[1], [1], [0], [0], [0, 0, 1, 0], [], []>} : vector<8x16xbf16>, vector<8x16xbf16>, vector<8x8xf32> -> vector<8x8xf32>
    %22 = vector.broadcast %3 : vector<1x8xf32> to vector<8x8xf32>
    %23 = arith.addf %21, %22 : vector<8x8xf32>
    %cst_19 = arith.constant dense<0xFF800000> : vector<8xf32>
    %24 = vector.multi_reduction <maximumf>, %23, %cst_19 [1] : vector<8x8xf32> to vector<8xf32>
    %25 = vector.shape_cast %24 : vector<8xf32> to vector<8x1xf32>
    %26 = vector.broadcast %25 : vector<8x1xf32> to vector<8x8xf32>
    %27 = arith.subf %23, %26 : vector<8x8xf32>
    %28 = math.exp %27 : vector<8x8xf32>
    %cst_20 = arith.constant dense<0.000000e+00> : vector<8xf32>
    %29 = vector.multi_reduction <add>, %28, %cst_20 [1] : vector<8x8xf32> to vector<8xf32>
    %30 = vector.shape_cast %29 : vector<8xf32> to vector<8x1xf32>
    %31 = tpu.reciprocal %30 {approx = true} : vector<8x1xf32> -> vector<8x1xf32>
    %32 = vector.broadcast %31 : vector<8x1xf32> to vector<8x8xf32>
    %33 = arith.mulf %28, %32 : vector<8x8xf32>
    %c0_21 = arith.constant 0 : index
    %c0_22 = arith.constant 0 : index
    %c0_23 = arith.constant 0 : index
    %c0_24 = arith.constant 0 : index
    %34 = vector.load %arg17[%c0_21, %c0_22, %c0_23, %c0_24] : memref<1x8x8x8xf32, #tpu.memory_space<vmem>>, vector<1x1x8x8xf32>
    %35 = vector.shape_cast %34 : vector<1x1x8x8xf32> to vector<8x8xf32>
    %36 = vector.shape_cast %33 : vector<8x8xf32> to vector<1x1x8x8xf32>
    tpu.vector_store %arg17[%c0_21, %c0_22, %c0_23, %c0_24], %36 {strides = array<i32>} : memref<1x8x8x8xf32, #tpu.memory_space<vmem>>, vector<1x1x8x8xf32>,
    %37 = arith.truncf %33 : vector<8x8xf32> to vector<8x8xbf16>
    %cst_25 = arith.constant dense<0.000000e+00> : vector<8x16xf32>
    %38 = tpu.matmul %37, %20, %cst_25 {dimension_numbers = #tpu.dot_dimension_numbers<[1], [0], [0], [1], [0, 0, 1, 1], [], []>} : vector<8x8xbf16>, vector<8x16xbf16>, vector<8x16xf32> -> vector<8x16xf32>
    %39 = arith.truncf %38 : vector<8x16xf32> to vector<8x16xbf16>
    %40 = vector.extract_strided_slice %16 {offsets = [0, 0], sizes = [16, 32], strides = [1, 1]} : vector<64x32xbf16> to vector<16x32xbf16>
    %cst_26 = arith.constant dense<0.000000e+00> : vector<8x32xf32>
    %41 = tpu.matmul %39, %40, %cst_26 {dimension_numbers = #tpu.dot_dimension_numbers<[1], [0], [0], [1], [0, 0, 1, 1], [], []>} : vector<8x16xbf16>, vector<16x32xbf16>, vector<8x32xf32> -> vector<8x32xf32>
    %42 = arith.addf %17, %41 : vector<8x32xf32>
    %43 = vector.extract_strided_slice %14 {offsets = [0, 16], sizes = [8, 16], strides = [1, 1]} : vector<8x192xbf16> to vector<8x16xbf16>
    %44 = vector.extract_strided_slice %14 {offsets = [0, 80], sizes = [8, 16], strides = [1, 1]} : vector<8x192xbf16> to vector<8x16xbf16>
    %45 = vector.extract_strided_slice %14 {offsets = [0, 144], sizes = [8, 16], strides = [1, 1]} : vector<8x192xbf16> to vector<8x16xbf16>
    %cst_27 = arith.constant dense<0.000000e+00> : vector<8x8xf32>
    %46 = tpu.matmul %43, %44, %cst_27 {dimension_numbers = #tpu.dot_dimension_numbers<[1], [1], [0], [0], [0, 0, 1, 0], [], []>} : vector<8x16xbf16>, vector<8x16xbf16>, vector<8x8xf32> -> vector<8x8xf32>
    %47 = vector.broadcast %3 : vector<1x8xf32> to vector<8x8xf32>
    %48 = arith.addf %46, %47 : vector<8x8xf32>
    %cst_28 = arith.constant dense<0xFF800000> : vector<8xf32>
    %49 = vector.multi_reduction <maximumf>, %48, %cst_28 [1] : vector<8x8xf32> to vector<8xf32>
    %50 = vector.shape_cast %49 : vector<8xf32> to vector<8x1xf32>
    %51 = vector.broadcast %50 : vector<8x1xf32> to vector<8x8xf32>
    %52 = arith.subf %48, %51 : vector<8x8xf32>
    %53 = math.exp %52 : vector<8x8xf32>
    %cst_29 = arith.constant dense<0.000000e+00> : vector<8xf32>
    %54 = vector.multi_reduction <add>, %53, %cst_29 [1] : vector<8x8xf32> to vector<8xf32>
    %55 = vector.shape_cast %54 : vector<8xf32> to vector<8x1xf32>
    %56 = tpu.reciprocal %55 {approx = true} : vector<8x1xf32> -> vector<8x1xf32>
    %57 = vector.broadcast %56 : vector<8x1xf32> to vector<8x8xf32>
    %58 = arith.mulf %53, %57 : vector<8x8xf32>
    %c0_30 = arith.constant 0 : index
    %c1 = arith.constant 1 : index
    %c0_31 = arith.constant 0 : index
    %c0_32 = arith.constant 0 : index
    %59 = vector.load %arg17[%c0_30, %c1, %c0_31, %c0_32] : memref<1x8x8x8xf32, #tpu.memory_space<vmem>>, vector<1x1x8x8xf32>
    %60 = vector.shape_cast %59 : vector<1x1x8x8xf32> to vector<8x8xf32>
    %61 = vector.shape_cast %58 : vector<8x8xf32> to vector<1x1x8x8xf32>
    tpu.vector_store %arg17[%c0_30, %c1, %c0_31, %c0_32], %61 {strides = array<i32>} : memref<1x8x8x8xf32, #tpu.memory_space<vmem>>, vector<1x1x8x8xf32>,
    %62 = arith.truncf %58 : vector<8x8xf32> to vector<8x8xbf16>
    %cst_33 = arith.constant dense<0.000000e+00> : vector<8x16xf32>
    %63 = tpu.matmul %62, %45, %cst_33 {dimension_numbers = #tpu.dot_dimension_numbers<[1], [0], [0], [1], [0, 0, 1, 1], [], []>} : vector<8x8xbf16>, vector<8x16xbf16>, vector<8x16xf32> -> vector<8x16xf32>
    %64 = arith.truncf %63 : vector<8x16xf32> to vector<8x16xbf16>
    %65 = vector.extract_strided_slice %16 {offsets = [16, 0], sizes = [16, 32], strides = [1, 1]} : vector<64x32xbf16> to vector<16x32xbf16>
    %cst_34 = arith.constant dense<0.000000e+00> : vector<8x32xf32>
    %66 = tpu.matmul %64, %65, %cst_34 {dimension_numbers = #tpu.dot_dimension_numbers<[1], [0], [0], [1], [0, 0, 1, 1], [], []>} : vector<8x16xbf16>, vector<16x32xbf16>, vector<8x32xf32> -> vector<8x32xf32>
    %67 = arith.addf %42, %66 : vector<8x32xf32>
    %68 = vector.extract_strided_slice %14 {offsets = [0, 32], sizes = [8, 16], strides = [1, 1]} : vector<8x192xbf16> to vector<8x16xbf16>
    %69 = vector.extract_strided_slice %14 {offsets = [0, 96], sizes = [8, 16], strides = [1, 1]} : vector<8x192xbf16> to vector<8x16xbf16>
    %70 = vector.extract_strided_slice %14 {offsets = [0, 160], sizes = [8, 16], strides = [1, 1]} : vector<8x192xbf16> to vector<8x16xbf16>
    %cst_35 = arith.constant dense<0.000000e+00> : vector<8x8xf32>
    %71 = tpu.matmul %68, %69, %cst_35 {dimension_numbers = #tpu.dot_dimension_numbers<[1], [1], [0], [0], [0, 0, 1, 0], [], []>} : vector<8x16xbf16>, vector<8x16xbf16>, vector<8x8xf32> -> vector<8x8xf32>
    %72 = vector.broadcast %3 : vector<1x8xf32> to vector<8x8xf32>
    %73 = arith.addf %71, %72 : vector<8x8xf32>
    %cst_36 = arith.constant dense<0xFF800000> : vector<8xf32>
    %74 = vector.multi_reduction <maximumf>, %73, %cst_36 [1] : vector<8x8xf32> to vector<8xf32>
    %75 = vector.shape_cast %74 : vector<8xf32> to vector<8x1xf32>
    %76 = vector.broadcast %75 : vector<8x1xf32> to vector<8x8xf32>
    %77 = arith.subf %73, %76 : vector<8x8xf32>
    %78 = math.exp %77 : vector<8x8xf32>
    %cst_37 = arith.constant dense<0.000000e+00> : vector<8xf32>
    %79 = vector.multi_reduction <add>, %78, %cst_37 [1] : vector<8x8xf32> to vector<8xf32>
    %80 = vector.shape_cast %79 : vector<8xf32> to vector<8x1xf32>
    %81 = tpu.reciprocal %80 {approx = true} : vector<8x1xf32> -> vector<8x1xf32>
    %82 = vector.broadcast %81 : vector<8x1xf32> to vector<8x8xf32>
    %83 = arith.mulf %78, %82 : vector<8x8xf32>
    %c0_38 = arith.constant 0 : index
    %c2 = arith.constant 2 : index
    %c0_39 = arith.constant 0 : index
    %c0_40 = arith.constant 0 : index
    %84 = vector.load %arg17[%c0_38, %c2, %c0_39, %c0_40] : memref<1x8x8x8xf32, #tpu.memory_space<vmem>>, vector<1x1x8x8xf32>
    %85 = vector.shape_cast %84 : vector<1x1x8x8xf32> to vector<8x8xf32>
    %86 = vector.shape_cast %83 : vector<8x8xf32> to vector<1x1x8x8xf32>
    tpu.vector_store %arg17[%c0_38, %c2, %c0_39, %c0_40], %86 {strides = array<i32>} : memref<1x8x8x8xf32, #tpu.memory_space<vmem>>, vector<1x1x8x8xf32>,
    %87 = arith.truncf %83 : vector<8x8xf32> to vector<8x8xbf16>
    %cst_41 = arith.constant dense<0.000000e+00> : vector<8x16xf32>
    %88 = tpu.matmul %87, %70, %cst_41 {dimension_numbers = #tpu.dot_dimension_numbers<[1], [0], [0], [1], [0, 0, 1, 1], [], []>} : vector<8x8xbf16>, vector<8x16xbf16>, vector<8x16xf32> -> vector<8x16xf32>
    %89 = arith.truncf %88 : vector<8x16xf32> to vector<8x16xbf16>
    %90 = vector.extract_strided_slice %16 {offsets = [32, 0], sizes = [16, 32], strides = [1, 1]} : vector<64x32xbf16> to vector<16x32xbf16>
    %cst_42 = arith.constant dense<0.000000e+00> : vector<8x32xf32>
    %91 = tpu.matmul %89, %90, %cst_42 {dimension_numbers = #tpu.dot_dimension_numbers<[1], [0], [0], [1], [0, 0, 1, 1], [], []>} : vector<8x16xbf16>, vector<16x32xbf16>, vector<8x32xf32> -> vector<8x32xf32>
    %92 = arith.addf %67, %91 : vector<8x32xf32>
    %93 = vector.extract_strided_slice %14 {offsets = [0, 48], sizes = [8, 16], strides = [1, 1]} : vector<8x192xbf16> to vector<8x16xbf16>
    %94 = vector.extract_strided_slice %14 {offsets = [0, 112], sizes = [8, 16], strides = [1, 1]} : vector<8x192xbf16> to vector<8x16xbf16>
    %95 = vector.extract_strided_slice %14 {offsets = [0, 176], sizes = [8, 16], strides = [1, 1]} : vector<8x192xbf16> to vector<8x16xbf16>
    %cst_43 = arith.constant dense<0.000000e+00> : vector<8x8xf32>
    %96 = tpu.matmul %93, %94, %cst_43 {dimension_numbers = #tpu.dot_dimension_numbers<[1], [1], [0], [0], [0, 0, 1, 0], [], []>} : vector<8x16xbf16>, vector<8x16xbf16>, vector<8x8xf32> -> vector<8x8xf32>
    %97 = vector.broadcast %3 : vector<1x8xf32> to vector<8x8xf32>
    %98 = arith.addf %96, %97 : vector<8x8xf32>
    %cst_44 = arith.constant dense<0xFF800000> : vector<8xf32>
    %99 = vector.multi_reduction <maximumf>, %98, %cst_44 [1] : vector<8x8xf32> to vector<8xf32>
    %100 = vector.shape_cast %99 : vector<8xf32> to vector<8x1xf32>
    %101 = vector.broadcast %100 : vector<8x1xf32> to vector<8x8xf32>
    %102 = arith.subf %98, %101 : vector<8x8xf32>
    %103 = math.exp %102 : vector<8x8xf32>
    %cst_45 = arith.constant dense<0.000000e+00> : vector<8xf32>
    %104 = vector.multi_reduction <add>, %103, %cst_45 [1] : vector<8x8xf32> to vector<8xf32>
    %105 = vector.shape_cast %104 : vector<8xf32> to vector<8x1xf32>
    %106 = tpu.reciprocal %105 {approx = true} : vector<8x1xf32> -> vector<8x1xf32>
    %107 = vector.broadcast %106 : vector<8x1xf32> to vector<8x8xf32>
    %108 = arith.mulf %103, %107 : vector<8x8xf32>
    %c0_46 = arith.constant 0 : index
    %c3 = arith.constant 3 : index
    %c0_47 = arith.constant 0 : index
    %c0_48 = arith.constant 0 : index
    %109 = vector.load %arg17[%c0_46, %c3, %c0_47, %c0_48] : memref<1x8x8x8xf32, #tpu.memory_space<vmem>>, vector<1x1x8x8xf32>
    %110 = vector.shape_cast %109 : vector<1x1x8x8xf32> to vector<8x8xf32>
    %111 = vector.shape_cast %108 : vector<8x8xf32> to vector<1x1x8x8xf32>
    tpu.vector_store %arg17[%c0_46, %c3, %c0_47, %c0_48], %111 {strides = array<i32>} : memref<1x8x8x8xf32, #tpu.memory_space<vmem>>, vector<1x1x8x8xf32>,
    %112 = arith.truncf %108 : vector<8x8xf32> to vector<8x8xbf16>
    %cst_49 = arith.constant dense<0.000000e+00> : vector<8x16xf32>
    %113 = tpu.matmul %112, %95, %cst_49 {dimension_numbers = #tpu.dot_dimension_numbers<[1], [0], [0], [1], [0, 0, 1, 1], [], []>} : vector<8x8xbf16>, vector<8x16xbf16>, vector<8x16xf32> -> vector<8x16xf32>
    %114 = arith.truncf %113 : vector<8x16xf32> to vector<8x16xbf16>
    %115 = vector.extract_strided_slice %16 {offsets = [48, 0], sizes = [16, 32], strides = [1, 1]} : vector<64x32xbf16> to vector<16x32xbf16>
    %cst_50 = arith.constant dense<0.000000e+00> : vector<8x32xf32>
    %116 = tpu.matmul %114, %115, %cst_50 {dimension_numbers = #tpu.dot_dimension_numbers<[1], [0], [0], [1], [0, 0, 1, 1], [], []>} : vector<8x16xbf16>, vector<16x32xbf16>, vector<8x32xf32> -> vector<8x32xf32>
    %117 = arith.addf %92, %116 : vector<8x32xf32>
    %c0_51 = arith.constant 0 : index
    %c0_52 = arith.constant 0 : index
    %c0_53 = arith.constant 0 : index
    %118 = vector.load %arg7[%c0_51, %c0_52, %c0_53] : memref<2x1x32xf32, #tpu.memory_space<vmem>>, vector<1x1x32xf32>
    %119 = vector.shape_cast %118 : vector<1x1x32xf32> to vector<1x32xf32>
    %120 = vector.broadcast %119 : vector<1x32xf32> to vector<8x32xf32>
    %121 = arith.addf %117, %120 : vector<8x32xf32>
    %122 = arith.addf %121, %1 : vector<8x32xf32>
    %c0_54 = arith.constant 0 : index
    %c0_55 = arith.constant 0 : index
    %c0_56 = arith.constant 0 : index
    %123 = vector.load %arg8[%c0_54, %c0_55, %c0_56] : memref<2x1x32xf32, #tpu.memory_space<vmem>>, vector<1x1x32xf32>
    %124 = vector.shape_cast %123 : vector<1x1x32xf32> to vector<1x32xf32>
    %c0_57 = arith.constant 0 : index
    %c0_58 = arith.constant 0 : index
    %c0_59 = arith.constant 0 : index
    %125 = vector.load %arg9[%c0_57, %c0_58, %c0_59] : memref<2x1x32xf32, #tpu.memory_space<vmem>>, vector<1x1x32xf32>
    %126 = vector.shape_cast %125 : vector<1x1x32xf32> to vector<1x32xf32>
    %cst_60 = arith.constant dense<0.000000e+00> : vector<8xf32>
    %127 = vector.multi_reduction <add>, %122, %cst_60 [1] : vector<8x32xf32> to vector<8xf32>
    %128 = vector.shape_cast %127 : vector<8xf32> to vector<8x1xf32>
    %cst_61 = arith.constant 3.200000e+01 : f32
    %129 = vector.broadcast %cst_61 : f32 to vector<8x1xf32>
    %130 = arith.divf %128, %129 : vector<8x1xf32>
    %131 = vector.broadcast %130 : vector<8x1xf32> to vector<8x32xf32>
    %132 = arith.subf %122, %131 : vector<8x32xf32>
    %133 = arith.mulf %132, %132 : vector<8x32xf32>
    %cst_62 = arith.constant dense<0.000000e+00> : vector<8xf32>
    %134 = vector.multi_reduction <add>, %133, %cst_62 [1] : vector<8x32xf32> to vector<8xf32>
    %135 = vector.shape_cast %134 : vector<8xf32> to vector<8x1xf32>
    %cst_63 = arith.constant 3.200000e+01 : f32
    %136 = vector.broadcast %cst_63 : f32 to vector<8x1xf32>
    %137 = arith.divf %135, %136 : vector<8x1xf32>
    %138 = vector.broadcast %130 : vector<8x1xf32> to vector<8x32xf32>
    %139 = arith.subf %122, %138 : vector<8x32xf32>
    %cst_64 = arith.constant 9.99999974E-6 : f32
    %140 = vector.broadcast %cst_64 : f32 to vector<8x1xf32>
    %141 = arith.addf %137, %140 : vector<8x1xf32>
    %142 = math.rsqrt %141 : vector<8x1xf32>
    %143 = vector.broadcast %142 : vector<8x1xf32> to vector<8x32xf32>
    %144 = arith.mulf %139, %143 : vector<8x32xf32>
    %145 = vector.broadcast %124 : vector<1x32xf32> to vector<8x32xf32>
    %146 = arith.mulf %144, %145 : vector<8x32xf32>
    %147 = vector.broadcast %126 : vector<1x32xf32> to vector<8x32xf32>
    %148 = arith.addf %146, %147 : vector<8x32xf32>
    %149 = vector.broadcast %5 : vector<8x1xf32> to vector<8x32xf32>
    %150 = arith.mulf %148, %149 : vector<8x32xf32>
    %151 = arith.truncf %150 : vector<8x32xf32> to vector<8x32xbf16>
    %c0_65 = arith.constant 0 : index
    %c0_66 = arith.constant 0 : index
    %c0_67 = arith.constant 0 : index
    %152 = vector.load %arg10[%c0_65, %c0_66, %c0_67] : memref<2x32x64xbf16, #tpu.memory_space<vmem>>, vector<1x32x64xbf16>
    %153 = vector.shape_cast %152 : vector<1x32x64xbf16> to vector<32x64xbf16>
    %cst_68 = arith.constant dense<0.000000e+00> : vector<8x64xf32>
    %154 = tpu.matmul %151, %153, %cst_68 {dimension_numbers = #tpu.dot_dimension_numbers<[1], [0], [0], [1], [0, 0, 1, 1], [], []>} : vector<8x32xbf16>, vector<32x64xbf16>, vector<8x64xf32> -> vector<8x64xf32>
    %c0_69 = arith.constant 0 : index
    %c0_70 = arith.constant 0 : index
    %c0_71 = arith.constant 0 : index
    %155 = vector.load %arg11[%c0_69, %c0_70, %c0_71] : memref<2x1x64xf32, #tpu.memory_space<vmem>>, vector<1x1x64xf32>
    %156 = vector.shape_cast %155 : vector<1x1x64xf32> to vector<1x64xf32>
    %157 = vector.broadcast %156 : vector<1x64xf32> to vector<8x64xf32>
    %158 = arith.addf %154, %157 : vector<8x64xf32>
    %cst_72 = arith.constant 0.000000e+00 : f32
    %159 = vector.broadcast %cst_72 : f32 to vector<8x64xf32>
    %160 = arith.maximumf %158, %159 : vector<8x64xf32>
    %161 = arith.truncf %160 : vector<8x64xf32> to vector<8x64xbf16>
    %c0_73 = arith.constant 0 : index
    %c0_74 = arith.constant 0 : index
    %c0_75 = arith.constant 0 : index
    %162 = vector.load %arg12[%c0_73, %c0_74, %c0_75] : memref<2x64x32xbf16, #tpu.memory_space<vmem>>, vector<1x64x32xbf16>
    %163 = vector.shape_cast %162 : vector<1x64x32xbf16> to vector<64x32xbf16>
    %cst_76 = arith.constant dense<0.000000e+00> : vector<8x32xf32>
    %164 = tpu.matmul %161, %163, %cst_76 {dimension_numbers = #tpu.dot_dimension_numbers<[1], [0], [0], [1], [0, 0, 1, 1], [], []>} : vector<8x64xbf16>, vector<64x32xbf16>, vector<8x32xf32> -> vector<8x32xf32>
    %c0_77 = arith.constant 0 : index
    %c0_78 = arith.constant 0 : index
    %c0_79 = arith.constant 0 : index
    %165 = vector.load %arg13[%c0_77, %c0_78, %c0_79] : memref<2x1x32xf32, #tpu.memory_space<vmem>>, vector<1x1x32xf32>
    %166 = vector.shape_cast %165 : vector<1x1x32xf32> to vector<1x32xf32>
    %167 = vector.broadcast %166 : vector<1x32xf32> to vector<8x32xf32>
    %168 = arith.addf %164, %167 : vector<8x32xf32>
    %169 = arith.addf %168, %150 : vector<8x32xf32>
    %c0_80 = arith.constant 0 : index
    %c0_81 = arith.constant 0 : index
    %c0_82 = arith.constant 0 : index
    %170 = vector.load %arg14[%c0_80, %c0_81, %c0_82] : memref<2x1x32xf32, #tpu.memory_space<vmem>>, vector<1x1x32xf32>
    %171 = vector.shape_cast %170 : vector<1x1x32xf32> to vector<1x32xf32>
    %c0_83 = arith.constant 0 : index
    %c0_84 = arith.constant 0 : index
    %c0_85 = arith.constant 0 : index
    %172 = vector.load %arg15[%c0_83, %c0_84, %c0_85] : memref<2x1x32xf32, #tpu.memory_space<vmem>>, vector<1x1x32xf32>
    %173 = vector.shape_cast %172 : vector<1x1x32xf32> to vector<1x32xf32>
    %cst_86 = arith.constant dense<0.000000e+00> : vector<8xf32>
    %174 = vector.multi_reduction <add>, %169, %cst_86 [1] : vector<8x32xf32> to vector<8xf32>
    %175 = vector.shape_cast %174 : vector<8xf32> to vector<8x1xf32>
    %cst_87 = arith.constant 3.200000e+01 : f32
    %176 = vector.broadcast %cst_87 : f32 to vector<8x1xf32>
    %177 = arith.divf %175, %176 : vector<8x1xf32>
    %178 = vector.broadcast %177 : vector<8x1xf32> to vector<8x32xf32>
    %179 = arith.subf %169, %178 : vector<8x32xf32>
    %180 = arith.mulf %179, %179 : vector<8x32xf32>
    %cst_88 = arith.constant dense<0.000000e+00> : vector<8xf32>
    %181 = vector.multi_reduction <add>, %180, %cst_88 [1] : vector<8x32xf32> to vector<8xf32>
    %182 = vector.shape_cast %181 : vector<8xf32> to vector<8x1xf32>
    %cst_89 = arith.constant 3.200000e+01 : f32
    %183 = vector.broadcast %cst_89 : f32 to vector<8x1xf32>
    %184 = arith.divf %182, %183 : vector<8x1xf32>
    %185 = vector.broadcast %177 : vector<8x1xf32> to vector<8x32xf32>
    %186 = arith.subf %169, %185 : vector<8x32xf32>
    %cst_90 = arith.constant 9.99999974E-6 : f32
    %187 = vector.broadcast %cst_90 : f32 to vector<8x1xf32>
    %188 = arith.addf %184, %187 : vector<8x1xf32>
    %189 = math.rsqrt %188 : vector<8x1xf32>
    %190 = vector.broadcast %189 : vector<8x1xf32> to vector<8x32xf32>
    %191 = arith.mulf %186, %190 : vector<8x32xf32>
    %192 = vector.broadcast %171 : vector<1x32xf32> to vector<8x32xf32>
    %193 = arith.mulf %191, %192 : vector<8x32xf32>
    %194 = vector.broadcast %173 : vector<1x32xf32> to vector<8x32xf32>
    %195 = arith.addf %193, %194 : vector<8x32xf32>
    %196 = vector.broadcast %5 : vector<8x1xf32> to vector<8x32xf32>
    %197 = arith.mulf %195, %196 : vector<8x32xf32>
    %198 = arith.truncf %197 : vector<8x32xf32> to vector<8x32xbf16>
    %c1_91 = arith.constant 1 : index
    %c0_92 = arith.constant 0 : index
    %c0_93 = arith.constant 0 : index
    %199 = vector.load %arg4[%c1_91, %c0_92, %c0_93] : memref<2x32x192xbf16, #tpu.memory_space<vmem>>, vector<1x32x192xbf16>
    %200 = vector.shape_cast %199 : vector<1x32x192xbf16> to vector<32x192xbf16>
    %cst_94 = arith.constant dense<0.000000e+00> : vector<8x192xf32>
    %201 = tpu.matmul %198, %200, %cst_94 {dimension_numbers = #tpu.dot_dimension_numbers<[1], [0], [0], [1], [0, 0, 1, 1], [], []>} : vector<8x32xbf16>, vector<32x192xbf16>, vector<8x192xf32> -> vector<8x192xf32>
    %c1_95 = arith.constant 1 : index
    %c0_96 = arith.constant 0 : index
    %c0_97 = arith.constant 0 : index
    %202 = vector.load %arg5[%c1_95, %c0_96, %c0_97] : memref<2x1x192xf32, #tpu.memory_space<vmem>>, vector<1x1x192xf32>
    %203 = vector.shape_cast %202 : vector<1x1x192xf32> to vector<1x192xf32>
    %204 = vector.broadcast %203 : vector<1x192xf32> to vector<8x192xf32>
    %205 = arith.addf %201, %204 : vector<8x192xf32>
    %206 = arith.truncf %205 : vector<8x192xf32> to vector<8x192xbf16>
    %c1_98 = arith.constant 1 : index
    %c0_99 = arith.constant 0 : index
    %c0_100 = arith.constant 0 : index
    %207 = vector.load %arg6[%c1_98, %c0_99, %c0_100] : memref<2x64x32xbf16, #tpu.memory_space<vmem>>, vector<1x64x32xbf16>
    %208 = vector.shape_cast %207 : vector<1x64x32xbf16> to vector<64x32xbf16>
    %cst_101 = arith.constant 0.000000e+00 : f32
    %209 = vector.broadcast %cst_101 : f32 to vector<8x32xf32>
    %210 = vector.extract_strided_slice %206 {offsets = [0, 0], sizes = [8, 16], strides = [1, 1]} : vector<8x192xbf16> to vector<8x16xbf16>
    %211 = vector.extract_strided_slice %206 {offsets = [0, 64], sizes = [8, 16], strides = [1, 1]} : vector<8x192xbf16> to vector<8x16xbf16>
    %212 = vector.extract_strided_slice %206 {offsets = [0, 128], sizes = [8, 16], strides = [1, 1]} : vector<8x192xbf16> to vector<8x16xbf16>
    %cst_102 = arith.constant dense<0.000000e+00> : vector<8x8xf32>
    %213 = tpu.matmul %210, %211, %cst_102 {dimension_numbers = #tpu.dot_dimension_numbers<[1], [1], [0], [0], [0, 0, 1, 0], [], []>} : vector<8x16xbf16>, vector<8x16xbf16>, vector<8x8xf32> -> vector<8x8xf32>
    %214 = vector.broadcast %3 : vector<1x8xf32> to vector<8x8xf32>
    %215 = arith.addf %213, %214 : vector<8x8xf32>
    %cst_103 = arith.constant dense<0xFF800000> : vector<8xf32>
    %216 = vector.multi_reduction <maximumf>, %215, %cst_103 [1] : vector<8x8xf32> to vector<8xf32>
    %217 = vector.shape_cast %216 : vector<8xf32> to vector<8x1xf32>
    %218 = vector.broadcast %217 : vector<8x1xf32> to vector<8x8xf32>
    %219 = arith.subf %215, %218 : vector<8x8xf32>
    %220 = math.exp %219 : vector<8x8xf32>
    %cst_104 = arith.constant dense<0.000000e+00> : vector<8xf32>
    %221 = vector.multi_reduction <add>, %220, %cst_104 [1] : vector<8x8xf32> to vector<8xf32>
    %222 = vector.shape_cast %221 : vector<8xf32> to vector<8x1xf32>
    %223 = tpu.reciprocal %222 {approx = true} : vector<8x1xf32> -> vector<8x1xf32>
    %224 = vector.broadcast %223 : vector<8x1xf32> to vector<8x8xf32>
    %225 = arith.mulf %220, %224 : vector<8x8xf32>
    %c0_105 = arith.constant 0 : index
    %c4 = arith.constant 4 : index
    %c0_106 = arith.constant 0 : index
    %c0_107 = arith.constant 0 : index
    %226 = vector.load %arg17[%c0_105, %c4, %c0_106, %c0_107] : memref<1x8x8x8xf32, #tpu.memory_space<vmem>>, vector<1x1x8x8xf32>
    %227 = vector.shape_cast %226 : vector<1x1x8x8xf32> to vector<8x8xf32>
    %228 = vector.shape_cast %225 : vector<8x8xf32> to vector<1x1x8x8xf32>
    tpu.vector_store %arg17[%c0_105, %c4, %c0_106, %c0_107], %228 {strides = array<i32>} : memref<1x8x8x8xf32, #tpu.memory_space<vmem>>, vector<1x1x8x8xf32>,
    %229 = arith.truncf %225 : vector<8x8xf32> to vector<8x8xbf16>
    %cst_108 = arith.constant dense<0.000000e+00> : vector<8x16xf32>
    %230 = tpu.matmul %229, %212, %cst_108 {dimension_numbers = #tpu.dot_dimension_numbers<[1], [0], [0], [1], [0, 0, 1, 1], [], []>} : vector<8x8xbf16>, vector<8x16xbf16>, vector<8x16xf32> -> vector<8x16xf32>
    %231 = arith.truncf %230 : vector<8x16xf32> to vector<8x16xbf16>
    %232 = vector.extract_strided_slice %208 {offsets = [0, 0], sizes = [16, 32], strides = [1, 1]} : vector<64x32xbf16> to vector<16x32xbf16>
    %cst_109 = arith.constant dense<0.000000e+00> : vector<8x32xf32>
    %233 = tpu.matmul %231, %232, %cst_109 {dimension_numbers = #tpu.dot_dimension_numbers<[1], [0], [0], [1], [0, 0, 1, 1], [], []>} : vector<8x16xbf16>, vector<16x32xbf16>, vector<8x32xf32> -> vector<8x32xf32>
    %234 = arith.addf %209, %233 : vector<8x32xf32>
    %235 = vector.extract_strided_slice %206 {offsets = [0, 16], sizes = [8, 16], strides = [1, 1]} : vector<8x192xbf16> to vector<8x16xbf16>
    %236 = vector.extract_strided_slice %206 {offsets = [0, 80], sizes = [8, 16], strides = [1, 1]} : vector<8x192xbf16> to vector<8x16xbf16>
    %237 = vector.extract_strided_slice %206 {offsets = [0, 144], sizes = [8, 16], strides = [1, 1]} : vector<8x192xbf16> to vector<8x16xbf16>
    %cst_110 = arith.constant dense<0.000000e+00> : vector<8x8xf32>
    %238 = tpu.matmul %235, %236, %cst_110 {dimension_numbers = #tpu.dot_dimension_numbers<[1], [1], [0], [0], [0, 0, 1, 0], [], []>} : vector<8x16xbf16>, vector<8x16xbf16>, vector<8x8xf32> -> vector<8x8xf32>
    %239 = vector.broadcast %3 : vector<1x8xf32> to vector<8x8xf32>
    %240 = arith.addf %238, %239 : vector<8x8xf32>
    %cst_111 = arith.constant dense<0xFF800000> : vector<8xf32>
    %241 = vector.multi_reduction <maximumf>, %240, %cst_111 [1] : vector<8x8xf32> to vector<8xf32>
    %242 = vector.shape_cast %241 : vector<8xf32> to vector<8x1xf32>
    %243 = vector.broadcast %242 : vector<8x1xf32> to vector<8x8xf32>
    %244 = arith.subf %240, %243 : vector<8x8xf32>
    %245 = math.exp %244 : vector<8x8xf32>
    %cst_112 = arith.constant dense<0.000000e+00> : vector<8xf32>
    %246 = vector.multi_reduction <add>, %245, %cst_112 [1] : vector<8x8xf32> to vector<8xf32>
    %247 = vector.shape_cast %246 : vector<8xf32> to vector<8x1xf32>
    %248 = tpu.reciprocal %247 {approx = true} : vector<8x1xf32> -> vector<8x1xf32>
    %249 = vector.broadcast %248 : vector<8x1xf32> to vector<8x8xf32>
    %250 = arith.mulf %245, %249 : vector<8x8xf32>
    %c0_113 = arith.constant 0 : index
    %c5 = arith.constant 5 : index
    %c0_114 = arith.constant 0 : index
    %c0_115 = arith.constant 0 : index
    %251 = vector.load %arg17[%c0_113, %c5, %c0_114, %c0_115] : memref<1x8x8x8xf32, #tpu.memory_space<vmem>>, vector<1x1x8x8xf32>
    %252 = vector.shape_cast %251 : vector<1x1x8x8xf32> to vector<8x8xf32>
    %253 = vector.shape_cast %250 : vector<8x8xf32> to vector<1x1x8x8xf32>
    tpu.vector_store %arg17[%c0_113, %c5, %c0_114, %c0_115], %253 {strides = array<i32>} : memref<1x8x8x8xf32, #tpu.memory_space<vmem>>, vector<1x1x8x8xf32>,
    %254 = arith.truncf %250 : vector<8x8xf32> to vector<8x8xbf16>
    %cst_116 = arith.constant dense<0.000000e+00> : vector<8x16xf32>
    %255 = tpu.matmul %254, %237, %cst_116 {dimension_numbers = #tpu.dot_dimension_numbers<[1], [0], [0], [1], [0, 0, 1, 1], [], []>} : vector<8x8xbf16>, vector<8x16xbf16>, vector<8x16xf32> -> vector<8x16xf32>
    %256 = arith.truncf %255 : vector<8x16xf32> to vector<8x16xbf16>
    %257 = vector.extract_strided_slice %208 {offsets = [16, 0], sizes = [16, 32], strides = [1, 1]} : vector<64x32xbf16> to vector<16x32xbf16>
    %cst_117 = arith.constant dense<0.000000e+00> : vector<8x32xf32>
    %258 = tpu.matmul %256, %257, %cst_117 {dimension_numbers = #tpu.dot_dimension_numbers<[1], [0], [0], [1], [0, 0, 1, 1], [], []>} : vector<8x16xbf16>, vector<16x32xbf16>, vector<8x32xf32> -> vector<8x32xf32>
    %259 = arith.addf %234, %258 : vector<8x32xf32>
    %260 = vector.extract_strided_slice %206 {offsets = [0, 32], sizes = [8, 16], strides = [1, 1]} : vector<8x192xbf16> to vector<8x16xbf16>
    %261 = vector.extract_strided_slice %206 {offsets = [0, 96], sizes = [8, 16], strides = [1, 1]} : vector<8x192xbf16> to vector<8x16xbf16>
    %262 = vector.extract_strided_slice %206 {offsets = [0, 160], sizes = [8, 16], strides = [1, 1]} : vector<8x192xbf16> to vector<8x16xbf16>
    %cst_118 = arith.constant dense<0.000000e+00> : vector<8x8xf32>
    %263 = tpu.matmul %260, %261, %cst_118 {dimension_numbers = #tpu.dot_dimension_numbers<[1], [1], [0], [0], [0, 0, 1, 0], [], []>} : vector<8x16xbf16>, vector<8x16xbf16>, vector<8x8xf32> -> vector<8x8xf32>
    %264 = vector.broadcast %3 : vector<1x8xf32> to vector<8x8xf32>
    %265 = arith.addf %263, %264 : vector<8x8xf32>
    %cst_119 = arith.constant dense<0xFF800000> : vector<8xf32>
    %266 = vector.multi_reduction <maximumf>, %265, %cst_119 [1] : vector<8x8xf32> to vector<8xf32>
    %267 = vector.shape_cast %266 : vector<8xf32> to vector<8x1xf32>
    %268 = vector.broadcast %267 : vector<8x1xf32> to vector<8x8xf32>
    %269 = arith.subf %265, %268 : vector<8x8xf32>
    %270 = math.exp %269 : vector<8x8xf32>
    %cst_120 = arith.constant dense<0.000000e+00> : vector<8xf32>
    %271 = vector.multi_reduction <add>, %270, %cst_120 [1] : vector<8x8xf32> to vector<8xf32>
    %272 = vector.shape_cast %271 : vector<8xf32> to vector<8x1xf32>
    %273 = tpu.reciprocal %272 {approx = true} : vector<8x1xf32> -> vector<8x1xf32>
    %274 = vector.broadcast %273 : vector<8x1xf32> to vector<8x8xf32>
    %275 = arith.mulf %270, %274 : vector<8x8xf32>
    %c0_121 = arith.constant 0 : index
    %c6 = arith.constant 6 : index
    %c0_122 = arith.constant 0 : index
    %c0_123 = arith.constant 0 : index
    %276 = vector.load %arg17[%c0_121, %c6, %c0_122, %c0_123] : memref<1x8x8x8xf32, #tpu.memory_space<vmem>>, vector<1x1x8x8xf32>
    %277 = vector.shape_cast %276 : vector<1x1x8x8xf32> to vector<8x8xf32>
    %278 = vector.shape_cast %275 : vector<8x8xf32> to vector<1x1x8x8xf32>
    tpu.vector_store %arg17[%c0_121, %c6, %c0_122, %c0_123], %278 {strides = array<i32>} : memref<1x8x8x8xf32, #tpu.memory_space<vmem>>, vector<1x1x8x8xf32>,
    %279 = arith.truncf %275 : vector<8x8xf32> to vector<8x8xbf16>
    %cst_124 = arith.constant dense<0.000000e+00> : vector<8x16xf32>
    %280 = tpu.matmul %279, %262, %cst_124 {dimension_numbers = #tpu.dot_dimension_numbers<[1], [0], [0], [1], [0, 0, 1, 1], [], []>} : vector<8x8xbf16>, vector<8x16xbf16>, vector<8x16xf32> -> vector<8x16xf32>
    %281 = arith.truncf %280 : vector<8x16xf32> to vector<8x16xbf16>
    %282 = vector.extract_strided_slice %208 {offsets = [32, 0], sizes = [16, 32], strides = [1, 1]} : vector<64x32xbf16> to vector<16x32xbf16>
    %cst_125 = arith.constant dense<0.000000e+00> : vector<8x32xf32>
    %283 = tpu.matmul %281, %282, %cst_125 {dimension_numbers = #tpu.dot_dimension_numbers<[1], [0], [0], [1], [0, 0, 1, 1], [], []>} : vector<8x16xbf16>, vector<16x32xbf16>, vector<8x32xf32> -> vector<8x32xf32>
    %284 = arith.addf %259, %283 : vector<8x32xf32>
    %285 = vector.extract_strided_slice %206 {offsets = [0, 48], sizes = [8, 16], strides = [1, 1]} : vector<8x192xbf16> to vector<8x16xbf16>
    %286 = vector.extract_strided_slice %206 {offsets = [0, 112], sizes = [8, 16], strides = [1, 1]} : vector<8x192xbf16> to vector<8x16xbf16>
    %287 = vector.extract_strided_slice %206 {offsets = [0, 176], sizes = [8, 16], strides = [1, 1]} : vector<8x192xbf16> to vector<8x16xbf16>
    %cst_126 = arith.constant dense<0.000000e+00> : vector<8x8xf32>
    %288 = tpu.matmul %285, %286, %cst_126 {dimension_numbers = #tpu.dot_dimension_numbers<[1], [1], [0], [0], [0, 0, 1, 0], [], []>} : vector<8x16xbf16>, vector<8x16xbf16>, vector<8x8xf32> -> vector<8x8xf32>
    %289 = vector.broadcast %3 : vector<1x8xf32> to vector<8x8xf32>
    %290 = arith.addf %288, %289 : vector<8x8xf32>
    %cst_127 = arith.constant dense<0xFF800000> : vector<8xf32>
    %291 = vector.multi_reduction <maximumf>, %290, %cst_127 [1] : vector<8x8xf32> to vector<8xf32>
    %292 = vector.shape_cast %291 : vector<8xf32> to vector<8x1xf32>
    %293 = vector.broadcast %292 : vector<8x1xf32> to vector<8x8xf32>
    %294 = arith.subf %290, %293 : vector<8x8xf32>
    %295 = math.exp %294 : vector<8x8xf32>
    %cst_128 = arith.constant dense<0.000000e+00> : vector<8xf32>
    %296 = vector.multi_reduction <add>, %295, %cst_128 [1] : vector<8x8xf32> to vector<8xf32>
    %297 = vector.shape_cast %296 : vector<8xf32> to vector<8x1xf32>
    %298 = tpu.reciprocal %297 {approx = true} : vector<8x1xf32> -> vector<8x1xf32>
    %299 = vector.broadcast %298 : vector<8x1xf32> to vector<8x8xf32>
    %300 = arith.mulf %295, %299 : vector<8x8xf32>
    %c0_129 = arith.constant 0 : index
    %c7 = arith.constant 7 : index
    %c0_130 = arith.constant 0 : index
    %c0_131 = arith.constant 0 : index
    %301 = vector.load %arg17[%c0_129, %c7, %c0_130, %c0_131] : memref<1x8x8x8xf32, #tpu.memory_space<vmem>>, vector<1x1x8x8xf32>
    %302 = vector.shape_cast %301 : vector<1x1x8x8xf32> to vector<8x8xf32>
    %303 = vector.shape_cast %300 : vector<8x8xf32> to vector<1x1x8x8xf32>
    tpu.vector_store %arg17[%c0_129, %c7, %c0_130, %c0_131], %303 {strides = array<i32>} : memref<1x8x8x8xf32, #tpu.memory_space<vmem>>, vector<1x1x8x8xf32>,
    %304 = arith.truncf %300 : vector<8x8xf32> to vector<8x8xbf16>
    %cst_132 = arith.constant dense<0.000000e+00> : vector<8x16xf32>
    %305 = tpu.matmul %304, %287, %cst_132 {dimension_numbers = #tpu.dot_dimension_numbers<[1], [0], [0], [1], [0, 0, 1, 1], [], []>} : vector<8x8xbf16>, vector<8x16xbf16>, vector<8x16xf32> -> vector<8x16xf32>
    %306 = arith.truncf %305 : vector<8x16xf32> to vector<8x16xbf16>
    %307 = vector.extract_strided_slice %208 {offsets = [48, 0], sizes = [16, 32], strides = [1, 1]} : vector<64x32xbf16> to vector<16x32xbf16>
    %cst_133 = arith.constant dense<0.000000e+00> : vector<8x32xf32>
    %308 = tpu.matmul %306, %307, %cst_133 {dimension_numbers = #tpu.dot_dimension_numbers<[1], [0], [0], [1], [0, 0, 1, 1], [], []>} : vector<8x16xbf16>, vector<16x32xbf16>, vector<8x32xf32> -> vector<8x32xf32>
    %309 = arith.addf %284, %308 : vector<8x32xf32>
    %c1_134 = arith.constant 1 : index
    %c0_135 = arith.constant 0 : index
    %c0_136 = arith.constant 0 : index
    %310 = vector.load %arg7[%c1_134, %c0_135, %c0_136] : memref<2x1x32xf32, #tpu.memory_space<vmem>>, vector<1x1x32xf32>
    %311 = vector.shape_cast %310 : vector<1x1x32xf32> to vector<1x32xf32>
    %312 = vector.broadcast %311 : vector<1x32xf32> to vector<8x32xf32>
    %313 = arith.addf %309, %312 : vector<8x32xf32>
    %314 = arith.addf %313, %197 : vector<8x32xf32>
    %c1_137 = arith.constant 1 : index
    %c0_138 = arith.constant 0 : index
    %c0_139 = arith.constant 0 : index
    %315 = vector.load %arg8[%c1_137, %c0_138, %c0_139] : memref<2x1x32xf32, #tpu.memory_space<vmem>>, vector<1x1x32xf32>
    %316 = vector.shape_cast %315 : vector<1x1x32xf32> to vector<1x32xf32>
    %c1_140 = arith.constant 1 : index
    %c0_141 = arith.constant 0 : index
    %c0_142 = arith.constant 0 : index
    %317 = vector.load %arg9[%c1_140, %c0_141, %c0_142] : memref<2x1x32xf32, #tpu.memory_space<vmem>>, vector<1x1x32xf32>
    %318 = vector.shape_cast %317 : vector<1x1x32xf32> to vector<1x32xf32>
    %cst_143 = arith.constant dense<0.000000e+00> : vector<8xf32>
    %319 = vector.multi_reduction <add>, %314, %cst_143 [1] : vector<8x32xf32> to vector<8xf32>
    %320 = vector.shape_cast %319 : vector<8xf32> to vector<8x1xf32>
    %cst_144 = arith.constant 3.200000e+01 : f32
    %321 = vector.broadcast %cst_144 : f32 to vector<8x1xf32>
    %322 = arith.divf %320, %321 : vector<8x1xf32>
    %323 = vector.broadcast %322 : vector<8x1xf32> to vector<8x32xf32>
    %324 = arith.subf %314, %323 : vector<8x32xf32>
    %325 = arith.mulf %324, %324 : vector<8x32xf32>
    %cst_145 = arith.constant dense<0.000000e+00> : vector<8xf32>
    %326 = vector.multi_reduction <add>, %325, %cst_145 [1] : vector<8x32xf32> to vector<8xf32>
    %327 = vector.shape_cast %326 : vector<8xf32> to vector<8x1xf32>
    %cst_146 = arith.constant 3.200000e+01 : f32
    %328 = vector.broadcast %cst_146 : f32 to vector<8x1xf32>
    %329 = arith.divf %327, %328 : vector<8x1xf32>
    %330 = vector.broadcast %322 : vector<8x1xf32> to vector<8x32xf32>
    %331 = arith.subf %314, %330 : vector<8x32xf32>
    %cst_147 = arith.constant 9.99999974E-6 : f32
    %332 = vector.broadcast %cst_147 : f32 to vector<8x1xf32>
    %333 = arith.addf %329, %332 : vector<8x1xf32>
    %334 = math.rsqrt %333 : vector<8x1xf32>
    %335 = vector.broadcast %334 : vector<8x1xf32> to vector<8x32xf32>
    %336 = arith.mulf %331, %335 : vector<8x32xf32>
    %337 = vector.broadcast %316 : vector<1x32xf32> to vector<8x32xf32>
    %338 = arith.mulf %336, %337 : vector<8x32xf32>
    %339 = vector.broadcast %318 : vector<1x32xf32> to vector<8x32xf32>
    %340 = arith.addf %338, %339 : vector<8x32xf32>
    %341 = vector.broadcast %5 : vector<8x1xf32> to vector<8x32xf32>
    %342 = arith.mulf %340, %341 : vector<8x32xf32>
    %343 = arith.truncf %342 : vector<8x32xf32> to vector<8x32xbf16>
    %c1_148 = arith.constant 1 : index
    %c0_149 = arith.constant 0 : index
    %c0_150 = arith.constant 0 : index
    %344 = vector.load %arg10[%c1_148, %c0_149, %c0_150] : memref<2x32x64xbf16, #tpu.memory_space<vmem>>, vector<1x32x64xbf16>
    %345 = vector.shape_cast %344 : vector<1x32x64xbf16> to vector<32x64xbf16>
    %cst_151 = arith.constant dense<0.000000e+00> : vector<8x64xf32>
    %346 = tpu.matmul %343, %345, %cst_151 {dimension_numbers = #tpu.dot_dimension_numbers<[1], [0], [0], [1], [0, 0, 1, 1], [], []>} : vector<8x32xbf16>, vector<32x64xbf16>, vector<8x64xf32> -> vector<8x64xf32>
    %c1_152 = arith.constant 1 : index
    %c0_153 = arith.constant 0 : index
    %c0_154 = arith.constant 0 : index
    %347 = vector.load %arg11[%c1_152, %c0_153, %c0_154] : memref<2x1x64xf32, #tpu.memory_space<vmem>>, vector<1x1x64xf32>
    %348 = vector.shape_cast %347 : vector<1x1x64xf32> to vector<1x64xf32>
    %349 = vector.broadcast %348 : vector<1x64xf32> to vector<8x64xf32>
    %350 = arith.addf %346, %349 : vector<8x64xf32>
    %cst_155 = arith.constant 0.000000e+00 : f32
    %351 = vector.broadcast %cst_155 : f32 to vector<8x64xf32>
    %352 = arith.maximumf %350, %351 : vector<8x64xf32>
    %353 = arith.truncf %352 : vector<8x64xf32> to vector<8x64xbf16>
    %c1_156 = arith.constant 1 : index
    %c0_157 = arith.constant 0 : index
    %c0_158 = arith.constant 0 : index
    %354 = vector.load %arg12[%c1_156, %c0_157, %c0_158] : memref<2x64x32xbf16, #tpu.memory_space<vmem>>, vector<1x64x32xbf16>
    %355 = vector.shape_cast %354 : vector<1x64x32xbf16> to vector<64x32xbf16>
    %cst_159 = arith.constant dense<0.000000e+00> : vector<8x32xf32>
    %356 = tpu.matmul %353, %355, %cst_159 {dimension_numbers = #tpu.dot_dimension_numbers<[1], [0], [0], [1], [0, 0, 1, 1], [], []>} : vector<8x64xbf16>, vector<64x32xbf16>, vector<8x32xf32> -> vector<8x32xf32>
    %c1_160 = arith.constant 1 : index
    %c0_161 = arith.constant 0 : index
    %c0_162 = arith.constant 0 : index
    %357 = vector.load %arg13[%c1_160, %c0_161, %c0_162] : memref<2x1x32xf32, #tpu.memory_space<vmem>>, vector<1x1x32xf32>
    %358 = vector.shape_cast %357 : vector<1x1x32xf32> to vector<1x32xf32>
    %359 = vector.broadcast %358 : vector<1x32xf32> to vector<8x32xf32>
    %360 = arith.addf %356, %359 : vector<8x32xf32>
    %361 = arith.addf %360, %342 : vector<8x32xf32>
    %c1_163 = arith.constant 1 : index
    %c0_164 = arith.constant 0 : index
    %c0_165 = arith.constant 0 : index
    %362 = vector.load %arg14[%c1_163, %c0_164, %c0_165] : memref<2x1x32xf32, #tpu.memory_space<vmem>>, vector<1x1x32xf32>
    %363 = vector.shape_cast %362 : vector<1x1x32xf32> to vector<1x32xf32>
    %c1_166 = arith.constant 1 : index
    %c0_167 = arith.constant 0 : index
    %c0_168 = arith.constant 0 : index
    %364 = vector.load %arg15[%c1_166, %c0_167, %c0_168] : memref<2x1x32xf32, #tpu.memory_space<vmem>>, vector<1x1x32xf32>
    %365 = vector.shape_cast %364 : vector<1x1x32xf32> to vector<1x32xf32>
    %cst_169 = arith.constant dense<0.000000e+00> : vector<8xf32>
    %366 = vector.multi_reduction <add>, %361, %cst_169 [1] : vector<8x32xf32> to vector<8xf32>
    %367 = vector.shape_cast %366 : vector<8xf32> to vector<8x1xf32>
    %cst_170 = arith.constant 3.200000e+01 : f32
    %368 = vector.broadcast %cst_170 : f32 to vector<8x1xf32>
    %369 = arith.divf %367, %368 : vector<8x1xf32>
    %370 = vector.broadcast %369 : vector<8x1xf32> to vector<8x32xf32>
    %371 = arith.subf %361, %370 : vector<8x32xf32>
    %372 = arith.mulf %371, %371 : vector<8x32xf32>
    %cst_171 = arith.constant dense<0.000000e+00> : vector<8xf32>
    %373 = vector.multi_reduction <add>, %372, %cst_171 [1] : vector<8x32xf32> to vector<8xf32>
    %374 = vector.shape_cast %373 : vector<8xf32> to vector<8x1xf32>
    %cst_172 = arith.constant 3.200000e+01 : f32
    %375 = vector.broadcast %cst_172 : f32 to vector<8x1xf32>
    %376 = arith.divf %374, %375 : vector<8x1xf32>
    %377 = vector.broadcast %369 : vector<8x1xf32> to vector<8x32xf32>
    %378 = arith.subf %361, %377 : vector<8x32xf32>
    %cst_173 = arith.constant 9.99999974E-6 : f32
    %379 = vector.broadcast %cst_173 : f32 to vector<8x1xf32>
    %380 = arith.addf %376, %379 : vector<8x1xf32>
    %381 = math.rsqrt %380 : vector<8x1xf32>
    %382 = vector.broadcast %381 : vector<8x1xf32> to vector<8x32xf32>
    %383 = arith.mulf %378, %382 : vector<8x32xf32>
    %384 = vector.broadcast %363 : vector<1x32xf32> to vector<8x32xf32>
    %385 = arith.mulf %383, %384 : vector<8x32xf32>
    %386 = vector.broadcast %365 : vector<1x32xf32> to vector<8x32xf32>
    %387 = arith.addf %385, %386 : vector<8x32xf32>
    %388 = vector.broadcast %5 : vector<8x1xf32> to vector<8x32xf32>
    %389 = arith.mulf %387, %388 : vector<8x32xf32>
    %390 = arith.truncf %389 : vector<8x32xf32> to vector<8x32xbf16>
    %c0_174 = arith.constant 0 : index
    %c0_175 = arith.constant 0 : index
    %c0_176 = arith.constant 0 : index
    %391 = vector.load %arg16[%c0_174, %c0_175, %c0_176] : memref<1x8x32xbf16, #tpu.memory_space<vmem>>, vector<1x8x32xbf16>
    %392 = vector.shape_cast %391 : vector<1x8x32xbf16> to vector<8x32xbf16>
    %393 = vector.shape_cast %390 : vector<8x32xbf16> to vector<1x8x32xbf16>
    tpu.vector_store %arg16[%c0_174, %c0_175, %c0_176], %393 {strides = array<i32>} : memref<1x8x32xbf16, #tpu.memory_space<vmem>>, vector<1x8x32xbf16>,
    return
  }
  func.func @transform_0(%arg0: i32) -> (i32, i32, i32) {
    %c0_i32 = arith.constant 0 : i32
    %c0_i32_0 = arith.constant 0 : i32
    %c0_i32_1 = arith.constant 0 : i32
    return %arg0, %c0_i32, %c0_i32_0 : i32, i32, i32
  }
  func.func @transform_1(%arg0: i32) -> (i32, i32, i32) {
    %c0_i32 = arith.constant 0 : i32
    %c0_i32_0 = arith.constant 0 : i32
    %c0_i32_1 = arith.constant 0 : i32
    return %arg0, %c0_i32, %c0_i32_0 : i32, i32, i32
  }
  func.func @transform_2(%arg0: i32) -> (i32, i32, i32) {
    %c0_i32 = arith.constant 0 : i32
    %c0_i32_0 = arith.constant 0 : i32
    %c0_i32_1 = arith.constant 0 : i32
    return %arg0, %c0_i32, %c0_i32_0 : i32, i32, i32
  }
  func.func @transform_3(%arg0: i32) -> (i32, i32, i32) {
    %c0_i32 = arith.constant 0 : i32
    %c0_i32_0 = arith.constant 0 : i32
    %c0_i32_1 = arith.constant 0 : i32
    %c0_i32_2 = arith.constant 0 : i32
    return %c0_i32, %c0_i32_0, %c0_i32_1 : i32, i32, i32
  }
  func.func @transform_4(%arg0: i32) -> (i32, i32, i32) {
    %c0_i32 = arith.constant 0 : i32
    %c0_i32_0 = arith.constant 0 : i32
    %c0_i32_1 = arith.constant 0 : i32
    %c0_i32_2 = arith.constant 0 : i32
    return %c0_i32, %c0_i32_0, %c0_i32_1 : i32, i32, i32
  }
  func.func @transform_5(%arg0: i32) -> (i32, i32, i32) {
    %c0_i32 = arith.constant 0 : i32
    %c0_i32_0 = arith.constant 0 : i32
    %c0_i32_1 = arith.constant 0 : i32
    %c0_i32_2 = arith.constant 0 : i32
    return %c0_i32, %c0_i32_0, %c0_i32_1 : i32, i32, i32
  }
  func.func @transform_6(%arg0: i32) -> (i32, i32, i32) {
    %c0_i32 = arith.constant 0 : i32
    %c0_i32_0 = arith.constant 0 : i32
    %c0_i32_1 = arith.constant 0 : i32
    %c0_i32_2 = arith.constant 0 : i32
    return %c0_i32, %c0_i32_0, %c0_i32_1 : i32, i32, i32
  }
  func.func @transform_7(%arg0: i32) -> (i32, i32, i32) {
    %c0_i32 = arith.constant 0 : i32
    %c0_i32_0 = arith.constant 0 : i32
    %c0_i32_1 = arith.constant 0 : i32
    %c0_i32_2 = arith.constant 0 : i32
    return %c0_i32, %c0_i32_0, %c0_i32_1 : i32, i32, i32
  }
  func.func @transform_8(%arg0: i32) -> (i32, i32, i32) {
    %c0_i32 = arith.constant 0 : i32
    %c0_i32_0 = arith.constant 0 : i32
    %c0_i32_1 = arith.constant 0 : i32
    %c0_i32_2 = arith.constant 0 : i32
    return %c0_i32, %c0_i32_0, %c0_i32_1 : i32, i32, i32
  }
  func.func @transform_9(%arg0: i32) -> (i32, i32, i32) {
    %c0_i32 = arith.constant 0 : i32
    %c0_i32_0 = arith.constant 0 : i32
    %c0_i32_1 = arith.constant 0 : i32
    %c0_i32_2 = arith.constant 0 : i32
    return %c0_i32, %c0_i32_0, %c0_i32_1 : i32, i32, i32
  }
  func.func @transform_10(%arg0: i32) -> (i32, i32, i32) {
    %c0_i32 = arith.constant 0 : i32
    %c0_i32_0 = arith.constant 0 : i32
    %c0_i32_1 = arith.constant 0 : i32
    %c0_i32_2 = arith.constant 0 : i32
    return %c0_i32, %c0_i32_0, %c0_i32_1 : i32, i32, i32
  }
  func.func @transform_11(%arg0: i32) -> (i32, i32, i32) {
    %c0_i32 = arith.constant 0 : i32
    %c0_i32_0 = arith.constant 0 : i32
    %c0_i32_1 = arith.constant 0 : i32
    %c0_i32_2 = arith.constant 0 : i32
    return %c0_i32, %c0_i32_0, %c0_i32_1 : i32, i32, i32
  }
  func.func @transform_12(%arg0: i32) -> (i32, i32, i32) {
    %c0_i32 = arith.constant 0 : i32
    %c0_i32_0 = arith.constant 0 : i32
    %c0_i32_1 = arith.constant 0 : i32
    %c0_i32_2 = arith.constant 0 : i32
    return %c0_i32, %c0_i32_0, %c0_i32_1 : i32, i32, i32
  }
  func.func @transform_13(%arg0: i32) -> (i32, i32, i32) {
    %c0_i32 = arith.constant 0 : i32
    %c0_i32_0 = arith.constant 0 : i32
    %c0_i32_1 = arith.constant 0 : i32
    %c0_i32_2 = arith.constant 0 : i32
    return %c0_i32, %c0_i32_0, %c0_i32_1 : i32, i32, i32
  }
  func.func @transform_14(%arg0: i32) -> (i32, i32, i32) {
    %c0_i32 = arith.constant 0 : i32
    %c0_i32_0 = arith.constant 0 : i32
    %c0_i32_1 = arith.constant 0 : i32
    %c0_i32_2 = arith.constant 0 : i32
    return %c0_i32, %c0_i32_0, %c0_i32_1 : i32, i32, i32
  }
  func.func @transform_15(%arg0: i32) -> (i32, i32, i32) {
    %c0_i32 = arith.constant 0 : i32
    %c0_i32_0 = arith.constant 0 : i32
    %c0_i32_1 = arith.constant 0 : i32
    return %arg0, %c0_i32, %c0_i32_0 : i32, i32, i32
  }
  func.func @transform_16(%arg0: i32) -> (i32, i32, i32, i32) {
    %c0_i32 = arith.constant 0 : i32
    %c0_i32_0 = arith.constant 0 : i32
    %c0_i32_1 = arith.constant 0 : i32
    %c0_i32_2 = arith.constant 0 : i32
    return %arg0, %c0_i32, %c0_i32_0, %c0_i32_1 : i32, i32, i32, i32
  }
}

module attributes {stable_mosaic.version = 11 : i64} {
  func.func @_enc_stack_kernel(%arg0: i32, %arg1: memref<1x8x32xf32, #tpu.memory_space<vmem>>, %arg2: memref<1x8x8xf32, #tpu.memory_space<vmem>>, %arg3: memref<1x8x1xf32, #tpu.memory_space<vmem>>, %arg4: memref<2x32x192xbf16, #tpu.memory_space<vmem>>, %arg5: memref<2x1x192xf32, #tpu.memory_space<vmem>>, %arg6: memref<2x64x32xbf16, #tpu.memory_space<vmem>>, %arg7: memref<2x1x32xf32, #tpu.memory_space<vmem>>, %arg8: memref<2x1x32xf32, #tpu.memory_space<vmem>>, %arg9: memref<2x1x32xf32, #tpu.memory_space<vmem>>, %arg10: memref<2x32x64xbf16, #tpu.memory_space<vmem>>, %arg11: memref<2x1x64xf32, #tpu.memory_space<vmem>>, %arg12: memref<2x64x32xbf16, #tpu.memory_space<vmem>>, %arg13: memref<2x1x32xf32, #tpu.memory_space<vmem>>, %arg14: memref<2x1x32xf32, #tpu.memory_space<vmem>>, %arg15: memref<2x1x32xf32, #tpu.memory_space<vmem>>, %arg16: memref<1x8x32xbf16, #tpu.memory_space<vmem>>, %arg17: memref<1x8x8x8xf32, #tpu.memory_space<vmem>>) attributes {dimension_semantics = [#tpu.dimension_semantics<parallel>], iteration_bounds = array<i64: 2>, scalar_prefetch = 0 : i64, scratch_operands = 0 : i64, tpu.core_type = #tpu.core_type<tc>, window_params = [{transform_indices = @transform_0, window_bounds = array<i64: 1, 8, 32>}, {transform_indices = @transform_1, window_bounds = array<i64: 1, 8, 8>}, {transform_indices = @transform_2, window_bounds = array<i64: 1, 8, 1>}, {pipeline_mode = #tpu.pipeline_mode<synchronous>, transform_indices = @transform_3, window_bounds = array<i64: 2, 32, 192>}, {pipeline_mode = #tpu.pipeline_mode<synchronous>, transform_indices = @transform_4, window_bounds = array<i64: 2, 1, 192>}, {pipeline_mode = #tpu.pipeline_mode<synchronous>, transform_indices = @transform_5, window_bounds = array<i64: 2, 64, 32>}, {pipeline_mode = #tpu.pipeline_mode<synchronous>, transform_indices = @transform_6, window_bounds = array<i64: 2, 1, 32>}, {pipeline_mode = #tpu.pipeline_mode<synchronous>, transform_indices = @transform_7, window_bounds = array<i64: 2, 1, 32>}, {pipeline_mode = #tpu.pipeline_mode<synchronous>, transform_indices = @transform_8, window_bounds = array<i64: 2, 1, 32>}, {pipeline_mode = #tpu.pipeline_mode<synchronous>, transform_indices = @transform_9, window_bounds = array<i64: 2, 32, 64>}, {pipeline_mode = #tpu.pipeline_mode<synchronous>, transform_indices = @transform_10, window_bounds = array<i64: 2, 1, 64>}, {pipeline_mode = #tpu.pipeline_mode<synchronous>, transform_indices = @transform_11, window_bounds = array<i64: 2, 64, 32>}, {pipeline_mode = #tpu.pipeline_mode<synchronous>, transform_indices = @transform_12, window_bounds = array<i64: 2, 1, 32>}, {pipeline_mode = #tpu.pipeline_mode<synchronous>, transform_indices = @transform_13, window_bounds = array<i64: 2, 1, 32>}, {pipeline_mode = #tpu.pipeline_mode<synchronous>, transform_indices = @transform_14, window_bounds = array<i64: 2, 1, 32>}, {transform_indices = @transform_15, window_bounds = array<i64: 1, 8, 32>}, {transform_indices = @transform_16, window_bounds = array<i64: 1, 8, 8, 8>}]} {
    %c0 = arith.constant 0 : index
    %c0_0 = arith.constant 0 : index
    %c0_1 = arith.constant 0 : index
    %0 = vector.load %arg1[%c0, %c0_0, %c0_1] : memref<1x8x32xf32, #tpu.memory_space<vmem>>, vector<1x8x32xf32>
    %1 = vector.shape_cast %0 : vector<1x8x32xf32> to vector<8x32xf32>
    %c0_2 = arith.constant 0 : index
    %c0_3 = arith.constant 0 : index
    %c0_4 = arith.constant 0 : index
    %2 = vector.load %arg2[%c0_2, %c0_3, %c0_4] : memref<1x8x8xf32, #tpu.memory_space<vmem>>, vector<1x8x8xf32>
    %3 = vector.shape_cast %2 : vector<1x8x8xf32> to vector<8x8xf32>
    %c0_5 = arith.constant 0 : index
    %c0_6 = arith.constant 0 : index
    %c0_7 = arith.constant 0 : index
    %4 = vector.load %arg3[%c0_5, %c0_6, %c0_7] : memref<1x8x1xf32, #tpu.memory_space<vmem>>, vector<1x8x1xf32>
    %5 = vector.shape_cast %4 : vector<1x8x1xf32> to vector<8x1xf32>
    %6 = arith.truncf %1 : vector<8x32xf32> to vector<8x32xbf16>
    %c0_8 = arith.constant 0 : index
    %c0_9 = arith.constant 0 : index
    %c0_10 = arith.constant 0 : index
    %7 = vector.load %arg4[%c0_8, %c0_9, %c0_10] : memref<2x32x192xbf16, #tpu.memory_space<vmem>>, vector<1x32x192xbf16>
    %8 = vector.shape_cast %7 : vector<1x32x192xbf16> to vector<32x192xbf16>
    %cst = arith.constant dense<0.000000e+00> : vector<8x192xf32>
    %9 = tpu.matmul %6, %8, %cst {dimension_numbers = #tpu.dot_dimension_numbers<[1], [0], [0], [1], [0, 0, 1, 1], [], []>} : vector<8x32xbf16>, vector<32x192xbf16>, vector<8x192xf32> -> vector<8x192xf32>
    %c0_11 = arith.constant 0 : index
    %c0_12 = arith.constant 0 : index
    %c0_13 = arith.constant 0 : index
    %10 = vector.load %arg5[%c0_11, %c0_12, %c0_13] : memref<2x1x192xf32, #tpu.memory_space<vmem>>, vector<1x1x192xf32>
    %11 = vector.shape_cast %10 : vector<1x1x192xf32> to vector<1x192xf32>
    %12 = vector.broadcast %11 : vector<1x192xf32> to vector<8x192xf32>
    %13 = arith.addf %9, %12 : vector<8x192xf32>
    %14 = arith.truncf %13 : vector<8x192xf32> to vector<8x192xbf16>
    %c0_14 = arith.constant 0 : index
    %c0_15 = arith.constant 0 : index
    %c0_16 = arith.constant 0 : index
    %15 = vector.load %arg6[%c0_14, %c0_15, %c0_16] : memref<2x64x32xbf16, #tpu.memory_space<vmem>>, vector<1x64x32xbf16>
    %16 = vector.shape_cast %15 : vector<1x64x32xbf16> to vector<64x32xbf16>
    %cst_17 = arith.constant 0.000000e+00 : f32
    %17 = vector.broadcast %cst_17 : f32 to vector<8x32xf32>
    %18 = vector.extract_strided_slice %14 {offsets = [0, 0], sizes = [8, 16], strides = [1, 1]} : vector<8x192xbf16> to vector<8x16xbf16>
    %19 = vector.extract_strided_slice %14 {offsets = [0, 64], sizes = [8, 16], strides = [1, 1]} : vector<8x192xbf16> to vector<8x16xbf16>
    %20 = vector.extract_strided_slice %14 {offsets = [0, 128], sizes = [8, 16], strides = [1, 1]} : vector<8x192xbf16> to vector<8x16xbf16>
    %cst_18 = arith.constant dense<0.000000e+00> : vector<8x8xf32>
    %21 = tpu.matmul %18, %19, %cst_18 {dimension_numbers = #tpu.dot_dimension_numbers<[1], [1], [0], [0], [0, 0, 1, 0], [], []>} : vector<8x16xbf16>, vector<8x16xbf16>, vector<8x8xf32> -> vector<8x8xf32>
    %22 = arith.addf %21, %3 : vector<8x8xf32>
    %cst_19 = arith.constant dense<0xFF800000> : vector<8xf32>
    %23 = vector.multi_reduction <maximumf>, %22, %cst_19 [1] : vector<8x8xf32> to vector<8xf32>
    %24 = vector.shape_cast %23 : vector<8xf32> to vector<8x1xf32>
    %25 = vector.broadcast %24 : vector<8x1xf32> to vector<8x8xf32>
    %26 = arith.subf %22, %25 : vector<8x8xf32>
    %27 = math.exp %26 : vector<8x8xf32>
    %cst_20 = arith.constant dense<0.000000e+00> : vector<8xf32>
    %28 = vector.multi_reduction <add>, %27, %cst_20 [1] : vector<8x8xf32> to vector<8xf32>
    %29 = vector.shape_cast %28 : vector<8xf32> to vector<8x1xf32>
    %30 = tpu.reciprocal %29 {approx = true} : vector<8x1xf32> -> vector<8x1xf32>
    %31 = vector.broadcast %30 : vector<8x1xf32> to vector<8x8xf32>
    %32 = arith.mulf %27, %31 : vector<8x8xf32>
    %c0_21 = arith.constant 0 : index
    %c0_22 = arith.constant 0 : index
    %c0_23 = arith.constant 0 : index
    %c0_24 = arith.constant 0 : index
    %33 = vector.load %arg17[%c0_21, %c0_22, %c0_23, %c0_24] : memref<1x8x8x8xf32, #tpu.memory_space<vmem>>, vector<1x1x8x8xf32>
    %34 = vector.shape_cast %33 : vector<1x1x8x8xf32> to vector<8x8xf32>
    %35 = vector.shape_cast %32 : vector<8x8xf32> to vector<1x1x8x8xf32>
    tpu.vector_store %arg17[%c0_21, %c0_22, %c0_23, %c0_24], %35 {strides = array<i32>} : memref<1x8x8x8xf32, #tpu.memory_space<vmem>>, vector<1x1x8x8xf32>,
    %36 = arith.truncf %32 : vector<8x8xf32> to vector<8x8xbf16>
    %cst_25 = arith.constant dense<0.000000e+00> : vector<8x16xf32>
    %37 = tpu.matmul %36, %20, %cst_25 {dimension_numbers = #tpu.dot_dimension_numbers<[1], [0], [0], [1], [0, 0, 1, 1], [], []>} : vector<8x8xbf16>, vector<8x16xbf16>, vector<8x16xf32> -> vector<8x16xf32>
    %38 = arith.truncf %37 : vector<8x16xf32> to vector<8x16xbf16>
    %39 = vector.extract_strided_slice %16 {offsets = [0, 0], sizes = [16, 32], strides = [1, 1]} : vector<64x32xbf16> to vector<16x32xbf16>
    %cst_26 = arith.constant dense<0.000000e+00> : vector<8x32xf32>
    %40 = tpu.matmul %38, %39, %cst_26 {dimension_numbers = #tpu.dot_dimension_numbers<[1], [0], [0], [1], [0, 0, 1, 1], [], []>} : vector<8x16xbf16>, vector<16x32xbf16>, vector<8x32xf32> -> vector<8x32xf32>
    %41 = arith.addf %17, %40 : vector<8x32xf32>
    %42 = vector.extract_strided_slice %14 {offsets = [0, 16], sizes = [8, 16], strides = [1, 1]} : vector<8x192xbf16> to vector<8x16xbf16>
    %43 = vector.extract_strided_slice %14 {offsets = [0, 80], sizes = [8, 16], strides = [1, 1]} : vector<8x192xbf16> to vector<8x16xbf16>
    %44 = vector.extract_strided_slice %14 {offsets = [0, 144], sizes = [8, 16], strides = [1, 1]} : vector<8x192xbf16> to vector<8x16xbf16>
    %cst_27 = arith.constant dense<0.000000e+00> : vector<8x8xf32>
    %45 = tpu.matmul %42, %43, %cst_27 {dimension_numbers = #tpu.dot_dimension_numbers<[1], [1], [0], [0], [0, 0, 1, 0], [], []>} : vector<8x16xbf16>, vector<8x16xbf16>, vector<8x8xf32> -> vector<8x8xf32>
    %46 = arith.addf %45, %3 : vector<8x8xf32>
    %cst_28 = arith.constant dense<0xFF800000> : vector<8xf32>
    %47 = vector.multi_reduction <maximumf>, %46, %cst_28 [1] : vector<8x8xf32> to vector<8xf32>
    %48 = vector.shape_cast %47 : vector<8xf32> to vector<8x1xf32>
    %49 = vector.broadcast %48 : vector<8x1xf32> to vector<8x8xf32>
    %50 = arith.subf %46, %49 : vector<8x8xf32>
    %51 = math.exp %50 : vector<8x8xf32>
    %cst_29 = arith.constant dense<0.000000e+00> : vector<8xf32>
    %52 = vector.multi_reduction <add>, %51, %cst_29 [1] : vector<8x8xf32> to vector<8xf32>
    %53 = vector.shape_cast %52 : vector<8xf32> to vector<8x1xf32>
    %54 = tpu.reciprocal %53 {approx = true} : vector<8x1xf32> -> vector<8x1xf32>
    %55 = vector.broadcast %54 : vector<8x1xf32> to vector<8x8xf32>
    %56 = arith.mulf %51, %55 : vector<8x8xf32>
    %c0_30 = arith.constant 0 : index
    %c1 = arith.constant 1 : index
    %c0_31 = arith.constant 0 : index
    %c0_32 = arith.constant 0 : index
    %57 = vector.load %arg17[%c0_30, %c1, %c0_31, %c0_32] : memref<1x8x8x8xf32, #tpu.memory_space<vmem>>, vector<1x1x8x8xf32>
    %58 = vector.shape_cast %57 : vector<1x1x8x8xf32> to vector<8x8xf32>
    %59 = vector.shape_cast %56 : vector<8x8xf32> to vector<1x1x8x8xf32>
    tpu.vector_store %arg17[%c0_30, %c1, %c0_31, %c0_32], %59 {strides = array<i32>} : memref<1x8x8x8xf32, #tpu.memory_space<vmem>>, vector<1x1x8x8xf32>,
    %60 = arith.truncf %56 : vector<8x8xf32> to vector<8x8xbf16>
    %cst_33 = arith.constant dense<0.000000e+00> : vector<8x16xf32>
    %61 = tpu.matmul %60, %44, %cst_33 {dimension_numbers = #tpu.dot_dimension_numbers<[1], [0], [0], [1], [0, 0, 1, 1], [], []>} : vector<8x8xbf16>, vector<8x16xbf16>, vector<8x16xf32> -> vector<8x16xf32>
    %62 = arith.truncf %61 : vector<8x16xf32> to vector<8x16xbf16>
    %63 = vector.extract_strided_slice %16 {offsets = [16, 0], sizes = [16, 32], strides = [1, 1]} : vector<64x32xbf16> to vector<16x32xbf16>
    %cst_34 = arith.constant dense<0.000000e+00> : vector<8x32xf32>
    %64 = tpu.matmul %62, %63, %cst_34 {dimension_numbers = #tpu.dot_dimension_numbers<[1], [0], [0], [1], [0, 0, 1, 1], [], []>} : vector<8x16xbf16>, vector<16x32xbf16>, vector<8x32xf32> -> vector<8x32xf32>
    %65 = arith.addf %41, %64 : vector<8x32xf32>
    %66 = vector.extract_strided_slice %14 {offsets = [0, 32], sizes = [8, 16], strides = [1, 1]} : vector<8x192xbf16> to vector<8x16xbf16>
    %67 = vector.extract_strided_slice %14 {offsets = [0, 96], sizes = [8, 16], strides = [1, 1]} : vector<8x192xbf16> to vector<8x16xbf16>
    %68 = vector.extract_strided_slice %14 {offsets = [0, 160], sizes = [8, 16], strides = [1, 1]} : vector<8x192xbf16> to vector<8x16xbf16>
    %cst_35 = arith.constant dense<0.000000e+00> : vector<8x8xf32>
    %69 = tpu.matmul %66, %67, %cst_35 {dimension_numbers = #tpu.dot_dimension_numbers<[1], [1], [0], [0], [0, 0, 1, 0], [], []>} : vector<8x16xbf16>, vector<8x16xbf16>, vector<8x8xf32> -> vector<8x8xf32>
    %70 = arith.addf %69, %3 : vector<8x8xf32>
    %cst_36 = arith.constant dense<0xFF800000> : vector<8xf32>
    %71 = vector.multi_reduction <maximumf>, %70, %cst_36 [1] : vector<8x8xf32> to vector<8xf32>
    %72 = vector.shape_cast %71 : vector<8xf32> to vector<8x1xf32>
    %73 = vector.broadcast %72 : vector<8x1xf32> to vector<8x8xf32>
    %74 = arith.subf %70, %73 : vector<8x8xf32>
    %75 = math.exp %74 : vector<8x8xf32>
    %cst_37 = arith.constant dense<0.000000e+00> : vector<8xf32>
    %76 = vector.multi_reduction <add>, %75, %cst_37 [1] : vector<8x8xf32> to vector<8xf32>
    %77 = vector.shape_cast %76 : vector<8xf32> to vector<8x1xf32>
    %78 = tpu.reciprocal %77 {approx = true} : vector<8x1xf32> -> vector<8x1xf32>
    %79 = vector.broadcast %78 : vector<8x1xf32> to vector<8x8xf32>
    %80 = arith.mulf %75, %79 : vector<8x8xf32>
    %c0_38 = arith.constant 0 : index
    %c2 = arith.constant 2 : index
    %c0_39 = arith.constant 0 : index
    %c0_40 = arith.constant 0 : index
    %81 = vector.load %arg17[%c0_38, %c2, %c0_39, %c0_40] : memref<1x8x8x8xf32, #tpu.memory_space<vmem>>, vector<1x1x8x8xf32>
    %82 = vector.shape_cast %81 : vector<1x1x8x8xf32> to vector<8x8xf32>
    %83 = vector.shape_cast %80 : vector<8x8xf32> to vector<1x1x8x8xf32>
    tpu.vector_store %arg17[%c0_38, %c2, %c0_39, %c0_40], %83 {strides = array<i32>} : memref<1x8x8x8xf32, #tpu.memory_space<vmem>>, vector<1x1x8x8xf32>,
    %84 = arith.truncf %80 : vector<8x8xf32> to vector<8x8xbf16>
    %cst_41 = arith.constant dense<0.000000e+00> : vector<8x16xf32>
    %85 = tpu.matmul %84, %68, %cst_41 {dimension_numbers = #tpu.dot_dimension_numbers<[1], [0], [0], [1], [0, 0, 1, 1], [], []>} : vector<8x8xbf16>, vector<8x16xbf16>, vector<8x16xf32> -> vector<8x16xf32>
    %86 = arith.truncf %85 : vector<8x16xf32> to vector<8x16xbf16>
    %87 = vector.extract_strided_slice %16 {offsets = [32, 0], sizes = [16, 32], strides = [1, 1]} : vector<64x32xbf16> to vector<16x32xbf16>
    %cst_42 = arith.constant dense<0.000000e+00> : vector<8x32xf32>
    %88 = tpu.matmul %86, %87, %cst_42 {dimension_numbers = #tpu.dot_dimension_numbers<[1], [0], [0], [1], [0, 0, 1, 1], [], []>} : vector<8x16xbf16>, vector<16x32xbf16>, vector<8x32xf32> -> vector<8x32xf32>
    %89 = arith.addf %65, %88 : vector<8x32xf32>
    %90 = vector.extract_strided_slice %14 {offsets = [0, 48], sizes = [8, 16], strides = [1, 1]} : vector<8x192xbf16> to vector<8x16xbf16>
    %91 = vector.extract_strided_slice %14 {offsets = [0, 112], sizes = [8, 16], strides = [1, 1]} : vector<8x192xbf16> to vector<8x16xbf16>
    %92 = vector.extract_strided_slice %14 {offsets = [0, 176], sizes = [8, 16], strides = [1, 1]} : vector<8x192xbf16> to vector<8x16xbf16>
    %cst_43 = arith.constant dense<0.000000e+00> : vector<8x8xf32>
    %93 = tpu.matmul %90, %91, %cst_43 {dimension_numbers = #tpu.dot_dimension_numbers<[1], [1], [0], [0], [0, 0, 1, 0], [], []>} : vector<8x16xbf16>, vector<8x16xbf16>, vector<8x8xf32> -> vector<8x8xf32>
    %94 = arith.addf %93, %3 : vector<8x8xf32>
    %cst_44 = arith.constant dense<0xFF800000> : vector<8xf32>
    %95 = vector.multi_reduction <maximumf>, %94, %cst_44 [1] : vector<8x8xf32> to vector<8xf32>
    %96 = vector.shape_cast %95 : vector<8xf32> to vector<8x1xf32>
    %97 = vector.broadcast %96 : vector<8x1xf32> to vector<8x8xf32>
    %98 = arith.subf %94, %97 : vector<8x8xf32>
    %99 = math.exp %98 : vector<8x8xf32>
    %cst_45 = arith.constant dense<0.000000e+00> : vector<8xf32>
    %100 = vector.multi_reduction <add>, %99, %cst_45 [1] : vector<8x8xf32> to vector<8xf32>
    %101 = vector.shape_cast %100 : vector<8xf32> to vector<8x1xf32>
    %102 = tpu.reciprocal %101 {approx = true} : vector<8x1xf32> -> vector<8x1xf32>
    %103 = vector.broadcast %102 : vector<8x1xf32> to vector<8x8xf32>
    %104 = arith.mulf %99, %103 : vector<8x8xf32>
    %c0_46 = arith.constant 0 : index
    %c3 = arith.constant 3 : index
    %c0_47 = arith.constant 0 : index
    %c0_48 = arith.constant 0 : index
    %105 = vector.load %arg17[%c0_46, %c3, %c0_47, %c0_48] : memref<1x8x8x8xf32, #tpu.memory_space<vmem>>, vector<1x1x8x8xf32>
    %106 = vector.shape_cast %105 : vector<1x1x8x8xf32> to vector<8x8xf32>
    %107 = vector.shape_cast %104 : vector<8x8xf32> to vector<1x1x8x8xf32>
    tpu.vector_store %arg17[%c0_46, %c3, %c0_47, %c0_48], %107 {strides = array<i32>} : memref<1x8x8x8xf32, #tpu.memory_space<vmem>>, vector<1x1x8x8xf32>,
    %108 = arith.truncf %104 : vector<8x8xf32> to vector<8x8xbf16>
    %cst_49 = arith.constant dense<0.000000e+00> : vector<8x16xf32>
    %109 = tpu.matmul %108, %92, %cst_49 {dimension_numbers = #tpu.dot_dimension_numbers<[1], [0], [0], [1], [0, 0, 1, 1], [], []>} : vector<8x8xbf16>, vector<8x16xbf16>, vector<8x16xf32> -> vector<8x16xf32>
    %110 = arith.truncf %109 : vector<8x16xf32> to vector<8x16xbf16>
    %111 = vector.extract_strided_slice %16 {offsets = [48, 0], sizes = [16, 32], strides = [1, 1]} : vector<64x32xbf16> to vector<16x32xbf16>
    %cst_50 = arith.constant dense<0.000000e+00> : vector<8x32xf32>
    %112 = tpu.matmul %110, %111, %cst_50 {dimension_numbers = #tpu.dot_dimension_numbers<[1], [0], [0], [1], [0, 0, 1, 1], [], []>} : vector<8x16xbf16>, vector<16x32xbf16>, vector<8x32xf32> -> vector<8x32xf32>
    %113 = arith.addf %89, %112 : vector<8x32xf32>
    %c0_51 = arith.constant 0 : index
    %c0_52 = arith.constant 0 : index
    %c0_53 = arith.constant 0 : index
    %114 = vector.load %arg7[%c0_51, %c0_52, %c0_53] : memref<2x1x32xf32, #tpu.memory_space<vmem>>, vector<1x1x32xf32>
    %115 = vector.shape_cast %114 : vector<1x1x32xf32> to vector<1x32xf32>
    %116 = vector.broadcast %115 : vector<1x32xf32> to vector<8x32xf32>
    %117 = arith.addf %113, %116 : vector<8x32xf32>
    %118 = arith.addf %117, %1 : vector<8x32xf32>
    %c0_54 = arith.constant 0 : index
    %c0_55 = arith.constant 0 : index
    %c0_56 = arith.constant 0 : index
    %119 = vector.load %arg8[%c0_54, %c0_55, %c0_56] : memref<2x1x32xf32, #tpu.memory_space<vmem>>, vector<1x1x32xf32>
    %120 = vector.shape_cast %119 : vector<1x1x32xf32> to vector<1x32xf32>
    %c0_57 = arith.constant 0 : index
    %c0_58 = arith.constant 0 : index
    %c0_59 = arith.constant 0 : index
    %121 = vector.load %arg9[%c0_57, %c0_58, %c0_59] : memref<2x1x32xf32, #tpu.memory_space<vmem>>, vector<1x1x32xf32>
    %122 = vector.shape_cast %121 : vector<1x1x32xf32> to vector<1x32xf32>
    %cst_60 = arith.constant dense<0.000000e+00> : vector<8xf32>
    %123 = vector.multi_reduction <add>, %118, %cst_60 [1] : vector<8x32xf32> to vector<8xf32>
    %124 = vector.shape_cast %123 : vector<8xf32> to vector<8x1xf32>
    %cst_61 = arith.constant 3.200000e+01 : f32
    %125 = vector.broadcast %cst_61 : f32 to vector<8x1xf32>
    %126 = arith.divf %124, %125 : vector<8x1xf32>
    %127 = vector.broadcast %126 : vector<8x1xf32> to vector<8x32xf32>
    %128 = arith.subf %118, %127 : vector<8x32xf32>
    %129 = arith.mulf %128, %128 : vector<8x32xf32>
    %cst_62 = arith.constant dense<0.000000e+00> : vector<8xf32>
    %130 = vector.multi_reduction <add>, %129, %cst_62 [1] : vector<8x32xf32> to vector<8xf32>
    %131 = vector.shape_cast %130 : vector<8xf32> to vector<8x1xf32>
    %cst_63 = arith.constant 3.200000e+01 : f32
    %132 = vector.broadcast %cst_63 : f32 to vector<8x1xf32>
    %133 = arith.divf %131, %132 : vector<8x1xf32>
    %134 = vector.broadcast %126 : vector<8x1xf32> to vector<8x32xf32>
    %135 = arith.subf %118, %134 : vector<8x32xf32>
    %cst_64 = arith.constant 9.99999974E-6 : f32
    %136 = vector.broadcast %cst_64 : f32 to vector<8x1xf32>
    %137 = arith.addf %133, %136 : vector<8x1xf32>
    %138 = math.rsqrt %137 : vector<8x1xf32>
    %139 = vector.broadcast %138 : vector<8x1xf32> to vector<8x32xf32>
    %140 = arith.mulf %135, %139 : vector<8x32xf32>
    %141 = vector.broadcast %120 : vector<1x32xf32> to vector<8x32xf32>
    %142 = arith.mulf %140, %141 : vector<8x32xf32>
    %143 = vector.broadcast %122 : vector<1x32xf32> to vector<8x32xf32>
    %144 = arith.addf %142, %143 : vector<8x32xf32>
    %145 = vector.broadcast %5 : vector<8x1xf32> to vector<8x32xf32>
    %146 = arith.mulf %144, %145 : vector<8x32xf32>
    %147 = arith.truncf %146 : vector<8x32xf32> to vector<8x32xbf16>
    %c0_65 = arith.constant 0 : index
    %c0_66 = arith.constant 0 : index
    %c0_67 = arith.constant 0 : index
    %148 = vector.load %arg10[%c0_65, %c0_66, %c0_67] : memref<2x32x64xbf16, #tpu.memory_space<vmem>>, vector<1x32x64xbf16>
    %149 = vector.shape_cast %148 : vector<1x32x64xbf16> to vector<32x64xbf16>
    %cst_68 = arith.constant dense<0.000000e+00> : vector<8x64xf32>
    %150 = tpu.matmul %147, %149, %cst_68 {dimension_numbers = #tpu.dot_dimension_numbers<[1], [0], [0], [1], [0, 0, 1, 1], [], []>} : vector<8x32xbf16>, vector<32x64xbf16>, vector<8x64xf32> -> vector<8x64xf32>
    %c0_69 = arith.constant 0 : index
    %c0_70 = arith.constant 0 : index
    %c0_71 = arith.constant 0 : index
    %151 = vector.load %arg11[%c0_69, %c0_70, %c0_71] : memref<2x1x64xf32, #tpu.memory_space<vmem>>, vector<1x1x64xf32>
    %152 = vector.shape_cast %151 : vector<1x1x64xf32> to vector<1x64xf32>
    %153 = vector.broadcast %152 : vector<1x64xf32> to vector<8x64xf32>
    %154 = arith.addf %150, %153 : vector<8x64xf32>
    %cst_72 = arith.constant 0.000000e+00 : f32
    %155 = vector.broadcast %cst_72 : f32 to vector<8x64xf32>
    %156 = arith.maximumf %154, %155 : vector<8x64xf32>
    %157 = arith.truncf %156 : vector<8x64xf32> to vector<8x64xbf16>
    %c0_73 = arith.constant 0 : index
    %c0_74 = arith.constant 0 : index
    %c0_75 = arith.constant 0 : index
    %158 = vector.load %arg12[%c0_73, %c0_74, %c0_75] : memref<2x64x32xbf16, #tpu.memory_space<vmem>>, vector<1x64x32xbf16>
    %159 = vector.shape_cast %158 : vector<1x64x32xbf16> to vector<64x32xbf16>
    %cst_76 = arith.constant dense<0.000000e+00> : vector<8x32xf32>
    %160 = tpu.matmul %157, %159, %cst_76 {dimension_numbers = #tpu.dot_dimension_numbers<[1], [0], [0], [1], [0, 0, 1, 1], [], []>} : vector<8x64xbf16>, vector<64x32xbf16>, vector<8x32xf32> -> vector<8x32xf32>
    %c0_77 = arith.constant 0 : index
    %c0_78 = arith.constant 0 : index
    %c0_79 = arith.constant 0 : index
    %161 = vector.load %arg13[%c0_77, %c0_78, %c0_79] : memref<2x1x32xf32, #tpu.memory_space<vmem>>, vector<1x1x32xf32>
    %162 = vector.shape_cast %161 : vector<1x1x32xf32> to vector<1x32xf32>
    %163 = vector.broadcast %162 : vector<1x32xf32> to vector<8x32xf32>
    %164 = arith.addf %160, %163 : vector<8x32xf32>
    %165 = arith.addf %164, %146 : vector<8x32xf32>
    %c0_80 = arith.constant 0 : index
    %c0_81 = arith.constant 0 : index
    %c0_82 = arith.constant 0 : index
    %166 = vector.load %arg14[%c0_80, %c0_81, %c0_82] : memref<2x1x32xf32, #tpu.memory_space<vmem>>, vector<1x1x32xf32>
    %167 = vector.shape_cast %166 : vector<1x1x32xf32> to vector<1x32xf32>
    %c0_83 = arith.constant 0 : index
    %c0_84 = arith.constant 0 : index
    %c0_85 = arith.constant 0 : index
    %168 = vector.load %arg15[%c0_83, %c0_84, %c0_85] : memref<2x1x32xf32, #tpu.memory_space<vmem>>, vector<1x1x32xf32>
    %169 = vector.shape_cast %168 : vector<1x1x32xf32> to vector<1x32xf32>
    %cst_86 = arith.constant dense<0.000000e+00> : vector<8xf32>
    %170 = vector.multi_reduction <add>, %165, %cst_86 [1] : vector<8x32xf32> to vector<8xf32>
    %171 = vector.shape_cast %170 : vector<8xf32> to vector<8x1xf32>
    %cst_87 = arith.constant 3.200000e+01 : f32
    %172 = vector.broadcast %cst_87 : f32 to vector<8x1xf32>
    %173 = arith.divf %171, %172 : vector<8x1xf32>
    %174 = vector.broadcast %173 : vector<8x1xf32> to vector<8x32xf32>
    %175 = arith.subf %165, %174 : vector<8x32xf32>
    %176 = arith.mulf %175, %175 : vector<8x32xf32>
    %cst_88 = arith.constant dense<0.000000e+00> : vector<8xf32>
    %177 = vector.multi_reduction <add>, %176, %cst_88 [1] : vector<8x32xf32> to vector<8xf32>
    %178 = vector.shape_cast %177 : vector<8xf32> to vector<8x1xf32>
    %cst_89 = arith.constant 3.200000e+01 : f32
    %179 = vector.broadcast %cst_89 : f32 to vector<8x1xf32>
    %180 = arith.divf %178, %179 : vector<8x1xf32>
    %181 = vector.broadcast %173 : vector<8x1xf32> to vector<8x32xf32>
    %182 = arith.subf %165, %181 : vector<8x32xf32>
    %cst_90 = arith.constant 9.99999974E-6 : f32
    %183 = vector.broadcast %cst_90 : f32 to vector<8x1xf32>
    %184 = arith.addf %180, %183 : vector<8x1xf32>
    %185 = math.rsqrt %184 : vector<8x1xf32>
    %186 = vector.broadcast %185 : vector<8x1xf32> to vector<8x32xf32>
    %187 = arith.mulf %182, %186 : vector<8x32xf32>
    %188 = vector.broadcast %167 : vector<1x32xf32> to vector<8x32xf32>
    %189 = arith.mulf %187, %188 : vector<8x32xf32>
    %190 = vector.broadcast %169 : vector<1x32xf32> to vector<8x32xf32>
    %191 = arith.addf %189, %190 : vector<8x32xf32>
    %192 = vector.broadcast %5 : vector<8x1xf32> to vector<8x32xf32>
    %193 = arith.mulf %191, %192 : vector<8x32xf32>
    %194 = arith.truncf %193 : vector<8x32xf32> to vector<8x32xbf16>
    %c1_91 = arith.constant 1 : index
    %c0_92 = arith.constant 0 : index
    %c0_93 = arith.constant 0 : index
    %195 = vector.load %arg4[%c1_91, %c0_92, %c0_93] : memref<2x32x192xbf16, #tpu.memory_space<vmem>>, vector<1x32x192xbf16>
    %196 = vector.shape_cast %195 : vector<1x32x192xbf16> to vector<32x192xbf16>
    %cst_94 = arith.constant dense<0.000000e+00> : vector<8x192xf32>
    %197 = tpu.matmul %194, %196, %cst_94 {dimension_numbers = #tpu.dot_dimension_numbers<[1], [0], [0], [1], [0, 0, 1, 1], [], []>} : vector<8x32xbf16>, vector<32x192xbf16>, vector<8x192xf32> -> vector<8x192xf32>
    %c1_95 = arith.constant 1 : index
    %c0_96 = arith.constant 0 : index
    %c0_97 = arith.constant 0 : index
    %198 = vector.load %arg5[%c1_95, %c0_96, %c0_97] : memref<2x1x192xf32, #tpu.memory_space<vmem>>, vector<1x1x192xf32>
    %199 = vector.shape_cast %198 : vector<1x1x192xf32> to vector<1x192xf32>
    %200 = vector.broadcast %199 : vector<1x192xf32> to vector<8x192xf32>
    %201 = arith.addf %197, %200 : vector<8x192xf32>
    %202 = arith.truncf %201 : vector<8x192xf32> to vector<8x192xbf16>
    %c1_98 = arith.constant 1 : index
    %c0_99 = arith.constant 0 : index
    %c0_100 = arith.constant 0 : index
    %203 = vector.load %arg6[%c1_98, %c0_99, %c0_100] : memref<2x64x32xbf16, #tpu.memory_space<vmem>>, vector<1x64x32xbf16>
    %204 = vector.shape_cast %203 : vector<1x64x32xbf16> to vector<64x32xbf16>
    %cst_101 = arith.constant 0.000000e+00 : f32
    %205 = vector.broadcast %cst_101 : f32 to vector<8x32xf32>
    %206 = vector.extract_strided_slice %202 {offsets = [0, 0], sizes = [8, 16], strides = [1, 1]} : vector<8x192xbf16> to vector<8x16xbf16>
    %207 = vector.extract_strided_slice %202 {offsets = [0, 64], sizes = [8, 16], strides = [1, 1]} : vector<8x192xbf16> to vector<8x16xbf16>
    %208 = vector.extract_strided_slice %202 {offsets = [0, 128], sizes = [8, 16], strides = [1, 1]} : vector<8x192xbf16> to vector<8x16xbf16>
    %cst_102 = arith.constant dense<0.000000e+00> : vector<8x8xf32>
    %209 = tpu.matmul %206, %207, %cst_102 {dimension_numbers = #tpu.dot_dimension_numbers<[1], [1], [0], [0], [0, 0, 1, 0], [], []>} : vector<8x16xbf16>, vector<8x16xbf16>, vector<8x8xf32> -> vector<8x8xf32>
    %210 = arith.addf %209, %3 : vector<8x8xf32>
    %cst_103 = arith.constant dense<0xFF800000> : vector<8xf32>
    %211 = vector.multi_reduction <maximumf>, %210, %cst_103 [1] : vector<8x8xf32> to vector<8xf32>
    %212 = vector.shape_cast %211 : vector<8xf32> to vector<8x1xf32>
    %213 = vector.broadcast %212 : vector<8x1xf32> to vector<8x8xf32>
    %214 = arith.subf %210, %213 : vector<8x8xf32>
    %215 = math.exp %214 : vector<8x8xf32>
    %cst_104 = arith.constant dense<0.000000e+00> : vector<8xf32>
    %216 = vector.multi_reduction <add>, %215, %cst_104 [1] : vector<8x8xf32> to vector<8xf32>
    %217 = vector.shape_cast %216 : vector<8xf32> to vector<8x1xf32>
    %218 = tpu.reciprocal %217 {approx = true} : vector<8x1xf32> -> vector<8x1xf32>
    %219 = vector.broadcast %218 : vector<8x1xf32> to vector<8x8xf32>
    %220 = arith.mulf %215, %219 : vector<8x8xf32>
    %c0_105 = arith.constant 0 : index
    %c4 = arith.constant 4 : index
    %c0_106 = arith.constant 0 : index
    %c0_107 = arith.constant 0 : index
    %221 = vector.load %arg17[%c0_105, %c4, %c0_106, %c0_107] : memref<1x8x8x8xf32, #tpu.memory_space<vmem>>, vector<1x1x8x8xf32>
    %222 = vector.shape_cast %221 : vector<1x1x8x8xf32> to vector<8x8xf32>
    %223 = vector.shape_cast %220 : vector<8x8xf32> to vector<1x1x8x8xf32>
    tpu.vector_store %arg17[%c0_105, %c4, %c0_106, %c0_107], %223 {strides = array<i32>} : memref<1x8x8x8xf32, #tpu.memory_space<vmem>>, vector<1x1x8x8xf32>,
    %224 = arith.truncf %220 : vector<8x8xf32> to vector<8x8xbf16>
    %cst_108 = arith.constant dense<0.000000e+00> : vector<8x16xf32>
    %225 = tpu.matmul %224, %208, %cst_108 {dimension_numbers = #tpu.dot_dimension_numbers<[1], [0], [0], [1], [0, 0, 1, 1], [], []>} : vector<8x8xbf16>, vector<8x16xbf16>, vector<8x16xf32> -> vector<8x16xf32>
    %226 = arith.truncf %225 : vector<8x16xf32> to vector<8x16xbf16>
    %227 = vector.extract_strided_slice %204 {offsets = [0, 0], sizes = [16, 32], strides = [1, 1]} : vector<64x32xbf16> to vector<16x32xbf16>
    %cst_109 = arith.constant dense<0.000000e+00> : vector<8x32xf32>
    %228 = tpu.matmul %226, %227, %cst_109 {dimension_numbers = #tpu.dot_dimension_numbers<[1], [0], [0], [1], [0, 0, 1, 1], [], []>} : vector<8x16xbf16>, vector<16x32xbf16>, vector<8x32xf32> -> vector<8x32xf32>
    %229 = arith.addf %205, %228 : vector<8x32xf32>
    %230 = vector.extract_strided_slice %202 {offsets = [0, 16], sizes = [8, 16], strides = [1, 1]} : vector<8x192xbf16> to vector<8x16xbf16>
    %231 = vector.extract_strided_slice %202 {offsets = [0, 80], sizes = [8, 16], strides = [1, 1]} : vector<8x192xbf16> to vector<8x16xbf16>
    %232 = vector.extract_strided_slice %202 {offsets = [0, 144], sizes = [8, 16], strides = [1, 1]} : vector<8x192xbf16> to vector<8x16xbf16>
    %cst_110 = arith.constant dense<0.000000e+00> : vector<8x8xf32>
    %233 = tpu.matmul %230, %231, %cst_110 {dimension_numbers = #tpu.dot_dimension_numbers<[1], [1], [0], [0], [0, 0, 1, 0], [], []>} : vector<8x16xbf16>, vector<8x16xbf16>, vector<8x8xf32> -> vector<8x8xf32>
    %234 = arith.addf %233, %3 : vector<8x8xf32>
    %cst_111 = arith.constant dense<0xFF800000> : vector<8xf32>
    %235 = vector.multi_reduction <maximumf>, %234, %cst_111 [1] : vector<8x8xf32> to vector<8xf32>
    %236 = vector.shape_cast %235 : vector<8xf32> to vector<8x1xf32>
    %237 = vector.broadcast %236 : vector<8x1xf32> to vector<8x8xf32>
    %238 = arith.subf %234, %237 : vector<8x8xf32>
    %239 = math.exp %238 : vector<8x8xf32>
    %cst_112 = arith.constant dense<0.000000e+00> : vector<8xf32>
    %240 = vector.multi_reduction <add>, %239, %cst_112 [1] : vector<8x8xf32> to vector<8xf32>
    %241 = vector.shape_cast %240 : vector<8xf32> to vector<8x1xf32>
    %242 = tpu.reciprocal %241 {approx = true} : vector<8x1xf32> -> vector<8x1xf32>
    %243 = vector.broadcast %242 : vector<8x1xf32> to vector<8x8xf32>
    %244 = arith.mulf %239, %243 : vector<8x8xf32>
    %c0_113 = arith.constant 0 : index
    %c5 = arith.constant 5 : index
    %c0_114 = arith.constant 0 : index
    %c0_115 = arith.constant 0 : index
    %245 = vector.load %arg17[%c0_113, %c5, %c0_114, %c0_115] : memref<1x8x8x8xf32, #tpu.memory_space<vmem>>, vector<1x1x8x8xf32>
    %246 = vector.shape_cast %245 : vector<1x1x8x8xf32> to vector<8x8xf32>
    %247 = vector.shape_cast %244 : vector<8x8xf32> to vector<1x1x8x8xf32>
    tpu.vector_store %arg17[%c0_113, %c5, %c0_114, %c0_115], %247 {strides = array<i32>} : memref<1x8x8x8xf32, #tpu.memory_space<vmem>>, vector<1x1x8x8xf32>,
    %248 = arith.truncf %244 : vector<8x8xf32> to vector<8x8xbf16>
    %cst_116 = arith.constant dense<0.000000e+00> : vector<8x16xf32>
    %249 = tpu.matmul %248, %232, %cst_116 {dimension_numbers = #tpu.dot_dimension_numbers<[1], [0], [0], [1], [0, 0, 1, 1], [], []>} : vector<8x8xbf16>, vector<8x16xbf16>, vector<8x16xf32> -> vector<8x16xf32>
    %250 = arith.truncf %249 : vector<8x16xf32> to vector<8x16xbf16>
    %251 = vector.extract_strided_slice %204 {offsets = [16, 0], sizes = [16, 32], strides = [1, 1]} : vector<64x32xbf16> to vector<16x32xbf16>
    %cst_117 = arith.constant dense<0.000000e+00> : vector<8x32xf32>
    %252 = tpu.matmul %250, %251, %cst_117 {dimension_numbers = #tpu.dot_dimension_numbers<[1], [0], [0], [1], [0, 0, 1, 1], [], []>} : vector<8x16xbf16>, vector<16x32xbf16>, vector<8x32xf32> -> vector<8x32xf32>
    %253 = arith.addf %229, %252 : vector<8x32xf32>
    %254 = vector.extract_strided_slice %202 {offsets = [0, 32], sizes = [8, 16], strides = [1, 1]} : vector<8x192xbf16> to vector<8x16xbf16>
    %255 = vector.extract_strided_slice %202 {offsets = [0, 96], sizes = [8, 16], strides = [1, 1]} : vector<8x192xbf16> to vector<8x16xbf16>
    %256 = vector.extract_strided_slice %202 {offsets = [0, 160], sizes = [8, 16], strides = [1, 1]} : vector<8x192xbf16> to vector<8x16xbf16>
    %cst_118 = arith.constant dense<0.000000e+00> : vector<8x8xf32>
    %257 = tpu.matmul %254, %255, %cst_118 {dimension_numbers = #tpu.dot_dimension_numbers<[1], [1], [0], [0], [0, 0, 1, 0], [], []>} : vector<8x16xbf16>, vector<8x16xbf16>, vector<8x8xf32> -> vector<8x8xf32>
    %258 = arith.addf %257, %3 : vector<8x8xf32>
    %cst_119 = arith.constant dense<0xFF800000> : vector<8xf32>
    %259 = vector.multi_reduction <maximumf>, %258, %cst_119 [1] : vector<8x8xf32> to vector<8xf32>
    %260 = vector.shape_cast %259 : vector<8xf32> to vector<8x1xf32>
    %261 = vector.broadcast %260 : vector<8x1xf32> to vector<8x8xf32>
    %262 = arith.subf %258, %261 : vector<8x8xf32>
    %263 = math.exp %262 : vector<8x8xf32>
    %cst_120 = arith.constant dense<0.000000e+00> : vector<8xf32>
    %264 = vector.multi_reduction <add>, %263, %cst_120 [1] : vector<8x8xf32> to vector<8xf32>
    %265 = vector.shape_cast %264 : vector<8xf32> to vector<8x1xf32>
    %266 = tpu.reciprocal %265 {approx = true} : vector<8x1xf32> -> vector<8x1xf32>
    %267 = vector.broadcast %266 : vector<8x1xf32> to vector<8x8xf32>
    %268 = arith.mulf %263, %267 : vector<8x8xf32>
    %c0_121 = arith.constant 0 : index
    %c6 = arith.constant 6 : index
    %c0_122 = arith.constant 0 : index
    %c0_123 = arith.constant 0 : index
    %269 = vector.load %arg17[%c0_121, %c6, %c0_122, %c0_123] : memref<1x8x8x8xf32, #tpu.memory_space<vmem>>, vector<1x1x8x8xf32>
    %270 = vector.shape_cast %269 : vector<1x1x8x8xf32> to vector<8x8xf32>
    %271 = vector.shape_cast %268 : vector<8x8xf32> to vector<1x1x8x8xf32>
    tpu.vector_store %arg17[%c0_121, %c6, %c0_122, %c0_123], %271 {strides = array<i32>} : memref<1x8x8x8xf32, #tpu.memory_space<vmem>>, vector<1x1x8x8xf32>,
    %272 = arith.truncf %268 : vector<8x8xf32> to vector<8x8xbf16>
    %cst_124 = arith.constant dense<0.000000e+00> : vector<8x16xf32>
    %273 = tpu.matmul %272, %256, %cst_124 {dimension_numbers = #tpu.dot_dimension_numbers<[1], [0], [0], [1], [0, 0, 1, 1], [], []>} : vector<8x8xbf16>, vector<8x16xbf16>, vector<8x16xf32> -> vector<8x16xf32>
    %274 = arith.truncf %273 : vector<8x16xf32> to vector<8x16xbf16>
    %275 = vector.extract_strided_slice %204 {offsets = [32, 0], sizes = [16, 32], strides = [1, 1]} : vector<64x32xbf16> to vector<16x32xbf16>
    %cst_125 = arith.constant dense<0.000000e+00> : vector<8x32xf32>
    %276 = tpu.matmul %274, %275, %cst_125 {dimension_numbers = #tpu.dot_dimension_numbers<[1], [0], [0], [1], [0, 0, 1, 1], [], []>} : vector<8x16xbf16>, vector<16x32xbf16>, vector<8x32xf32> -> vector<8x32xf32>
    %277 = arith.addf %253, %276 : vector<8x32xf32>
    %278 = vector.extract_strided_slice %202 {offsets = [0, 48], sizes = [8, 16], strides = [1, 1]} : vector<8x192xbf16> to vector<8x16xbf16>
    %279 = vector.extract_strided_slice %202 {offsets = [0, 112], sizes = [8, 16], strides = [1, 1]} : vector<8x192xbf16> to vector<8x16xbf16>
    %280 = vector.extract_strided_slice %202 {offsets = [0, 176], sizes = [8, 16], strides = [1, 1]} : vector<8x192xbf16> to vector<8x16xbf16>
    %cst_126 = arith.constant dense<0.000000e+00> : vector<8x8xf32>
    %281 = tpu.matmul %278, %279, %cst_126 {dimension_numbers = #tpu.dot_dimension_numbers<[1], [1], [0], [0], [0, 0, 1, 0], [], []>} : vector<8x16xbf16>, vector<8x16xbf16>, vector<8x8xf32> -> vector<8x8xf32>
    %282 = arith.addf %281, %3 : vector<8x8xf32>
    %cst_127 = arith.constant dense<0xFF800000> : vector<8xf32>
    %283 = vector.multi_reduction <maximumf>, %282, %cst_127 [1] : vector<8x8xf32> to vector<8xf32>
    %284 = vector.shape_cast %283 : vector<8xf32> to vector<8x1xf32>
    %285 = vector.broadcast %284 : vector<8x1xf32> to vector<8x8xf32>
    %286 = arith.subf %282, %285 : vector<8x8xf32>
    %287 = math.exp %286 : vector<8x8xf32>
    %cst_128 = arith.constant dense<0.000000e+00> : vector<8xf32>
    %288 = vector.multi_reduction <add>, %287, %cst_128 [1] : vector<8x8xf32> to vector<8xf32>
    %289 = vector.shape_cast %288 : vector<8xf32> to vector<8x1xf32>
    %290 = tpu.reciprocal %289 {approx = true} : vector<8x1xf32> -> vector<8x1xf32>
    %291 = vector.broadcast %290 : vector<8x1xf32> to vector<8x8xf32>
    %292 = arith.mulf %287, %291 : vector<8x8xf32>
    %c0_129 = arith.constant 0 : index
    %c7 = arith.constant 7 : index
    %c0_130 = arith.constant 0 : index
    %c0_131 = arith.constant 0 : index
    %293 = vector.load %arg17[%c0_129, %c7, %c0_130, %c0_131] : memref<1x8x8x8xf32, #tpu.memory_space<vmem>>, vector<1x1x8x8xf32>
    %294 = vector.shape_cast %293 : vector<1x1x8x8xf32> to vector<8x8xf32>
    %295 = vector.shape_cast %292 : vector<8x8xf32> to vector<1x1x8x8xf32>
    tpu.vector_store %arg17[%c0_129, %c7, %c0_130, %c0_131], %295 {strides = array<i32>} : memref<1x8x8x8xf32, #tpu.memory_space<vmem>>, vector<1x1x8x8xf32>,
    %296 = arith.truncf %292 : vector<8x8xf32> to vector<8x8xbf16>
    %cst_132 = arith.constant dense<0.000000e+00> : vector<8x16xf32>
    %297 = tpu.matmul %296, %280, %cst_132 {dimension_numbers = #tpu.dot_dimension_numbers<[1], [0], [0], [1], [0, 0, 1, 1], [], []>} : vector<8x8xbf16>, vector<8x16xbf16>, vector<8x16xf32> -> vector<8x16xf32>
    %298 = arith.truncf %297 : vector<8x16xf32> to vector<8x16xbf16>
    %299 = vector.extract_strided_slice %204 {offsets = [48, 0], sizes = [16, 32], strides = [1, 1]} : vector<64x32xbf16> to vector<16x32xbf16>
    %cst_133 = arith.constant dense<0.000000e+00> : vector<8x32xf32>
    %300 = tpu.matmul %298, %299, %cst_133 {dimension_numbers = #tpu.dot_dimension_numbers<[1], [0], [0], [1], [0, 0, 1, 1], [], []>} : vector<8x16xbf16>, vector<16x32xbf16>, vector<8x32xf32> -> vector<8x32xf32>
    %301 = arith.addf %277, %300 : vector<8x32xf32>
    %c1_134 = arith.constant 1 : index
    %c0_135 = arith.constant 0 : index
    %c0_136 = arith.constant 0 : index
    %302 = vector.load %arg7[%c1_134, %c0_135, %c0_136] : memref<2x1x32xf32, #tpu.memory_space<vmem>>, vector<1x1x32xf32>
    %303 = vector.shape_cast %302 : vector<1x1x32xf32> to vector<1x32xf32>
    %304 = vector.broadcast %303 : vector<1x32xf32> to vector<8x32xf32>
    %305 = arith.addf %301, %304 : vector<8x32xf32>
    %306 = arith.addf %305, %193 : vector<8x32xf32>
    %c1_137 = arith.constant 1 : index
    %c0_138 = arith.constant 0 : index
    %c0_139 = arith.constant 0 : index
    %307 = vector.load %arg8[%c1_137, %c0_138, %c0_139] : memref<2x1x32xf32, #tpu.memory_space<vmem>>, vector<1x1x32xf32>
    %308 = vector.shape_cast %307 : vector<1x1x32xf32> to vector<1x32xf32>
    %c1_140 = arith.constant 1 : index
    %c0_141 = arith.constant 0 : index
    %c0_142 = arith.constant 0 : index
    %309 = vector.load %arg9[%c1_140, %c0_141, %c0_142] : memref<2x1x32xf32, #tpu.memory_space<vmem>>, vector<1x1x32xf32>
    %310 = vector.shape_cast %309 : vector<1x1x32xf32> to vector<1x32xf32>
    %cst_143 = arith.constant dense<0.000000e+00> : vector<8xf32>
    %311 = vector.multi_reduction <add>, %306, %cst_143 [1] : vector<8x32xf32> to vector<8xf32>
    %312 = vector.shape_cast %311 : vector<8xf32> to vector<8x1xf32>
    %cst_144 = arith.constant 3.200000e+01 : f32
    %313 = vector.broadcast %cst_144 : f32 to vector<8x1xf32>
    %314 = arith.divf %312, %313 : vector<8x1xf32>
    %315 = vector.broadcast %314 : vector<8x1xf32> to vector<8x32xf32>
    %316 = arith.subf %306, %315 : vector<8x32xf32>
    %317 = arith.mulf %316, %316 : vector<8x32xf32>
    %cst_145 = arith.constant dense<0.000000e+00> : vector<8xf32>
    %318 = vector.multi_reduction <add>, %317, %cst_145 [1] : vector<8x32xf32> to vector<8xf32>
    %319 = vector.shape_cast %318 : vector<8xf32> to vector<8x1xf32>
    %cst_146 = arith.constant 3.200000e+01 : f32
    %320 = vector.broadcast %cst_146 : f32 to vector<8x1xf32>
    %321 = arith.divf %319, %320 : vector<8x1xf32>
    %322 = vector.broadcast %314 : vector<8x1xf32> to vector<8x32xf32>
    %323 = arith.subf %306, %322 : vector<8x32xf32>
    %cst_147 = arith.constant 9.99999974E-6 : f32
    %324 = vector.broadcast %cst_147 : f32 to vector<8x1xf32>
    %325 = arith.addf %321, %324 : vector<8x1xf32>
    %326 = math.rsqrt %325 : vector<8x1xf32>
    %327 = vector.broadcast %326 : vector<8x1xf32> to vector<8x32xf32>
    %328 = arith.mulf %323, %327 : vector<8x32xf32>
    %329 = vector.broadcast %308 : vector<1x32xf32> to vector<8x32xf32>
    %330 = arith.mulf %328, %329 : vector<8x32xf32>
    %331 = vector.broadcast %310 : vector<1x32xf32> to vector<8x32xf32>
    %332 = arith.addf %330, %331 : vector<8x32xf32>
    %333 = vector.broadcast %5 : vector<8x1xf32> to vector<8x32xf32>
    %334 = arith.mulf %332, %333 : vector<8x32xf32>
    %335 = arith.truncf %334 : vector<8x32xf32> to vector<8x32xbf16>
    %c1_148 = arith.constant 1 : index
    %c0_149 = arith.constant 0 : index
    %c0_150 = arith.constant 0 : index
    %336 = vector.load %arg10[%c1_148, %c0_149, %c0_150] : memref<2x32x64xbf16, #tpu.memory_space<vmem>>, vector<1x32x64xbf16>
    %337 = vector.shape_cast %336 : vector<1x32x64xbf16> to vector<32x64xbf16>
    %cst_151 = arith.constant dense<0.000000e+00> : vector<8x64xf32>
    %338 = tpu.matmul %335, %337, %cst_151 {dimension_numbers = #tpu.dot_dimension_numbers<[1], [0], [0], [1], [0, 0, 1, 1], [], []>} : vector<8x32xbf16>, vector<32x64xbf16>, vector<8x64xf32> -> vector<8x64xf32>
    %c1_152 = arith.constant 1 : index
    %c0_153 = arith.constant 0 : index
    %c0_154 = arith.constant 0 : index
    %339 = vector.load %arg11[%c1_152, %c0_153, %c0_154] : memref<2x1x64xf32, #tpu.memory_space<vmem>>, vector<1x1x64xf32>
    %340 = vector.shape_cast %339 : vector<1x1x64xf32> to vector<1x64xf32>
    %341 = vector.broadcast %340 : vector<1x64xf32> to vector<8x64xf32>
    %342 = arith.addf %338, %341 : vector<8x64xf32>
    %cst_155 = arith.constant 0.000000e+00 : f32
    %343 = vector.broadcast %cst_155 : f32 to vector<8x64xf32>
    %344 = arith.maximumf %342, %343 : vector<8x64xf32>
    %345 = arith.truncf %344 : vector<8x64xf32> to vector<8x64xbf16>
    %c1_156 = arith.constant 1 : index
    %c0_157 = arith.constant 0 : index
    %c0_158 = arith.constant 0 : index
    %346 = vector.load %arg12[%c1_156, %c0_157, %c0_158] : memref<2x64x32xbf16, #tpu.memory_space<vmem>>, vector<1x64x32xbf16>
    %347 = vector.shape_cast %346 : vector<1x64x32xbf16> to vector<64x32xbf16>
    %cst_159 = arith.constant dense<0.000000e+00> : vector<8x32xf32>
    %348 = tpu.matmul %345, %347, %cst_159 {dimension_numbers = #tpu.dot_dimension_numbers<[1], [0], [0], [1], [0, 0, 1, 1], [], []>} : vector<8x64xbf16>, vector<64x32xbf16>, vector<8x32xf32> -> vector<8x32xf32>
    %c1_160 = arith.constant 1 : index
    %c0_161 = arith.constant 0 : index
    %c0_162 = arith.constant 0 : index
    %349 = vector.load %arg13[%c1_160, %c0_161, %c0_162] : memref<2x1x32xf32, #tpu.memory_space<vmem>>, vector<1x1x32xf32>
    %350 = vector.shape_cast %349 : vector<1x1x32xf32> to vector<1x32xf32>
    %351 = vector.broadcast %350 : vector<1x32xf32> to vector<8x32xf32>
    %352 = arith.addf %348, %351 : vector<8x32xf32>
    %353 = arith.addf %352, %334 : vector<8x32xf32>
    %c1_163 = arith.constant 1 : index
    %c0_164 = arith.constant 0 : index
    %c0_165 = arith.constant 0 : index
    %354 = vector.load %arg14[%c1_163, %c0_164, %c0_165] : memref<2x1x32xf32, #tpu.memory_space<vmem>>, vector<1x1x32xf32>
    %355 = vector.shape_cast %354 : vector<1x1x32xf32> to vector<1x32xf32>
    %c1_166 = arith.constant 1 : index
    %c0_167 = arith.constant 0 : index
    %c0_168 = arith.constant 0 : index
    %356 = vector.load %arg15[%c1_166, %c0_167, %c0_168] : memref<2x1x32xf32, #tpu.memory_space<vmem>>, vector<1x1x32xf32>
    %357 = vector.shape_cast %356 : vector<1x1x32xf32> to vector<1x32xf32>
    %cst_169 = arith.constant dense<0.000000e+00> : vector<8xf32>
    %358 = vector.multi_reduction <add>, %353, %cst_169 [1] : vector<8x32xf32> to vector<8xf32>
    %359 = vector.shape_cast %358 : vector<8xf32> to vector<8x1xf32>
    %cst_170 = arith.constant 3.200000e+01 : f32
    %360 = vector.broadcast %cst_170 : f32 to vector<8x1xf32>
    %361 = arith.divf %359, %360 : vector<8x1xf32>
    %362 = vector.broadcast %361 : vector<8x1xf32> to vector<8x32xf32>
    %363 = arith.subf %353, %362 : vector<8x32xf32>
    %364 = arith.mulf %363, %363 : vector<8x32xf32>
    %cst_171 = arith.constant dense<0.000000e+00> : vector<8xf32>
    %365 = vector.multi_reduction <add>, %364, %cst_171 [1] : vector<8x32xf32> to vector<8xf32>
    %366 = vector.shape_cast %365 : vector<8xf32> to vector<8x1xf32>
    %cst_172 = arith.constant 3.200000e+01 : f32
    %367 = vector.broadcast %cst_172 : f32 to vector<8x1xf32>
    %368 = arith.divf %366, %367 : vector<8x1xf32>
    %369 = vector.broadcast %361 : vector<8x1xf32> to vector<8x32xf32>
    %370 = arith.subf %353, %369 : vector<8x32xf32>
    %cst_173 = arith.constant 9.99999974E-6 : f32
    %371 = vector.broadcast %cst_173 : f32 to vector<8x1xf32>
    %372 = arith.addf %368, %371 : vector<8x1xf32>
    %373 = math.rsqrt %372 : vector<8x1xf32>
    %374 = vector.broadcast %373 : vector<8x1xf32> to vector<8x32xf32>
    %375 = arith.mulf %370, %374 : vector<8x32xf32>
    %376 = vector.broadcast %355 : vector<1x32xf32> to vector<8x32xf32>
    %377 = arith.mulf %375, %376 : vector<8x32xf32>
    %378 = vector.broadcast %357 : vector<1x32xf32> to vector<8x32xf32>
    %379 = arith.addf %377, %378 : vector<8x32xf32>
    %380 = vector.broadcast %5 : vector<8x1xf32> to vector<8x32xf32>
    %381 = arith.mulf %379, %380 : vector<8x32xf32>
    %382 = arith.truncf %381 : vector<8x32xf32> to vector<8x32xbf16>
    %c0_174 = arith.constant 0 : index
    %c0_175 = arith.constant 0 : index
    %c0_176 = arith.constant 0 : index
    %383 = vector.load %arg16[%c0_174, %c0_175, %c0_176] : memref<1x8x32xbf16, #tpu.memory_space<vmem>>, vector<1x8x32xbf16>
    %384 = vector.shape_cast %383 : vector<1x8x32xbf16> to vector<8x32xbf16>
    %385 = vector.shape_cast %382 : vector<8x32xbf16> to vector<1x8x32xbf16>
    tpu.vector_store %arg16[%c0_174, %c0_175, %c0_176], %385 {strides = array<i32>} : memref<1x8x32xbf16, #tpu.memory_space<vmem>>, vector<1x8x32xbf16>,
    return
  }
  func.func @transform_0(%arg0: i32) -> (i32, i32, i32) {
    %c0_i32 = arith.constant 0 : i32
    %c0_i32_0 = arith.constant 0 : i32
    %c0_i32_1 = arith.constant 0 : i32
    return %arg0, %c0_i32, %c0_i32_0 : i32, i32, i32
  }
  func.func @transform_1(%arg0: i32) -> (i32, i32, i32) {
    %c0_i32 = arith.constant 0 : i32
    %c0_i32_0 = arith.constant 0 : i32
    %c0_i32_1 = arith.constant 0 : i32
    return %arg0, %c0_i32, %c0_i32_0 : i32, i32, i32
  }
  func.func @transform_2(%arg0: i32) -> (i32, i32, i32) {
    %c0_i32 = arith.constant 0 : i32
    %c0_i32_0 = arith.constant 0 : i32
    %c0_i32_1 = arith.constant 0 : i32
    return %arg0, %c0_i32, %c0_i32_0 : i32, i32, i32
  }
  func.func @transform_3(%arg0: i32) -> (i32, i32, i32) {
    %c0_i32 = arith.constant 0 : i32
    %c0_i32_0 = arith.constant 0 : i32
    %c0_i32_1 = arith.constant 0 : i32
    %c0_i32_2 = arith.constant 0 : i32
    return %c0_i32, %c0_i32_0, %c0_i32_1 : i32, i32, i32
  }
  func.func @transform_4(%arg0: i32) -> (i32, i32, i32) {
    %c0_i32 = arith.constant 0 : i32
    %c0_i32_0 = arith.constant 0 : i32
    %c0_i32_1 = arith.constant 0 : i32
    %c0_i32_2 = arith.constant 0 : i32
    return %c0_i32, %c0_i32_0, %c0_i32_1 : i32, i32, i32
  }
  func.func @transform_5(%arg0: i32) -> (i32, i32, i32) {
    %c0_i32 = arith.constant 0 : i32
    %c0_i32_0 = arith.constant 0 : i32
    %c0_i32_1 = arith.constant 0 : i32
    %c0_i32_2 = arith.constant 0 : i32
    return %c0_i32, %c0_i32_0, %c0_i32_1 : i32, i32, i32
  }
  func.func @transform_6(%arg0: i32) -> (i32, i32, i32) {
    %c0_i32 = arith.constant 0 : i32
    %c0_i32_0 = arith.constant 0 : i32
    %c0_i32_1 = arith.constant 0 : i32
    %c0_i32_2 = arith.constant 0 : i32
    return %c0_i32, %c0_i32_0, %c0_i32_1 : i32, i32, i32
  }
  func.func @transform_7(%arg0: i32) -> (i32, i32, i32) {
    %c0_i32 = arith.constant 0 : i32
    %c0_i32_0 = arith.constant 0 : i32
    %c0_i32_1 = arith.constant 0 : i32
    %c0_i32_2 = arith.constant 0 : i32
    return %c0_i32, %c0_i32_0, %c0_i32_1 : i32, i32, i32
  }
  func.func @transform_8(%arg0: i32) -> (i32, i32, i32) {
    %c0_i32 = arith.constant 0 : i32
    %c0_i32_0 = arith.constant 0 : i32
    %c0_i32_1 = arith.constant 0 : i32
    %c0_i32_2 = arith.constant 0 : i32
    return %c0_i32, %c0_i32_0, %c0_i32_1 : i32, i32, i32
  }
  func.func @transform_9(%arg0: i32) -> (i32, i32, i32) {
    %c0_i32 = arith.constant 0 : i32
    %c0_i32_0 = arith.constant 0 : i32
    %c0_i32_1 = arith.constant 0 : i32
    %c0_i32_2 = arith.constant 0 : i32
    return %c0_i32, %c0_i32_0, %c0_i32_1 : i32, i32, i32
  }
  func.func @transform_10(%arg0: i32) -> (i32, i32, i32) {
    %c0_i32 = arith.constant 0 : i32
    %c0_i32_0 = arith.constant 0 : i32
    %c0_i32_1 = arith.constant 0 : i32
    %c0_i32_2 = arith.constant 0 : i32
    return %c0_i32, %c0_i32_0, %c0_i32_1 : i32, i32, i32
  }
  func.func @transform_11(%arg0: i32) -> (i32, i32, i32) {
    %c0_i32 = arith.constant 0 : i32
    %c0_i32_0 = arith.constant 0 : i32
    %c0_i32_1 = arith.constant 0 : i32
    %c0_i32_2 = arith.constant 0 : i32
    return %c0_i32, %c0_i32_0, %c0_i32_1 : i32, i32, i32
  }
  func.func @transform_12(%arg0: i32) -> (i32, i32, i32) {
    %c0_i32 = arith.constant 0 : i32
    %c0_i32_0 = arith.constant 0 : i32
    %c0_i32_1 = arith.constant 0 : i32
    %c0_i32_2 = arith.constant 0 : i32
    return %c0_i32, %c0_i32_0, %c0_i32_1 : i32, i32, i32
  }
  func.func @transform_13(%arg0: i32) -> (i32, i32, i32) {
    %c0_i32 = arith.constant 0 : i32
    %c0_i32_0 = arith.constant 0 : i32
    %c0_i32_1 = arith.constant 0 : i32
    %c0_i32_2 = arith.constant 0 : i32
    return %c0_i32, %c0_i32_0, %c0_i32_1 : i32, i32, i32
  }
  func.func @transform_14(%arg0: i32) -> (i32, i32, i32) {
    %c0_i32 = arith.constant 0 : i32
    %c0_i32_0 = arith.constant 0 : i32
    %c0_i32_1 = arith.constant 0 : i32
    %c0_i32_2 = arith.constant 0 : i32
    return %c0_i32, %c0_i32_0, %c0_i32_1 : i32, i32, i32
  }
  func.func @transform_15(%arg0: i32) -> (i32, i32, i32) {
    %c0_i32 = arith.constant 0 : i32
    %c0_i32_0 = arith.constant 0 : i32
    %c0_i32_1 = arith.constant 0 : i32
    return %arg0, %c0_i32, %c0_i32_0 : i32, i32, i32
  }
  func.func @transform_16(%arg0: i32) -> (i32, i32, i32, i32) {
    %c0_i32 = arith.constant 0 : i32
    %c0_i32_0 = arith.constant 0 : i32
    %c0_i32_1 = arith.constant 0 : i32
    %c0_i32_2 = arith.constant 0 : i32
    return %arg0, %c0_i32, %c0_i32_0, %c0_i32_1 : i32, i32, i32, i32
  }
}

module attributes {stable_mosaic.version = 11 : i64} {
  func.func @_logits_kernel(%arg0: i32, %arg1: i32, %arg2: memref<14x32xbf16, #tpu.memory_space<vmem>>, %arg3: memref<40x32xf32, #tpu.memory_space<vmem>>, %arg4: memref<14x40xf32, #tpu.memory_space<vmem>>) attributes {dimension_semantics = [#tpu.dimension_semantics<parallel>, #tpu.dimension_semantics<parallel>], iteration_bounds = array<i64: 1, 1>, scalar_prefetch = 0 : i64, scratch_operands = 0 : i64, tpu.core_type = #tpu.core_type<tc>, window_params = [{transform_indices = @transform_0, window_bounds = array<i64: 14, 32>}, {transform_indices = @transform_1, window_bounds = array<i64: 40, 32>}, {transform_indices = @transform_2, window_bounds = array<i64: 14, 40>}]} {
    %c0 = arith.constant 0 : index
    %c0_0 = arith.constant 0 : index
    %0 = vector.load %arg2[%c0, %c0_0] : memref<14x32xbf16, #tpu.memory_space<vmem>>, vector<14x32xbf16>
    %c0_1 = arith.constant 0 : index
    %c0_2 = arith.constant 0 : index
    %1 = vector.load %arg3[%c0_1, %c0_2] : memref<40x32xf32, #tpu.memory_space<vmem>>, vector<40x32xf32>
    %2 = arith.truncf %1 : vector<40x32xf32> to vector<40x32xbf16>
    %cst = arith.constant dense<0.000000e+00> : vector<14x40xf32>
    %3 = tpu.matmul %0, %2, %cst {dimension_numbers = #tpu.dot_dimension_numbers<[1], [1], [0], [0], [0, 0, 1, 0], [], []>} : vector<14x32xbf16>, vector<40x32xbf16>, vector<14x40xf32> -> vector<14x40xf32>
    %cst_3 = arith.constant 0.176776692 : f32
    %4 = vector.broadcast %cst_3 : f32 to vector<14x40xf32>
    %5 = arith.mulf %3, %4 : vector<14x40xf32>
    %c0_4 = arith.constant 0 : index
    %c0_5 = arith.constant 0 : index
    %6 = vector.load %arg4[%c0_4, %c0_5] : memref<14x40xf32, #tpu.memory_space<vmem>>, vector<14x40xf32>
    tpu.vector_store %arg4[%c0_4, %c0_5], %5 {strides = array<i32>} : memref<14x40xf32, #tpu.memory_space<vmem>>, vector<14x40xf32>,
    return
  }
  func.func @transform_0(%arg0: i32, %arg1: i32) -> (i32, i32) {
    %c0_i32 = arith.constant 0 : i32
    %c0_i32_0 = arith.constant 0 : i32
    return %arg0, %c0_i32 : i32, i32
  }
  func.func @transform_1(%arg0: i32, %arg1: i32) -> (i32, i32) {
    %c0_i32 = arith.constant 0 : i32
    %c0_i32_0 = arith.constant 0 : i32
    return %arg1, %c0_i32 : i32, i32
  }
  func.func @transform_2(%arg0: i32, %arg1: i32) -> (i32, i32) {
    %c0_i32 = arith.constant 0 : i32
    return %arg0, %arg1 : i32, i32
  }
}

module attributes {stable_mosaic.version = 11 : i64} {
  func.func @_dec_stack_kernel(%arg0: i32, %arg1: memref<1x7x32xf32, #tpu.memory_space<vmem>>, %arg2: memref<1x8x32xbf16, #tpu.memory_space<vmem>>, %arg3: memref<1x8x32xbf16, #tpu.memory_space<vmem>>, %arg4: memref<1x1x7xf32, #tpu.memory_space<vmem>>, %arg5: memref<1x1x8xf32, #tpu.memory_space<vmem>>, %arg6: memref<1x1x8xf32, #tpu.memory_space<vmem>>, %arg7: memref<1x7x1xf32, #tpu.memory_space<vmem>>, %arg8: memref<2x32x192xbf16, #tpu.memory_space<vmem>>, %arg9: memref<2x1x192xf32, #tpu.memory_space<vmem>>, %arg10: memref<2x64x32xbf16, #tpu.memory_space<vmem>>, %arg11: memref<2x1x32xf32, #tpu.memory_space<vmem>>, %arg12: memref<2x1x32xf32, #tpu.memory_space<vmem>>, %arg13: memref<2x1x32xf32, #tpu.memory_space<vmem>>, %arg14: memref<2x32x64xbf16, #tpu.memory_space<vmem>>, %arg15: memref<2x1x64xf32, #tpu.memory_space<vmem>>, %arg16: memref<2x32x64xbf16, #tpu.memory_space<vmem>>, %arg17: memref<2x1x64xf32, #tpu.memory_space<vmem>>, %arg18: memref<2x32x64xbf16, #tpu.memory_space<vmem>>, %arg19: memref<2x1x64xf32, #tpu.memory_space<vmem>>, %arg20: memref<2x64x32xbf16, #tpu.memory_space<vmem>>, %arg21: memref<2x1x32xf32, #tpu.memory_space<vmem>>, %arg22: memref<2x1x32xf32, #tpu.memory_space<vmem>>, %arg23: memref<2x1x32xf32, #tpu.memory_space<vmem>>, %arg24: memref<2x32x64xbf16, #tpu.memory_space<vmem>>, %arg25: memref<2x1x64xf32, #tpu.memory_space<vmem>>, %arg26: memref<2x64x32xbf16, #tpu.memory_space<vmem>>, %arg27: memref<2x1x32xf32, #tpu.memory_space<vmem>>, %arg28: memref<2x1x32xf32, #tpu.memory_space<vmem>>, %arg29: memref<2x1x32xf32, #tpu.memory_space<vmem>>, %arg30: memref<1x7x32xbf16, #tpu.memory_space<vmem>>, %arg31: memref<1x8x7x7xf32, #tpu.memory_space<vmem>>, %arg32: memref<1x4x7x8xf32, #tpu.memory_space<vmem>>, %arg33: memref<1x4x7x8xf32, #tpu.memory_space<vmem>>) attributes {dimension_semantics = [#tpu.dimension_semantics<parallel>], iteration_bounds = array<i64: 2>, scalar_prefetch = 0 : i64, scratch_operands = 0 : i64, tpu.core_type = #tpu.core_type<tc>, window_params = [{transform_indices = @transform_0, window_bounds = array<i64: 1, 7, 32>}, {transform_indices = @transform_1, window_bounds = array<i64: 1, 8, 32>}, {transform_indices = @transform_2, window_bounds = array<i64: 1, 8, 32>}, {transform_indices = @transform_3, window_bounds = array<i64: 1, 1, 7>}, {transform_indices = @transform_4, window_bounds = array<i64: 1, 1, 8>}, {transform_indices = @transform_5, window_bounds = array<i64: 1, 1, 8>}, {transform_indices = @transform_6, window_bounds = array<i64: 1, 7, 1>}, {pipeline_mode = #tpu.pipeline_mode<synchronous>, transform_indices = @transform_7, window_bounds = array<i64: 2, 32, 192>}, {pipeline_mode = #tpu.pipeline_mode<synchronous>, transform_indices = @transform_8, window_bounds = array<i64: 2, 1, 192>}, {pipeline_mode = #tpu.pipeline_mode<synchronous>, transform_indices = @transform_9, window_bounds = array<i64: 2, 64, 32>}, {pipeline_mode = #tpu.pipeline_mode<synchronous>, transform_indices = @transform_10, window_bounds = array<i64: 2, 1, 32>}, {pipeline_mode = #tpu.pipeline_mode<synchronous>, transform_indices = @transform_11, window_bounds = array<i64: 2, 1, 32>}, {pipeline_mode = #tpu.pipeline_mode<synchronous>, transform_indices = @transform_12, window_bounds = array<i64: 2, 1, 32>}, {pipeline_mode = #tpu.pipeline_mode<synchronous>, transform_indices = @transform_13, window_bounds = array<i64: 2, 32, 64>}, {pipeline_mode = #tpu.pipeline_mode<synchronous>, transform_indices = @transform_14, window_bounds = array<i64: 2, 1, 64>}, {pipeline_mode = #tpu.pipeline_mode<synchronous>, transform_indices = @transform_15, window_bounds = array<i64: 2, 32, 64>}, {pipeline_mode = #tpu.pipeline_mode<synchronous>, transform_indices = @transform_16, window_bounds = array<i64: 2, 1, 64>}, {pipeline_mode = #tpu.pipeline_mode<synchronous>, transform_indices = @transform_17, window_bounds = array<i64: 2, 32, 64>}, {pipeline_mode = #tpu.pipeline_mode<synchronous>, transform_indices = @transform_18, window_bounds = array<i64: 2, 1, 64>}, {pipeline_mode = #tpu.pipeline_mode<synchronous>, transform_indices = @transform_19, window_bounds = array<i64: 2, 64, 32>}, {pipeline_mode = #tpu.pipeline_mode<synchronous>, transform_indices = @transform_20, window_bounds = array<i64: 2, 1, 32>}, {pipeline_mode = #tpu.pipeline_mode<synchronous>, transform_indices = @transform_21, window_bounds = array<i64: 2, 1, 32>}, {pipeline_mode = #tpu.pipeline_mode<synchronous>, transform_indices = @transform_22, window_bounds = array<i64: 2, 1, 32>}, {pipeline_mode = #tpu.pipeline_mode<synchronous>, transform_indices = @transform_23, window_bounds = array<i64: 2, 32, 64>}, {pipeline_mode = #tpu.pipeline_mode<synchronous>, transform_indices = @transform_24, window_bounds = array<i64: 2, 1, 64>}, {pipeline_mode = #tpu.pipeline_mode<synchronous>, transform_indices = @transform_25, window_bounds = array<i64: 2, 64, 32>}, {pipeline_mode = #tpu.pipeline_mode<synchronous>, transform_indices = @transform_26, window_bounds = array<i64: 2, 1, 32>}, {pipeline_mode = #tpu.pipeline_mode<synchronous>, transform_indices = @transform_27, window_bounds = array<i64: 2, 1, 32>}, {pipeline_mode = #tpu.pipeline_mode<synchronous>, transform_indices = @transform_28, window_bounds = array<i64: 2, 1, 32>}, {transform_indices = @transform_29, window_bounds = array<i64: 1, 7, 32>}, {transform_indices = @transform_30, window_bounds = array<i64: 1, 8, 7, 7>}, {transform_indices = @transform_31, window_bounds = array<i64: 1, 4, 7, 8>}, {transform_indices = @transform_32, window_bounds = array<i64: 1, 4, 7, 8>}]} {
    %c0 = arith.constant 0 : index
    %c0_0 = arith.constant 0 : index
    %c0_1 = arith.constant 0 : index
    %0 = vector.load %arg1[%c0, %c0_0, %c0_1] : memref<1x7x32xf32, #tpu.memory_space<vmem>>, vector<1x7x32xf32>
    %1 = vector.shape_cast %0 : vector<1x7x32xf32> to vector<7x32xf32>
    %c0_2 = arith.constant 0 : index
    %c0_3 = arith.constant 0 : index
    %c0_4 = arith.constant 0 : index
    %2 = vector.load %arg2[%c0_2, %c0_3, %c0_4] : memref<1x8x32xbf16, #tpu.memory_space<vmem>>, vector<1x8x32xbf16>
    %3 = vector.shape_cast %2 : vector<1x8x32xbf16> to vector<8x32xbf16>
    %c0_5 = arith.constant 0 : index
    %c0_6 = arith.constant 0 : index
    %c0_7 = arith.constant 0 : index
    %4 = vector.load %arg3[%c0_5, %c0_6, %c0_7] : memref<1x8x32xbf16, #tpu.memory_space<vmem>>, vector<1x8x32xbf16>
    %5 = vector.shape_cast %4 : vector<1x8x32xbf16> to vector<8x32xbf16>
    %c0_8 = arith.constant 0 : index
    %c0_9 = arith.constant 0 : index
    %c0_10 = arith.constant 0 : index
    %6 = vector.load %arg7[%c0_8, %c0_9, %c0_10] : memref<1x7x1xf32, #tpu.memory_space<vmem>>, vector<1x7x1xf32>
    %7 = vector.shape_cast %6 : vector<1x7x1xf32> to vector<7x1xf32>
    %8 = tpu.iota {dimensions = array<i32: 0>} : vector<7x7xi32>
    %9 = tpu.iota {dimensions = array<i32: 1>} : vector<7x7xi32>
    %10 = arith.cmpi sgt, %9, %8 : vector<7x7xi32>
    %cst = arith.constant -1.000000e+09 : f32
    %cst_11 = arith.constant 0.000000e+00 : f32
    %11 = vector.broadcast %cst : f32 to vector<7x7xf32>
    %12 = vector.broadcast %cst_11 : f32 to vector<7x7xf32>
    %13 = arith.select %10, %11, %12 : vector<7x7xi1>, vector<7x7xf32>
    %c0_12 = arith.constant 0 : index
    %c0_13 = arith.constant 0 : index
    %c0_14 = arith.constant 0 : index
    %14 = vector.load %arg4[%c0_12, %c0_13, %c0_14] : memref<1x1x7xf32, #tpu.memory_space<vmem>>, vector<1x1x7xf32>
    %15 = vector.shape_cast %14 : vector<1x1x7xf32> to vector<1x7xf32>
    %16 = vector.broadcast %15 : vector<1x7xf32> to vector<7x7xf32>
    %17 = arith.addf %13, %16 : vector<7x7xf32>
    %c0_15 = arith.constant 0 : index
    %c0_16 = arith.constant 0 : index
    %c0_17 = arith.constant 0 : index
    %18 = vector.load %arg5[%c0_15, %c0_16, %c0_17] : memref<1x1x8xf32, #tpu.memory_space<vmem>>, vector<1x1x8xf32>
    %19 = vector.shape_cast %18 : vector<1x1x8xf32> to vector<1x8xf32>
    %c0_18 = arith.constant 0 : index
    %c0_19 = arith.constant 0 : index
    %c0_20 = arith.constant 0 : index
    %20 = vector.load %arg6[%c0_18, %c0_19, %c0_20] : memref<1x1x8xf32, #tpu.memory_space<vmem>>, vector<1x1x8xf32>
    %21 = vector.shape_cast %20 : vector<1x1x8xf32> to vector<1x8xf32>
    %22 = arith.truncf %1 : vector<7x32xf32> to vector<7x32xbf16>
    %c0_21 = arith.constant 0 : index
    %c0_22 = arith.constant 0 : index
    %c0_23 = arith.constant 0 : index
    %23 = vector.load %arg8[%c0_21, %c0_22, %c0_23] : memref<2x32x192xbf16, #tpu.memory_space<vmem>>, vector<1x32x192xbf16>
    %24 = vector.shape_cast %23 : vector<1x32x192xbf16> to vector<32x192xbf16>
    %cst_24 = arith.constant dense<0.000000e+00> : vector<7x192xf32>
    %25 = tpu.matmul %22, %24, %cst_24 {dimension_numbers = #tpu.dot_dimension_numbers<[1], [0], [0], [1], [0, 0, 1, 1], [], []>} : vector<7x32xbf16>, vector<32x192xbf16>, vector<7x192xf32> -> vector<7x192xf32>
    %c0_25 = arith.constant 0 : index
    %c0_26 = arith.constant 0 : index
    %c0_27 = arith.constant 0 : index
    %26 = vector.load %arg9[%c0_25, %c0_26, %c0_27] : memref<2x1x192xf32, #tpu.memory_space<vmem>>, vector<1x1x192xf32>
    %27 = vector.shape_cast %26 : vector<1x1x192xf32> to vector<1x192xf32>
    %28 = vector.broadcast %27 : vector<1x192xf32> to vector<7x192xf32>
    %29 = arith.addf %25, %28 : vector<7x192xf32>
    %30 = arith.truncf %29 : vector<7x192xf32> to vector<7x192xbf16>
    %c0_28 = arith.constant 0 : index
    %c0_29 = arith.constant 0 : index
    %c0_30 = arith.constant 0 : index
    %31 = vector.load %arg10[%c0_28, %c0_29, %c0_30] : memref<2x64x32xbf16, #tpu.memory_space<vmem>>, vector<1x64x32xbf16>
    %32 = vector.shape_cast %31 : vector<1x64x32xbf16> to vector<64x32xbf16>
    %cst_31 = arith.constant 0.000000e+00 : f32
    %33 = vector.broadcast %cst_31 : f32 to vector<7x32xf32>
    %34 = vector.extract_strided_slice %30 {offsets = [0, 0], sizes = [7, 16], strides = [1, 1]} : vector<7x192xbf16> to vector<7x16xbf16>
    %35 = vector.extract_strided_slice %30 {offsets = [0, 64], sizes = [7, 16], strides = [1, 1]} : vector<7x192xbf16> to vector<7x16xbf16>
    %36 = vector.extract_strided_slice %30 {offsets = [0, 128], sizes = [7, 16], strides = [1, 1]} : vector<7x192xbf16> to vector<7x16xbf16>
    %cst_32 = arith.constant dense<0.000000e+00> : vector<7x7xf32>
    %37 = tpu.matmul %34, %35, %cst_32 {dimension_numbers = #tpu.dot_dimension_numbers<[1], [1], [0], [0], [0, 0, 1, 0], [], []>} : vector<7x16xbf16>, vector<7x16xbf16>, vector<7x7xf32> -> vector<7x7xf32>
    %38 = arith.addf %37, %17 : vector<7x7xf32>
    %cst_33 = arith.constant dense<0xFF800000> : vector<7xf32>
    %39 = vector.multi_reduction <maximumf>, %38, %cst_33 [1] : vector<7x7xf32> to vector<7xf32>
    %40 = vector.shape_cast %39 : vector<7xf32> to vector<7x1xf32>
    %41 = vector.broadcast %40 : vector<7x1xf32> to vector<7x7xf32>
    %42 = arith.subf %38, %41 : vector<7x7xf32>
    %43 = math.exp %42 : vector<7x7xf32>
    %cst_34 = arith.constant dense<0.000000e+00> : vector<7xf32>
    %44 = vector.multi_reduction <add>, %43, %cst_34 [1] : vector<7x7xf32> to vector<7xf32>
    %45 = vector.shape_cast %44 : vector<7xf32> to vector<7x1xf32>
    %46 = tpu.reciprocal %45 {approx = true} : vector<7x1xf32> -> vector<7x1xf32>
    %47 = vector.broadcast %46 : vector<7x1xf32> to vector<7x7xf32>
    %48 = arith.mulf %43, %47 : vector<7x7xf32>
    %c0_35 = arith.constant 0 : index
    %c0_36 = arith.constant 0 : index
    %c0_37 = arith.constant 0 : index
    %c0_38 = arith.constant 0 : index
    %49 = vector.load %arg31[%c0_35, %c0_36, %c0_37, %c0_38] : memref<1x8x7x7xf32, #tpu.memory_space<vmem>>, vector<1x1x7x7xf32>
    %50 = vector.shape_cast %49 : vector<1x1x7x7xf32> to vector<7x7xf32>
    %51 = vector.shape_cast %48 : vector<7x7xf32> to vector<1x1x7x7xf32>
    tpu.vector_store %arg31[%c0_35, %c0_36, %c0_37, %c0_38], %51 {strides = array<i32>} : memref<1x8x7x7xf32, #tpu.memory_space<vmem>>, vector<1x1x7x7xf32>,
    %52 = arith.truncf %48 : vector<7x7xf32> to vector<7x7xbf16>
    %cst_39 = arith.constant dense<0.000000e+00> : vector<7x16xf32>
    %53 = tpu.matmul %52, %36, %cst_39 {dimension_numbers = #tpu.dot_dimension_numbers<[1], [0], [0], [1], [0, 0, 1, 1], [], []>} : vector<7x7xbf16>, vector<7x16xbf16>, vector<7x16xf32> -> vector<7x16xf32>
    %54 = arith.truncf %53 : vector<7x16xf32> to vector<7x16xbf16>
    %55 = vector.extract_strided_slice %32 {offsets = [0, 0], sizes = [16, 32], strides = [1, 1]} : vector<64x32xbf16> to vector<16x32xbf16>
    %cst_40 = arith.constant dense<0.000000e+00> : vector<7x32xf32>
    %56 = tpu.matmul %54, %55, %cst_40 {dimension_numbers = #tpu.dot_dimension_numbers<[1], [0], [0], [1], [0, 0, 1, 1], [], []>} : vector<7x16xbf16>, vector<16x32xbf16>, vector<7x32xf32> -> vector<7x32xf32>
    %57 = arith.addf %33, %56 : vector<7x32xf32>
    %58 = vector.extract_strided_slice %30 {offsets = [0, 16], sizes = [7, 16], strides = [1, 1]} : vector<7x192xbf16> to vector<7x16xbf16>
    %59 = vector.extract_strided_slice %30 {offsets = [0, 80], sizes = [7, 16], strides = [1, 1]} : vector<7x192xbf16> to vector<7x16xbf16>
    %60 = vector.extract_strided_slice %30 {offsets = [0, 144], sizes = [7, 16], strides = [1, 1]} : vector<7x192xbf16> to vector<7x16xbf16>
    %cst_41 = arith.constant dense<0.000000e+00> : vector<7x7xf32>
    %61 = tpu.matmul %58, %59, %cst_41 {dimension_numbers = #tpu.dot_dimension_numbers<[1], [1], [0], [0], [0, 0, 1, 0], [], []>} : vector<7x16xbf16>, vector<7x16xbf16>, vector<7x7xf32> -> vector<7x7xf32>
    %62 = arith.addf %61, %17 : vector<7x7xf32>
    %cst_42 = arith.constant dense<0xFF800000> : vector<7xf32>
    %63 = vector.multi_reduction <maximumf>, %62, %cst_42 [1] : vector<7x7xf32> to vector<7xf32>
    %64 = vector.shape_cast %63 : vector<7xf32> to vector<7x1xf32>
    %65 = vector.broadcast %64 : vector<7x1xf32> to vector<7x7xf32>
    %66 = arith.subf %62, %65 : vector<7x7xf32>
    %67 = math.exp %66 : vector<7x7xf32>
    %cst_43 = arith.constant dense<0.000000e+00> : vector<7xf32>
    %68 = vector.multi_reduction <add>, %67, %cst_43 [1] : vector<7x7xf32> to vector<7xf32>
    %69 = vector.shape_cast %68 : vector<7xf32> to vector<7x1xf32>
    %70 = tpu.reciprocal %69 {approx = true} : vector<7x1xf32> -> vector<7x1xf32>
    %71 = vector.broadcast %70 : vector<7x1xf32> to vector<7x7xf32>
    %72 = arith.mulf %67, %71 : vector<7x7xf32>
    %c0_44 = arith.constant 0 : index
    %c1 = arith.constant 1 : index
    %c0_45 = arith.constant 0 : index
    %c0_46 = arith.constant 0 : index
    %73 = vector.load %arg31[%c0_44, %c1, %c0_45, %c0_46] : memref<1x8x7x7xf32, #tpu.memory_space<vmem>>, vector<1x1x7x7xf32>
    %74 = vector.shape_cast %73 : vector<1x1x7x7xf32> to vector<7x7xf32>
    %75 = vector.shape_cast %72 : vector<7x7xf32> to vector<1x1x7x7xf32>
    tpu.vector_store %arg31[%c0_44, %c1, %c0_45, %c0_46], %75 {strides = array<i32>} : memref<1x8x7x7xf32, #tpu.memory_space<vmem>>, vector<1x1x7x7xf32>,
    %76 = arith.truncf %72 : vector<7x7xf32> to vector<7x7xbf16>
    %cst_47 = arith.constant dense<0.000000e+00> : vector<7x16xf32>
    %77 = tpu.matmul %76, %60, %cst_47 {dimension_numbers = #tpu.dot_dimension_numbers<[1], [0], [0], [1], [0, 0, 1, 1], [], []>} : vector<7x7xbf16>, vector<7x16xbf16>, vector<7x16xf32> -> vector<7x16xf32>
    %78 = arith.truncf %77 : vector<7x16xf32> to vector<7x16xbf16>
    %79 = vector.extract_strided_slice %32 {offsets = [16, 0], sizes = [16, 32], strides = [1, 1]} : vector<64x32xbf16> to vector<16x32xbf16>
    %cst_48 = arith.constant dense<0.000000e+00> : vector<7x32xf32>
    %80 = tpu.matmul %78, %79, %cst_48 {dimension_numbers = #tpu.dot_dimension_numbers<[1], [0], [0], [1], [0, 0, 1, 1], [], []>} : vector<7x16xbf16>, vector<16x32xbf16>, vector<7x32xf32> -> vector<7x32xf32>
    %81 = arith.addf %57, %80 : vector<7x32xf32>
    %82 = vector.extract_strided_slice %30 {offsets = [0, 32], sizes = [7, 16], strides = [1, 1]} : vector<7x192xbf16> to vector<7x16xbf16>
    %83 = vector.extract_strided_slice %30 {offsets = [0, 96], sizes = [7, 16], strides = [1, 1]} : vector<7x192xbf16> to vector<7x16xbf16>
    %84 = vector.extract_strided_slice %30 {offsets = [0, 160], sizes = [7, 16], strides = [1, 1]} : vector<7x192xbf16> to vector<7x16xbf16>
    %cst_49 = arith.constant dense<0.000000e+00> : vector<7x7xf32>
    %85 = tpu.matmul %82, %83, %cst_49 {dimension_numbers = #tpu.dot_dimension_numbers<[1], [1], [0], [0], [0, 0, 1, 0], [], []>} : vector<7x16xbf16>, vector<7x16xbf16>, vector<7x7xf32> -> vector<7x7xf32>
    %86 = arith.addf %85, %17 : vector<7x7xf32>
    %cst_50 = arith.constant dense<0xFF800000> : vector<7xf32>
    %87 = vector.multi_reduction <maximumf>, %86, %cst_50 [1] : vector<7x7xf32> to vector<7xf32>
    %88 = vector.shape_cast %87 : vector<7xf32> to vector<7x1xf32>
    %89 = vector.broadcast %88 : vector<7x1xf32> to vector<7x7xf32>
    %90 = arith.subf %86, %89 : vector<7x7xf32>
    %91 = math.exp %90 : vector<7x7xf32>
    %cst_51 = arith.constant dense<0.000000e+00> : vector<7xf32>
    %92 = vector.multi_reduction <add>, %91, %cst_51 [1] : vector<7x7xf32> to vector<7xf32>
    %93 = vector.shape_cast %92 : vector<7xf32> to vector<7x1xf32>
    %94 = tpu.reciprocal %93 {approx = true} : vector<7x1xf32> -> vector<7x1xf32>
    %95 = vector.broadcast %94 : vector<7x1xf32> to vector<7x7xf32>
    %96 = arith.mulf %91, %95 : vector<7x7xf32>
    %c0_52 = arith.constant 0 : index
    %c2 = arith.constant 2 : index
    %c0_53 = arith.constant 0 : index
    %c0_54 = arith.constant 0 : index
    %97 = vector.load %arg31[%c0_52, %c2, %c0_53, %c0_54] : memref<1x8x7x7xf32, #tpu.memory_space<vmem>>, vector<1x1x7x7xf32>
    %98 = vector.shape_cast %97 : vector<1x1x7x7xf32> to vector<7x7xf32>
    %99 = vector.shape_cast %96 : vector<7x7xf32> to vector<1x1x7x7xf32>
    tpu.vector_store %arg31[%c0_52, %c2, %c0_53, %c0_54], %99 {strides = array<i32>} : memref<1x8x7x7xf32, #tpu.memory_space<vmem>>, vector<1x1x7x7xf32>,
    %100 = arith.truncf %96 : vector<7x7xf32> to vector<7x7xbf16>
    %cst_55 = arith.constant dense<0.000000e+00> : vector<7x16xf32>
    %101 = tpu.matmul %100, %84, %cst_55 {dimension_numbers = #tpu.dot_dimension_numbers<[1], [0], [0], [1], [0, 0, 1, 1], [], []>} : vector<7x7xbf16>, vector<7x16xbf16>, vector<7x16xf32> -> vector<7x16xf32>
    %102 = arith.truncf %101 : vector<7x16xf32> to vector<7x16xbf16>
    %103 = vector.extract_strided_slice %32 {offsets = [32, 0], sizes = [16, 32], strides = [1, 1]} : vector<64x32xbf16> to vector<16x32xbf16>
    %cst_56 = arith.constant dense<0.000000e+00> : vector<7x32xf32>
    %104 = tpu.matmul %102, %103, %cst_56 {dimension_numbers = #tpu.dot_dimension_numbers<[1], [0], [0], [1], [0, 0, 1, 1], [], []>} : vector<7x16xbf16>, vector<16x32xbf16>, vector<7x32xf32> -> vector<7x32xf32>
    %105 = arith.addf %81, %104 : vector<7x32xf32>
    %106 = vector.extract_strided_slice %30 {offsets = [0, 48], sizes = [7, 16], strides = [1, 1]} : vector<7x192xbf16> to vector<7x16xbf16>
    %107 = vector.extract_strided_slice %30 {offsets = [0, 112], sizes = [7, 16], strides = [1, 1]} : vector<7x192xbf16> to vector<7x16xbf16>
    %108 = vector.extract_strided_slice %30 {offsets = [0, 176], sizes = [7, 16], strides = [1, 1]} : vector<7x192xbf16> to vector<7x16xbf16>
    %cst_57 = arith.constant dense<0.000000e+00> : vector<7x7xf32>
    %109 = tpu.matmul %106, %107, %cst_57 {dimension_numbers = #tpu.dot_dimension_numbers<[1], [1], [0], [0], [0, 0, 1, 0], [], []>} : vector<7x16xbf16>, vector<7x16xbf16>, vector<7x7xf32> -> vector<7x7xf32>
    %110 = arith.addf %109, %17 : vector<7x7xf32>
    %cst_58 = arith.constant dense<0xFF800000> : vector<7xf32>
    %111 = vector.multi_reduction <maximumf>, %110, %cst_58 [1] : vector<7x7xf32> to vector<7xf32>
    %112 = vector.shape_cast %111 : vector<7xf32> to vector<7x1xf32>
    %113 = vector.broadcast %112 : vector<7x1xf32> to vector<7x7xf32>
    %114 = arith.subf %110, %113 : vector<7x7xf32>
    %115 = math.exp %114 : vector<7x7xf32>
    %cst_59 = arith.constant dense<0.000000e+00> : vector<7xf32>
    %116 = vector.multi_reduction <add>, %115, %cst_59 [1] : vector<7x7xf32> to vector<7xf32>
    %117 = vector.shape_cast %116 : vector<7xf32> to vector<7x1xf32>
    %118 = tpu.reciprocal %117 {approx = true} : vector<7x1xf32> -> vector<7x1xf32>
    %119 = vector.broadcast %118 : vector<7x1xf32> to vector<7x7xf32>
    %120 = arith.mulf %115, %119 : vector<7x7xf32>
    %c0_60 = arith.constant 0 : index
    %c3 = arith.constant 3 : index
    %c0_61 = arith.constant 0 : index
    %c0_62 = arith.constant 0 : index
    %121 = vector.load %arg31[%c0_60, %c3, %c0_61, %c0_62] : memref<1x8x7x7xf32, #tpu.memory_space<vmem>>, vector<1x1x7x7xf32>
    %122 = vector.shape_cast %121 : vector<1x1x7x7xf32> to vector<7x7xf32>
    %123 = vector.shape_cast %120 : vector<7x7xf32> to vector<1x1x7x7xf32>
    tpu.vector_store %arg31[%c0_60, %c3, %c0_61, %c0_62], %123 {strides = array<i32>} : memref<1x8x7x7xf32, #tpu.memory_space<vmem>>, vector<1x1x7x7xf32>,
    %124 = arith.truncf %120 : vector<7x7xf32> to vector<7x7xbf16>
    %cst_63 = arith.constant dense<0.000000e+00> : vector<7x16xf32>
    %125 = tpu.matmul %124, %108, %cst_63 {dimension_numbers = #tpu.dot_dimension_numbers<[1], [0], [0], [1], [0, 0, 1, 1], [], []>} : vector<7x7xbf16>, vector<7x16xbf16>, vector<7x16xf32> -> vector<7x16xf32>
    %126 = arith.truncf %125 : vector<7x16xf32> to vector<7x16xbf16>
    %127 = vector.extract_strided_slice %32 {offsets = [48, 0], sizes = [16, 32], strides = [1, 1]} : vector<64x32xbf16> to vector<16x32xbf16>
    %cst_64 = arith.constant dense<0.000000e+00> : vector<7x32xf32>
    %128 = tpu.matmul %126, %127, %cst_64 {dimension_numbers = #tpu.dot_dimension_numbers<[1], [0], [0], [1], [0, 0, 1, 1], [], []>} : vector<7x16xbf16>, vector<16x32xbf16>, vector<7x32xf32> -> vector<7x32xf32>
    %129 = arith.addf %105, %128 : vector<7x32xf32>
    %c0_65 = arith.constant 0 : index
    %c0_66 = arith.constant 0 : index
    %c0_67 = arith.constant 0 : index
    %130 = vector.load %arg11[%c0_65, %c0_66, %c0_67] : memref<2x1x32xf32, #tpu.memory_space<vmem>>, vector<1x1x32xf32>
    %131 = vector.shape_cast %130 : vector<1x1x32xf32> to vector<1x32xf32>
    %132 = vector.broadcast %131 : vector<1x32xf32> to vector<7x32xf32>
    %133 = arith.addf %129, %132 : vector<7x32xf32>
    %134 = arith.addf %133, %1 : vector<7x32xf32>
    %c0_68 = arith.constant 0 : index
    %c0_69 = arith.constant 0 : index
    %c0_70 = arith.constant 0 : index
    %135 = vector.load %arg12[%c0_68, %c0_69, %c0_70] : memref<2x1x32xf32, #tpu.memory_space<vmem>>, vector<1x1x32xf32>
    %136 = vector.shape_cast %135 : vector<1x1x32xf32> to vector<1x32xf32>
    %c0_71 = arith.constant 0 : index
    %c0_72 = arith.constant 0 : index
    %c0_73 = arith.constant 0 : index
    %137 = vector.load %arg13[%c0_71, %c0_72, %c0_73] : memref<2x1x32xf32, #tpu.memory_space<vmem>>, vector<1x1x32xf32>
    %138 = vector.shape_cast %137 : vector<1x1x32xf32> to vector<1x32xf32>
    %cst_74 = arith.constant dense<0.000000e+00> : vector<7xf32>
    %139 = vector.multi_reduction <add>, %134, %cst_74 [1] : vector<7x32xf32> to vector<7xf32>
    %140 = vector.shape_cast %139 : vector<7xf32> to vector<7x1xf32>
    %cst_75 = arith.constant 3.200000e+01 : f32
    %141 = vector.broadcast %cst_75 : f32 to vector<7x1xf32>
    %142 = arith.divf %140, %141 : vector<7x1xf32>
    %143 = vector.broadcast %142 : vector<7x1xf32> to vector<7x32xf32>
    %144 = arith.subf %134, %143 : vector<7x32xf32>
    %145 = arith.mulf %144, %144 : vector<7x32xf32>
    %cst_76 = arith.constant dense<0.000000e+00> : vector<7xf32>
    %146 = vector.multi_reduction <add>, %145, %cst_76 [1] : vector<7x32xf32> to vector<7xf32>
    %147 = vector.shape_cast %146 : vector<7xf32> to vector<7x1xf32>
    %cst_77 = arith.constant 3.200000e+01 : f32
    %148 = vector.broadcast %cst_77 : f32 to vector<7x1xf32>
    %149 = arith.divf %147, %148 : vector<7x1xf32>
    %150 = vector.broadcast %142 : vector<7x1xf32> to vector<7x32xf32>
    %151 = arith.subf %134, %150 : vector<7x32xf32>
    %cst_78 = arith.constant 9.99999974E-6 : f32
    %152 = vector.broadcast %cst_78 : f32 to vector<7x1xf32>
    %153 = arith.addf %149, %152 : vector<7x1xf32>
    %154 = math.rsqrt %153 : vector<7x1xf32>
    %155 = vector.broadcast %154 : vector<7x1xf32> to vector<7x32xf32>
    %156 = arith.mulf %151, %155 : vector<7x32xf32>
    %157 = vector.broadcast %136 : vector<1x32xf32> to vector<7x32xf32>
    %158 = arith.mulf %156, %157 : vector<7x32xf32>
    %159 = vector.broadcast %138 : vector<1x32xf32> to vector<7x32xf32>
    %160 = arith.addf %158, %159 : vector<7x32xf32>
    %161 = vector.broadcast %7 : vector<7x1xf32> to vector<7x32xf32>
    %162 = arith.mulf %160, %161 : vector<7x32xf32>
    %163 = arith.truncf %162 : vector<7x32xf32> to vector<7x32xbf16>
    %c0_79 = arith.constant 0 : index
    %c0_80 = arith.constant 0 : index
    %c0_81 = arith.constant 0 : index
    %164 = vector.load %arg14[%c0_79, %c0_80, %c0_81] : memref<2x32x64xbf16, #tpu.memory_space<vmem>>, vector<1x32x64xbf16>
    %165 = vector.shape_cast %164 : vector<1x32x64xbf16> to vector<32x64xbf16>
    %cst_82 = arith.constant dense<0.000000e+00> : vector<7x64xf32>
    %166 = tpu.matmul %163, %165, %cst_82 {dimension_numbers = #tpu.dot_dimension_numbers<[1], [0], [0], [1], [0, 0, 1, 1], [], []>} : vector<7x32xbf16>, vector<32x64xbf16>, vector<7x64xf32> -> vector<7x64xf32>
    %c0_83 = arith.constant 0 : index
    %c0_84 = arith.constant 0 : index
    %c0_85 = arith.constant 0 : index
    %167 = vector.load %arg15[%c0_83, %c0_84, %c0_85] : memref<2x1x64xf32, #tpu.memory_space<vmem>>, vector<1x1x64xf32>
    %168 = vector.shape_cast %167 : vector<1x1x64xf32> to vector<1x64xf32>
    %169 = vector.broadcast %168 : vector<1x64xf32> to vector<7x64xf32>
    %170 = arith.addf %166, %169 : vector<7x64xf32>
    %171 = arith.truncf %170 : vector<7x64xf32> to vector<7x64xbf16>
    %c0_86 = arith.constant 0 : index
    %c0_87 = arith.constant 0 : index
    %c0_88 = arith.constant 0 : index
    %172 = vector.load %arg16[%c0_86, %c0_87, %c0_88] : memref<2x32x64xbf16, #tpu.memory_space<vmem>>, vector<1x32x64xbf16>
    %173 = vector.shape_cast %172 : vector<1x32x64xbf16> to vector<32x64xbf16>
    %cst_89 = arith.constant dense<0.000000e+00> : vector<8x64xf32>
    %174 = tpu.matmul %3, %173, %cst_89 {dimension_numbers = #tpu.dot_dimension_numbers<[1], [0], [0], [1], [0, 0, 1, 1], [], []>} : vector<8x32xbf16>, vector<32x64xbf16>, vector<8x64xf32> -> vector<8x64xf32>
    %c0_90 = arith.constant 0 : index
    %c0_91 = arith.constant 0 : index
    %c0_92 = arith.constant 0 : index
    %175 = vector.load %arg17[%c0_90, %c0_91, %c0_92] : memref<2x1x64xf32, #tpu.memory_space<vmem>>, vector<1x1x64xf32>
    %176 = vector.shape_cast %175 : vector<1x1x64xf32> to vector<1x64xf32>
    %177 = vector.broadcast %176 : vector<1x64xf32> to vector<8x64xf32>
    %178 = arith.addf %174, %177 : vector<8x64xf32>
    %179 = arith.truncf %178 : vector<8x64xf32> to vector<8x64xbf16>
    %c0_93 = arith.constant 0 : index
    %c0_94 = arith.constant 0 : index
    %c0_95 = arith.constant 0 : index
    %180 = vector.load %arg18[%c0_93, %c0_94, %c0_95] : memref<2x32x64xbf16, #tpu.memory_space<vmem>>, vector<1x32x64xbf16>
    %181 = vector.shape_cast %180 : vector<1x32x64xbf16> to vector<32x64xbf16>
    %cst_96 = arith.constant dense<0.000000e+00> : vector<8x64xf32>
    %182 = tpu.matmul %5, %181, %cst_96 {dimension_numbers = #tpu.dot_dimension_numbers<[1], [0], [0], [1], [0, 0, 1, 1], [], []>} : vector<8x32xbf16>, vector<32x64xbf16>, vector<8x64xf32> -> vector<8x64xf32>
    %c0_97 = arith.constant 0 : index
    %c0_98 = arith.constant 0 : index
    %c0_99 = arith.constant 0 : index
    %183 = vector.load %arg19[%c0_97, %c0_98, %c0_99] : memref<2x1x64xf32, #tpu.memory_space<vmem>>, vector<1x1x64xf32>
    %184 = vector.shape_cast %183 : vector<1x1x64xf32> to vector<1x64xf32>
    %185 = vector.broadcast %184 : vector<1x64xf32> to vector<8x64xf32>
    %186 = arith.addf %182, %185 : vector<8x64xf32>
    %187 = arith.truncf %186 : vector<8x64xf32> to vector<8x64xbf16>
    %c0_100 = arith.constant 0 : index
    %c0_101 = arith.constant 0 : index
    %c0_102 = arith.constant 0 : index
    %188 = vector.load %arg20[%c0_100, %c0_101, %c0_102] : memref<2x64x32xbf16, #tpu.memory_space<vmem>>, vector<1x64x32xbf16>
    %189 = vector.shape_cast %188 : vector<1x64x32xbf16> to vector<64x32xbf16>
    %cst_103 = arith.constant 0.000000e+00 : f32
    %190 = vector.broadcast %cst_103 : f32 to vector<7x32xf32>
    %191 = vector.extract_strided_slice %171 {offsets = [0, 0], sizes = [7, 16], strides = [1, 1]} : vector<7x64xbf16> to vector<7x16xbf16>
    %192 = vector.extract_strided_slice %179 {offsets = [0, 0], sizes = [8, 16], strides = [1, 1]} : vector<8x64xbf16> to vector<8x16xbf16>
    %193 = vector.extract_strided_slice %179 {offsets = [0, 32], sizes = [8, 16], strides = [1, 1]} : vector<8x64xbf16> to vector<8x16xbf16>
    %cst_104 = arith.constant dense<0.000000e+00> : vector<7x8xf32>
    %194 = tpu.matmul %191, %192, %cst_104 {dimension_numbers = #tpu.dot_dimension_numbers<[1], [1], [0], [0], [0, 0, 1, 0], [], []>} : vector<7x16xbf16>, vector<8x16xbf16>, vector<7x8xf32> -> vector<7x8xf32>
    %195 = vector.broadcast %19 : vector<1x8xf32> to vector<7x8xf32>
    %196 = arith.addf %194, %195 : vector<7x8xf32>
    %cst_105 = arith.constant dense<0xFF800000> : vector<7xf32>
    %197 = vector.multi_reduction <maximumf>, %196, %cst_105 [1] : vector<7x8xf32> to vector<7xf32>
    %198 = vector.shape_cast %197 : vector<7xf32> to vector<7x1xf32>
    %199 = vector.broadcast %198 : vector<7x1xf32> to vector<7x8xf32>
    %200 = arith.subf %196, %199 : vector<7x8xf32>
    %201 = math.exp %200 : vector<7x8xf32>
    %cst_106 = arith.constant dense<0.000000e+00> : vector<7xf32>
    %202 = vector.multi_reduction <add>, %201, %cst_106 [1] : vector<7x8xf32> to vector<7xf32>
    %203 = vector.shape_cast %202 : vector<7xf32> to vector<7x1xf32>
    %204 = tpu.reciprocal %203 {approx = true} : vector<7x1xf32> -> vector<7x1xf32>
    %205 = vector.broadcast %204 : vector<7x1xf32> to vector<7x8xf32>
    %206 = arith.mulf %201, %205 : vector<7x8xf32>
    %c0_107 = arith.constant 0 : index
    %c0_108 = arith.constant 0 : index
    %c0_109 = arith.constant 0 : index
    %c0_110 = arith.constant 0 : index
    %207 = vector.load %arg32[%c0_107, %c0_108, %c0_109, %c0_110] : memref<1x4x7x8xf32, #tpu.memory_space<vmem>>, vector<1x1x7x8xf32>
    %208 = vector.shape_cast %207 : vector<1x1x7x8xf32> to vector<7x8xf32>
    %209 = vector.shape_cast %206 : vector<7x8xf32> to vector<1x1x7x8xf32>
    tpu.vector_store %arg32[%c0_107, %c0_108, %c0_109, %c0_110], %209 {strides = array<i32>} : memref<1x4x7x8xf32, #tpu.memory_space<vmem>>, vector<1x1x7x8xf32>,
    %210 = arith.truncf %206 : vector<7x8xf32> to vector<7x8xbf16>
    %cst_111 = arith.constant dense<0.000000e+00> : vector<7x16xf32>
    %211 = tpu.matmul %210, %193, %cst_111 {dimension_numbers = #tpu.dot_dimension_numbers<[1], [0], [0], [1], [0, 0, 1, 1], [], []>} : vector<7x8xbf16>, vector<8x16xbf16>, vector<7x16xf32> -> vector<7x16xf32>
    %212 = arith.truncf %211 : vector<7x16xf32> to vector<7x16xbf16>
    %213 = vector.extract_strided_slice %189 {offsets = [0, 0], sizes = [16, 32], strides = [1, 1]} : vector<64x32xbf16> to vector<16x32xbf16>
    %cst_112 = arith.constant dense<0.000000e+00> : vector<7x32xf32>
    %214 = tpu.matmul %212, %213, %cst_112 {dimension_numbers = #tpu.dot_dimension_numbers<[1], [0], [0], [1], [0, 0, 1, 1], [], []>} : vector<7x16xbf16>, vector<16x32xbf16>, vector<7x32xf32> -> vector<7x32xf32>
    %215 = arith.addf %190, %214 : vector<7x32xf32>
    %216 = vector.extract_strided_slice %171 {offsets = [0, 16], sizes = [7, 16], strides = [1, 1]} : vector<7x64xbf16> to vector<7x16xbf16>
    %217 = vector.extract_strided_slice %179 {offsets = [0, 16], sizes = [8, 16], strides = [1, 1]} : vector<8x64xbf16> to vector<8x16xbf16>
    %218 = vector.extract_strided_slice %179 {offsets = [0, 48], sizes = [8, 16], strides = [1, 1]} : vector<8x64xbf16> to vector<8x16xbf16>
    %cst_113 = arith.constant dense<0.000000e+00> : vector<7x8xf32>
    %219 = tpu.matmul %216, %217, %cst_113 {dimension_numbers = #tpu.dot_dimension_numbers<[1], [1], [0], [0], [0, 0, 1, 0], [], []>} : vector<7x16xbf16>, vector<8x16xbf16>, vector<7x8xf32> -> vector<7x8xf32>
    %220 = vector.broadcast %19 : vector<1x8xf32> to vector<7x8xf32>
    %221 = arith.addf %219, %220 : vector<7x8xf32>
    %cst_114 = arith.constant dense<0xFF800000> : vector<7xf32>
    %222 = vector.multi_reduction <maximumf>, %221, %cst_114 [1] : vector<7x8xf32> to vector<7xf32>
    %223 = vector.shape_cast %222 : vector<7xf32> to vector<7x1xf32>
    %224 = vector.broadcast %223 : vector<7x1xf32> to vector<7x8xf32>
    %225 = arith.subf %221, %224 : vector<7x8xf32>
    %226 = math.exp %225 : vector<7x8xf32>
    %cst_115 = arith.constant dense<0.000000e+00> : vector<7xf32>
    %227 = vector.multi_reduction <add>, %226, %cst_115 [1] : vector<7x8xf32> to vector<7xf32>
    %228 = vector.shape_cast %227 : vector<7xf32> to vector<7x1xf32>
    %229 = tpu.reciprocal %228 {approx = true} : vector<7x1xf32> -> vector<7x1xf32>
    %230 = vector.broadcast %229 : vector<7x1xf32> to vector<7x8xf32>
    %231 = arith.mulf %226, %230 : vector<7x8xf32>
    %c0_116 = arith.constant 0 : index
    %c1_117 = arith.constant 1 : index
    %c0_118 = arith.constant 0 : index
    %c0_119 = arith.constant 0 : index
    %232 = vector.load %arg32[%c0_116, %c1_117, %c0_118, %c0_119] : memref<1x4x7x8xf32, #tpu.memory_space<vmem>>, vector<1x1x7x8xf32>
    %233 = vector.shape_cast %232 : vector<1x1x7x8xf32> to vector<7x8xf32>
    %234 = vector.shape_cast %231 : vector<7x8xf32> to vector<1x1x7x8xf32>
    tpu.vector_store %arg32[%c0_116, %c1_117, %c0_118, %c0_119], %234 {strides = array<i32>} : memref<1x4x7x8xf32, #tpu.memory_space<vmem>>, vector<1x1x7x8xf32>,
    %235 = arith.truncf %231 : vector<7x8xf32> to vector<7x8xbf16>
    %cst_120 = arith.constant dense<0.000000e+00> : vector<7x16xf32>
    %236 = tpu.matmul %235, %218, %cst_120 {dimension_numbers = #tpu.dot_dimension_numbers<[1], [0], [0], [1], [0, 0, 1, 1], [], []>} : vector<7x8xbf16>, vector<8x16xbf16>, vector<7x16xf32> -> vector<7x16xf32>
    %237 = arith.truncf %236 : vector<7x16xf32> to vector<7x16xbf16>
    %238 = vector.extract_strided_slice %189 {offsets = [16, 0], sizes = [16, 32], strides = [1, 1]} : vector<64x32xbf16> to vector<16x32xbf16>
    %cst_121 = arith.constant dense<0.000000e+00> : vector<7x32xf32>
    %239 = tpu.matmul %237, %238, %cst_121 {dimension_numbers = #tpu.dot_dimension_numbers<[1], [0], [0], [1], [0, 0, 1, 1], [], []>} : vector<7x16xbf16>, vector<16x32xbf16>, vector<7x32xf32> -> vector<7x32xf32>
    %240 = arith.addf %215, %239 : vector<7x32xf32>
    %241 = vector.extract_strided_slice %171 {offsets = [0, 32], sizes = [7, 16], strides = [1, 1]} : vector<7x64xbf16> to vector<7x16xbf16>
    %242 = vector.extract_strided_slice %187 {offsets = [0, 0], sizes = [8, 16], strides = [1, 1]} : vector<8x64xbf16> to vector<8x16xbf16>
    %243 = vector.extract_strided_slice %187 {offsets = [0, 32], sizes = [8, 16], strides = [1, 1]} : vector<8x64xbf16> to vector<8x16xbf16>
    %cst_122 = arith.constant dense<0.000000e+00> : vector<7x8xf32>
    %244 = tpu.matmul %241, %242, %cst_122 {dimension_numbers = #tpu.dot_dimension_numbers<[1], [1], [0], [0], [0, 0, 1, 0], [], []>} : vector<7x16xbf16>, vector<8x16xbf16>, vector<7x8xf32> -> vector<7x8xf32>
    %245 = vector.broadcast %21 : vector<1x8xf32> to vector<7x8xf32>
    %246 = arith.addf %244, %245 : vector<7x8xf32>
    %cst_123 = arith.constant dense<0xFF800000> : vector<7xf32>
    %247 = vector.multi_reduction <maximumf>, %246, %cst_123 [1] : vector<7x8xf32> to vector<7xf32>
    %248 = vector.shape_cast %247 : vector<7xf32> to vector<7x1xf32>
    %249 = vector.broadcast %248 : vector<7x1xf32> to vector<7x8xf32>
    %250 = arith.subf %246, %249 : vector<7x8xf32>
    %251 = math.exp %250 : vector<7x8xf32>
    %cst_124 = arith.constant dense<0.000000e+00> : vector<7xf32>
    %252 = vector.multi_reduction <add>, %251, %cst_124 [1] : vector<7x8xf32> to vector<7xf32>
    %253 = vector.shape_cast %252 : vector<7xf32> to vector<7x1xf32>
    %254 = tpu.reciprocal %253 {approx = true} : vector<7x1xf32> -> vector<7x1xf32>
    %255 = vector.broadcast %254 : vector<7x1xf32> to vector<7x8xf32>
    %256 = arith.mulf %251, %255 : vector<7x8xf32>
    %c0_125 = arith.constant 0 : index
    %c0_126 = arith.constant 0 : index
    %c0_127 = arith.constant 0 : index
    %c0_128 = arith.constant 0 : index
    %257 = vector.load %arg33[%c0_125, %c0_126, %c0_127, %c0_128] : memref<1x4x7x8xf32, #tpu.memory_space<vmem>>, vector<1x1x7x8xf32>
    %258 = vector.shape_cast %257 : vector<1x1x7x8xf32> to vector<7x8xf32>
    %259 = vector.shape_cast %256 : vector<7x8xf32> to vector<1x1x7x8xf32>
    tpu.vector_store %arg33[%c0_125, %c0_126, %c0_127, %c0_128], %259 {strides = array<i32>} : memref<1x4x7x8xf32, #tpu.memory_space<vmem>>, vector<1x1x7x8xf32>,
    %260 = arith.truncf %256 : vector<7x8xf32> to vector<7x8xbf16>
    %cst_129 = arith.constant dense<0.000000e+00> : vector<7x16xf32>
    %261 = tpu.matmul %260, %243, %cst_129 {dimension_numbers = #tpu.dot_dimension_numbers<[1], [0], [0], [1], [0, 0, 1, 1], [], []>} : vector<7x8xbf16>, vector<8x16xbf16>, vector<7x16xf32> -> vector<7x16xf32>
    %262 = arith.truncf %261 : vector<7x16xf32> to vector<7x16xbf16>
    %263 = vector.extract_strided_slice %189 {offsets = [32, 0], sizes = [16, 32], strides = [1, 1]} : vector<64x32xbf16> to vector<16x32xbf16>
    %cst_130 = arith.constant dense<0.000000e+00> : vector<7x32xf32>
    %264 = tpu.matmul %262, %263, %cst_130 {dimension_numbers = #tpu.dot_dimension_numbers<[1], [0], [0], [1], [0, 0, 1, 1], [], []>} : vector<7x16xbf16>, vector<16x32xbf16>, vector<7x32xf32> -> vector<7x32xf32>
    %265 = arith.addf %240, %264 : vector<7x32xf32>
    %266 = vector.extract_strided_slice %171 {offsets = [0, 48], sizes = [7, 16], strides = [1, 1]} : vector<7x64xbf16> to vector<7x16xbf16>
    %267 = vector.extract_strided_slice %187 {offsets = [0, 16], sizes = [8, 16], strides = [1, 1]} : vector<8x64xbf16> to vector<8x16xbf16>
    %268 = vector.extract_strided_slice %187 {offsets = [0, 48], sizes = [8, 16], strides = [1, 1]} : vector<8x64xbf16> to vector<8x16xbf16>
    %cst_131 = arith.constant dense<0.000000e+00> : vector<7x8xf32>
    %269 = tpu.matmul %266, %267, %cst_131 {dimension_numbers = #tpu.dot_dimension_numbers<[1], [1], [0], [0], [0, 0, 1, 0], [], []>} : vector<7x16xbf16>, vector<8x16xbf16>, vector<7x8xf32> -> vector<7x8xf32>
    %270 = vector.broadcast %21 : vector<1x8xf32> to vector<7x8xf32>
    %271 = arith.addf %269, %270 : vector<7x8xf32>
    %cst_132 = arith.constant dense<0xFF800000> : vector<7xf32>
    %272 = vector.multi_reduction <maximumf>, %271, %cst_132 [1] : vector<7x8xf32> to vector<7xf32>
    %273 = vector.shape_cast %272 : vector<7xf32> to vector<7x1xf32>
    %274 = vector.broadcast %273 : vector<7x1xf32> to vector<7x8xf32>
    %275 = arith.subf %271, %274 : vector<7x8xf32>
    %276 = math.exp %275 : vector<7x8xf32>
    %cst_133 = arith.constant dense<0.000000e+00> : vector<7xf32>
    %277 = vector.multi_reduction <add>, %276, %cst_133 [1] : vector<7x8xf32> to vector<7xf32>
    %278 = vector.shape_cast %277 : vector<7xf32> to vector<7x1xf32>
    %279 = tpu.reciprocal %278 {approx = true} : vector<7x1xf32> -> vector<7x1xf32>
    %280 = vector.broadcast %279 : vector<7x1xf32> to vector<7x8xf32>
    %281 = arith.mulf %276, %280 : vector<7x8xf32>
    %c0_134 = arith.constant 0 : index
    %c1_135 = arith.constant 1 : index
    %c0_136 = arith.constant 0 : index
    %c0_137 = arith.constant 0 : index
    %282 = vector.load %arg33[%c0_134, %c1_135, %c0_136, %c0_137] : memref<1x4x7x8xf32, #tpu.memory_space<vmem>>, vector<1x1x7x8xf32>
    %283 = vector.shape_cast %282 : vector<1x1x7x8xf32> to vector<7x8xf32>
    %284 = vector.shape_cast %281 : vector<7x8xf32> to vector<1x1x7x8xf32>
    tpu.vector_store %arg33[%c0_134, %c1_135, %c0_136, %c0_137], %284 {strides = array<i32>} : memref<1x4x7x8xf32, #tpu.memory_space<vmem>>, vector<1x1x7x8xf32>,
    %285 = arith.truncf %281 : vector<7x8xf32> to vector<7x8xbf16>
    %cst_138 = arith.constant dense<0.000000e+00> : vector<7x16xf32>
    %286 = tpu.matmul %285, %268, %cst_138 {dimension_numbers = #tpu.dot_dimension_numbers<[1], [0], [0], [1], [0, 0, 1, 1], [], []>} : vector<7x8xbf16>, vector<8x16xbf16>, vector<7x16xf32> -> vector<7x16xf32>
    %287 = arith.truncf %286 : vector<7x16xf32> to vector<7x16xbf16>
    %288 = vector.extract_strided_slice %189 {offsets = [48, 0], sizes = [16, 32], strides = [1, 1]} : vector<64x32xbf16> to vector<16x32xbf16>
    %cst_139 = arith.constant dense<0.000000e+00> : vector<7x32xf32>
    %289 = tpu.matmul %287, %288, %cst_139 {dimension_numbers = #tpu.dot_dimension_numbers<[1], [0], [0], [1], [0, 0, 1, 1], [], []>} : vector<7x16xbf16>, vector<16x32xbf16>, vector<7x32xf32> -> vector<7x32xf32>
    %290 = arith.addf %265, %289 : vector<7x32xf32>
    %c0_140 = arith.constant 0 : index
    %c0_141 = arith.constant 0 : index
    %c0_142 = arith.constant 0 : index
    %291 = vector.load %arg21[%c0_140, %c0_141, %c0_142] : memref<2x1x32xf32, #tpu.memory_space<vmem>>, vector<1x1x32xf32>
    %292 = vector.shape_cast %291 : vector<1x1x32xf32> to vector<1x32xf32>
    %293 = vector.broadcast %292 : vector<1x32xf32> to vector<7x32xf32>
    %294 = arith.addf %290, %293 : vector<7x32xf32>
    %295 = arith.addf %294, %162 : vector<7x32xf32>
    %c0_143 = arith.constant 0 : index
    %c0_144 = arith.constant 0 : index
    %c0_145 = arith.constant 0 : index
    %296 = vector.load %arg22[%c0_143, %c0_144, %c0_145] : memref<2x1x32xf32, #tpu.memory_space<vmem>>, vector<1x1x32xf32>
    %297 = vector.shape_cast %296 : vector<1x1x32xf32> to vector<1x32xf32>
    %c0_146 = arith.constant 0 : index
    %c0_147 = arith.constant 0 : index
    %c0_148 = arith.constant 0 : index
    %298 = vector.load %arg23[%c0_146, %c0_147, %c0_148] : memref<2x1x32xf32, #tpu.memory_space<vmem>>, vector<1x1x32xf32>
    %299 = vector.shape_cast %298 : vector<1x1x32xf32> to vector<1x32xf32>
    %cst_149 = arith.constant dense<0.000000e+00> : vector<7xf32>
    %300 = vector.multi_reduction <add>, %295, %cst_149 [1] : vector<7x32xf32> to vector<7xf32>
    %301 = vector.shape_cast %300 : vector<7xf32> to vector<7x1xf32>
    %cst_150 = arith.constant 3.200000e+01 : f32
    %302 = vector.broadcast %cst_150 : f32 to vector<7x1xf32>
    %303 = arith.divf %301, %302 : vector<7x1xf32>
    %304 = vector.broadcast %303 : vector<7x1xf32> to vector<7x32xf32>
    %305 = arith.subf %295, %304 : vector<7x32xf32>
    %306 = arith.mulf %305, %305 : vector<7x32xf32>
    %cst_151 = arith.constant dense<0.000000e+00> : vector<7xf32>
    %307 = vector.multi_reduction <add>, %306, %cst_151 [1] : vector<7x32xf32> to vector<7xf32>
    %308 = vector.shape_cast %307 : vector<7xf32> to vector<7x1xf32>
    %cst_152 = arith.constant 3.200000e+01 : f32
    %309 = vector.broadcast %cst_152 : f32 to vector<7x1xf32>
    %310 = arith.divf %308, %309 : vector<7x1xf32>
    %311 = vector.broadcast %303 : vector<7x1xf32> to vector<7x32xf32>
    %312 = arith.subf %295, %311 : vector<7x32xf32>
    %cst_153 = arith.constant 9.99999974E-6 : f32
    %313 = vector.broadcast %cst_153 : f32 to vector<7x1xf32>
    %314 = arith.addf %310, %313 : vector<7x1xf32>
    %315 = math.rsqrt %314 : vector<7x1xf32>
    %316 = vector.broadcast %315 : vector<7x1xf32> to vector<7x32xf32>
    %317 = arith.mulf %312, %316 : vector<7x32xf32>
    %318 = vector.broadcast %297 : vector<1x32xf32> to vector<7x32xf32>
    %319 = arith.mulf %317, %318 : vector<7x32xf32>
    %320 = vector.broadcast %299 : vector<1x32xf32> to vector<7x32xf32>
    %321 = arith.addf %319, %320 : vector<7x32xf32>
    %322 = vector.broadcast %7 : vector<7x1xf32> to vector<7x32xf32>
    %323 = arith.mulf %321, %322 : vector<7x32xf32>
    %324 = arith.truncf %323 : vector<7x32xf32> to vector<7x32xbf16>
    %c0_154 = arith.constant 0 : index
    %c0_155 = arith.constant 0 : index
    %c0_156 = arith.constant 0 : index
    %325 = vector.load %arg24[%c0_154, %c0_155, %c0_156] : memref<2x32x64xbf16, #tpu.memory_space<vmem>>, vector<1x32x64xbf16>
    %326 = vector.shape_cast %325 : vector<1x32x64xbf16> to vector<32x64xbf16>
    %cst_157 = arith.constant dense<0.000000e+00> : vector<7x64xf32>
    %327 = tpu.matmul %324, %326, %cst_157 {dimension_numbers = #tpu.dot_dimension_numbers<[1], [0], [0], [1], [0, 0, 1, 1], [], []>} : vector<7x32xbf16>, vector<32x64xbf16>, vector<7x64xf32> -> vector<7x64xf32>
    %c0_158 = arith.constant 0 : index
    %c0_159 = arith.constant 0 : index
    %c0_160 = arith.constant 0 : index
    %328 = vector.load %arg25[%c0_158, %c0_159, %c0_160] : memref<2x1x64xf32, #tpu.memory_space<vmem>>, vector<1x1x64xf32>
    %329 = vector.shape_cast %328 : vector<1x1x64xf32> to vector<1x64xf32>
    %330 = vector.broadcast %329 : vector<1x64xf32> to vector<7x64xf32>
    %331 = arith.addf %327, %330 : vector<7x64xf32>
    %cst_161 = arith.constant 0.000000e+00 : f32
    %332 = vector.broadcast %cst_161 : f32 to vector<7x64xf32>
    %333 = arith.maximumf %331, %332 : vector<7x64xf32>
    %334 = arith.truncf %333 : vector<7x64xf32> to vector<7x64xbf16>
    %c0_162 = arith.constant 0 : index
    %c0_163 = arith.constant 0 : index
    %c0_164 = arith.constant 0 : index
    %335 = vector.load %arg26[%c0_162, %c0_163, %c0_164] : memref<2x64x32xbf16, #tpu.memory_space<vmem>>, vector<1x64x32xbf16>
    %336 = vector.shape_cast %335 : vector<1x64x32xbf16> to vector<64x32xbf16>
    %cst_165 = arith.constant dense<0.000000e+00> : vector<7x32xf32>
    %337 = tpu.matmul %334, %336, %cst_165 {dimension_numbers = #tpu.dot_dimension_numbers<[1], [0], [0], [1], [0, 0, 1, 1], [], []>} : vector<7x64xbf16>, vector<64x32xbf16>, vector<7x32xf32> -> vector<7x32xf32>
    %c0_166 = arith.constant 0 : index
    %c0_167 = arith.constant 0 : index
    %c0_168 = arith.constant 0 : index
    %338 = vector.load %arg27[%c0_166, %c0_167, %c0_168] : memref<2x1x32xf32, #tpu.memory_space<vmem>>, vector<1x1x32xf32>
    %339 = vector.shape_cast %338 : vector<1x1x32xf32> to vector<1x32xf32>
    %340 = vector.broadcast %339 : vector<1x32xf32> to vector<7x32xf32>
    %341 = arith.addf %337, %340 : vector<7x32xf32>
    %342 = arith.addf %341, %323 : vector<7x32xf32>
    %c0_169 = arith.constant 0 : index
    %c0_170 = arith.constant 0 : index
    %c0_171 = arith.constant 0 : index
    %343 = vector.load %arg28[%c0_169, %c0_170, %c0_171] : memref<2x1x32xf32, #tpu.memory_space<vmem>>, vector<1x1x32xf32>
    %344 = vector.shape_cast %343 : vector<1x1x32xf32> to vector<1x32xf32>
    %c0_172 = arith.constant 0 : index
    %c0_173 = arith.constant 0 : index
    %c0_174 = arith.constant 0 : index
    %345 = vector.load %arg29[%c0_172, %c0_173, %c0_174] : memref<2x1x32xf32, #tpu.memory_space<vmem>>, vector<1x1x32xf32>
    %346 = vector.shape_cast %345 : vector<1x1x32xf32> to vector<1x32xf32>
    %cst_175 = arith.constant dense<0.000000e+00> : vector<7xf32>
    %347 = vector.multi_reduction <add>, %342, %cst_175 [1] : vector<7x32xf32> to vector<7xf32>
    %348 = vector.shape_cast %347 : vector<7xf32> to vector<7x1xf32>
    %cst_176 = arith.constant 3.200000e+01 : f32
    %349 = vector.broadcast %cst_176 : f32 to vector<7x1xf32>
    %350 = arith.divf %348, %349 : vector<7x1xf32>
    %351 = vector.broadcast %350 : vector<7x1xf32> to vector<7x32xf32>
    %352 = arith.subf %342, %351 : vector<7x32xf32>
    %353 = arith.mulf %352, %352 : vector<7x32xf32>
    %cst_177 = arith.constant dense<0.000000e+00> : vector<7xf32>
    %354 = vector.multi_reduction <add>, %353, %cst_177 [1] : vector<7x32xf32> to vector<7xf32>
    %355 = vector.shape_cast %354 : vector<7xf32> to vector<7x1xf32>
    %cst_178 = arith.constant 3.200000e+01 : f32
    %356 = vector.broadcast %cst_178 : f32 to vector<7x1xf32>
    %357 = arith.divf %355, %356 : vector<7x1xf32>
    %358 = vector.broadcast %350 : vector<7x1xf32> to vector<7x32xf32>
    %359 = arith.subf %342, %358 : vector<7x32xf32>
    %cst_179 = arith.constant 9.99999974E-6 : f32
    %360 = vector.broadcast %cst_179 : f32 to vector<7x1xf32>
    %361 = arith.addf %357, %360 : vector<7x1xf32>
    %362 = math.rsqrt %361 : vector<7x1xf32>
    %363 = vector.broadcast %362 : vector<7x1xf32> to vector<7x32xf32>
    %364 = arith.mulf %359, %363 : vector<7x32xf32>
    %365 = vector.broadcast %344 : vector<1x32xf32> to vector<7x32xf32>
    %366 = arith.mulf %364, %365 : vector<7x32xf32>
    %367 = vector.broadcast %346 : vector<1x32xf32> to vector<7x32xf32>
    %368 = arith.addf %366, %367 : vector<7x32xf32>
    %369 = vector.broadcast %7 : vector<7x1xf32> to vector<7x32xf32>
    %370 = arith.mulf %368, %369 : vector<7x32xf32>
    %371 = arith.truncf %370 : vector<7x32xf32> to vector<7x32xbf16>
    %c1_180 = arith.constant 1 : index
    %c0_181 = arith.constant 0 : index
    %c0_182 = arith.constant 0 : index
    %372 = vector.load %arg8[%c1_180, %c0_181, %c0_182] : memref<2x32x192xbf16, #tpu.memory_space<vmem>>, vector<1x32x192xbf16>
    %373 = vector.shape_cast %372 : vector<1x32x192xbf16> to vector<32x192xbf16>
    %cst_183 = arith.constant dense<0.000000e+00> : vector<7x192xf32>
    %374 = tpu.matmul %371, %373, %cst_183 {dimension_numbers = #tpu.dot_dimension_numbers<[1], [0], [0], [1], [0, 0, 1, 1], [], []>} : vector<7x32xbf16>, vector<32x192xbf16>, vector<7x192xf32> -> vector<7x192xf32>
    %c1_184 = arith.constant 1 : index
    %c0_185 = arith.constant 0 : index
    %c0_186 = arith.constant 0 : index
    %375 = vector.load %arg9[%c1_184, %c0_185, %c0_186] : memref<2x1x192xf32, #tpu.memory_space<vmem>>, vector<1x1x192xf32>
    %376 = vector.shape_cast %375 : vector<1x1x192xf32> to vector<1x192xf32>
    %377 = vector.broadcast %376 : vector<1x192xf32> to vector<7x192xf32>
    %378 = arith.addf %374, %377 : vector<7x192xf32>
    %379 = arith.truncf %378 : vector<7x192xf32> to vector<7x192xbf16>
    %c1_187 = arith.constant 1 : index
    %c0_188 = arith.constant 0 : index
    %c0_189 = arith.constant 0 : index
    %380 = vector.load %arg10[%c1_187, %c0_188, %c0_189] : memref<2x64x32xbf16, #tpu.memory_space<vmem>>, vector<1x64x32xbf16>
    %381 = vector.shape_cast %380 : vector<1x64x32xbf16> to vector<64x32xbf16>
    %cst_190 = arith.constant 0.000000e+00 : f32
    %382 = vector.broadcast %cst_190 : f32 to vector<7x32xf32>
    %383 = vector.extract_strided_slice %379 {offsets = [0, 0], sizes = [7, 16], strides = [1, 1]} : vector<7x192xbf16> to vector<7x16xbf16>
    %384 = vector.extract_strided_slice %379 {offsets = [0, 64], sizes = [7, 16], strides = [1, 1]} : vector<7x192xbf16> to vector<7x16xbf16>
    %385 = vector.extract_strided_slice %379 {offsets = [0, 128], sizes = [7, 16], strides = [1, 1]} : vector<7x192xbf16> to vector<7x16xbf16>
    %cst_191 = arith.constant dense<0.000000e+00> : vector<7x7xf32>
    %386 = tpu.matmul %383, %384, %cst_191 {dimension_numbers = #tpu.dot_dimension_numbers<[1], [1], [0], [0], [0, 0, 1, 0], [], []>} : vector<7x16xbf16>, vector<7x16xbf16>, vector<7x7xf32> -> vector<7x7xf32>
    %387 = arith.addf %386, %17 : vector<7x7xf32>
    %cst_192 = arith.constant dense<0xFF800000> : vector<7xf32>
    %388 = vector.multi_reduction <maximumf>, %387, %cst_192 [1] : vector<7x7xf32> to vector<7xf32>
    %389 = vector.shape_cast %388 : vector<7xf32> to vector<7x1xf32>
    %390 = vector.broadcast %389 : vector<7x1xf32> to vector<7x7xf32>
    %391 = arith.subf %387, %390 : vector<7x7xf32>
    %392 = math.exp %391 : vector<7x7xf32>
    %cst_193 = arith.constant dense<0.000000e+00> : vector<7xf32>
    %393 = vector.multi_reduction <add>, %392, %cst_193 [1] : vector<7x7xf32> to vector<7xf32>
    %394 = vector.shape_cast %393 : vector<7xf32> to vector<7x1xf32>
    %395 = tpu.reciprocal %394 {approx = true} : vector<7x1xf32> -> vector<7x1xf32>
    %396 = vector.broadcast %395 : vector<7x1xf32> to vector<7x7xf32>
    %397 = arith.mulf %392, %396 : vector<7x7xf32>
    %c0_194 = arith.constant 0 : index
    %c4 = arith.constant 4 : index
    %c0_195 = arith.constant 0 : index
    %c0_196 = arith.constant 0 : index
    %398 = vector.load %arg31[%c0_194, %c4, %c0_195, %c0_196] : memref<1x8x7x7xf32, #tpu.memory_space<vmem>>, vector<1x1x7x7xf32>
    %399 = vector.shape_cast %398 : vector<1x1x7x7xf32> to vector<7x7xf32>
    %400 = vector.shape_cast %397 : vector<7x7xf32> to vector<1x1x7x7xf32>
    tpu.vector_store %arg31[%c0_194, %c4, %c0_195, %c0_196], %400 {strides = array<i32>} : memref<1x8x7x7xf32, #tpu.memory_space<vmem>>, vector<1x1x7x7xf32>,
    %401 = arith.truncf %397 : vector<7x7xf32> to vector<7x7xbf16>
    %cst_197 = arith.constant dense<0.000000e+00> : vector<7x16xf32>
    %402 = tpu.matmul %401, %385, %cst_197 {dimension_numbers = #tpu.dot_dimension_numbers<[1], [0], [0], [1], [0, 0, 1, 1], [], []>} : vector<7x7xbf16>, vector<7x16xbf16>, vector<7x16xf32> -> vector<7x16xf32>
    %403 = arith.truncf %402 : vector<7x16xf32> to vector<7x16xbf16>
    %404 = vector.extract_strided_slice %381 {offsets = [0, 0], sizes = [16, 32], strides = [1, 1]} : vector<64x32xbf16> to vector<16x32xbf16>
    %cst_198 = arith.constant dense<0.000000e+00> : vector<7x32xf32>
    %405 = tpu.matmul %403, %404, %cst_198 {dimension_numbers = #tpu.dot_dimension_numbers<[1], [0], [0], [1], [0, 0, 1, 1], [], []>} : vector<7x16xbf16>, vector<16x32xbf16>, vector<7x32xf32> -> vector<7x32xf32>
    %406 = arith.addf %382, %405 : vector<7x32xf32>
    %407 = vector.extract_strided_slice %379 {offsets = [0, 16], sizes = [7, 16], strides = [1, 1]} : vector<7x192xbf16> to vector<7x16xbf16>
    %408 = vector.extract_strided_slice %379 {offsets = [0, 80], sizes = [7, 16], strides = [1, 1]} : vector<7x192xbf16> to vector<7x16xbf16>
    %409 = vector.extract_strided_slice %379 {offsets = [0, 144], sizes = [7, 16], strides = [1, 1]} : vector<7x192xbf16> to vector<7x16xbf16>
    %cst_199 = arith.constant dense<0.000000e+00> : vector<7x7xf32>
    %410 = tpu.matmul %407, %408, %cst_199 {dimension_numbers = #tpu.dot_dimension_numbers<[1], [1], [0], [0], [0, 0, 1, 0], [], []>} : vector<7x16xbf16>, vector<7x16xbf16>, vector<7x7xf32> -> vector<7x7xf32>
    %411 = arith.addf %410, %17 : vector<7x7xf32>
    %cst_200 = arith.constant dense<0xFF800000> : vector<7xf32>
    %412 = vector.multi_reduction <maximumf>, %411, %cst_200 [1] : vector<7x7xf32> to vector<7xf32>
    %413 = vector.shape_cast %412 : vector<7xf32> to vector<7x1xf32>
    %414 = vector.broadcast %413 : vector<7x1xf32> to vector<7x7xf32>
    %415 = arith.subf %411, %414 : vector<7x7xf32>
    %416 = math.exp %415 : vector<7x7xf32>
    %cst_201 = arith.constant dense<0.000000e+00> : vector<7xf32>
    %417 = vector.multi_reduction <add>, %416, %cst_201 [1] : vector<7x7xf32> to vector<7xf32>
    %418 = vector.shape_cast %417 : vector<7xf32> to vector<7x1xf32>
    %419 = tpu.reciprocal %418 {approx = true} : vector<7x1xf32> -> vector<7x1xf32>
    %420 = vector.broadcast %419 : vector<7x1xf32> to vector<7x7xf32>
    %421 = arith.mulf %416, %420 : vector<7x7xf32>
    %c0_202 = arith.constant 0 : index
    %c5 = arith.constant 5 : index
    %c0_203 = arith.constant 0 : index
    %c0_204 = arith.constant 0 : index
    %422 = vector.load %arg31[%c0_202, %c5, %c0_203, %c0_204] : memref<1x8x7x7xf32, #tpu.memory_space<vmem>>, vector<1x1x7x7xf32>
    %423 = vector.shape_cast %422 : vector<1x1x7x7xf32> to vector<7x7xf32>
    %424 = vector.shape_cast %421 : vector<7x7xf32> to vector<1x1x7x7xf32>
    tpu.vector_store %arg31[%c0_202, %c5, %c0_203, %c0_204], %424 {strides = array<i32>} : memref<1x8x7x7xf32, #tpu.memory_space<vmem>>, vector<1x1x7x7xf32>,
    %425 = arith.truncf %421 : vector<7x7xf32> to vector<7x7xbf16>
    %cst_205 = arith.constant dense<0.000000e+00> : vector<7x16xf32>
    %426 = tpu.matmul %425, %409, %cst_205 {dimension_numbers = #tpu.dot_dimension_numbers<[1], [0], [0], [1], [0, 0, 1, 1], [], []>} : vector<7x7xbf16>, vector<7x16xbf16>, vector<7x16xf32> -> vector<7x16xf32>
    %427 = arith.truncf %426 : vector<7x16xf32> to vector<7x16xbf16>
    %428 = vector.extract_strided_slice %381 {offsets = [16, 0], sizes = [16, 32], strides = [1, 1]} : vector<64x32xbf16> to vector<16x32xbf16>
    %cst_206 = arith.constant dense<0.000000e+00> : vector<7x32xf32>
    %429 = tpu.matmul %427, %428, %cst_206 {dimension_numbers = #tpu.dot_dimension_numbers<[1], [0], [0], [1], [0, 0, 1, 1], [], []>} : vector<7x16xbf16>, vector<16x32xbf16>, vector<7x32xf32> -> vector<7x32xf32>
    %430 = arith.addf %406, %429 : vector<7x32xf32>
    %431 = vector.extract_strided_slice %379 {offsets = [0, 32], sizes = [7, 16], strides = [1, 1]} : vector<7x192xbf16> to vector<7x16xbf16>
    %432 = vector.extract_strided_slice %379 {offsets = [0, 96], sizes = [7, 16], strides = [1, 1]} : vector<7x192xbf16> to vector<7x16xbf16>
    %433 = vector.extract_strided_slice %379 {offsets = [0, 160], sizes = [7, 16], strides = [1, 1]} : vector<7x192xbf16> to vector<7x16xbf16>
    %cst_207 = arith.constant dense<0.000000e+00> : vector<7x7xf32>
    %434 = tpu.matmul %431, %432, %cst_207 {dimension_numbers = #tpu.dot_dimension_numbers<[1], [1], [0], [0], [0, 0, 1, 0], [], []>} : vector<7x16xbf16>, vector<7x16xbf16>, vector<7x7xf32> -> vector<7x7xf32>
    %435 = arith.addf %434, %17 : vector<7x7xf32>
    %cst_208 = arith.constant dense<0xFF800000> : vector<7xf32>
    %436 = vector.multi_reduction <maximumf>, %435, %cst_208 [1] : vector<7x7xf32> to vector<7xf32>
    %437 = vector.shape_cast %436 : vector<7xf32> to vector<7x1xf32>
    %438 = vector.broadcast %437 : vector<7x1xf32> to vector<7x7xf32>
    %439 = arith.subf %435, %438 : vector<7x7xf32>
    %440 = math.exp %439 : vector<7x7xf32>
    %cst_209 = arith.constant dense<0.000000e+00> : vector<7xf32>
    %441 = vector.multi_reduction <add>, %440, %cst_209 [1] : vector<7x7xf32> to vector<7xf32>
    %442 = vector.shape_cast %441 : vector<7xf32> to vector<7x1xf32>
    %443 = tpu.reciprocal %442 {approx = true} : vector<7x1xf32> -> vector<7x1xf32>
    %444 = vector.broadcast %443 : vector<7x1xf32> to vector<7x7xf32>
    %445 = arith.mulf %440, %444 : vector<7x7xf32>
    %c0_210 = arith.constant 0 : index
    %c6 = arith.constant 6 : index
    %c0_211 = arith.constant 0 : index
    %c0_212 = arith.constant 0 : index
    %446 = vector.load %arg31[%c0_210, %c6, %c0_211, %c0_212] : memref<1x8x7x7xf32, #tpu.memory_space<vmem>>, vector<1x1x7x7xf32>
    %447 = vector.shape_cast %446 : vector<1x1x7x7xf32> to vector<7x7xf32>
    %448 = vector.shape_cast %445 : vector<7x7xf32> to vector<1x1x7x7xf32>
    tpu.vector_store %arg31[%c0_210, %c6, %c0_211, %c0_212], %448 {strides = array<i32>} : memref<1x8x7x7xf32, #tpu.memory_space<vmem>>, vector<1x1x7x7xf32>,
    %449 = arith.truncf %445 : vector<7x7xf32> to vector<7x7xbf16>
    %cst_213 = arith.constant dense<0.000000e+00> : vector<7x16xf32>
    %450 = tpu.matmul %449, %433, %cst_213 {dimension_numbers = #tpu.dot_dimension_numbers<[1], [0], [0], [1], [0, 0, 1, 1], [], []>} : vector<7x7xbf16>, vector<7x16xbf16>, vector<7x16xf32> -> vector<7x16xf32>
    %451 = arith.truncf %450 : vector<7x16xf32> to vector<7x16xbf16>
    %452 = vector.extract_strided_slice %381 {offsets = [32, 0], sizes = [16, 32], strides = [1, 1]} : vector<64x32xbf16> to vector<16x32xbf16>
    %cst_214 = arith.constant dense<0.000000e+00> : vector<7x32xf32>
    %453 = tpu.matmul %451, %452, %cst_214 {dimension_numbers = #tpu.dot_dimension_numbers<[1], [0], [0], [1], [0, 0, 1, 1], [], []>} : vector<7x16xbf16>, vector<16x32xbf16>, vector<7x32xf32> -> vector<7x32xf32>
    %454 = arith.addf %430, %453 : vector<7x32xf32>
    %455 = vector.extract_strided_slice %379 {offsets = [0, 48], sizes = [7, 16], strides = [1, 1]} : vector<7x192xbf16> to vector<7x16xbf16>
    %456 = vector.extract_strided_slice %379 {offsets = [0, 112], sizes = [7, 16], strides = [1, 1]} : vector<7x192xbf16> to vector<7x16xbf16>
    %457 = vector.extract_strided_slice %379 {offsets = [0, 176], sizes = [7, 16], strides = [1, 1]} : vector<7x192xbf16> to vector<7x16xbf16>
    %cst_215 = arith.constant dense<0.000000e+00> : vector<7x7xf32>
    %458 = tpu.matmul %455, %456, %cst_215 {dimension_numbers = #tpu.dot_dimension_numbers<[1], [1], [0], [0], [0, 0, 1, 0], [], []>} : vector<7x16xbf16>, vector<7x16xbf16>, vector<7x7xf32> -> vector<7x7xf32>
    %459 = arith.addf %458, %17 : vector<7x7xf32>
    %cst_216 = arith.constant dense<0xFF800000> : vector<7xf32>
    %460 = vector.multi_reduction <maximumf>, %459, %cst_216 [1] : vector<7x7xf32> to vector<7xf32>
    %461 = vector.shape_cast %460 : vector<7xf32> to vector<7x1xf32>
    %462 = vector.broadcast %461 : vector<7x1xf32> to vector<7x7xf32>
    %463 = arith.subf %459, %462 : vector<7x7xf32>
    %464 = math.exp %463 : vector<7x7xf32>
    %cst_217 = arith.constant dense<0.000000e+00> : vector<7xf32>
    %465 = vector.multi_reduction <add>, %464, %cst_217 [1] : vector<7x7xf32> to vector<7xf32>
    %466 = vector.shape_cast %465 : vector<7xf32> to vector<7x1xf32>
    %467 = tpu.reciprocal %466 {approx = true} : vector<7x1xf32> -> vector<7x1xf32>
    %468 = vector.broadcast %467 : vector<7x1xf32> to vector<7x7xf32>
    %469 = arith.mulf %464, %468 : vector<7x7xf32>
    %c0_218 = arith.constant 0 : index
    %c7 = arith.constant 7 : index
    %c0_219 = arith.constant 0 : index
    %c0_220 = arith.constant 0 : index
    %470 = vector.load %arg31[%c0_218, %c7, %c0_219, %c0_220] : memref<1x8x7x7xf32, #tpu.memory_space<vmem>>, vector<1x1x7x7xf32>
    %471 = vector.shape_cast %470 : vector<1x1x7x7xf32> to vector<7x7xf32>
    %472 = vector.shape_cast %469 : vector<7x7xf32> to vector<1x1x7x7xf32>
    tpu.vector_store %arg31[%c0_218, %c7, %c0_219, %c0_220], %472 {strides = array<i32>} : memref<1x8x7x7xf32, #tpu.memory_space<vmem>>, vector<1x1x7x7xf32>,
    %473 = arith.truncf %469 : vector<7x7xf32> to vector<7x7xbf16>
    %cst_221 = arith.constant dense<0.000000e+00> : vector<7x16xf32>
    %474 = tpu.matmul %473, %457, %cst_221 {dimension_numbers = #tpu.dot_dimension_numbers<[1], [0], [0], [1], [0, 0, 1, 1], [], []>} : vector<7x7xbf16>, vector<7x16xbf16>, vector<7x16xf32> -> vector<7x16xf32>
    %475 = arith.truncf %474 : vector<7x16xf32> to vector<7x16xbf16>
    %476 = vector.extract_strided_slice %381 {offsets = [48, 0], sizes = [16, 32], strides = [1, 1]} : vector<64x32xbf16> to vector<16x32xbf16>
    %cst_222 = arith.constant dense<0.000000e+00> : vector<7x32xf32>
    %477 = tpu.matmul %475, %476, %cst_222 {dimension_numbers = #tpu.dot_dimension_numbers<[1], [0], [0], [1], [0, 0, 1, 1], [], []>} : vector<7x16xbf16>, vector<16x32xbf16>, vector<7x32xf32> -> vector<7x32xf32>
    %478 = arith.addf %454, %477 : vector<7x32xf32>
    %c1_223 = arith.constant 1 : index
    %c0_224 = arith.constant 0 : index
    %c0_225 = arith.constant 0 : index
    %479 = vector.load %arg11[%c1_223, %c0_224, %c0_225] : memref<2x1x32xf32, #tpu.memory_space<vmem>>, vector<1x1x32xf32>
    %480 = vector.shape_cast %479 : vector<1x1x32xf32> to vector<1x32xf32>
    %481 = vector.broadcast %480 : vector<1x32xf32> to vector<7x32xf32>
    %482 = arith.addf %478, %481 : vector<7x32xf32>
    %483 = arith.addf %482, %370 : vector<7x32xf32>
    %c1_226 = arith.constant 1 : index
    %c0_227 = arith.constant 0 : index
    %c0_228 = arith.constant 0 : index
    %484 = vector.load %arg12[%c1_226, %c0_227, %c0_228] : memref<2x1x32xf32, #tpu.memory_space<vmem>>, vector<1x1x32xf32>
    %485 = vector.shape_cast %484 : vector<1x1x32xf32> to vector<1x32xf32>
    %c1_229 = arith.constant 1 : index
    %c0_230 = arith.constant 0 : index
    %c0_231 = arith.constant 0 : index
    %486 = vector.load %arg13[%c1_229, %c0_230, %c0_231] : memref<2x1x32xf32, #tpu.memory_space<vmem>>, vector<1x1x32xf32>
    %487 = vector.shape_cast %486 : vector<1x1x32xf32> to vector<1x32xf32>
    %cst_232 = arith.constant dense<0.000000e+00> : vector<7xf32>
    %488 = vector.multi_reduction <add>, %483, %cst_232 [1] : vector<7x32xf32> to vector<7xf32>
    %489 = vector.shape_cast %488 : vector<7xf32> to vector<7x1xf32>
    %cst_233 = arith.constant 3.200000e+01 : f32
    %490 = vector.broadcast %cst_233 : f32 to vector<7x1xf32>
    %491 = arith.divf %489, %490 : vector<7x1xf32>
    %492 = vector.broadcast %491 : vector<7x1xf32> to vector<7x32xf32>
    %493 = arith.subf %483, %492 : vector<7x32xf32>
    %494 = arith.mulf %493, %493 : vector<7x32xf32>
    %cst_234 = arith.constant dense<0.000000e+00> : vector<7xf32>
    %495 = vector.multi_reduction <add>, %494, %cst_234 [1] : vector<7x32xf32> to vector<7xf32>
    %496 = vector.shape_cast %495 : vector<7xf32> to vector<7x1xf32>
    %cst_235 = arith.constant 3.200000e+01 : f32
    %497 = vector.broadcast %cst_235 : f32 to vector<7x1xf32>
    %498 = arith.divf %496, %497 : vector<7x1xf32>
    %499 = vector.broadcast %491 : vector<7x1xf32> to vector<7x32xf32>
    %500 = arith.subf %483, %499 : vector<7x32xf32>
    %cst_236 = arith.constant 9.99999974E-6 : f32
    %501 = vector.broadcast %cst_236 : f32 to vector<7x1xf32>
    %502 = arith.addf %498, %501 : vector<7x1xf32>
    %503 = math.rsqrt %502 : vector<7x1xf32>
    %504 = vector.broadcast %503 : vector<7x1xf32> to vector<7x32xf32>
    %505 = arith.mulf %500, %504 : vector<7x32xf32>
    %506 = vector.broadcast %485 : vector<1x32xf32> to vector<7x32xf32>
    %507 = arith.mulf %505, %506 : vector<7x32xf32>
    %508 = vector.broadcast %487 : vector<1x32xf32> to vector<7x32xf32>
    %509 = arith.addf %507, %508 : vector<7x32xf32>
    %510 = vector.broadcast %7 : vector<7x1xf32> to vector<7x32xf32>
    %511 = arith.mulf %509, %510 : vector<7x32xf32>
    %512 = arith.truncf %511 : vector<7x32xf32> to vector<7x32xbf16>
    %c1_237 = arith.constant 1 : index
    %c0_238 = arith.constant 0 : index
    %c0_239 = arith.constant 0 : index
    %513 = vector.load %arg14[%c1_237, %c0_238, %c0_239] : memref<2x32x64xbf16, #tpu.memory_space<vmem>>, vector<1x32x64xbf16>
    %514 = vector.shape_cast %513 : vector<1x32x64xbf16> to vector<32x64xbf16>
    %cst_240 = arith.constant dense<0.000000e+00> : vector<7x64xf32>
    %515 = tpu.matmul %512, %514, %cst_240 {dimension_numbers = #tpu.dot_dimension_numbers<[1], [0], [0], [1], [0, 0, 1, 1], [], []>} : vector<7x32xbf16>, vector<32x64xbf16>, vector<7x64xf32> -> vector<7x64xf32>
    %c1_241 = arith.constant 1 : index
    %c0_242 = arith.constant 0 : index
    %c0_243 = arith.constant 0 : index
    %516 = vector.load %arg15[%c1_241, %c0_242, %c0_243] : memref<2x1x64xf32, #tpu.memory_space<vmem>>, vector<1x1x64xf32>
    %517 = vector.shape_cast %516 : vector<1x1x64xf32> to vector<1x64xf32>
    %518 = vector.broadcast %517 : vector<1x64xf32> to vector<7x64xf32>
    %519 = arith.addf %515, %518 : vector<7x64xf32>
    %520 = arith.truncf %519 : vector<7x64xf32> to vector<7x64xbf16>
    %c1_244 = arith.constant 1 : index
    %c0_245 = arith.constant 0 : index
    %c0_246 = arith.constant 0 : index
    %521 = vector.load %arg16[%c1_244, %c0_245, %c0_246] : memref<2x32x64xbf16, #tpu.memory_space<vmem>>, vector<1x32x64xbf16>
    %522 = vector.shape_cast %521 : vector<1x32x64xbf16> to vector<32x64xbf16>
    %cst_247 = arith.constant dense<0.000000e+00> : vector<8x64xf32>
    %523 = tpu.matmul %3, %522, %cst_247 {dimension_numbers = #tpu.dot_dimension_numbers<[1], [0], [0], [1], [0, 0, 1, 1], [], []>} : vector<8x32xbf16>, vector<32x64xbf16>, vector<8x64xf32> -> vector<8x64xf32>
    %c1_248 = arith.constant 1 : index
    %c0_249 = arith.constant 0 : index
    %c0_250 = arith.constant 0 : index
    %524 = vector.load %arg17[%c1_248, %c0_249, %c0_250] : memref<2x1x64xf32, #tpu.memory_space<vmem>>, vector<1x1x64xf32>
    %525 = vector.shape_cast %524 : vector<1x1x64xf32> to vector<1x64xf32>
    %526 = vector.broadcast %525 : vector<1x64xf32> to vector<8x64xf32>
    %527 = arith.addf %523, %526 : vector<8x64xf32>
    %528 = arith.truncf %527 : vector<8x64xf32> to vector<8x64xbf16>
    %c1_251 = arith.constant 1 : index
    %c0_252 = arith.constant 0 : index
    %c0_253 = arith.constant 0 : index
    %529 = vector.load %arg18[%c1_251, %c0_252, %c0_253] : memref<2x32x64xbf16, #tpu.memory_space<vmem>>, vector<1x32x64xbf16>
    %530 = vector.shape_cast %529 : vector<1x32x64xbf16> to vector<32x64xbf16>
    %cst_254 = arith.constant dense<0.000000e+00> : vector<8x64xf32>
    %531 = tpu.matmul %5, %530, %cst_254 {dimension_numbers = #tpu.dot_dimension_numbers<[1], [0], [0], [1], [0, 0, 1, 1], [], []>} : vector<8x32xbf16>, vector<32x64xbf16>, vector<8x64xf32> -> vector<8x64xf32>
    %c1_255 = arith.constant 1 : index
    %c0_256 = arith.constant 0 : index
    %c0_257 = arith.constant 0 : index
    %532 = vector.load %arg19[%c1_255, %c0_256, %c0_257] : memref<2x1x64xf32, #tpu.memory_space<vmem>>, vector<1x1x64xf32>
    %533 = vector.shape_cast %532 : vector<1x1x64xf32> to vector<1x64xf32>
    %534 = vector.broadcast %533 : vector<1x64xf32> to vector<8x64xf32>
    %535 = arith.addf %531, %534 : vector<8x64xf32>
    %536 = arith.truncf %535 : vector<8x64xf32> to vector<8x64xbf16>
    %c1_258 = arith.constant 1 : index
    %c0_259 = arith.constant 0 : index
    %c0_260 = arith.constant 0 : index
    %537 = vector.load %arg20[%c1_258, %c0_259, %c0_260] : memref<2x64x32xbf16, #tpu.memory_space<vmem>>, vector<1x64x32xbf16>
    %538 = vector.shape_cast %537 : vector<1x64x32xbf16> to vector<64x32xbf16>
    %cst_261 = arith.constant 0.000000e+00 : f32
    %539 = vector.broadcast %cst_261 : f32 to vector<7x32xf32>
    %540 = vector.extract_strided_slice %520 {offsets = [0, 0], sizes = [7, 16], strides = [1, 1]} : vector<7x64xbf16> to vector<7x16xbf16>
    %541 = vector.extract_strided_slice %528 {offsets = [0, 0], sizes = [8, 16], strides = [1, 1]} : vector<8x64xbf16> to vector<8x16xbf16>
    %542 = vector.extract_strided_slice %528 {offsets = [0, 32], sizes = [8, 16], strides = [1, 1]} : vector<8x64xbf16> to vector<8x16xbf16>
    %cst_262 = arith.constant dense<0.000000e+00> : vector<7x8xf32>
    %543 = tpu.matmul %540, %541, %cst_262 {dimension_numbers = #tpu.dot_dimension_numbers<[1], [1], [0], [0], [0, 0, 1, 0], [], []>} : vector<7x16xbf16>, vector<8x16xbf16>, vector<7x8xf32> -> vector<7x8xf32>
    %544 = vector.broadcast %19 : vector<1x8xf32> to vector<7x8xf32>
    %545 = arith.addf %543, %544 : vector<7x8xf32>
    %cst_263 = arith.constant dense<0xFF800000> : vector<7xf32>
    %546 = vector.multi_reduction <maximumf>, %545, %cst_263 [1] : vector<7x8xf32> to vector<7xf32>
    %547 = vector.shape_cast %546 : vector<7xf32> to vector<7x1xf32>
    %548 = vector.broadcast %547 : vector<7x1xf32> to vector<7x8xf32>
    %549 = arith.subf %545, %548 : vector<7x8xf32>
    %550 = math.exp %549 : vector<7x8xf32>
    %cst_264 = arith.constant dense<0.000000e+00> : vector<7xf32>
    %551 = vector.multi_reduction <add>, %550, %cst_264 [1] : vector<7x8xf32> to vector<7xf32>
    %552 = vector.shape_cast %551 : vector<7xf32> to vector<7x1xf32>
    %553 = tpu.reciprocal %552 {approx = true} : vector<7x1xf32> -> vector<7x1xf32>
    %554 = vector.broadcast %553 : vector<7x1xf32> to vector<7x8xf32>
    %555 = arith.mulf %550, %554 : vector<7x8xf32>
    %c0_265 = arith.constant 0 : index
    %c2_266 = arith.constant 2 : index
    %c0_267 = arith.constant 0 : index
    %c0_268 = arith.constant 0 : index
    %556 = vector.load %arg32[%c0_265, %c2_266, %c0_267, %c0_268] : memref<1x4x7x8xf32, #tpu.memory_space<vmem>>, vector<1x1x7x8xf32>
    %557 = vector.shape_cast %556 : vector<1x1x7x8xf32> to vector<7x8xf32>
    %558 = vector.shape_cast %555 : vector<7x8xf32> to vector<1x1x7x8xf32>
    tpu.vector_store %arg32[%c0_265, %c2_266, %c0_267, %c0_268], %558 {strides = array<i32>} : memref<1x4x7x8xf32, #tpu.memory_space<vmem>>, vector<1x1x7x8xf32>,
    %559 = arith.truncf %555 : vector<7x8xf32> to vector<7x8xbf16>
    %cst_269 = arith.constant dense<0.000000e+00> : vector<7x16xf32>
    %560 = tpu.matmul %559, %542, %cst_269 {dimension_numbers = #tpu.dot_dimension_numbers<[1], [0], [0], [1], [0, 0, 1, 1], [], []>} : vector<7x8xbf16>, vector<8x16xbf16>, vector<7x16xf32> -> vector<7x16xf32>
    %561 = arith.truncf %560 : vector<7x16xf32> to vector<7x16xbf16>
    %562 = vector.extract_strided_slice %538 {offsets = [0, 0], sizes = [16, 32], strides = [1, 1]} : vector<64x32xbf16> to vector<16x32xbf16>
    %cst_270 = arith.constant dense<0.000000e+00> : vector<7x32xf32>
    %563 = tpu.matmul %561, %562, %cst_270 {dimension_numbers = #tpu.dot_dimension_numbers<[1], [0], [0], [1], [0, 0, 1, 1], [], []>} : vector<7x16xbf16>, vector<16x32xbf16>, vector<7x32xf32> -> vector<7x32xf32>
    %564 = arith.addf %539, %563 : vector<7x32xf32>
    %565 = vector.extract_strided_slice %520 {offsets = [0, 16], sizes = [7, 16], strides = [1, 1]} : vector<7x64xbf16> to vector<7x16xbf16>
    %566 = vector.extract_strided_slice %528 {offsets = [0, 16], sizes = [8, 16], strides = [1, 1]} : vector<8x64xbf16> to vector<8x16xbf16>
    %567 = vector.extract_strided_slice %528 {offsets = [0, 48], sizes = [8, 16], strides = [1, 1]} : vector<8x64xbf16> to vector<8x16xbf16>
    %cst_271 = arith.constant dense<0.000000e+00> : vector<7x8xf32>
    %568 = tpu.matmul %565, %566, %cst_271 {dimension_numbers = #tpu.dot_dimension_numbers<[1], [1], [0], [0], [0, 0, 1, 0], [], []>} : vector<7x16xbf16>, vector<8x16xbf16>, vector<7x8xf32> -> vector<7x8xf32>
    %569 = vector.broadcast %19 : vector<1x8xf32> to vector<7x8xf32>
    %570 = arith.addf %568, %569 : vector<7x8xf32>
    %cst_272 = arith.constant dense<0xFF800000> : vector<7xf32>
    %571 = vector.multi_reduction <maximumf>, %570, %cst_272 [1] : vector<7x8xf32> to vector<7xf32>
    %572 = vector.shape_cast %571 : vector<7xf32> to vector<7x1xf32>
    %573 = vector.broadcast %572 : vector<7x1xf32> to vector<7x8xf32>
    %574 = arith.subf %570, %573 : vector<7x8xf32>
    %575 = math.exp %574 : vector<7x8xf32>
    %cst_273 = arith.constant dense<0.000000e+00> : vector<7xf32>
    %576 = vector.multi_reduction <add>, %575, %cst_273 [1] : vector<7x8xf32> to vector<7xf32>
    %577 = vector.shape_cast %576 : vector<7xf32> to vector<7x1xf32>
    %578 = tpu.reciprocal %577 {approx = true} : vector<7x1xf32> -> vector<7x1xf32>
    %579 = vector.broadcast %578 : vector<7x1xf32> to vector<7x8xf32>
    %580 = arith.mulf %575, %579 : vector<7x8xf32>
    %c0_274 = arith.constant 0 : index
    %c3_275 = arith.constant 3 : index
    %c0_276 = arith.constant 0 : index
    %c0_277 = arith.constant 0 : index
    %581 = vector.load %arg32[%c0_274, %c3_275, %c0_276, %c0_277] : memref<1x4x7x8xf32, #tpu.memory_space<vmem>>, vector<1x1x7x8xf32>
    %582 = vector.shape_cast %581 : vector<1x1x7x8xf32> to vector<7x8xf32>
    %583 = vector.shape_cast %580 : vector<7x8xf32> to vector<1x1x7x8xf32>
    tpu.vector_store %arg32[%c0_274, %c3_275, %c0_276, %c0_277], %583 {strides = array<i32>} : memref<1x4x7x8xf32, #tpu.memory_space<vmem>>, vector<1x1x7x8xf32>,
    %584 = arith.truncf %580 : vector<7x8xf32> to vector<7x8xbf16>
    %cst_278 = arith.constant dense<0.000000e+00> : vector<7x16xf32>
    %585 = tpu.matmul %584, %567, %cst_278 {dimension_numbers = #tpu.dot_dimension_numbers<[1], [0], [0], [1], [0, 0, 1, 1], [], []>} : vector<7x8xbf16>, vector<8x16xbf16>, vector<7x16xf32> -> vector<7x16xf32>
    %586 = arith.truncf %585 : vector<7x16xf32> to vector<7x16xbf16>
    %587 = vector.extract_strided_slice %538 {offsets = [16, 0], sizes = [16, 32], strides = [1, 1]} : vector<64x32xbf16> to vector<16x32xbf16>
    %cst_279 = arith.constant dense<0.000000e+00> : vector<7x32xf32>
    %588 = tpu.matmul %586, %587, %cst_279 {dimension_numbers = #tpu.dot_dimension_numbers<[1], [0], [0], [1], [0, 0, 1, 1], [], []>} : vector<7x16xbf16>, vector<16x32xbf16>, vector<7x32xf32> -> vector<7x32xf32>
    %589 = arith.addf %564, %588 : vector<7x32xf32>
    %590 = vector.extract_strided_slice %520 {offsets = [0, 32], sizes = [7, 16], strides = [1, 1]} : vector<7x64xbf16> to vector<7x16xbf16>
    %591 = vector.extract_strided_slice %536 {offsets = [0, 0], sizes = [8, 16], strides = [1, 1]} : vector<8x64xbf16> to vector<8x16xbf16>
    %592 = vector.extract_strided_slice %536 {offsets = [0, 32], sizes = [8, 16], strides = [1, 1]} : vector<8x64xbf16> to vector<8x16xbf16>
    %cst_280 = arith.constant dense<0.000000e+00> : vector<7x8xf32>
    %593 = tpu.matmul %590, %591, %cst_280 {dimension_numbers = #tpu.dot_dimension_numbers<[1], [1], [0], [0], [0, 0, 1, 0], [], []>} : vector<7x16xbf16>, vector<8x16xbf16>, vector<7x8xf32> -> vector<7x8xf32>
    %594 = vector.broadcast %21 : vector<1x8xf32> to vector<7x8xf32>
    %595 = arith.addf %593, %594 : vector<7x8xf32>
    %cst_281 = arith.constant dense<0xFF800000> : vector<7xf32>
    %596 = vector.multi_reduction <maximumf>, %595, %cst_281 [1] : vector<7x8xf32> to vector<7xf32>
    %597 = vector.shape_cast %596 : vector<7xf32> to vector<7x1xf32>
    %598 = vector.broadcast %597 : vector<7x1xf32> to vector<7x8xf32>
    %599 = arith.subf %595, %598 : vector<7x8xf32>
    %600 = math.exp %599 : vector<7x8xf32>
    %cst_282 = arith.constant dense<0.000000e+00> : vector<7xf32>
    %601 = vector.multi_reduction <add>, %600, %cst_282 [1] : vector<7x8xf32> to vector<7xf32>
    %602 = vector.shape_cast %601 : vector<7xf32> to vector<7x1xf32>
    %603 = tpu.reciprocal %602 {approx = true} : vector<7x1xf32> -> vector<7x1xf32>
    %604 = vector.broadcast %603 : vector<7x1xf32> to vector<7x8xf32>
    %605 = arith.mulf %600, %604 : vector<7x8xf32>
    %c0_283 = arith.constant 0 : index
    %c2_284 = arith.constant 2 : index
    %c0_285 = arith.constant 0 : index
    %c0_286 = arith.constant 0 : index
    %606 = vector.load %arg33[%c0_283, %c2_284, %c0_285, %c0_286] : memref<1x4x7x8xf32, #tpu.memory_space<vmem>>, vector<1x1x7x8xf32>
    %607 = vector.shape_cast %606 : vector<1x1x7x8xf32> to vector<7x8xf32>
    %608 = vector.shape_cast %605 : vector<7x8xf32> to vector<1x1x7x8xf32>
    tpu.vector_store %arg33[%c0_283, %c2_284, %c0_285, %c0_286], %608 {strides = array<i32>} : memref<1x4x7x8xf32, #tpu.memory_space<vmem>>, vector<1x1x7x8xf32>,
    %609 = arith.truncf %605 : vector<7x8xf32> to vector<7x8xbf16>
    %cst_287 = arith.constant dense<0.000000e+00> : vector<7x16xf32>
    %610 = tpu.matmul %609, %592, %cst_287 {dimension_numbers = #tpu.dot_dimension_numbers<[1], [0], [0], [1], [0, 0, 1, 1], [], []>} : vector<7x8xbf16>, vector<8x16xbf16>, vector<7x16xf32> -> vector<7x16xf32>
    %611 = arith.truncf %610 : vector<7x16xf32> to vector<7x16xbf16>
    %612 = vector.extract_strided_slice %538 {offsets = [32, 0], sizes = [16, 32], strides = [1, 1]} : vector<64x32xbf16> to vector<16x32xbf16>
    %cst_288 = arith.constant dense<0.000000e+00> : vector<7x32xf32>
    %613 = tpu.matmul %611, %612, %cst_288 {dimension_numbers = #tpu.dot_dimension_numbers<[1], [0], [0], [1], [0, 0, 1, 1], [], []>} : vector<7x16xbf16>, vector<16x32xbf16>, vector<7x32xf32> -> vector<7x32xf32>
    %614 = arith.addf %589, %613 : vector<7x32xf32>
    %615 = vector.extract_strided_slice %520 {offsets = [0, 48], sizes = [7, 16], strides = [1, 1]} : vector<7x64xbf16> to vector<7x16xbf16>
    %616 = vector.extract_strided_slice %536 {offsets = [0, 16], sizes = [8, 16], strides = [1, 1]} : vector<8x64xbf16> to vector<8x16xbf16>
    %617 = vector.extract_strided_slice %536 {offsets = [0, 48], sizes = [8, 16], strides = [1, 1]} : vector<8x64xbf16> to vector<8x16xbf16>
    %cst_289 = arith.constant dense<0.000000e+00> : vector<7x8xf32>
    %618 = tpu.matmul %615, %616, %cst_289 {dimension_numbers = #tpu.dot_dimension_numbers<[1], [1], [0], [0], [0, 0, 1, 0], [], []>} : vector<7x16xbf16>, vector<8x16xbf16>, vector<7x8xf32> -> vector<7x8xf32>
    %619 = vector.broadcast %21 : vector<1x8xf32> to vector<7x8xf32>
    %620 = arith.addf %618, %619 : vector<7x8xf32>
    %cst_290 = arith.constant dense<0xFF800000> : vector<7xf32>
    %621 = vector.multi_reduction <maximumf>, %620, %cst_290 [1] : vector<7x8xf32> to vector<7xf32>
    %622 = vector.shape_cast %621 : vector<7xf32> to vector<7x1xf32>
    %623 = vector.broadcast %622 : vector<7x1xf32> to vector<7x8xf32>
    %624 = arith.subf %620, %623 : vector<7x8xf32>
    %625 = math.exp %624 : vector<7x8xf32>
    %cst_291 = arith.constant dense<0.000000e+00> : vector<7xf32>
    %626 = vector.multi_reduction <add>, %625, %cst_291 [1] : vector<7x8xf32> to vector<7xf32>
    %627 = vector.shape_cast %626 : vector<7xf32> to vector<7x1xf32>
    %628 = tpu.reciprocal %627 {approx = true} : vector<7x1xf32> -> vector<7x1xf32>
    %629 = vector.broadcast %628 : vector<7x1xf32> to vector<7x8xf32>
    %630 = arith.mulf %625, %629 : vector<7x8xf32>
    %c0_292 = arith.constant 0 : index
    %c3_293 = arith.constant 3 : index
    %c0_294 = arith.constant 0 : index
    %c0_295 = arith.constant 0 : index
    %631 = vector.load %arg33[%c0_292, %c3_293, %c0_294, %c0_295] : memref<1x4x7x8xf32, #tpu.memory_space<vmem>>, vector<1x1x7x8xf32>
    %632 = vector.shape_cast %631 : vector<1x1x7x8xf32> to vector<7x8xf32>
    %633 = vector.shape_cast %630 : vector<7x8xf32> to vector<1x1x7x8xf32>
    tpu.vector_store %arg33[%c0_292, %c3_293, %c0_294, %c0_295], %633 {strides = array<i32>} : memref<1x4x7x8xf32, #tpu.memory_space<vmem>>, vector<1x1x7x8xf32>,
    %634 = arith.truncf %630 : vector<7x8xf32> to vector<7x8xbf16>
    %cst_296 = arith.constant dense<0.000000e+00> : vector<7x16xf32>
    %635 = tpu.matmul %634, %617, %cst_296 {dimension_numbers = #tpu.dot_dimension_numbers<[1], [0], [0], [1], [0, 0, 1, 1], [], []>} : vector<7x8xbf16>, vector<8x16xbf16>, vector<7x16xf32> -> vector<7x16xf32>
    %636 = arith.truncf %635 : vector<7x16xf32> to vector<7x16xbf16>
    %637 = vector.extract_strided_slice %538 {offsets = [48, 0], sizes = [16, 32], strides = [1, 1]} : vector<64x32xbf16> to vector<16x32xbf16>
    %cst_297 = arith.constant dense<0.000000e+00> : vector<7x32xf32>
    %638 = tpu.matmul %636, %637, %cst_297 {dimension_numbers = #tpu.dot_dimension_numbers<[1], [0], [0], [1], [0, 0, 1, 1], [], []>} : vector<7x16xbf16>, vector<16x32xbf16>, vector<7x32xf32> -> vector<7x32xf32>
    %639 = arith.addf %614, %638 : vector<7x32xf32>
    %c1_298 = arith.constant 1 : index
    %c0_299 = arith.constant 0 : index
    %c0_300 = arith.constant 0 : index
    %640 = vector.load %arg21[%c1_298, %c0_299, %c0_300] : memref<2x1x32xf32, #tpu.memory_space<vmem>>, vector<1x1x32xf32>
    %641 = vector.shape_cast %640 : vector<1x1x32xf32> to vector<1x32xf32>
    %642 = vector.broadcast %641 : vector<1x32xf32> to vector<7x32xf32>
    %643 = arith.addf %639, %642 : vector<7x32xf32>
    %644 = arith.addf %643, %511 : vector<7x32xf32>
    %c1_301 = arith.constant 1 : index
    %c0_302 = arith.constant 0 : index
    %c0_303 = arith.constant 0 : index
    %645 = vector.load %arg22[%c1_301, %c0_302, %c0_303] : memref<2x1x32xf32, #tpu.memory_space<vmem>>, vector<1x1x32xf32>
    %646 = vector.shape_cast %645 : vector<1x1x32xf32> to vector<1x32xf32>
    %c1_304 = arith.constant 1 : index
    %c0_305 = arith.constant 0 : index
    %c0_306 = arith.constant 0 : index
    %647 = vector.load %arg23[%c1_304, %c0_305, %c0_306] : memref<2x1x32xf32, #tpu.memory_space<vmem>>, vector<1x1x32xf32>
    %648 = vector.shape_cast %647 : vector<1x1x32xf32> to vector<1x32xf32>
    %cst_307 = arith.constant dense<0.000000e+00> : vector<7xf32>
    %649 = vector.multi_reduction <add>, %644, %cst_307 [1] : vector<7x32xf32> to vector<7xf32>
    %650 = vector.shape_cast %649 : vector<7xf32> to vector<7x1xf32>
    %cst_308 = arith.constant 3.200000e+01 : f32
    %651 = vector.broadcast %cst_308 : f32 to vector<7x1xf32>
    %652 = arith.divf %650, %651 : vector<7x1xf32>
    %653 = vector.broadcast %652 : vector<7x1xf32> to vector<7x32xf32>
    %654 = arith.subf %644, %653 : vector<7x32xf32>
    %655 = arith.mulf %654, %654 : vector<7x32xf32>
    %cst_309 = arith.constant dense<0.000000e+00> : vector<7xf32>
    %656 = vector.multi_reduction <add>, %655, %cst_309 [1] : vector<7x32xf32> to vector<7xf32>
    %657 = vector.shape_cast %656 : vector<7xf32> to vector<7x1xf32>
    %cst_310 = arith.constant 3.200000e+01 : f32
    %658 = vector.broadcast %cst_310 : f32 to vector<7x1xf32>
    %659 = arith.divf %657, %658 : vector<7x1xf32>
    %660 = vector.broadcast %652 : vector<7x1xf32> to vector<7x32xf32>
    %661 = arith.subf %644, %660 : vector<7x32xf32>
    %cst_311 = arith.constant 9.99999974E-6 : f32
    %662 = vector.broadcast %cst_311 : f32 to vector<7x1xf32>
    %663 = arith.addf %659, %662 : vector<7x1xf32>
    %664 = math.rsqrt %663 : vector<7x1xf32>
    %665 = vector.broadcast %664 : vector<7x1xf32> to vector<7x32xf32>
    %666 = arith.mulf %661, %665 : vector<7x32xf32>
    %667 = vector.broadcast %646 : vector<1x32xf32> to vector<7x32xf32>
    %668 = arith.mulf %666, %667 : vector<7x32xf32>
    %669 = vector.broadcast %648 : vector<1x32xf32> to vector<7x32xf32>
    %670 = arith.addf %668, %669 : vector<7x32xf32>
    %671 = vector.broadcast %7 : vector<7x1xf32> to vector<7x32xf32>
    %672 = arith.mulf %670, %671 : vector<7x32xf32>
    %673 = arith.truncf %672 : vector<7x32xf32> to vector<7x32xbf16>
    %c1_312 = arith.constant 1 : index
    %c0_313 = arith.constant 0 : index
    %c0_314 = arith.constant 0 : index
    %674 = vector.load %arg24[%c1_312, %c0_313, %c0_314] : memref<2x32x64xbf16, #tpu.memory_space<vmem>>, vector<1x32x64xbf16>
    %675 = vector.shape_cast %674 : vector<1x32x64xbf16> to vector<32x64xbf16>
    %cst_315 = arith.constant dense<0.000000e+00> : vector<7x64xf32>
    %676 = tpu.matmul %673, %675, %cst_315 {dimension_numbers = #tpu.dot_dimension_numbers<[1], [0], [0], [1], [0, 0, 1, 1], [], []>} : vector<7x32xbf16>, vector<32x64xbf16>, vector<7x64xf32> -> vector<7x64xf32>
    %c1_316 = arith.constant 1 : index
    %c0_317 = arith.constant 0 : index
    %c0_318 = arith.constant 0 : index
    %677 = vector.load %arg25[%c1_316, %c0_317, %c0_318] : memref<2x1x64xf32, #tpu.memory_space<vmem>>, vector<1x1x64xf32>
    %678 = vector.shape_cast %677 : vector<1x1x64xf32> to vector<1x64xf32>
    %679 = vector.broadcast %678 : vector<1x64xf32> to vector<7x64xf32>
    %680 = arith.addf %676, %679 : vector<7x64xf32>
    %cst_319 = arith.constant 0.000000e+00 : f32
    %681 = vector.broadcast %cst_319 : f32 to vector<7x64xf32>
    %682 = arith.maximumf %680, %681 : vector<7x64xf32>
    %683 = arith.truncf %682 : vector<7x64xf32> to vector<7x64xbf16>
    %c1_320 = arith.constant 1 : index
    %c0_321 = arith.constant 0 : index
    %c0_322 = arith.constant 0 : index
    %684 = vector.load %arg26[%c1_320, %c0_321, %c0_322] : memref<2x64x32xbf16, #tpu.memory_space<vmem>>, vector<1x64x32xbf16>
    %685 = vector.shape_cast %684 : vector<1x64x32xbf16> to vector<64x32xbf16>
    %cst_323 = arith.constant dense<0.000000e+00> : vector<7x32xf32>
    %686 = tpu.matmul %683, %685, %cst_323 {dimension_numbers = #tpu.dot_dimension_numbers<[1], [0], [0], [1], [0, 0, 1, 1], [], []>} : vector<7x64xbf16>, vector<64x32xbf16>, vector<7x32xf32> -> vector<7x32xf32>
    %c1_324 = arith.constant 1 : index
    %c0_325 = arith.constant 0 : index
    %c0_326 = arith.constant 0 : index
    %687 = vector.load %arg27[%c1_324, %c0_325, %c0_326] : memref<2x1x32xf32, #tpu.memory_space<vmem>>, vector<1x1x32xf32>
    %688 = vector.shape_cast %687 : vector<1x1x32xf32> to vector<1x32xf32>
    %689 = vector.broadcast %688 : vector<1x32xf32> to vector<7x32xf32>
    %690 = arith.addf %686, %689 : vector<7x32xf32>
    %691 = arith.addf %690, %672 : vector<7x32xf32>
    %c1_327 = arith.constant 1 : index
    %c0_328 = arith.constant 0 : index
    %c0_329 = arith.constant 0 : index
    %692 = vector.load %arg28[%c1_327, %c0_328, %c0_329] : memref<2x1x32xf32, #tpu.memory_space<vmem>>, vector<1x1x32xf32>
    %693 = vector.shape_cast %692 : vector<1x1x32xf32> to vector<1x32xf32>
    %c1_330 = arith.constant 1 : index
    %c0_331 = arith.constant 0 : index
    %c0_332 = arith.constant 0 : index
    %694 = vector.load %arg29[%c1_330, %c0_331, %c0_332] : memref<2x1x32xf32, #tpu.memory_space<vmem>>, vector<1x1x32xf32>
    %695 = vector.shape_cast %694 : vector<1x1x32xf32> to vector<1x32xf32>
    %cst_333 = arith.constant dense<0.000000e+00> : vector<7xf32>
    %696 = vector.multi_reduction <add>, %691, %cst_333 [1] : vector<7x32xf32> to vector<7xf32>
    %697 = vector.shape_cast %696 : vector<7xf32> to vector<7x1xf32>
    %cst_334 = arith.constant 3.200000e+01 : f32
    %698 = vector.broadcast %cst_334 : f32 to vector<7x1xf32>
    %699 = arith.divf %697, %698 : vector<7x1xf32>
    %700 = vector.broadcast %699 : vector<7x1xf32> to vector<7x32xf32>
    %701 = arith.subf %691, %700 : vector<7x32xf32>
    %702 = arith.mulf %701, %701 : vector<7x32xf32>
    %cst_335 = arith.constant dense<0.000000e+00> : vector<7xf32>
    %703 = vector.multi_reduction <add>, %702, %cst_335 [1] : vector<7x32xf32> to vector<7xf32>
    %704 = vector.shape_cast %703 : vector<7xf32> to vector<7x1xf32>
    %cst_336 = arith.constant 3.200000e+01 : f32
    %705 = vector.broadcast %cst_336 : f32 to vector<7x1xf32>
    %706 = arith.divf %704, %705 : vector<7x1xf32>
    %707 = vector.broadcast %699 : vector<7x1xf32> to vector<7x32xf32>
    %708 = arith.subf %691, %707 : vector<7x32xf32>
    %cst_337 = arith.constant 9.99999974E-6 : f32
    %709 = vector.broadcast %cst_337 : f32 to vector<7x1xf32>
    %710 = arith.addf %706, %709 : vector<7x1xf32>
    %711 = math.rsqrt %710 : vector<7x1xf32>
    %712 = vector.broadcast %711 : vector<7x1xf32> to vector<7x32xf32>
    %713 = arith.mulf %708, %712 : vector<7x32xf32>
    %714 = vector.broadcast %693 : vector<1x32xf32> to vector<7x32xf32>
    %715 = arith.mulf %713, %714 : vector<7x32xf32>
    %716 = vector.broadcast %695 : vector<1x32xf32> to vector<7x32xf32>
    %717 = arith.addf %715, %716 : vector<7x32xf32>
    %718 = vector.broadcast %7 : vector<7x1xf32> to vector<7x32xf32>
    %719 = arith.mulf %717, %718 : vector<7x32xf32>
    %720 = arith.truncf %719 : vector<7x32xf32> to vector<7x32xbf16>
    %c0_338 = arith.constant 0 : index
    %c0_339 = arith.constant 0 : index
    %c0_340 = arith.constant 0 : index
    %721 = vector.load %arg30[%c0_338, %c0_339, %c0_340] : memref<1x7x32xbf16, #tpu.memory_space<vmem>>, vector<1x7x32xbf16>
    %722 = vector.shape_cast %721 : vector<1x7x32xbf16> to vector<7x32xbf16>
    %723 = vector.shape_cast %720 : vector<7x32xbf16> to vector<1x7x32xbf16>
    tpu.vector_store %arg30[%c0_338, %c0_339, %c0_340], %723 {strides = array<i32>} : memref<1x7x32xbf16, #tpu.memory_space<vmem>>, vector<1x7x32xbf16>,
    return
  }
  func.func @transform_0(%arg0: i32) -> (i32, i32, i32) {
    %c0_i32 = arith.constant 0 : i32
    %c0_i32_0 = arith.constant 0 : i32
    %c0_i32_1 = arith.constant 0 : i32
    return %arg0, %c0_i32, %c0_i32_0 : i32, i32, i32
  }
  func.func @transform_1(%arg0: i32) -> (i32, i32, i32) {
    %c0_i32 = arith.constant 0 : i32
    %c0_i32_0 = arith.constant 0 : i32
    %c0_i32_1 = arith.constant 0 : i32
    return %arg0, %c0_i32, %c0_i32_0 : i32, i32, i32
  }
  func.func @transform_2(%arg0: i32) -> (i32, i32, i32) {
    %c0_i32 = arith.constant 0 : i32
    %c0_i32_0 = arith.constant 0 : i32
    %c0_i32_1 = arith.constant 0 : i32
    return %arg0, %c0_i32, %c0_i32_0 : i32, i32, i32
  }
  func.func @transform_3(%arg0: i32) -> (i32, i32, i32) {
    %c0_i32 = arith.constant 0 : i32
    %c0_i32_0 = arith.constant 0 : i32
    %c0_i32_1 = arith.constant 0 : i32
    return %arg0, %c0_i32, %c0_i32_0 : i32, i32, i32
  }
  func.func @transform_4(%arg0: i32) -> (i32, i32, i32) {
    %c0_i32 = arith.constant 0 : i32
    %c0_i32_0 = arith.constant 0 : i32
    %c0_i32_1 = arith.constant 0 : i32
    return %arg0, %c0_i32, %c0_i32_0 : i32, i32, i32
  }
  func.func @transform_5(%arg0: i32) -> (i32, i32, i32) {
    %c0_i32 = arith.constant 0 : i32
    %c0_i32_0 = arith.constant 0 : i32
    %c0_i32_1 = arith.constant 0 : i32
    return %arg0, %c0_i32, %c0_i32_0 : i32, i32, i32
  }
  func.func @transform_6(%arg0: i32) -> (i32, i32, i32) {
    %c0_i32 = arith.constant 0 : i32
    %c0_i32_0 = arith.constant 0 : i32
    %c0_i32_1 = arith.constant 0 : i32
    return %arg0, %c0_i32, %c0_i32_0 : i32, i32, i32
  }
  func.func @transform_7(%arg0: i32) -> (i32, i32, i32) {
    %c0_i32 = arith.constant 0 : i32
    %c0_i32_0 = arith.constant 0 : i32
    %c0_i32_1 = arith.constant 0 : i32
    %c0_i32_2 = arith.constant 0 : i32
    return %c0_i32, %c0_i32_0, %c0_i32_1 : i32, i32, i32
  }
  func.func @transform_8(%arg0: i32) -> (i32, i32, i32) {
    %c0_i32 = arith.constant 0 : i32
    %c0_i32_0 = arith.constant 0 : i32
    %c0_i32_1 = arith.constant 0 : i32
    %c0_i32_2 = arith.constant 0 : i32
    return %c0_i32, %c0_i32_0, %c0_i32_1 : i32, i32, i32
  }
  func.func @transform_9(%arg0: i32) -> (i32, i32, i32) {
    %c0_i32 = arith.constant 0 : i32
    %c0_i32_0 = arith.constant 0 : i32
    %c0_i32_1 = arith.constant 0 : i32
    %c0_i32_2 = arith.constant 0 : i32
    return %c0_i32, %c0_i32_0, %c0_i32_1 : i32, i32, i32
  }
  func.func @transform_10(%arg0: i32) -> (i32, i32, i32) {
    %c0_i32 = arith.constant 0 : i32
    %c0_i32_0 = arith.constant 0 : i32
    %c0_i32_1 = arith.constant 0 : i32
    %c0_i32_2 = arith.constant 0 : i32
    return %c0_i32, %c0_i32_0, %c0_i32_1 : i32, i32, i32
  }
  func.func @transform_11(%arg0: i32) -> (i32, i32, i32) {
    %c0_i32 = arith.constant 0 : i32
    %c0_i32_0 = arith.constant 0 : i32
    %c0_i32_1 = arith.constant 0 : i32
    %c0_i32_2 = arith.constant 0 : i32
    return %c0_i32, %c0_i32_0, %c0_i32_1 : i32, i32, i32
  }
  func.func @transform_12(%arg0: i32) -> (i32, i32, i32) {
    %c0_i32 = arith.constant 0 : i32
    %c0_i32_0 = arith.constant 0 : i32
    %c0_i32_1 = arith.constant 0 : i32
    %c0_i32_2 = arith.constant 0 : i32
    return %c0_i32, %c0_i32_0, %c0_i32_1 : i32, i32, i32
  }
  func.func @transform_13(%arg0: i32) -> (i32, i32, i32) {
    %c0_i32 = arith.constant 0 : i32
    %c0_i32_0 = arith.constant 0 : i32
    %c0_i32_1 = arith.constant 0 : i32
    %c0_i32_2 = arith.constant 0 : i32
    return %c0_i32, %c0_i32_0, %c0_i32_1 : i32, i32, i32
  }
  func.func @transform_14(%arg0: i32) -> (i32, i32, i32) {
    %c0_i32 = arith.constant 0 : i32
    %c0_i32_0 = arith.constant 0 : i32
    %c0_i32_1 = arith.constant 0 : i32
    %c0_i32_2 = arith.constant 0 : i32
    return %c0_i32, %c0_i32_0, %c0_i32_1 : i32, i32, i32
  }
  func.func @transform_15(%arg0: i32) -> (i32, i32, i32) {
    %c0_i32 = arith.constant 0 : i32
    %c0_i32_0 = arith.constant 0 : i32
    %c0_i32_1 = arith.constant 0 : i32
    %c0_i32_2 = arith.constant 0 : i32
    return %c0_i32, %c0_i32_0, %c0_i32_1 : i32, i32, i32
  }
  func.func @transform_16(%arg0: i32) -> (i32, i32, i32) {
    %c0_i32 = arith.constant 0 : i32
    %c0_i32_0 = arith.constant 0 : i32
    %c0_i32_1 = arith.constant 0 : i32
    %c0_i32_2 = arith.constant 0 : i32
    return %c0_i32, %c0_i32_0, %c0_i32_1 : i32, i32, i32
  }
  func.func @transform_17(%arg0: i32) -> (i32, i32, i32) {
    %c0_i32 = arith.constant 0 : i32
    %c0_i32_0 = arith.constant 0 : i32
    %c0_i32_1 = arith.constant 0 : i32
    %c0_i32_2 = arith.constant 0 : i32
    return %c0_i32, %c0_i32_0, %c0_i32_1 : i32, i32, i32
  }
  func.func @transform_18(%arg0: i32) -> (i32, i32, i32) {
    %c0_i32 = arith.constant 0 : i32
    %c0_i32_0 = arith.constant 0 : i32
    %c0_i32_1 = arith.constant 0 : i32
    %c0_i32_2 = arith.constant 0 : i32
    return %c0_i32, %c0_i32_0, %c0_i32_1 : i32, i32, i32
  }
  func.func @transform_19(%arg0: i32) -> (i32, i32, i32) {
    %c0_i32 = arith.constant 0 : i32
    %c0_i32_0 = arith.constant 0 : i32
    %c0_i32_1 = arith.constant 0 : i32
    %c0_i32_2 = arith.constant 0 : i32
    return %c0_i32, %c0_i32_0, %c0_i32_1 : i32, i32, i32
  }
  func.func @transform_20(%arg0: i32) -> (i32, i32, i32) {
    %c0_i32 = arith.constant 0 : i32
    %c0_i32_0 = arith.constant 0 : i32
    %c0_i32_1 = arith.constant 0 : i32
    %c0_i32_2 = arith.constant 0 : i32
    return %c0_i32, %c0_i32_0, %c0_i32_1 : i32, i32, i32
  }
  func.func @transform_21(%arg0: i32) -> (i32, i32, i32) {
    %c0_i32 = arith.constant 0 : i32
    %c0_i32_0 = arith.constant 0 : i32
    %c0_i32_1 = arith.constant 0 : i32
    %c0_i32_2 = arith.constant 0 : i32
    return %c0_i32, %c0_i32_0, %c0_i32_1 : i32, i32, i32
  }
  func.func @transform_22(%arg0: i32) -> (i32, i32, i32) {
    %c0_i32 = arith.constant 0 : i32
    %c0_i32_0 = arith.constant 0 : i32
    %c0_i32_1 = arith.constant 0 : i32
    %c0_i32_2 = arith.constant 0 : i32
    return %c0_i32, %c0_i32_0, %c0_i32_1 : i32, i32, i32
  }
  func.func @transform_23(%arg0: i32) -> (i32, i32, i32) {
    %c0_i32 = arith.constant 0 : i32
    %c0_i32_0 = arith.constant 0 : i32
    %c0_i32_1 = arith.constant 0 : i32
    %c0_i32_2 = arith.constant 0 : i32
    return %c0_i32, %c0_i32_0, %c0_i32_1 : i32, i32, i32
  }
  func.func @transform_24(%arg0: i32) -> (i32, i32, i32) {
    %c0_i32 = arith.constant 0 : i32
    %c0_i32_0 = arith.constant 0 : i32
    %c0_i32_1 = arith.constant 0 : i32
    %c0_i32_2 = arith.constant 0 : i32
    return %c0_i32, %c0_i32_0, %c0_i32_1 : i32, i32, i32
  }
  func.func @transform_25(%arg0: i32) -> (i32, i32, i32) {
    %c0_i32 = arith.constant 0 : i32
    %c0_i32_0 = arith.constant 0 : i32
    %c0_i32_1 = arith.constant 0 : i32
    %c0_i32_2 = arith.constant 0 : i32
    return %c0_i32, %c0_i32_0, %c0_i32_1 : i32, i32, i32
  }
  func.func @transform_26(%arg0: i32) -> (i32, i32, i32) {
    %c0_i32 = arith.constant 0 : i32
    %c0_i32_0 = arith.constant 0 : i32
    %c0_i32_1 = arith.constant 0 : i32
    %c0_i32_2 = arith.constant 0 : i32
    return %c0_i32, %c0_i32_0, %c0_i32_1 : i32, i32, i32
  }
  func.func @transform_27(%arg0: i32) -> (i32, i32, i32) {
    %c0_i32 = arith.constant 0 : i32
    %c0_i32_0 = arith.constant 0 : i32
    %c0_i32_1 = arith.constant 0 : i32
    %c0_i32_2 = arith.constant 0 : i32
    return %c0_i32, %c0_i32_0, %c0_i32_1 : i32, i32, i32
  }
  func.func @transform_28(%arg0: i32) -> (i32, i32, i32) {
    %c0_i32 = arith.constant 0 : i32
    %c0_i32_0 = arith.constant 0 : i32
    %c0_i32_1 = arith.constant 0 : i32
    %c0_i32_2 = arith.constant 0 : i32
    return %c0_i32, %c0_i32_0, %c0_i32_1 : i32, i32, i32
  }
  func.func @transform_29(%arg0: i32) -> (i32, i32, i32) {
    %c0_i32 = arith.constant 0 : i32
    %c0_i32_0 = arith.constant 0 : i32
    %c0_i32_1 = arith.constant 0 : i32
    return %arg0, %c0_i32, %c0_i32_0 : i32, i32, i32
  }
  func.func @transform_30(%arg0: i32) -> (i32, i32, i32, i32) {
    %c0_i32 = arith.constant 0 : i32
    %c0_i32_0 = arith.constant 0 : i32
    %c0_i32_1 = arith.constant 0 : i32
    %c0_i32_2 = arith.constant 0 : i32
    return %arg0, %c0_i32, %c0_i32_0, %c0_i32_1 : i32, i32, i32, i32
  }
  func.func @transform_31(%arg0: i32) -> (i32, i32, i32, i32) {
    %c0_i32 = arith.constant 0 : i32
    %c0_i32_0 = arith.constant 0 : i32
    %c0_i32_1 = arith.constant 0 : i32
    %c0_i32_2 = arith.constant 0 : i32
    return %arg0, %c0_i32, %c0_i32_0, %c0_i32_1 : i32, i32, i32, i32
  }
  func.func @transform_32(%arg0: i32) -> (i32, i32, i32, i32) {
    %c0_i32 = arith.constant 0 : i32
    %c0_i32_0 = arith.constant 0 : i32
    %c0_i32_1 = arith.constant 0 : i32
    %c0_i32_2 = arith.constant 0 : i32
    return %arg0, %c0_i32, %c0_i32_0, %c0_i32_1 : i32, i32, i32, i32
  }
}

</mosaic_0001>

<bundles_post_ra>
// kernel: fwd.7
= control target key start
LH: loop header
LB: loop body
LE: loop exit
PB: predicated region body
PF: predicated region fallthrough
CT: control target
= control target key end

     0   :  { %vm28_vm0 = vcmask 261120   ;;  %v148_v1 = vmov 0.0   ;;  %vm149_vm1 = vmmov 0   ;;  %s193_s0 = inlined_call_operand.vmem [shape: bf16[14,32], index: 0, kind: input, shape index: {}]   ;;  %s194_s1 = inlined_call_operand.vmem [shape: f32[40,32], index: 1, kind: input, shape index: {}]   ;;  %s195_s2 = inlined_call_operand.hbm [shape: f32[14,40], index: 2, kind: output, shape index: {}]  }
   0x1   :  { %v19_v0 = vld [vmem:[%s194_s1 + $0x20] sm:$0xff]  ;;  %110 = vmatprep.subr.bf16.mxu0 %v148_v1  ;;  %v17_v3 = vld [vmem:[%s194_s1 + $0x10] sm:$0xff]  ;;  %116 = vmatprep.mubr.msk.bf16.mxu0 %vm149_vm1, %v148_v1  ;;  %v18_v4 = vld [vmem:[%s194_s1 + $0x18] sm:$0xff] }
   0x2   :  { %v22_v2 = vpack.c.bf16 %v19_v0, %v19_v0 }
   0x3   :  { %7 = vsyncpa [#allocation3], 0  ;;  %v21_v6 = vpack.c.bf16 %v18_v4, %v17_v3  ;;  %v15_v8 = vld [vmem:[%s194_s1] sm:$0xff]  ;;  %v16_v9 = vld [vmem:[%s194_s1 + $0x8] sm:$0xff]  ;;  %vm84_vm2 = vcmask 326656   ;;  %s150_s21 = smov [#allocation2]  }
   0x4   :  { %v39_v5 = vsel %vm28_vm0, %v22_v2, 0  ;;  %v20_v10 = vpack.c.bf16 %v16_v9, %v15_v8  ;;  %v125_v12 = vld [vmem:[%s193_s0] sm:$0x7f]   ;;  %s93_s22 = sshll.u32 %s150_s21, 4  ;;  %vm86_vm3 = vcmask 324608   ;;  %s94_s22 = int_to_ptr.vmem [resolvable:$true] %s93_s22 }
   0x5   :  { %111 = vmatpush3.bf16.xpose.msra.mxu0 %v39_v5  ;;  %v36_v7 = vsel %vm28_vm0, %v21_v6, 0  ;;  %s126_s1 = scalar_lea.vmem %s94_s22, 256  ;;  %p131_p1 = scmp.lt.s32.totalorder %s94_s22, %s94_s22 }
   0x6   :  { %112 = vmatprep.subr.bf16.mxu0 %v148_v1  ;;  %v33_v11 = vsel %vm28_vm0, %v20_v10, 0  ;;  %p127_p0 = scmp.ne.s32.totalorder %s94_s22, %s126_s1  ;;  %p132_p2 = scmp.lt.s32.totalorder %s126_s1, %s126_s1 }
   0x8   :  { %p133_p3 = por %p132_p2, %p131_p1 }
   0xa   :  { %p134_p4 = pnand %p133_p3, %p127_p0 }
   0xd   :  { %113 = vmatpush3.bf16.xpose.msra.mxu0 %v36_v7 }
   0xe   :  { %114 = vmatprep.subr.bf16.mxu0 %v148_v1 }
  0x15   :  { %115 = vmatpush3.bf16.xpose.msra.mxu0 %v33_v11 }
  0x1c   :  { %117 = vmatmul.mubr.msk.bf16.vlgmr.msra.gmra.mxu0 %vm28_vm0, %v125_v12 }
  0xdc   :  { %v75_v13 = vpop.f32.mrf.mxu0 }
  0xdd   :  { %v82_v14 = vmul.f32 0.17677669, %v75_v13 }
  0xde   :  { %v118_v15 = vpop.f32.mrf.mxu0 }
  0xdf   :  { %85 = vst.msk [vmem:[#allocation2] sm:$0xff] %vm84_vm2, %v82_v14 }
  0xe0   :  { %v78_v16 = vpop.f32.mrf.mxu0 }
  0xe1   :  { %v83_v17 = vmul.f32 0.17677669, %v78_v16 }
  0xe2   :  { %v119_v18 = vpop.f32.mrf.mxu0 }
  0xe3   :  { %87 = vst.msk [vmem:[#allocation2 + $0x8] sm:$0x3f] %vm86_vm3, %v83_v17 }
  0xe4   :  { %137 = shalt.err (!%p134_p4)
}
  0xe5   :  { %s151_s0 = smov 128   ;;  %s152_s23 = smov 8  }
  0xe6   :  { %99 = dma.vmem_to_hbm [thread:$0]  %s94_s22, 256, %s195_s2, [#allocation3], %s151_s0, %s151_s0, %s152_s23  }
  0xe7   :  { %146 = dma.done.wait [#allocation3], 256  }
  0xe8   :  { %147 = vsyncadd [#allocation3], 4294967040 }
  0xe9   :  { %103 = vsyncpa [#allocation3], 1 }

// kernel: fwd.4
= control target key start
LH: loop header
LB: loop body
LE: loop exit
PB: predicated region body
PF: predicated region fallthrough
CT: control target
= control target key end

     0   :  { %s3191_s21 = smov 0   ;;  %s3639_s0 = inlined_call_operand.vmem [shape: f32[2,8,32], index: 0, kind: input, shape index: {}]   ;;  %s3640_s1 = inlined_call_operand.vmem [shape: f32[2,8,8], index: 1, kind: input, shape index: {}]   ;;  %s3641_s2 = inlined_call_operand.vmem [shape: f32[2,8,1], index: 2, kind: input, shape index: {}]   ;;  %s3642_s3 = inlined_call_operand.vmem [shape: bf16[2,32,192], index: 3, kind: input, shape index: {}]   ;;  %s3643_s4 = inlined_call_operand.vmem [shape: f32[2,1,192], index: 4, kind: input, shape index: {}]   ;;  %s3644_s5 = inlined_call_operand.vmem [shape: bf16[2,64,32], index: 5, kind: input, shape index: {}]   ;;  %s3645_s6 = inlined_call_operand.vmem [shape: f32[2,1,32], index: 6, kind: input, shape index: {}]   ;;  %s3646_s7 = inlined_call_operand.vmem [shape: f32[2,1,32], index: 7, kind: input, shape index: {}]   ;;  %s3647_s8 = inlined_call_operand.vmem [shape: f32[2,1,32], index: 8, kind: input, shape index: {}]   ;;  %s3648_s9 = inlined_call_operand.vmem [shape: bf16[2,32,64], index: 9, kind: input, shape index: {}]   ;;  %s3649_s10 = inlined_call_operand.vmem [shape: f32[2,1,64], index: 10, kind: input, shape index: {}]   ;;  %s3650_s11 = inlined_call_operand.vmem [shape: bf16[2,64,32], index: 11, kind: input, shape index: {}]   ;;  %s3651_s12 = inlined_call_operand.vmem [shape: f32[2,1,32], index: 12, kind: input, shape index: {}]   ;;  %s3652_s13 = inlined_call_operand.vmem [shape: f32[2,1,32], index: 13, kind: input, shape index: {}]   ;;  %s3653_s14 = inlined_call_operand.vmem [shape: f32[2,1,32], index: 14, kind: input, shape index: {}]   ;;  %s3654_s15 = inlined_call_operand.vmem [shape: bf16[2,8,32], index: 15, kind: output, shape index: {0}]   ;;  %s3655_s16 = inlined_call_operand.vmem [shape: f32[2,8,8,8], index: 16, kind: output, shape index: {1}]  }
   0x1   :  { %3664 = sst [smem:[#allocation2_spill]] %s3639_s0 }
   0x2 LB: > { %s2623_s22 = sadd.s32 4294967295, %s3094_s21   ;;  %p2627_p0 = scmp.ge.s32.totalorder %s3094_s21, 1  ;;  %s3094_s21 = sphi %s3191_s21, %s27_s21  }
   0x3   : > { %p482_p1 = scmp.lt.s32.totalorder %s3094_s21, 3 }
   0x5   : > { %p483_p2 = pnand %p2627_p0, %p482_p1 }
   0x6   : > { %p543_p3 = scmp.lt.s32.totalorder (!%p483_p2), %s2623_s22, 1  ;;  %s3665_s19 = sld [smem:[#allocation2_spill]] (!%p483_p2) }
   0x7   : > { %486 = sbr.rel (%p483_p2) target bundleno = 6983 (0x1b47), region = 80  ;;  %s3662_s25 = smov (!%p483_p2), 112  }
   0x8   : > { %s3100_s26 = smov (!%p483_p2), 64   ;;  %s3101_s27 = smov (!%p483_p2), 48  }
   0x9   : > { %s3659_s17 = smov (!%p483_p2), 32   ;;  %s3660_s18 = smov (!%p483_p2), 96  }
   0xa   : > { %s3658_s23 = smov (!%p483_p2), 16  }
   0xc   : > { %v3016_v0 = vld [vmem:[%s3642_s3 + $0x14] ss:$8 sps:$4 sm:$0xff]   ;;  %v3018_v1 = vld [vmem:[%s3642_s3 + $0x10] ss:$8 sps:$4 sm:$0xff]   ;;  %v3096_v2 = vmov 0   ;;  %s3672_s22 = smov (!%p543_p3, %s2623_s22), 1  ;;  %v575_v8 = vlaneseq }
   0xd   : > { %641 = vmatprep.mubr.bf16.mxu1 %v3096_v2  ;;  %3014 = vset.pattern.permute.xlu1 %v3096_v2  ;;  %v3019_v3 = vld [vmem:[%s3642_s3 + $0x4] ss:$8 sps:$4 sm:$0xff]   ;;  %v3021_v4 = vld [vmem:[%s3642_s3] ss:$8 sps:$4 sm:$0xff]   ;;  %s3217_s0 = sshll.u32 %s3672_s22, 3  ;;  %vm605_vm0 = vcmask 261120  }
   0xe   : > { %621 = vmatprep.subr.bf16.mxu1 %v3016_v0  ;;  %3015 = vset.pattern.permute.xlu0 %v3096_v2  ;;  %s546_s20 = scalar_lea.vmem %s3665_s19, %s3217_s0  ;;  %v3097_v7 = vmov 0.0   ;;  %v3230_v9 = vshrl.u32 %v575_v8, 7  ;;  %v573_v11 = vld [vmem:[%s3643_s4] sm:$0x3]  ;;  %vm3098_vm1 = vmmov 0   ;;  %vm727_vm2 = vcmask 1043456   ;;  %s550_s30 = scalar_lea.vmem %s3640_s1, %s3217_s0 }
   0xf   : > { %622 = vmatpush1.bf16.msra.mxu1 %v3018_v1  ;;  %v3223_v5 = vld [vmem:[%s546_s20] sm:$0xff]  ;;  %2818 = vmatprep.subr.bf16.mxu0 %v3097_v7  ;;  %vm663_vm3 = vcmask 130048   ;;  %vm710_vm4 = vcmask 64512   ;;  %s2747_s19 = sshll.u32 %s3672_s22, 6  ;;  %v3023_v63 = vld [vmem:[%s3644_s5 + $0x8] sm:$0xff]   ;;  %s3656_s20 = smov 80  }
  0x10   : > { %623 = vmatprep.subr.bf16.mxu1 %v3019_v3  ;;  %v568_v6 = vpack.c.bf16 %v3223_v5, %v3223_v5  ;;  %v577_v10 = vsub.s32 0, %v3230_v9  ;;  %v581_v12 = vsub.s32 1, %v3230_v9  ;;  %2820 = vmatprep.mubr.msk.bf16.mxu0 %vm3098_vm1, %v3097_v7  ;;  %v3273_v29 = vld [vmem:[%s550_s30] sm:$0xff]  ;;  %s3291_s24 = scalar_lea.vmem %s3655_s16, %s2747_s19  ;;  %s554_s28 = scalar_lea.vmem %s3641_s2, %s3217_s0  ;;  %vm1463_vm5 = vcmask 523264  }
  0x11   : > { %v3022_v62 = vld [vmem:[%s3644_s5] sm:$0xff]   ;;  %vm2511_vm6 = vcmask 257024  }
  0x12   : > { %v578_v13 = vrot.slane %v573_v11, %v577_v10  ;;  %v582_v14 = vrot.slane %v573_v11, %v581_v12 }
  0x13   : > { %624 = vmatpush1.bf16.msra.mxu1 %v3021_v4 }
  0x14   : > { %2812 = vmatprep.subr.bf16.mxu1 %v3097_v7 }
  0x16   : > { %2638 = vmatmul.mubr.msk.bf16.vlgmr.msra.gmra.mxu1 %vm605_vm0, %v568_v6 }
  0x17   : > { %2814 = vmatprep.mubr.msk.bf16.mxu1 %vm3098_vm1, %v3097_v7 }
  0xd6   : > { %v643_v15 = vpop.f32.mrf.mxu1 }
  0xd7   : > { %v644_v16 = vadd.f32 %v643_v15, %v578_v13 }
  0xd8   : > { %v645_v17 = vpop.f32.mrf.mxu1 }
  0xd9   : > { %v3245_v18 = vpack.c.bf16 %v644_v16, %v644_v16  ;;  %v646_v19 = vadd.f32 %v645_v17, %v582_v14 }
  0xda   : > { %v647_v20 = vpop.f32.mrf.mxu1 }
  0xdb   : > { %v3247_v21 = vpack.c.bf16 %v646_v19, %v646_v19  ;;  %772 = vrot.lane.b32.xlu1 %v3245_v18, %s3662_s25  ;;  %661 = vrot.lane.b32.xlu0 %v3245_v18, %s3100_s26 }
  0xdc   : > { %v648_v22 = vpop.f32.mrf.mxu1 }
  0xdd   : > { %v729_v23 = vsel %vm727_vm2, %v3247_v21, 0 }
  0xde   : > { %2819 = vmatpush3.bf16.msra.mxu0 %v729_v23 }
  0xdf   : > { %774 = vrot.lane.b32.xlu0 %v3245_v18, %s3101_s27  ;;  %2830 = vmatprep.subr.bf16.mxu0 %v3097_v7 }
 0x14d   : > { %v662_v24 = vpop.permute.xlu0 %661  ;;  %v773_v28 = vpop.permute.xlu1 %772 }
 0x14e   : > { %v668_v25 = vsel %vm663_vm3, %v662_v24, 0 }
 0x14f   : > { %2813 = vmatpush3.bf16.xpose.msra.mxu1 %v668_v25 }
 0x150   : > { %2824 = vmatprep.subr.bf16.mxu1 %v3097_v7 }
 0x151   : > { %v775_v26 = vpop.permute.xlu0 %774 }
 0x152   : > { %v780_v27 = vsel %vm663_vm3, %v775_v26, 0 }
 0x156   : > { %2815 = vmatmul.mubr.msk.bf16.vlgmr.msra.gmra.mxu1 %vm663_vm3, %v3245_v18 }
 0x157   : > { %2825 = vmatpush3.bf16.xpose.msra.mxu1 %v780_v27  ;;  %2826 = vmatprep.mubr.msk.bf16.mxu1 %vm3098_vm1, %v3097_v7 }
 0x158   : > { %2836 = vmatprep.subr.bf16.mxu1 %v3097_v7 }
 0x15e   : > { %2827 = vmatmul.mubr.msk.bf16.vlgmr.msra.gmra.mxu1 %vm663_vm3, %v773_v28 }
 0x15f   : > { %2838 = vmatprep.mubr.msk.bf16.mxu1 %vm3098_vm1, %v3097_v7  ;;  %2837 = vmatpush3.bf16.msra.mxu1 %v3023_v63 }
 0x160   : > { %2848 = vmatprep.subr.bf16.mxu1 %v3097_v7 }
 0x216   : > { %v704_v30 = vpop.f32.mrf.mxu1 }
 0x217   : > { %v705_v31 = vadd.f32 %v704_v30, %v3273_v29 }
 0x218   : > { %v2816_v32 = vpop.f32.mrf.mxu1 }
 0x219   : > { %v711_v33 = vsel %vm710_vm4, %v705_v31, -inf }
 0x21a   : > { %712 = vmax.xlane.f32.xlu1 %v711_v33  ;;  %v707_v34 = vpop.f32.mrf.mxu1 }
 0x21c   : > { %v2817_v35 = vpop.f32.mrf.mxu1 }
 0x21e   : > { %v816_v36 = vpop.f32.mrf.mxu1 }
 0x21f   : > { %v817_v37 = vadd.f32 %v816_v36, %v3273_v29 }
 0x220   : > { %v2828_v38 = vpop.f32.mrf.mxu1 }
 0x221   : > { %v822_v39 = vsel %vm710_vm4, %v817_v37, -inf }
 0x222   : > { %823 = vmax.xlane.f32.xlu0 %v822_v39  ;;  %v819_v40 = vpop.f32.mrf.mxu1 }
 0x224   : > { %v2829_v41 = vpop.f32.mrf.mxu1 }
 0x2a3   : > { %v713_v42 = vpop.xlane.xlu1 %712 }
 0x2a4   : > { %v714_v43 = vsub.f32 %v705_v31, %v713_v42 }
 0x2a6   : > { %v715_v44 = vmul.f32 1.442695, %v714_v43 }
 0x2a8   : > { %3048 = vpow2.f32 %v715_v44 }
 0x2ab   : > { %v824_v45 = vpop.xlane.xlu0 %823 }
 0x2ac   : > { %v825_v46 = vsub.f32 %v817_v37, %v824_v45 }
 0x2ae   : > { %v826_v47 = vmul.f32 1.442695, %v825_v46 }
 0x2b0   : > { %3050 = vpow2.f32 %v826_v47 }
 0x2b5   : > { %v3049_v48 = vpop.eup %3048 }
 0x2b6   : > { %v717_v49 = vsel %vm710_vm4, %v3049_v48, 0.0 }
 0x2b7   : > { %718 = vadd.xlane.f32.xlu0 %v717_v49 }
 0x2bd   : > { %v3051_v50 = vpop.eup %3050 }
 0x2be   : > { %v828_v51 = vsel %vm710_vm4, %v3051_v50, 0.0 }
 0x2bf   : > { %829 = vadd.xlane.f32.xlu1 %v828_v51 }
 0x2cd   : > { %837 = vrot.lane.b32.xlu0 %v3247_v21, %s3662_s25  ;;  %s3670_s25 = smov 80  }
 0x2d0   : > { %986 = vrot.lane.b32.xlu1 %v3245_v18, %s3659_s17 }
 0x2d4   : > { %984 = vrot.lane.b32.xlu1 %v3245_v18, %s3660_s18 }
 0x340   : > { %v719_v52 = vpop.xlane.xlu0 %718 }
 0x341   : > { %3052 = vrcp.f32 %v719_v52 }
 0x344   : > { %v838_v56 = vpop.permute.xlu0 %837 }
 0x345   : > { %v843_v58 = vsel %vm727_vm2, %v838_v56, 0 }
 0x348   : > { %v830_v53 = vpop.xlane.xlu1 %829 }
 0x349   : > { %3054 = vrcp.f32 %v830_v53 }
 0x34c   : > { %v987_v8 = vpop.permute.xlu1 %986 }
 0x34d   : > { %v992_v15 = vsel %vm663_vm3, %v987_v8, 0 }
 0x34e   : > { %v3053_v54 = vpop.eup %3052 }
 0x34f   : > { %v721_v55 = vmul.f32 %v3053_v54, %v3049_v48 }
 0x350   : > { %v985_v19 = vpop.permute.xlu1 %984 }
 0x351   : > { %722 = vst.msk [vmem:[%s3291_s24] sm:$0xff] %vm710_vm4, %v721_v55  ;;  %v723_v57 = vpack.c.bf16 %v721_v55, %v721_v55 }
 0x353   : > { %2821 = vmatmul.mubr.msk.bf16.vlgmr.msra.gmra.mxu0 %vm710_vm4, %v723_v57 }
 0x354   : > { %2831 = vmatpush3.bf16.msra.mxu0 %v843_v58  ;;  %2832 = vmatprep.mubr.msk.bf16.mxu0 %vm3098_vm1, %v3097_v7 }
 0x355   : > { %2842 = vmatprep.subr.bf16.mxu0 %v3097_v7 }
 0x356   : > { %v3055_v59 = vpop.eup %3054 }
 0x357   : > { %v832_v60 = vmul.f32 %v3055_v59, %v3051_v50 }
 0x359   : > { %2642 = vst.msk [vmem:[%s3291_s24 + $0x8] sm:$0xff] %vm710_vm4, %v832_v60  ;;  %v835_v61 = vpack.c.bf16 %v832_v60, %v832_v60 }
 0x35b   : > { %2833 = vmatmul.mubr.msk.bf16.vlgmr.msra.gmra.mxu0 %vm710_vm4, %v835_v61 }
 0x35c   : > { %2844 = vmatprep.mubr.msk.bf16.mxu0 %vm3098_vm1, %v3097_v7  ;;  %2843 = vmatpush3.bf16.msra.mxu0 %v3022_v62 }
 0x35d   : > { %2854 = vmatprep.subr.bf16.mxu0 %v3097_v7 }
 0x413   : > { %v765_v0 = vpop.f32.mrf.mxu0 }
 0x414   : > { %v771_v1 = vpack.c.bf16 %v765_v0, %v765_v0 }
 0x415   : > { %v2822_v3 = vpop.f32.mrf.mxu0 }
 0x416   : > { %2845 = vmatmul.mubr.msk.bf16.vlgmr.msra.gmra.mxu0 %vm663_vm3, %v771_v1 }
 0x417   : > { %v768_v4 = vpop.f32.mrf.mxu0  ;;  %2856 = vmatprep.mubr.msk.bf16.mxu0 %vm3098_vm1, %v3097_v7 }
 0x419   : > { %v2823_v6 = vpop.f32.mrf.mxu0 }
 0x41b   : > { %v879_v11 = vpop.f32.mrf.mxu0 }
 0x41c   : > { %v885_v13 = vpack.c.bf16 %v879_v11, %v879_v11  ;;  %v3025_v11 = vld [vmem:[%s3644_s5 + $0x18] sm:$0xff]  }
 0x41d   : > { %v2834_v14 = vpop.f32.mrf.mxu0 }
 0x41e   : > { %2839 = vmatmul.mubr.msk.bf16.vlgmr.msra.gmra.mxu1 %vm663_vm3, %v885_v13 }
 0x41f   : > { %2849 = vmatpush3.bf16.xpose.msra.mxu1 %v992_v15  ;;  %v882_v16 = vpop.f32.mrf.mxu0  ;;  %2850 = vmatprep.mubr.msk.bf16.mxu1 %vm3098_vm1, %v3097_v7 }
 0x420   : > { %2860 = vmatprep.subr.bf16.mxu1 %v3097_v7 }
 0x421   : > { %v2835_v17 = vpop.f32.mrf.mxu0 }
 0x426   : > { %2851 = vmatmul.mubr.msk.bf16.vlgmr.msra.gmra.mxu1 %vm663_vm3, %v985_v19 }
 0x427   : > { %2862 = vmatprep.mubr.msk.bf16.mxu1 %vm3098_vm1, %v3097_v7 }
 0x4d6   : > { %v978_v20 = vpop.f32.mrf.mxu0 }
 0x4d8   : > { %v2846_v22 = vpop.f32.mrf.mxu0 }
 0x4da   : > { %v981_v23 = vpop.f32.mrf.mxu0 }
 0x4dc   : > { %v2847_v24 = vpop.f32.mrf.mxu0 }
 0x4de   : > { %v929_v25 = vpop.f32.mrf.mxu1 }
 0x4df   : > { %v3324_v26 = vadd.f32 %v978_v20, %v929_v25 }
 0x4e0   : > { %v2840_v27 = vpop.f32.mrf.mxu1 }
 0x4e2   : > { %v932_v28 = vpop.f32.mrf.mxu1 }
 0x4e3   : > { %v2658_v28 = vld [vmem:[%s3645_s6] ss:$0 sm:$0xff] }
 0x4e4   : > { %v2841_v30 = vpop.f32.mrf.mxu1 }
 0x4e6   : > { %v1028_v31 = vpop.f32.mrf.mxu1 }
 0x4e7   : > { %v1029_v32 = vadd.f32 %v1028_v31, %v3273_v29 }
 0x4e8   : > { %v2852_v33 = vpop.f32.mrf.mxu1 }
 0x4e9   : > { %v1034_v34 = vsel %vm710_vm4, %v1029_v32, -inf }
 0x4ea   : > { %1035 = vmax.xlane.f32.xlu0 %v1034_v34  ;;  %v1031_v35 = vpop.f32.mrf.mxu1 }
 0x4ec   : > { %v2853_v36 = vpop.f32.mrf.mxu1 }
 0x500   : > { %1048 = vrot.lane.b32.xlu0 %v3247_v21, %s3660_s18 }
 0x504   : > { %1147 = vrot.lane.b32.xlu0 %v3245_v18, %s3656_s20 }
 0x573   : > { %v1036_v37 = vpop.xlane.xlu0 %1035 }
 0x574   : > { %v1037_v38 = vsub.f32 %v1029_v32, %v1036_v37 }
 0x576   : > { %v1038_v39 = vmul.f32 1.442695, %v1037_v38 }
 0x577   : > { %v1049_v40 = vpop.permute.xlu0 %1048 }
 0x578   : > { %3056 = vpow2.f32 %v1038_v39  ;;  %v1054_v41 = vsel %vm727_vm2, %v1049_v40, 0 }
 0x579   : > { %2855 = vmatpush3.bf16.msra.mxu0 %v1054_v41 }
 0x57a   : > { %2866 = vmatprep.subr.bf16.mxu0 %v3097_v7 }
 0x57b   : > { %v1148_v50 = vpop.permute.xlu0 %1147 }
 0x585   : > { %v3057_v42 = vpop.eup %3056 }
 0x586   : > { %v1040_v43 = vsel %vm710_vm4, %v3057_v42, 0.0 }
 0x587   : > { %1041 = vadd.xlane.f32.xlu1 %v1040_v43  ;;  %v3027_v43 = vld [vmem:[%s3648_s9] sm:$0xff]  }
 0x598   : > { %1149 = vrot.lane.b32.xlu1 %v3245_v18, %s3658_s23  ;;  %v3024_v18 = vld [vmem:[%s3644_s5 + $0x10] sm:$0xff]  }
 0x599   : > { %2861 = vmatpush3.bf16.msra.mxu1 %v3024_v18 }
 0x59a   : > { %2872 = vmatprep.subr.bf16.mxu1 %v3097_v7 }
 0x610   : > { %v1042_v44 = vpop.xlane.xlu1 %1041 }
 0x611   : > { %3058 = vrcp.f32 %v1042_v44  ;;  %v3028_v44 = vld [vmem:[%s3650_s11 + $0x18] sm:$0xff]  }
 0x614   : > { %v1150_v47 = vpop.permute.xlu1 %1149 }
 0x615   : > { %v1155_v49 = vsel %vm663_vm3, %v1150_v47, 0 }
 0x61e   : > { %v3059_v45 = vpop.eup %3058 }
 0x61f   : > { %v1044_v46 = vmul.f32 %v3059_v45, %v3057_v42  ;;  %v567_v42 = vld [vmem:[%s554_s28] sm:$0xff]  ;;  %v3029_v45 = vld [vmem:[%s3650_s11 + $0x10] sm:$0xff]   ;;  %s3666_s28 = smov 112  }
 0x621   : > { %2649 = vst.msk [vmem:[%s3291_s24 + $0x10] sm:$0xff] %vm710_vm4, %v1044_v46  ;;  %v1047_v48 = vpack.c.bf16 %v1044_v46, %v1044_v46 }
 0x623   : > { %2857 = vmatmul.mubr.msk.bf16.vlgmr.msra.gmra.mxu0 %vm710_vm4, %v1047_v48 }
 0x624   : > { %2867 = vmatpush3.bf16.xpose.msra.mxu0 %v1155_v49  ;;  %2868 = vmatprep.mubr.msk.bf16.mxu0 %vm3098_vm1, %v3097_v7 }
 0x625   : > { %2878 = vmatprep.subr.bf16.mxu0 %v3097_v7 }
 0x62b   : > { %2869 = vmatmul.mubr.msk.bf16.vlgmr.msra.gmra.mxu0 %vm663_vm3, %v1148_v50  ;;  %v2659_v50 = vld [vmem:[%s3646_s7] ss:$0 sm:$0xff] }
 0x62c   : > { %2880 = vmatprep.mubr.msk.bf16.mxu0 %vm3098_vm1, %v3097_v7  ;;  %2879 = vmatpush3.bf16.msra.mxu0 %v3025_v11 }
 0x62d   : > { %2892 = vmatprep.subr.bf16.mxu0 %v3097_v7 }
 0x6e3   : > { %v1090_v51 = vpop.f32.mrf.mxu0 }
 0x6e4   : > { %v1096_v52 = vpack.c.bf16 %v1090_v51, %v1090_v51  ;;  %v2660_v51 = vld [vmem:[%s3647_s8] ss:$0 sm:$0xff] }
 0x6e5   : > { %v2858_v53 = vpop.f32.mrf.mxu0 }
 0x6e6   : > { %2863 = vmatmul.mubr.msk.bf16.vlgmr.msra.gmra.mxu1 %vm663_vm3, %v1096_v52 }
 0x6e7   : > { %v1093_v54 = vpop.f32.mrf.mxu0  ;;  %2874 = vmatprep.mubr.msk.bf16.mxu1 %vm3098_vm1, %v3097_v7 }
 0x6e9   : > { %v2859_v55 = vpop.f32.mrf.mxu0 }
 0x6eb   : > { %v1191_v56 = vpop.f32.mrf.mxu0 }
 0x6ec   : > { %v1192_v57 = vadd.f32 %v1191_v56, %v3273_v29 }
 0x6ed   : > { %v2870_v58 = vpop.f32.mrf.mxu0 }
 0x6ee   : > { %v1197_v59 = vsel %vm710_vm4, %v1192_v57, -inf  ;;  %v3031_v58 = vld [vmem:[%s3650_s11] sm:$0xff]  }
 0x6ef   : > { %1198 = vmax.xlane.f32.xlu1 %v1197_v59  ;;  %v1194_v60 = vpop.f32.mrf.mxu0  ;;  %v2661_v59 = vld [vmem:[%s3649_s10] ss:$0 sm:$0xff] }
 0x6f1   : > { %v2871_v61 = vpop.f32.mrf.mxu0 }
 0x778   : > { %v1199_v62 = vpop.xlane.xlu1 %1198 }
 0x779   : > { %v1200_v63 = vsub.f32 %v1192_v57, %v1199_v62  ;;  %v3030_v57 = vld [vmem:[%s3650_s11 + $0x8] sm:$0xff]  }
 0x77b   : > { %v1201_v0 = vmul.f32 1.442695, %v1200_v63 }
 0x77d   : > { %3060 = vpow2.f32 %v1201_v0 }
 0x78a   : > { %v3061_v1 = vpop.eup %3060 }
 0x78b   : > { %v1203_v3 = vsel %vm710_vm4, %v3061_v1, 0.0 }
 0x78c   : > { %1204 = vadd.xlane.f32.xlu0 %v1203_v3  ;;  %v2665_v3 = vld [vmem:[%s3651_s12] ss:$0 sm:$0xff] }
 0x7a2   : > { %1211 = vrot.lane.b32.xlu0 %v3247_v21, %s3656_s20  ;;  %s3669_s20 = smov 16  }
 0x7a6   : > { %v1140_v4 = vpop.f32.mrf.mxu1 }
 0x7a7   : > { %v1146_v6 = vadd.f32 %v1140_v4, %v3324_v26 }
 0x7a8   : > { %v2864_v8 = vpop.f32.mrf.mxu1 }
 0x7aa   : > { %v1143_v13 = vpop.f32.mrf.mxu1 }
 0x7ac   : > { %v2865_v14 = vpop.f32.mrf.mxu1 }
 0x815   : > { %v1205_v15 = vpop.xlane.xlu0 %1204 }
 0x816   : > { %3062 = vrcp.f32 %v1205_v15 }
 0x819   : > { %v1212_v16 = vpop.permute.xlu0 %1211 }
 0x81a   : > { %v1217_v17 = vsel %vm727_vm2, %v1212_v16, 0 }
 0x81b   : > { %2873 = vmatpush3.bf16.msra.mxu1 %v1217_v17 }
 0x81c   : > { %2884 = vmatprep.subr.bf16.mxu1 %v3097_v7 }
 0x823   : > { %v3063_v21 = vpop.eup %3062 }
 0x824   : > { %v1207_v19 = vmul.f32 %v3063_v21, %v3061_v1 }
 0x826   : > { %2654 = vst.msk [vmem:[%s3291_s24 + $0x18] sm:$0xff] %vm710_vm4, %v1207_v19  ;;  %v1210_v20 = vpack.c.bf16 %v1207_v19, %v1207_v19 }
 0x828   : > { %2875 = vmatmul.mubr.msk.bf16.vlgmr.msra.gmra.mxu1 %vm710_vm4, %v1210_v20 }
 0x829   : > { %2888 = vmatprep.mubr.msk.bf16.mxu1 %vm3098_vm1, %v3097_v7 }
 0x8e8   : > { %v1253_v22 = vpop.f32.mrf.mxu1 }
 0x8e9   : > { %v1259_v23 = vpack.c.bf16 %v1253_v22, %v1253_v22  ;;  %v3034_v22 = vld [vmem:[%s3642_s3 + $0x34] ss:$8 sps:$4 sm:$0xff]  }
 0x8ea   : > { %v2876_v24 = vpop.f32.mrf.mxu1 }
 0x8eb   : > { %2881 = vmatmul.mubr.msk.bf16.vlgmr.msra.gmra.mxu0 %vm663_vm3, %v1259_v23  ;;  %v3032_v23 = vld [vmem:[%s3642_s3 + $0x30] ss:$8 sps:$4 sm:$0xff]   ;;  %v3037_v24 = vld [vmem:[%s3642_s3 + $0x24] ss:$8 sps:$4 sm:$0xff]  }
 0x8ec   : > { %v1256_v25 = vpop.f32.mrf.mxu1  ;;  %2900 = vmatprep.mubr.msk.bf16.mxu0 %vm3098_vm1, %v3097_v7  ;;  %2893 = vmatpush3.bf16.msra.mxu0 %v3028_v44 }
 0x8ed   : > { %2894 = vmatprep.subr.bf16.mxu0 %v3097_v7  ;;  %v3035_v25 = vld [vmem:[%s3642_s3 + $0x20] ss:$8 sps:$4 sm:$0xff]  }
 0x8ee   : > { %v2877_v26 = vpop.f32.mrf.mxu1 }
 0x8f0   : > { %2895 = vmatpush3.bf16.msra.mxu0 %v3029_v45 }
 0x8f1   : > { %2896 = vmatprep.subr.bf16.mxu0 %v3097_v7 }
 0x8f4   : > { %2897 = vmatpush3.bf16.msra.mxu0 %v3030_v57 }
 0x8f5   : > { %2898 = vmatprep.subr.bf16.mxu0 %v3097_v7 }
 0x8f8   : > { %2899 = vmatpush3.bf16.msra.mxu0 %v3031_v58 }
 0x8f9   : > { %2910 = vmatprep.subr.bf16.mxu0 %v3097_v7 }
 0x9ab   : > { %v1303_v27 = vpop.f32.mrf.mxu0 }
 0x9ac   : > { %v1309_v30 = vadd.f32 %v1303_v27, %v1146_v6 }
 0x9ad   : > { %v2882_v31 = vpop.f32.mrf.mxu0 }
 0x9ae   : > { %v1317_v32 = vadd.f32 %v2658_v28, %v1309_v30  ;;  %v2671_v31 = vld [vmem:[%s3652_s13] ss:$0 sm:$0xff] }
 0x9af   : > { %v1306_v33 = vpop.f32.mrf.mxu0 }
 0x9b0   : > { %v1318_v34 = vadd.f32 %v1317_v32, %v3223_v5  ;;  %v3026_v5 = vld [vmem:[%s3648_s9 + $0x8] sm:$0xff]   ;;  %v2672_v33 = vld [vmem:[%s3653_s14] ss:$0 sm:$0xff] }
 0x9b1   : > { %v2883_v35 = vpop.f32.mrf.mxu0  ;;  %2885 = vmatpush3.bf16.msra.mxu1 %v3026_v5 }
 0x9b2   : > { %v1321_v36 = vsel %vm605_vm0, %v1318_v34, 0.0  ;;  %2886 = vmatprep.subr.bf16.mxu1 %v3097_v7 }
 0x9b3   : > { %1322 = vadd.xlane.f32.xlu1 %v1321_v36 }
 0x9b5   : > { %2887 = vmatpush3.bf16.msra.mxu1 %v3027_v43 }
 0x9b6   : > { %1592 = vmatprep.subr.bf16.mxu1 %v3034_v22 }
 0xa3c   : > { %v1323_v37 = vpop.xlane.xlu1 %1322 }
 0xa3d   : > { %v1325_v38 = vmul.f32 0.03125, %v1323_v37 }
 0xa3f   : > { %v1326_v39 = vsub.f32 %v1318_v34, %v1325_v38  ;;  %v2677_v38 = vld [vmem:[%s3643_s4 + $0x2] sm:$0x3] }
 0xa41   : > { %v1327_v40 = vmul.f32 %v1326_v39, %v1326_v39 }
 0xa43   : > { %v1328_v41 = vsel %vm605_vm0, %v1327_v40, 0.0  ;;  %v1554_v40 = vrot.slane %v2677_v38, %v581_v12 }
 0xa44   : > { %1329 = vadd.xlane.f32.xlu1 %v1328_v41 }
 0xa55   : > { %1351 = vperm.xlu1 %3014, %v567_v42  }
 0xacd   : > { %v1330_v46 = vpop.xlane.xlu1 %1329 }
 0xace   : > { %v1331_v47 = vmul.f32 0.03125, %v1330_v46 }
 0xad0   : > { %v1332_v48 = vadd.f32 1e-05, %v1331_v47 }
 0xad1   : > { %v3405_v53 = vpop.permute.xlu1 %1351 }
 0xad2   : > { %3064 = vrsqrt.f32 %v1332_v48 }
 0xadf   : > { %v3065_v49 = vpop.eup %3064 }
 0xae0   : > { %v1334_v18 = vmul.f32 %v3065_v49, %v1326_v39  ;;  %v1550_v39 = vrot.slane %v2677_v38, %v577_v10 }
 0xae2   : > { %v1341_v52 = vmul.f32 %v2659_v50, %v1334_v18 }
 0xae4   : > { %v1348_v54 = vadd.f32 %v2660_v51, %v1341_v52 }
 0xae6   : > { %v1354_v55 = vmul.f32 %v3405_v53, %v1348_v54 }
 0xae8   : > { %v1355_v56 = vpack.c.bf16 %v1354_v55, %v1354_v55 }
 0xaea   : > { %2889 = vmatmul.mubr.msk.bf16.vlgmr.msra.gmra.mxu1 %vm605_vm0, %v1355_v56 }
 0xaeb   : > { %1612 = vmatprep.mubr.bf16.mxu1 %v3096_v2  ;;  %1593 = vmatpush1.bf16.msra.mxu1 %v3032_v23 }
 0xaec   : > { %1594 = vmatprep.subr.bf16.mxu1 %v3037_v24 }
 0xaef   : > { %1595 = vmatpush1.bf16.msra.mxu1 %v3035_v25  ;;  %v3038_v25 = vld [vmem:[%s3644_s5 + $0x20] sm:$0xff]  }
 0xaf0   : > { %2904 = vmatprep.subr.bf16.mxu1 %v3097_v7 }
 0xbaa   : > { %v1416_v60 = vpop.f32.mrf.mxu1 }
 0xbab   : > { %v1417_v2 = vadd.f32 %v2661_v59, %v1416_v60 }
 0xbac   : > { %v2890_v61 = vpop.f32.mrf.mxu1 }
 0xbad   : > { %v1422_v62 = vmax.f32 %v1417_v2, 0.0 }
 0xbae   : > { %v1419_v63 = vpop.f32.mrf.mxu1 }
 0xbaf   : > { %v1423_v0 = vpack.c.bf16 %v1422_v62, %v1422_v62 }
 0xbb0   : > { %v2891_v1 = vpop.f32.mrf.mxu1 }
 0xbb1   : > { %2901 = vmatmul.mubr.msk.bf16.vlgmr.msra.gmra.mxu0 %vm1463_vm5, %v1423_v0 }
 0xbb2   : > { %2912 = vmatprep.mubr.msk.bf16.mxu0 %vm3098_vm1, %v3097_v7 }
 0xc71   : > { %v1501_v4 = vpop.f32.mrf.mxu0 }
 0xc72   : > { %v1502_v6 = vadd.f32 %v2665_v3, %v1501_v4 }
 0xc73   : > { %v2902_v8 = vpop.f32.mrf.mxu0 }
 0xc74   : > { %v1507_v11 = vadd.f32 %v1502_v6, %v1354_v55 }
 0xc75   : > { %v1504_v13 = vpop.f32.mrf.mxu0 }
 0xc76   : > { %v1510_v14 = vsel %vm605_vm0, %v1507_v11, 0.0 }
 0xc77   : > { %1511 = vadd.xlane.f32.xlu0 %v1510_v14  ;;  %v2903_v15 = vpop.f32.mrf.mxu0 }
 0xd00   : > { %v1512_v16 = vpop.xlane.xlu0 %1511 }
 0xd01   : > { %v1513_v17 = vmul.f32 0.03125, %v1512_v16 }
 0xd03   : > { %v1514_v21 = vsub.f32 %v1507_v11, %v1513_v17 }
 0xd05   : > { %v1515_v19 = vmul.f32 %v1514_v21, %v1514_v21 }
 0xd07   : > { %v1516_v20 = vsel %vm605_vm0, %v1515_v19, 0.0 }
 0xd08   : > { %1517 = vadd.xlane.f32.xlu1 %v1516_v20 }
 0xd91   : > { %v1518_v26 = vpop.xlane.xlu1 %1517 }
 0xd92   : > { %v1519_v27 = vmul.f32 0.03125, %v1518_v26  ;;  %v3039_v26 = vld [vmem:[%s3644_s5 + $0x28] sm:$0xff]  }
 0xd94   : > { %v1520_v28 = vadd.f32 1e-05, %v1519_v27 }
 0xd96   : > { %3066 = vrsqrt.f32 %v1520_v28 }
 0xda3   : > { %v3067_v30 = vpop.eup %3066 }
 0xda4   : > { %v1522_v32 = vmul.f32 %v3067_v30, %v1514_v21 }
 0xda6   : > { %v1529_v34 = vmul.f32 %v2671_v31, %v1522_v32 }
 0xda8   : > { %v1536_v35 = vadd.f32 %v2672_v33, %v1529_v34 }
 0xdaa   : > { %v3449_v36 = vmul.f32 %v1536_v35, %v3405_v53 }
 0xdac   : > { %v1538_v37 = vpack.c.bf16 %v3449_v36, %v3449_v36 }
 0xdae   : > { %2682 = vmatmul.mubr.msk.bf16.vlgmr.msra.gmra.mxu1 %vm605_vm0, %v1538_v37 }
 0xdaf   : > { %2906 = vmatprep.mubr.msk.bf16.mxu1 %vm3098_vm1, %v3097_v7 }
 0xe6e   : > { %v1614_v41 = vpop.f32.mrf.mxu1 }
 0xe6f   : > { %v1615_v42 = vadd.f32 %v1614_v41, %v1550_v39 }
 0xe70   : > { %v1616_v5 = vpop.f32.mrf.mxu1 }
 0xe71   : > { %v3463_v43 = vpack.c.bf16 %v1615_v42, %v1615_v42  ;;  %v1617_v44 = vadd.f32 %v1616_v5, %v1554_v40 }
 0xe72   : > { %v1618_v45 = vpop.f32.mrf.mxu1 }
 0xe73   : > { %v3465_v46 = vpack.c.bf16 %v1617_v44, %v1617_v44  ;;  %1744 = vrot.lane.b32.xlu1 %v3463_v43, %s3101_s27  ;;  %1633 = vrot.lane.b32.xlu0 %v3463_v43, %s3100_s26  ;;  %s3667_s26 = smov 96   ;;  %s3668_s27 = smov 32  }
 0xe74   : > { %v1619_v47 = vpop.f32.mrf.mxu1 }
 0xe75   : > { %v1699_v9 = vsel %vm727_vm2, %v3465_v46, 0 }
 0xe76   : > { %2911 = vmatpush3.bf16.msra.mxu0 %v1699_v9 }
 0xe77   : > { %1742 = vrot.lane.b32.xlu0 %v3463_v43, %s3666_s28  ;;  %2922 = vmatprep.subr.bf16.mxu0 %v3097_v7 }
 0xee5   : > { %v1634_v10 = vpop.permute.xlu0 %1633  ;;  %v1745_v48 = vpop.permute.xlu1 %1744 }
 0xee6   : > { %v1639_v12 = vsel %vm663_vm3, %v1634_v10, 0  ;;  %v1750_v49 = vsel %vm663_vm3, %v1745_v48, 0 }
 0xee7   : > { %2905 = vmatpush3.bf16.xpose.msra.mxu1 %v1639_v12 }
 0xee8   : > { %2916 = vmatprep.subr.bf16.mxu1 %v3097_v7 }
 0xee9   : > { %v1743_v50 = vpop.permute.xlu0 %1742 }
 0xeee   : > { %2907 = vmatmul.mubr.msk.bf16.vlgmr.msra.gmra.mxu1 %vm663_vm3, %v3463_v43 }
 0xeef   : > { %2917 = vmatpush3.bf16.xpose.msra.mxu1 %v1750_v49  ;;  %2918 = vmatprep.mubr.msk.bf16.mxu1 %vm3098_vm1, %v3097_v7 }
 0xef0   : > { %2928 = vmatprep.subr.bf16.mxu1 %v3097_v7 }
 0xef6   : > { %2919 = vmatmul.mubr.msk.bf16.vlgmr.msra.gmra.mxu1 %vm663_vm3, %v1743_v50 }
 0xef7   : > { %2930 = vmatprep.mubr.msk.bf16.mxu1 %vm3098_vm1, %v3097_v7  ;;  %2929 = vmatpush3.bf16.msra.mxu1 %v3039_v26 }
 0xef8   : > { %2940 = vmatprep.subr.bf16.mxu1 %v3097_v7 }
 0xfae   : > { %v1675_v18 = vpop.f32.mrf.mxu1 }
 0xfaf   : > { %v1676_v51 = vadd.f32 %v1675_v18, %v3273_v29 }
 0xfb0   : > { %v2908_v52 = vpop.f32.mrf.mxu1 }
 0xfb1   : > { %v1681_v54 = vsel %vm710_vm4, %v1676_v51, -inf }
 0xfb2   : > { %1682 = vmax.xlane.f32.xlu0 %v1681_v54  ;;  %v1678_v55 = vpop.f32.mrf.mxu1 }
 0xfb4   : > { %v2909_v56 = vpop.f32.mrf.mxu1 }
 0xfb6   : > { %v1786_v57 = vpop.f32.mrf.mxu1 }
 0xfb7   : > { %v1787_v58 = vadd.f32 %v1786_v57, %v3273_v29 }
 0xfb8   : > { %v2920_v59 = vpop.f32.mrf.mxu1 }
 0xfb9   : > { %v1792_v60 = vsel %vm710_vm4, %v1787_v58, -inf }
 0xfba   : > { %1793 = vmax.xlane.f32.xlu1 %v1792_v60  ;;  %v1789_v2 = vpop.f32.mrf.mxu1 }
 0xfbc   : > { %v2921_v61 = vpop.f32.mrf.mxu1 }
 0xfcb   : > { %1807 = vrot.lane.b32.xlu1 %v3465_v46, %s3666_s28 }
 0xfcf   : > { %1954 = vrot.lane.b32.xlu1 %v3463_v43, %s3667_s26 }
0x103b   : > { %v1683_v62 = vpop.xlane.xlu0 %1682 }
0x103c   : > { %v1684_v63 = vsub.f32 %v1676_v51, %v1683_v62 }
0x103e   : > { %v1685_v0 = vmul.f32 1.442695, %v1684_v63 }
0x1040   : > { %3068 = vpow2.f32 %v1685_v0 }
0x1043   : > { %v1794_v1 = vpop.xlane.xlu1 %1793 }
0x1044   : > { %v1795_v3 = vsub.f32 %v1787_v58, %v1794_v1 }
0x1046   : > { %v1796_v4 = vmul.f32 1.442695, %v1795_v3 }
0x1047   : > { %v1808_v21 = vpop.permute.xlu1 %1807 }
0x1048   : > { %3070 = vpow2.f32 %v1796_v4  ;;  %v1813_v20 = vsel %vm727_vm2, %v1808_v21, 0  ;;  %v3040_v4 = vld [vmem:[%s3644_s5 + $0x30] sm:$0xff]  }
0x104b   : > { %v1955_v41 = vpop.permute.xlu1 %1954 }
0x104d   : > { %v3069_v6 = vpop.eup %3068 }
0x104e   : > { %v1687_v8 = vsel %vm710_vm4, %v3069_v6, 0.0 }
0x104f   : > { %1688 = vadd.xlane.f32.xlu0 %v1687_v8 }
0x1055   : > { %v3071_v11 = vpop.eup %3070 }
0x1056   : > { %v1798_v13 = vsel %vm710_vm4, %v3071_v11, 0.0 }
0x1057   : > { %1799 = vadd.xlane.f32.xlu0 %v1798_v13 }
0x106d   : > { %1956 = vrot.lane.b32.xlu0 %v3463_v43, %s3668_s27 }
0x10d8   : > { %v1689_v14 = vpop.xlane.xlu0 %1688 }
0x10d9   : > { %3072 = vrcp.f32 %v1689_v14 }
0x10e0   : > { %v1800_v15 = vpop.xlane.xlu0 %1799 }
0x10e1   : > { %3074 = vrcp.f32 %v1800_v15 }
0x10e4   : > { %v1957_v33 = vpop.permute.xlu0 %1956 }
0x10e5   : > { %v1962_v38 = vsel %vm663_vm3, %v1957_v33, 0 }
0x10e6   : > { %v3073_v16 = vpop.eup %3072 }
0x10e7   : > { %v1691_v17 = vmul.f32 %v3073_v16, %v3069_v6 }
0x10e9   : > { %2692 = vst.msk [vmem:[%s3291_s24 + $0x20] sm:$0xff] %vm710_vm4, %v1691_v17  ;;  %v1694_v19 = vpack.c.bf16 %v1691_v17, %v1691_v17 }
0x10eb   : > { %2913 = vmatmul.mubr.msk.bf16.vlgmr.msra.gmra.mxu0 %vm710_vm4, %v1694_v19 }
0x10ec   : > { %2923 = vmatpush3.bf16.msra.mxu0 %v1813_v20  ;;  %2924 = vmatprep.mubr.msk.bf16.mxu0 %vm3098_vm1, %v3097_v7 }
0x10ed   : > { %2934 = vmatprep.subr.bf16.mxu0 %v3097_v7 }
0x10ee   : > { %v3075_v22 = vpop.eup %3074 }
0x10ef   : > { %v1802_v23 = vmul.f32 %v3075_v22, %v3071_v11 }
0x10f1   : > { %2695 = vst.msk [vmem:[%s3291_s24 + $0x28] sm:$0xff] %vm710_vm4, %v1802_v23  ;;  %v1805_v24 = vpack.c.bf16 %v1802_v23, %v1802_v23 }
0x10f3   : > { %2925 = vmatmul.mubr.msk.bf16.vlgmr.msra.gmra.mxu0 %vm710_vm4, %v1805_v24 }
0x10f4   : > { %2936 = vmatprep.mubr.msk.bf16.mxu0 %vm3098_vm1, %v3097_v7  ;;  %2935 = vmatpush3.bf16.msra.mxu0 %v3038_v25 }
0x10f5   : > { %2946 = vmatprep.subr.bf16.mxu0 %v3097_v7 }
0x11ab   : > { %v1735_v27 = vpop.f32.mrf.mxu0 }
0x11ac   : > { %v1741_v28 = vpack.c.bf16 %v1735_v27, %v1735_v27 }
0x11ad   : > { %v2914_v30 = vpop.f32.mrf.mxu0 }
0x11ae   : > { %2937 = vmatmul.mubr.msk.bf16.vlgmr.msra.gmra.mxu0 %vm663_vm3, %v1741_v28 }
0x11af   : > { %v1738_v31 = vpop.f32.mrf.mxu0  ;;  %2948 = vmatprep.mubr.msk.bf16.mxu0 %vm3098_vm1, %v3097_v7 }
0x11b1   : > { %v2915_v32 = vpop.f32.mrf.mxu0 }
0x11b3   : > { %v1849_v34 = vpop.f32.mrf.mxu0 }
0x11b4   : > { %v1855_v35 = vpack.c.bf16 %v1849_v34, %v1849_v34 }
0x11b5   : > { %v2926_v37 = vpop.f32.mrf.mxu0 }
0x11b6   : > { %2931 = vmatmul.mubr.msk.bf16.vlgmr.msra.gmra.mxu1 %vm663_vm3, %v1855_v35 }
0x11b7   : > { %2941 = vmatpush3.bf16.xpose.msra.mxu1 %v1962_v38  ;;  %v1852_v39 = vpop.f32.mrf.mxu0  ;;  %2942 = vmatprep.mubr.msk.bf16.mxu1 %vm3098_vm1, %v3097_v7 }
0x11b8   : > { %2952 = vmatprep.subr.bf16.mxu1 %v3097_v7 }
0x11b9   : > { %v2927_v40 = vpop.f32.mrf.mxu0 }
0x11be   : > { %2943 = vmatmul.mubr.msk.bf16.vlgmr.msra.gmra.mxu1 %vm663_vm3, %v1955_v41 }
0x11bf   : > { %2954 = vmatprep.mubr.msk.bf16.mxu1 %vm3098_vm1, %v3097_v7  ;;  %2953 = vmatpush3.bf16.msra.mxu1 %v3040_v4 }
0x11c0   : > { %2964 = vmatprep.subr.bf16.mxu1 %v3097_v7 }
0x126e   : > { %v1948_v42 = vpop.f32.mrf.mxu0 }
0x1270   : > { %v2938_v5 = vpop.f32.mrf.mxu0 }
0x1272   : > { %v1951_v44 = vpop.f32.mrf.mxu0 }
0x1274   : > { %v2939_v45 = vpop.f32.mrf.mxu0 }
0x1275   : > { %v2712_v45 = vld [vmem:[%s3645_s6 + $0x1] ss:$0 sm:$0xff] }
0x1276   : > { %v1899_v47 = vpop.f32.mrf.mxu1 }
0x1277   : > { %v3530_v9 = vadd.f32 %v1948_v42, %v1899_v47 }
0x1278   : > { %v2932_v10 = vpop.f32.mrf.mxu1 }
0x127a   : > { %v1902_v12 = vpop.f32.mrf.mxu1 }
0x127c   : > { %v2933_v48 = vpop.f32.mrf.mxu1 }
0x127e   : > { %v1998_v49 = vpop.f32.mrf.mxu1 }
0x127f   : > { %v1999_v50 = vadd.f32 %v1998_v49, %v3273_v29 }
0x1280   : > { %v2944_v18 = vpop.f32.mrf.mxu1 }
0x1281   : > { %v2004_v51 = vsel %vm710_vm4, %v1999_v50, -inf }
0x1282   : > { %2005 = vmax.xlane.f32.xlu1 %v2004_v51  ;;  %v2001_v52 = vpop.f32.mrf.mxu1 }
0x1284   : > { %v2945_v54 = vpop.f32.mrf.mxu1 }
0x1293   : > { %2119 = vrot.lane.b32.xlu1 %v3463_v43, %s3669_s20 }
0x1297   : > { %2117 = vrot.lane.b32.xlu1 %v3463_v43, %s3670_s25 }
0x130b   : > { %v2006_v55 = vpop.xlane.xlu1 %2005 }
0x130c   : > { %v2007_v56 = vsub.f32 %v1999_v50, %v2006_v55 }
0x130e   : > { %v2008_v57 = vmul.f32 1.442695, %v2007_v56  ;;  %v3042_v56 = vld [vmem:[%s3648_s9 + $0x18] sm:$0xff]  }
0x130f   : > { %v2120_v63 = vpop.permute.xlu1 %2119 }
0x1310   : > { %3076 = vpow2.f32 %v2008_v57  ;;  %v2125_v1 = vsel %vm663_vm3, %v2120_v63, 0  ;;  %v3044_v57 = vld [vmem:[%s3650_s11 + $0x38] sm:$0xff]   ;;  %v2716_v63 = vld [vmem:[%s3647_s8 + $0x1] ss:$0 sm:$0xff] }
0x1313   : > { %v2118_v3 = vpop.permute.xlu1 %2117 }
0x131d   : > { %v3077_v58 = vpop.eup %3076 }
0x131e   : > { %v2010_v59 = vsel %vm710_vm4, %v3077_v58, 0.0 }
0x131f   : > { %2011 = vadd.xlane.f32.xlu0 %v2010_v59 }
0x1335   : > { %2018 = vrot.lane.b32.xlu0 %v3465_v46, %s3667_s26  ;;  %s2631_s26 = sshll.u32 %s3672_s22, 2 }
0x1336   : > { %s558_s29 = scalar_lea.vmem %s3654_s15, %s2631_s26 }
0x13a8   : > { %v2012_v60 = vpop.xlane.xlu0 %2011 }
0x13a9   : > { %3078 = vrcp.f32 %v2012_v60 }
0x13ac   : > { %v2019_v2 = vpop.permute.xlu0 %2018 }
0x13ad   : > { %v2024_v61 = vsel %vm727_vm2, %v2019_v2, 0 }
0x13ae   : > { %2947 = vmatpush3.bf16.msra.mxu0 %v2024_v61 }
0x13af   : > { %2958 = vmatprep.subr.bf16.mxu0 %v3097_v7 }
0x13b6   : > { %v3079_v43 = vpop.eup %3078 }
0x13b7   : > { %v2014_v62 = vmul.f32 %v3079_v43, %v3077_v58  ;;  %v3045_v58 = vld [vmem:[%s3650_s11 + $0x30] sm:$0xff]   ;;  %v2715_v43 = vld [vmem:[%s3646_s7 + $0x1] ss:$0 sm:$0xff] }
0x13b9   : > { %2702 = vst.msk [vmem:[%s3291_s24 + $0x30] sm:$0xff] %vm710_vm4, %v2014_v62  ;;  %v2017_v0 = vpack.c.bf16 %v2014_v62, %v2014_v62 }
0x13bb   : > { %2949 = vmatmul.mubr.msk.bf16.vlgmr.msra.gmra.mxu0 %vm710_vm4, %v2017_v0 }
0x13bc   : > { %2959 = vmatpush3.bf16.xpose.msra.mxu0 %v2125_v1  ;;  %2960 = vmatprep.mubr.msk.bf16.mxu0 %vm3098_vm1, %v3097_v7 }
0x13bd   : > { %2970 = vmatprep.subr.bf16.mxu0 %v3097_v7 }
0x13c3   : > { %2961 = vmatmul.mubr.msk.bf16.vlgmr.msra.gmra.mxu0 %vm663_vm3, %v2118_v3 }
0x13c4   : > { %2972 = vmatprep.mubr.msk.bf16.mxu0 %vm3098_vm1, %v3097_v7 }
0x147b   : > { %v2060_v6 = vpop.f32.mrf.mxu0 }
0x147c   : > { %v2066_v8 = vpack.c.bf16 %v2060_v6, %v2060_v6  ;;  %v3046_v6 = vld [vmem:[%s3650_s11 + $0x28] sm:$0xff]  }
0x147d   : > { %v2950_v11 = vpop.f32.mrf.mxu0 }
0x147e   : > { %2955 = vmatmul.mubr.msk.bf16.vlgmr.msra.gmra.mxu1 %vm663_vm3, %v2066_v8  ;;  %v3047_v8 = vld [vmem:[%s3650_s11 + $0x20] sm:$0xff]  }
0x147f   : > { %v2063_v13 = vpop.f32.mrf.mxu0  ;;  %2966 = vmatprep.mubr.msk.bf16.mxu1 %vm3098_vm1, %v3097_v7  ;;  %v2722_v11 = vld [vmem:[%s3649_s10 + $0x1] ss:$0 sm:$0xff] }
0x1481   : > { %v2951_v14 = vpop.f32.mrf.mxu0 }
0x1483   : > { %v2161_v15 = vpop.f32.mrf.mxu0 }
0x1484   : > { %v2162_v16 = vadd.f32 %v2161_v15, %v3273_v29 }
0x1485   : > { %v2962_v17 = vpop.f32.mrf.mxu0 }
0x1486   : > { %v2167_v21 = vsel %vm710_vm4, %v2162_v16, -inf }
0x1487   : > { %2168 = vmax.xlane.f32.xlu0 %v2167_v21  ;;  %v2164_v19 = vpop.f32.mrf.mxu0 }
0x1489   : > { %v2963_v20 = vpop.f32.mrf.mxu0 }
0x149d   : > { %2181 = vrot.lane.b32.xlu0 %v3465_v46, %s3670_s25  ;;  %v3041_v46 = vld [vmem:[%s3644_s5 + $0x38] sm:$0xff]  }
0x149e   : > { %2971 = vmatpush3.bf16.msra.mxu0 %v3041_v46 }
0x149f   : > { %2984 = vmatprep.subr.bf16.mxu0 %v3097_v7 }
0x1510   : > { %v2169_v22 = vpop.xlane.xlu0 %2168 }
0x1511   : > { %v2170_v23 = vsub.f32 %v2162_v16, %v2169_v22 }
0x1513   : > { %v2171_v24 = vmul.f32 1.442695, %v2170_v23 }
0x1514   : > { %v2182_v25 = vpop.permute.xlu0 %2181 }
0x1515   : > { %3080 = vpow2.f32 %v2171_v24  ;;  %v2187_v26 = vsel %vm727_vm2, %v2182_v25, 0 }
0x1516   : > { %2965 = vmatpush3.bf16.msra.mxu1 %v2187_v26 }
0x1517   : > { %2976 = vmatprep.subr.bf16.mxu1 %v3097_v7 }
0x1522   : > { %v3081_v29 = vpop.eup %3080 }
0x1523   : > { %v2173_v27 = vsel %vm710_vm4, %v3081_v29, 0.0 }
0x1524   : > { %2174 = vadd.xlane.f32.xlu1 %v2173_v27 }
0x153e   : > { %v2110_v28 = vpop.f32.mrf.mxu1 }
0x153f   : > { %v2116_v30 = vadd.f32 %v2110_v28, %v3530_v9 }
0x1540   : > { %v2956_v31 = vpop.f32.mrf.mxu1 }
0x1542   : > { %v2113_v32 = vpop.f32.mrf.mxu1 }
0x1544   : > { %v2957_v33 = vpop.f32.mrf.mxu1 }
0x15ad   : > { %v2175_v34 = vpop.xlane.xlu1 %2174 }
0x15ae   : > { %3082 = vrcp.f32 %v2175_v34 }
0x15bb   : > { %v3083_v35 = vpop.eup %3082 }
0x15bc   : > { %v2177_v37 = vmul.f32 %v3083_v35, %v3081_v29 }
0x15be   : > { %2707 = vst.msk [vmem:[%s3291_s24 + $0x38] sm:$0xff] %vm710_vm4, %v2177_v37  ;;  %v2180_v38 = vpack.c.bf16 %v2177_v37, %v2177_v37  ;;  %v2743_v37 = vld [vmem:[%s3652_s13 + $0x1] ss:$0 sm:$0xff] }
0x15c0   : > { %2967 = vmatmul.mubr.msk.bf16.vlgmr.msra.gmra.mxu1 %vm710_vm4, %v2180_v38 }
0x15c1   : > { %2980 = vmatprep.mubr.msk.bf16.mxu1 %vm3098_vm1, %v3097_v7  ;;  %2977 = vmatpush3.bf16.msra.mxu1 %v3042_v56 }
0x15c2   : > { %2978 = vmatprep.subr.bf16.mxu1 %v3097_v7 }
0x1680   : > { %v2223_v39 = vpop.f32.mrf.mxu1 }
0x1681   : > { %v2229_v40 = vpack.c.bf16 %v2223_v39, %v2223_v39  ;;  %v2744_v39 = vld [vmem:[%s3653_s14 + $0x1] ss:$0 sm:$0xff] }
0x1682   : > { %v2968_v41 = vpop.f32.mrf.mxu1 }
0x1683   : > { %2973 = vmatmul.mubr.msk.bf16.vlgmr.msra.gmra.mxu0 %vm663_vm3, %v2229_v40 }
0x1684   : > { %v2226_v42 = vpop.f32.mrf.mxu1  ;;  %2992 = vmatprep.mubr.msk.bf16.mxu0 %vm3098_vm1, %v3097_v7  ;;  %2985 = vmatpush3.bf16.msra.mxu0 %v3044_v57 }
0x1685   : > { %2986 = vmatprep.subr.bf16.mxu0 %v3097_v7 }
0x1686   : > { %v2969_v5 = vpop.f32.mrf.mxu1 }
0x1688   : > { %2987 = vmatpush3.bf16.msra.mxu0 %v3045_v58 }
0x1689   : > { %2988 = vmatprep.subr.bf16.mxu0 %v3097_v7 }
0x168c   : > { %2989 = vmatpush3.bf16.msra.mxu0 %v3046_v6 }
0x168d   : > { %2990 = vmatprep.subr.bf16.mxu0 %v3097_v7  ;;  %v2735_v7 = vld [vmem:[%s3651_s12 + $0x1] ss:$0 sm:$0xff] }
0x1690   : > { %2991 = vmatpush3.bf16.msra.mxu0 %v3047_v8 }
0x1743   : > { %v2273_v44 = vpop.f32.mrf.mxu0 }
0x1744   : > { %v2279_v47 = vadd.f32 %v2273_v44, %v2116_v30 }
0x1745   : > { %v2974_v9 = vpop.f32.mrf.mxu0 }
0x1746   : > { %v2288_v10 = vadd.f32 %v2712_v45, %v2279_v47 }
0x1747   : > { %v2276_v12 = vpop.f32.mrf.mxu0 }
0x1748   : > { %v2289_v48 = vadd.f32 %v2288_v10, %v3449_v36  ;;  %v3043_v36 = vld [vmem:[%s3648_s9 + $0x10] sm:$0xff]  }
0x1749   : > { %v2975_v49 = vpop.f32.mrf.mxu0  ;;  %2979 = vmatpush3.bf16.msra.mxu1 %v3043_v36 }
0x174a   : > { %v2294_v50 = vsel %vm605_vm0, %v2289_v48, 0.0 }
0x174b   : > { %2295 = vadd.xlane.f32.xlu1 %v2294_v50 }
0x17d4   : > { %v2296_v18 = vpop.xlane.xlu1 %2295 }
0x17d5   : > { %v2297_v51 = vmul.f32 0.03125, %v2296_v18 }
0x17d7   : > { %v2298_v52 = vsub.f32 %v2289_v48, %v2297_v51 }
0x17d9   : > { %v2299_v54 = vmul.f32 %v2298_v52, %v2298_v52 }
0x17db   : > { %v2300_v55 = vsel %vm605_vm0, %v2299_v54, 0.0 }
0x17dc   : > { %2301 = vadd.xlane.f32.xlu1 %v2300_v55 }
0x1865   : > { %v2302_v59 = vpop.xlane.xlu1 %2301 }
0x1866   : > { %v2303_v60 = vmul.f32 0.03125, %v2302_v59 }
0x1868   : > { %v2304_v2 = vadd.f32 1e-05, %v2303_v60 }
0x186a   : > { %3084 = vrsqrt.f32 %v2304_v2 }
0x1877   : > { %v3085_v61 = vpop.eup %3084 }
0x1878   : > { %v2306_v62 = vmul.f32 %v3085_v61, %v2298_v52 }
0x187a   : > { %v2313_v0 = vmul.f32 %v2715_v43, %v2306_v62 }
0x187c   : > { %v2320_v1 = vadd.f32 %v2716_v63, %v2313_v0 }
0x187e   : > { %v2321_v3 = vmul.f32 %v2320_v1, %v3405_v53 }
0x1880   : > { %v2322_v4 = vpack.c.bf16 %v2321_v3, %v2321_v3 }
0x1882   : > { %2981 = vmatmul.mubr.msk.bf16.vlgmr.msra.gmra.mxu1 %vm605_vm0, %v2322_v4 }
0x1942   : > { %v2385_v13 = vpop.f32.mrf.mxu1 }
0x1943   : > { %v2386_v14 = vadd.f32 %v2722_v11, %v2385_v13 }
0x1944   : > { %v2982_v15 = vpop.f32.mrf.mxu1 }
0x1945   : > { %v2391_v16 = vmax.f32 %v2386_v14, 0.0 }
0x1946   : > { %v2388_v17 = vpop.f32.mrf.mxu1 }
0x1947   : > { %v2392_v21 = vpack.c.bf16 %v2391_v16, %v2391_v16 }
0x1948   : > { %v2983_v19 = vpop.f32.mrf.mxu1 }
0x1949   : > { %2993 = vmatmul.mubr.msk.bf16.vlgmr.msra.gmra.mxu0 %vm1463_vm5, %v2392_v21 }
0x1a09   : > { %v2471_v20 = vpop.f32.mrf.mxu0 }
0x1a0a   : > { %v2472_v22 = vadd.f32 %v2735_v7, %v2471_v20 }
0x1a0b   : > { %v2994_v23 = vpop.f32.mrf.mxu0 }
0x1a0c   : > { %v2477_v24 = vadd.f32 %v2472_v22, %v2321_v3 }
0x1a0d   : > { %v2474_v25 = vpop.f32.mrf.mxu0 }
0x1a0e   : > { %v2482_v26 = vsel %vm605_vm0, %v2477_v24, 0.0 }
0x1a0f   : > { %2483 = vadd.xlane.f32.xlu1 %v2482_v26  ;;  %v2995_v29 = vpop.f32.mrf.mxu0 }
0x1a98   : > { %v2484_v27 = vpop.xlane.xlu1 %2483 }
0x1a99   : > { %v2485_v28 = vmul.f32 0.03125, %v2484_v27 }
0x1a9b   : > { %v2486_v30 = vsub.f32 %v2477_v24, %v2485_v28 }
0x1a9d   : > { %v2487_v31 = vmul.f32 %v2486_v30, %v2486_v30 }
0x1a9f   : > { %v2488_v46 = vsel %vm605_vm0, %v2487_v31, 0.0 }
0x1aa0   : > { %2489 = vadd.xlane.f32.xlu1 %v2488_v46 }
0x1b29   : > { %v2490_v32 = vpop.xlane.xlu1 %2489 }
0x1b2a   : > { %v2491_v33 = vmul.f32 0.03125, %v2490_v32 }
0x1b2c   : > { %v2492_v34 = vadd.f32 1e-05, %v2491_v33 }
0x1b2e   : > { %3086 = vrsqrt.f32 %v2492_v34 }
0x1b3b   : > { %v3087_v35 = vpop.eup %3086 }
0x1b3c   : > { %v2494_v38 = vmul.f32 %v3087_v35, %v2486_v30 }
0x1b3e   : > { %v2501_v40 = vmul.f32 %v2743_v37, %v2494_v38 }
0x1b40   : > { %v2508_v41 = vadd.f32 %v2744_v39, %v2501_v40 }
0x1b42   : > { %v2509_v42 = vmul.f32 %v2508_v41, %v3405_v53 }
0x1b44   : > { %v2510_v5 = vpack.c.bf16 %v2509_v42, %v2509_v42 }
0x1b46   : > { %2512 = vst.msk [vmem:[%s558_s29] sm:$0xf] %vm2511_vm6, %v2510_v5 }
0x1b47 PF: > { %s27_s21 = sadd.s32 1, %s3094_s21  }
0x1b48   : > { %p24_p4 = scmp.ge.s32.totalorder %s27_s21, 4  }
0x1b4a   :  { %26 = sbr.rel (!%p24_p4) target bundleno = 2 (0x2), region = 147 }

// kernel: fwd.5
= control target key start
LH: loop header
LB: loop body
LE: loop exit
PB: predicated region body
PF: predicated region fallthrough
CT: control target
= control target key end

     0   :  { %s3191_s21 = smov 0   ;;  %s3639_s0 = inlined_call_operand.vmem [shape: f32[2,8,32], index: 0, kind: input, shape index: {}]   ;;  %s3640_s1 = inlined_call_operand.vmem [shape: f32[2,1,8], index: 1, kind: input, shape index: {}]   ;;  %s3641_s2 = inlined_call_operand.vmem [shape: f32[2,8,1], index: 2, kind: input, shape index: {}]   ;;  %s3642_s3 = inlined_call_operand.vmem [shape: bf16[2,32,192], index: 3, kind: input, shape index: {}]   ;;  %s3643_s4 = inlined_call_operand.vmem [shape: f32[2,1,192], index: 4, kind: input, shape index: {}]   ;;  %s3644_s5 = inlined_call_operand.vmem [shape: bf16[2,64,32], index: 5, kind: input, shape index: {}]   ;;  %s3645_s6 = inlined_call_operand.vmem [shape: f32[2,1,32], index: 6, kind: input, shape index: {}]   ;;  %s3646_s7 = inlined_call_operand.vmem [shape: f32[2,1,32], index: 7, kind: input, shape index: {}]   ;;  %s3647_s8 = inlined_call_operand.vmem [shape: f32[2,1,32], index: 8, kind: input, shape index: {}]   ;;  %s3648_s9 = inlined_call_operand.vmem [shape: bf16[2,32,64], index: 9, kind: input, shape index: {}]   ;;  %s3649_s10 = inlined_call_operand.vmem [shape: f32[2,1,64], index: 10, kind: input, shape index: {}]   ;;  %s3650_s11 = inlined_call_operand.vmem [shape: bf16[2,64,32], index: 11, kind: input, shape index: {}]   ;;  %s3651_s12 = inlined_call_operand.vmem [shape: f32[2,1,32], index: 12, kind: input, shape index: {}]   ;;  %s3652_s13 = inlined_call_operand.vmem [shape: f32[2,1,32], index: 13, kind: input, shape index: {}]   ;;  %s3653_s14 = inlined_call_operand.vmem [shape: f32[2,1,32], index: 14, kind: input, shape index: {}]   ;;  %s3654_s15 = inlined_call_operand.vmem [shape: bf16[2,8,32], index: 15, kind: output, shape index: {0}]   ;;  %s3655_s16 = inlined_call_operand.vmem [shape: f32[2,8,8,8], index: 16, kind: output, shape index: {1}]  }
   0x1   :  { %3664 = sst [smem:[#allocation2_spill]] %s3639_s0 }
   0x2 LB: > { %s2623_s22 = sadd.s32 4294967295, %s3094_s21   ;;  %p2627_p0 = scmp.ge.s32.totalorder %s3094_s21, 1  ;;  %s3094_s21 = sphi %s3191_s21, %s27_s21  }
   0x3   : > { %p481_p1 = scmp.lt.s32.totalorder %s3094_s21, 3 }
   0x5   : > { %p482_p2 = pnand %p2627_p0, %p481_p1 }
   0x6   : > { %p541_p3 = scmp.lt.s32.totalorder (!%p482_p2), %s2623_s22, 1  ;;  %s3665_s19 = sld [smem:[#allocation2_spill]] (!%p482_p2) }
   0x7   : > { %485 = sbr.rel (%p482_p2) target bundleno = 6983 (0x1b47), region = 80  ;;  %s3662_s25 = smov (!%p482_p2), 112  }
   0x8   : > { %s3100_s26 = smov (!%p482_p2), 64   ;;  %s3101_s27 = smov (!%p482_p2), 48  }
   0x9   : > { %s3659_s17 = smov (!%p482_p2), 32   ;;  %s3660_s18 = smov (!%p482_p2), 96  }
   0xa   : > { %s3658_s23 = smov (!%p482_p2), 16  }
   0xc   : > { %v3016_v0 = vld [vmem:[%s3642_s3 + $0x14] ss:$8 sps:$4 sm:$0xff]   ;;  %v3018_v1 = vld [vmem:[%s3642_s3 + $0x10] ss:$8 sps:$4 sm:$0xff]   ;;  %v3096_v2 = vmov 0   ;;  %s3672_s22 = smov (!%p541_p3, %s2623_s22), 1  ;;  %v572_v8 = vlaneseq }
   0xd   : > { %638 = vmatprep.mubr.bf16.mxu1 %v3096_v2  ;;  %3014 = vset.pattern.permute.xlu1 %v3096_v2  ;;  %v3019_v3 = vld [vmem:[%s3642_s3 + $0x4] ss:$8 sps:$4 sm:$0xff]   ;;  %v3021_v4 = vld [vmem:[%s3642_s3] ss:$8 sps:$4 sm:$0xff]   ;;  %s2628_s0 = sshll.u32 %s3672_s22, 3  ;;  %vm602_vm0 = vcmask 261120   ;;  %s547_s30 = scalar_lea.vmem %s3640_s1, %s3672_s22 }
   0xe   : > { %618 = vmatprep.subr.bf16.mxu1 %v3016_v0  ;;  %3015 = vset.pattern.permute.xlu0 %v3096_v2  ;;  %s544_s20 = scalar_lea.vmem %s3665_s19, %s2628_s0  ;;  %v3097_v7 = vmov 0.0   ;;  %v3229_v9 = vshrl.u32 %v572_v8, 7  ;;  %v570_v11 = vld [vmem:[%s3643_s4] sm:$0x3]  ;;  %vm3098_vm1 = vmmov 0   ;;  %vm730_vm2 = vcmask 1043456   ;;  %s551_s28 = scalar_lea.vmem %s3641_s2, %s2628_s0 }
   0xf   : > { %619 = vmatpush1.bf16.msra.mxu1 %v3018_v1  ;;  %v3222_v5 = vld [vmem:[%s544_s20] sm:$0xff]  ;;  %2818 = vmatprep.subr.bf16.mxu0 %v3097_v7  ;;  %vm666_vm3 = vcmask 130048   ;;  %vm713_vm4 = vcmask 64512   ;;  %s2747_s19 = sshll.u32 %s3672_s22, 6  ;;  %v3023_v63 = vld [vmem:[%s3644_s5 + $0x8] sm:$0xff]   ;;  %s3656_s20 = smov 80  }
  0x10   : > { %620 = vmatprep.subr.bf16.mxu1 %v3019_v3  ;;  %v565_v6 = vpack.c.bf16 %v3222_v5, %v3222_v5  ;;  %v574_v10 = vsub.s32 0, %v3229_v9  ;;  %v578_v12 = vsub.s32 1, %v3229_v9  ;;  %2820 = vmatprep.mubr.msk.bf16.mxu0 %vm3098_vm1, %v3097_v7  ;;  %v3272_v29 = vld [vmem:[%s547_s30] ss:$0 sm:$0xff]  ;;  %s3290_s24 = scalar_lea.vmem %s3655_s16, %s2747_s19  ;;  %vm1466_vm5 = vcmask 523264  }
  0x11   : > { %v3022_v62 = vld [vmem:[%s3644_s5] sm:$0xff]   ;;  %vm2514_vm6 = vcmask 257024  }
  0x12   : > { %v575_v13 = vrot.slane %v570_v11, %v574_v10  ;;  %v579_v14 = vrot.slane %v570_v11, %v578_v12 }
  0x13   : > { %621 = vmatpush1.bf16.msra.mxu1 %v3021_v4 }
  0x14   : > { %2812 = vmatprep.subr.bf16.mxu1 %v3097_v7 }
  0x16   : > { %2637 = vmatmul.mubr.msk.bf16.vlgmr.msra.gmra.mxu1 %vm602_vm0, %v565_v6 }
  0x17   : > { %2814 = vmatprep.mubr.msk.bf16.mxu1 %vm3098_vm1, %v3097_v7 }
  0xd6   : > { %v640_v15 = vpop.f32.mrf.mxu1 }
  0xd7   : > { %v641_v16 = vadd.f32 %v640_v15, %v575_v13 }
  0xd8   : > { %v642_v17 = vpop.f32.mrf.mxu1 }
  0xd9   : > { %v3244_v18 = vpack.c.bf16 %v641_v16, %v641_v16  ;;  %v643_v19 = vadd.f32 %v642_v17, %v579_v14 }
  0xda   : > { %v644_v20 = vpop.f32.mrf.mxu1 }
  0xdb   : > { %v3246_v21 = vpack.c.bf16 %v643_v19, %v643_v19  ;;  %775 = vrot.lane.b32.xlu1 %v3244_v18, %s3662_s25  ;;  %664 = vrot.lane.b32.xlu0 %v3244_v18, %s3100_s26 }
  0xdc   : > { %v645_v22 = vpop.f32.mrf.mxu1 }
  0xdd   : > { %v732_v23 = vsel %vm730_vm2, %v3246_v21, 0 }
  0xde   : > { %2819 = vmatpush3.bf16.msra.mxu0 %v732_v23 }
  0xdf   : > { %777 = vrot.lane.b32.xlu0 %v3244_v18, %s3101_s27  ;;  %2830 = vmatprep.subr.bf16.mxu0 %v3097_v7 }
 0x14d   : > { %v665_v24 = vpop.permute.xlu0 %664  ;;  %v776_v28 = vpop.permute.xlu1 %775 }
 0x14e   : > { %v671_v25 = vsel %vm666_vm3, %v665_v24, 0 }
 0x14f   : > { %2813 = vmatpush3.bf16.xpose.msra.mxu1 %v671_v25 }
 0x150   : > { %2824 = vmatprep.subr.bf16.mxu1 %v3097_v7 }
 0x151   : > { %v778_v26 = vpop.permute.xlu0 %777 }
 0x152   : > { %v783_v27 = vsel %vm666_vm3, %v778_v26, 0 }
 0x156   : > { %2815 = vmatmul.mubr.msk.bf16.vlgmr.msra.gmra.mxu1 %vm666_vm3, %v3244_v18 }
 0x157   : > { %2825 = vmatpush3.bf16.xpose.msra.mxu1 %v783_v27  ;;  %2826 = vmatprep.mubr.msk.bf16.mxu1 %vm3098_vm1, %v3097_v7 }
 0x158   : > { %2836 = vmatprep.subr.bf16.mxu1 %v3097_v7 }
 0x15e   : > { %2827 = vmatmul.mubr.msk.bf16.vlgmr.msra.gmra.mxu1 %vm666_vm3, %v776_v28 }
 0x15f   : > { %2838 = vmatprep.mubr.msk.bf16.mxu1 %vm3098_vm1, %v3097_v7  ;;  %2837 = vmatpush3.bf16.msra.mxu1 %v3023_v63 }
 0x160   : > { %2848 = vmatprep.subr.bf16.mxu1 %v3097_v7 }
 0x216   : > { %v707_v30 = vpop.f32.mrf.mxu1 }
 0x217   : > { %v708_v31 = vadd.f32 %v3272_v29, %v707_v30 }
 0x218   : > { %v2816_v32 = vpop.f32.mrf.mxu1 }
 0x219   : > { %v714_v33 = vsel %vm713_vm4, %v708_v31, -inf }
 0x21a   : > { %715 = vmax.xlane.f32.xlu1 %v714_v33  ;;  %v710_v34 = vpop.f32.mrf.mxu1 }
 0x21c   : > { %v2817_v35 = vpop.f32.mrf.mxu1 }
 0x21e   : > { %v819_v36 = vpop.f32.mrf.mxu1 }
 0x21f   : > { %v820_v37 = vadd.f32 %v3272_v29, %v819_v36 }
 0x220   : > { %v2828_v38 = vpop.f32.mrf.mxu1 }
 0x221   : > { %v825_v39 = vsel %vm713_vm4, %v820_v37, -inf }
 0x222   : > { %826 = vmax.xlane.f32.xlu0 %v825_v39  ;;  %v822_v40 = vpop.f32.mrf.mxu1 }
 0x224   : > { %v2829_v41 = vpop.f32.mrf.mxu1 }
 0x2a3   : > { %v716_v42 = vpop.xlane.xlu1 %715 }
 0x2a4   : > { %v717_v43 = vsub.f32 %v708_v31, %v716_v42 }
 0x2a6   : > { %v718_v44 = vmul.f32 1.442695, %v717_v43 }
 0x2a8   : > { %3048 = vpow2.f32 %v718_v44 }
 0x2ab   : > { %v827_v45 = vpop.xlane.xlu0 %826 }
 0x2ac   : > { %v828_v46 = vsub.f32 %v820_v37, %v827_v45 }
 0x2ae   : > { %v829_v47 = vmul.f32 1.442695, %v828_v46 }
 0x2b0   : > { %3050 = vpow2.f32 %v829_v47 }
 0x2b5   : > { %v3049_v48 = vpop.eup %3048 }
 0x2b6   : > { %v720_v49 = vsel %vm713_vm4, %v3049_v48, 0.0 }
 0x2b7   : > { %721 = vadd.xlane.f32.xlu0 %v720_v49 }
 0x2bd   : > { %v3051_v50 = vpop.eup %3050 }
 0x2be   : > { %v831_v51 = vsel %vm713_vm4, %v3051_v50, 0.0 }
 0x2bf   : > { %832 = vadd.xlane.f32.xlu1 %v831_v51 }
 0x2cd   : > { %840 = vrot.lane.b32.xlu0 %v3246_v21, %s3662_s25  ;;  %s3670_s25 = smov 80  }
 0x2d0   : > { %989 = vrot.lane.b32.xlu1 %v3244_v18, %s3659_s17 }
 0x2d4   : > { %987 = vrot.lane.b32.xlu1 %v3244_v18, %s3660_s18 }
 0x340   : > { %v722_v52 = vpop.xlane.xlu0 %721 }
 0x341   : > { %3052 = vrcp.f32 %v722_v52 }
 0x344   : > { %v841_v56 = vpop.permute.xlu0 %840 }
 0x345   : > { %v846_v58 = vsel %vm730_vm2, %v841_v56, 0 }
 0x348   : > { %v833_v53 = vpop.xlane.xlu1 %832 }
 0x349   : > { %3054 = vrcp.f32 %v833_v53 }
 0x34c   : > { %v990_v8 = vpop.permute.xlu1 %989 }
 0x34d   : > { %v995_v15 = vsel %vm666_vm3, %v990_v8, 0 }
 0x34e   : > { %v3053_v54 = vpop.eup %3052 }
 0x34f   : > { %v724_v55 = vmul.f32 %v3053_v54, %v3049_v48 }
 0x350   : > { %v988_v19 = vpop.permute.xlu1 %987 }
 0x351   : > { %725 = vst.msk [vmem:[%s3290_s24] sm:$0xff] %vm713_vm4, %v724_v55  ;;  %v726_v57 = vpack.c.bf16 %v724_v55, %v724_v55 }
 0x353   : > { %2821 = vmatmul.mubr.msk.bf16.vlgmr.msra.gmra.mxu0 %vm713_vm4, %v726_v57 }
 0x354   : > { %2831 = vmatpush3.bf16.msra.mxu0 %v846_v58  ;;  %2832 = vmatprep.mubr.msk.bf16.mxu0 %vm3098_vm1, %v3097_v7 }
 0x355   : > { %2842 = vmatprep.subr.bf16.mxu0 %v3097_v7 }
 0x356   : > { %v3055_v59 = vpop.eup %3054 }
 0x357   : > { %v835_v60 = vmul.f32 %v3055_v59, %v3051_v50 }
 0x359   : > { %2642 = vst.msk [vmem:[%s3290_s24 + $0x8] sm:$0xff] %vm713_vm4, %v835_v60  ;;  %v838_v61 = vpack.c.bf16 %v835_v60, %v835_v60 }
 0x35b   : > { %2833 = vmatmul.mubr.msk.bf16.vlgmr.msra.gmra.mxu0 %vm713_vm4, %v838_v61 }
 0x35c   : > { %2844 = vmatprep.mubr.msk.bf16.mxu0 %vm3098_vm1, %v3097_v7  ;;  %2843 = vmatpush3.bf16.msra.mxu0 %v3022_v62 }
 0x35d   : > { %2854 = vmatprep.subr.bf16.mxu0 %v3097_v7 }
 0x413   : > { %v768_v0 = vpop.f32.mrf.mxu0 }
 0x414   : > { %v774_v1 = vpack.c.bf16 %v768_v0, %v768_v0 }
 0x415   : > { %v2822_v3 = vpop.f32.mrf.mxu0 }
 0x416   : > { %2845 = vmatmul.mubr.msk.bf16.vlgmr.msra.gmra.mxu0 %vm666_vm3, %v774_v1 }
 0x417   : > { %v771_v4 = vpop.f32.mrf.mxu0  ;;  %2856 = vmatprep.mubr.msk.bf16.mxu0 %vm3098_vm1, %v3097_v7 }
 0x419   : > { %v2823_v6 = vpop.f32.mrf.mxu0 }
 0x41b   : > { %v882_v11 = vpop.f32.mrf.mxu0 }
 0x41c   : > { %v888_v13 = vpack.c.bf16 %v882_v11, %v882_v11  ;;  %v3025_v11 = vld [vmem:[%s3644_s5 + $0x18] sm:$0xff]  }
 0x41d   : > { %v2834_v14 = vpop.f32.mrf.mxu0 }
 0x41e   : > { %2839 = vmatmul.mubr.msk.bf16.vlgmr.msra.gmra.mxu1 %vm666_vm3, %v888_v13 }
 0x41f   : > { %2849 = vmatpush3.bf16.xpose.msra.mxu1 %v995_v15  ;;  %v885_v16 = vpop.f32.mrf.mxu0  ;;  %2850 = vmatprep.mubr.msk.bf16.mxu1 %vm3098_vm1, %v3097_v7 }
 0x420   : > { %2860 = vmatprep.subr.bf16.mxu1 %v3097_v7 }
 0x421   : > { %v2835_v17 = vpop.f32.mrf.mxu0 }
 0x426   : > { %2851 = vmatmul.mubr.msk.bf16.vlgmr.msra.gmra.mxu1 %vm666_vm3, %v988_v19 }
 0x427   : > { %2862 = vmatprep.mubr.msk.bf16.mxu1 %vm3098_vm1, %v3097_v7 }
 0x4d6   : > { %v981_v20 = vpop.f32.mrf.mxu0 }
 0x4d8   : > { %v2846_v22 = vpop.f32.mrf.mxu0 }
 0x4da   : > { %v984_v23 = vpop.f32.mrf.mxu0 }
 0x4dc   : > { %v2847_v24 = vpop.f32.mrf.mxu0 }
 0x4de   : > { %v932_v25 = vpop.f32.mrf.mxu1 }
 0x4df   : > { %v3323_v26 = vadd.f32 %v981_v20, %v932_v25 }
 0x4e0   : > { %v2840_v27 = vpop.f32.mrf.mxu1 }
 0x4e2   : > { %v935_v28 = vpop.f32.mrf.mxu1 }
 0x4e3   : > { %v2658_v28 = vld [vmem:[%s3645_s6] ss:$0 sm:$0xff] }
 0x4e4   : > { %v2841_v30 = vpop.f32.mrf.mxu1 }
 0x4e6   : > { %v1031_v31 = vpop.f32.mrf.mxu1 }
 0x4e7   : > { %v1032_v32 = vadd.f32 %v3272_v29, %v1031_v31 }
 0x4e8   : > { %v2852_v33 = vpop.f32.mrf.mxu1 }
 0x4e9   : > { %v1037_v34 = vsel %vm713_vm4, %v1032_v32, -inf }
 0x4ea   : > { %1038 = vmax.xlane.f32.xlu0 %v1037_v34  ;;  %v1034_v35 = vpop.f32.mrf.mxu1 }
 0x4ec   : > { %v2853_v36 = vpop.f32.mrf.mxu1 }
 0x500   : > { %1051 = vrot.lane.b32.xlu0 %v3246_v21, %s3660_s18 }
 0x504   : > { %1150 = vrot.lane.b32.xlu0 %v3244_v18, %s3656_s20 }
 0x573   : > { %v1039_v37 = vpop.xlane.xlu0 %1038 }
 0x574   : > { %v1040_v38 = vsub.f32 %v1032_v32, %v1039_v37 }
 0x576   : > { %v1041_v39 = vmul.f32 1.442695, %v1040_v38 }
 0x577   : > { %v1052_v40 = vpop.permute.xlu0 %1051 }
 0x578   : > { %3056 = vpow2.f32 %v1041_v39  ;;  %v1057_v41 = vsel %vm730_vm2, %v1052_v40, 0 }
 0x579   : > { %2855 = vmatpush3.bf16.msra.mxu0 %v1057_v41 }
 0x57a   : > { %2866 = vmatprep.subr.bf16.mxu0 %v3097_v7 }
 0x57b   : > { %v1151_v50 = vpop.permute.xlu0 %1150 }
 0x585   : > { %v3057_v42 = vpop.eup %3056 }
 0x586   : > { %v1043_v43 = vsel %vm713_vm4, %v3057_v42, 0.0 }
 0x587   : > { %1044 = vadd.xlane.f32.xlu1 %v1043_v43  ;;  %v3027_v43 = vld [vmem:[%s3648_s9] sm:$0xff]  }
 0x598   : > { %1152 = vrot.lane.b32.xlu1 %v3244_v18, %s3658_s23  ;;  %v3024_v18 = vld [vmem:[%s3644_s5 + $0x10] sm:$0xff]  }
 0x599   : > { %2861 = vmatpush3.bf16.msra.mxu1 %v3024_v18 }
 0x59a   : > { %2872 = vmatprep.subr.bf16.mxu1 %v3097_v7 }
 0x610   : > { %v1045_v44 = vpop.xlane.xlu1 %1044 }
 0x611   : > { %3058 = vrcp.f32 %v1045_v44  ;;  %v3028_v44 = vld [vmem:[%s3650_s11 + $0x18] sm:$0xff]  }
 0x614   : > { %v1153_v47 = vpop.permute.xlu1 %1152 }
 0x615   : > { %v1158_v49 = vsel %vm666_vm3, %v1153_v47, 0 }
 0x61e   : > { %v3059_v45 = vpop.eup %3058 }
 0x61f   : > { %v1047_v46 = vmul.f32 %v3059_v45, %v3057_v42  ;;  %v564_v42 = vld [vmem:[%s551_s28] sm:$0xff]  ;;  %v3029_v45 = vld [vmem:[%s3650_s11 + $0x10] sm:$0xff]   ;;  %s3666_s28 = smov 112  }
 0x621   : > { %2649 = vst.msk [vmem:[%s3290_s24 + $0x10] sm:$0xff] %vm713_vm4, %v1047_v46  ;;  %v1050_v48 = vpack.c.bf16 %v1047_v46, %v1047_v46 }
 0x623   : > { %2857 = vmatmul.mubr.msk.bf16.vlgmr.msra.gmra.mxu0 %vm713_vm4, %v1050_v48 }
 0x624   : > { %2867 = vmatpush3.bf16.xpose.msra.mxu0 %v1158_v49  ;;  %2868 = vmatprep.mubr.msk.bf16.mxu0 %vm3098_vm1, %v3097_v7 }
 0x625   : > { %2878 = vmatprep.subr.bf16.mxu0 %v3097_v7 }
 0x62b   : > { %2869 = vmatmul.mubr.msk.bf16.vlgmr.msra.gmra.mxu0 %vm666_vm3, %v1151_v50  ;;  %v2659_v50 = vld [vmem:[%s3646_s7] ss:$0 sm:$0xff] }
 0x62c   : > { %2880 = vmatprep.mubr.msk.bf16.mxu0 %vm3098_vm1, %v3097_v7  ;;  %2879 = vmatpush3.bf16.msra.mxu0 %v3025_v11 }
 0x62d   : > { %2892 = vmatprep.subr.bf16.mxu0 %v3097_v7 }
 0x6e3   : > { %v1093_v51 = vpop.f32.mrf.mxu0 }
 0x6e4   : > { %v1099_v52 = vpack.c.bf16 %v1093_v51, %v1093_v51  ;;  %v2660_v51 = vld [vmem:[%s3647_s8] ss:$0 sm:$0xff] }
 0x6e5   : > { %v2858_v53 = vpop.f32.mrf.mxu0 }
 0x6e6   : > { %2863 = vmatmul.mubr.msk.bf16.vlgmr.msra.gmra.mxu1 %vm666_vm3, %v1099_v52 }
 0x6e7   : > { %v1096_v54 = vpop.f32.mrf.mxu0  ;;  %2874 = vmatprep.mubr.msk.bf16.mxu1 %vm3098_vm1, %v3097_v7 }
 0x6e9   : > { %v2859_v55 = vpop.f32.mrf.mxu0 }
 0x6eb   : > { %v1194_v56 = vpop.f32.mrf.mxu0 }
 0x6ec   : > { %v1195_v57 = vadd.f32 %v3272_v29, %v1194_v56 }
 0x6ed   : > { %v2870_v58 = vpop.f32.mrf.mxu0 }
 0x6ee   : > { %v1200_v59 = vsel %vm713_vm4, %v1195_v57, -inf  ;;  %v3031_v58 = vld [vmem:[%s3650_s11] sm:$0xff]  }
 0x6ef   : > { %1201 = vmax.xlane.f32.xlu1 %v1200_v59  ;;  %v1197_v60 = vpop.f32.mrf.mxu0  ;;  %v2661_v59 = vld [vmem:[%s3649_s10] ss:$0 sm:$0xff] }
 0x6f1   : > { %v2871_v61 = vpop.f32.mrf.mxu0 }
 0x778   : > { %v1202_v62 = vpop.xlane.xlu1 %1201 }
 0x779   : > { %v1203_v63 = vsub.f32 %v1195_v57, %v1202_v62  ;;  %v3030_v57 = vld [vmem:[%s3650_s11 + $0x8] sm:$0xff]  }
 0x77b   : > { %v1204_v0 = vmul.f32 1.442695, %v1203_v63 }
 0x77d   : > { %3060 = vpow2.f32 %v1204_v0 }
 0x78a   : > { %v3061_v1 = vpop.eup %3060 }
 0x78b   : > { %v1206_v3 = vsel %vm713_vm4, %v3061_v1, 0.0 }
 0x78c   : > { %1207 = vadd.xlane.f32.xlu0 %v1206_v3  ;;  %v2665_v3 = vld [vmem:[%s3651_s12] ss:$0 sm:$0xff] }
 0x7a2   : > { %1214 = vrot.lane.b32.xlu0 %v3246_v21, %s3656_s20  ;;  %s3669_s20 = smov 16  }
 0x7a6   : > { %v1143_v4 = vpop.f32.mrf.mxu1 }
 0x7a7   : > { %v1149_v6 = vadd.f32 %v1143_v4, %v3323_v26 }
 0x7a8   : > { %v2864_v8 = vpop.f32.mrf.mxu1 }
 0x7aa   : > { %v1146_v13 = vpop.f32.mrf.mxu1 }
 0x7ac   : > { %v2865_v14 = vpop.f32.mrf.mxu1 }
 0x815   : > { %v1208_v15 = vpop.xlane.xlu0 %1207 }
 0x816   : > { %3062 = vrcp.f32 %v1208_v15 }
 0x819   : > { %v1215_v16 = vpop.permute.xlu0 %1214 }
 0x81a   : > { %v1220_v17 = vsel %vm730_vm2, %v1215_v16, 0 }
 0x81b   : > { %2873 = vmatpush3.bf16.msra.mxu1 %v1220_v17 }
 0x81c   : > { %2884 = vmatprep.subr.bf16.mxu1 %v3097_v7 }
 0x823   : > { %v3063_v21 = vpop.eup %3062 }
 0x824   : > { %v1210_v19 = vmul.f32 %v3063_v21, %v3061_v1 }
 0x826   : > { %2654 = vst.msk [vmem:[%s3290_s24 + $0x18] sm:$0xff] %vm713_vm4, %v1210_v19  ;;  %v1213_v20 = vpack.c.bf16 %v1210_v19, %v1210_v19 }
 0x828   : > { %2875 = vmatmul.mubr.msk.bf16.vlgmr.msra.gmra.mxu1 %vm713_vm4, %v1213_v20 }
 0x829   : > { %2888 = vmatprep.mubr.msk.bf16.mxu1 %vm3098_vm1, %v3097_v7 }
 0x8e8   : > { %v1256_v22 = vpop.f32.mrf.mxu1 }
 0x8e9   : > { %v1262_v23 = vpack.c.bf16 %v1256_v22, %v1256_v22  ;;  %v3034_v22 = vld [vmem:[%s3642_s3 + $0x34] ss:$8 sps:$4 sm:$0xff]  }
 0x8ea   : > { %v2876_v24 = vpop.f32.mrf.mxu1 }
 0x8eb   : > { %2881 = vmatmul.mubr.msk.bf16.vlgmr.msra.gmra.mxu0 %vm666_vm3, %v1262_v23  ;;  %v3032_v23 = vld [vmem:[%s3642_s3 + $0x30] ss:$8 sps:$4 sm:$0xff]   ;;  %v3037_v24 = vld [vmem:[%s3642_s3 + $0x24] ss:$8 sps:$4 sm:$0xff]  }
 0x8ec   : > { %v1259_v25 = vpop.f32.mrf.mxu1  ;;  %2900 = vmatprep.mubr.msk.bf16.mxu0 %vm3098_vm1, %v3097_v7  ;;  %2893 = vmatpush3.bf16.msra.mxu0 %v3028_v44 }
 0x8ed   : > { %2894 = vmatprep.subr.bf16.mxu0 %v3097_v7  ;;  %v3035_v25 = vld [vmem:[%s3642_s3 + $0x20] ss:$8 sps:$4 sm:$0xff]  }
 0x8ee   : > { %v2877_v26 = vpop.f32.mrf.mxu1 }
 0x8f0   : > { %2895 = vmatpush3.bf16.msra.mxu0 %v3029_v45 }
 0x8f1   : > { %2896 = vmatprep.subr.bf16.mxu0 %v3097_v7 }
 0x8f4   : > { %2897 = vmatpush3.bf16.msra.mxu0 %v3030_v57 }
 0x8f5   : > { %2898 = vmatprep.subr.bf16.mxu0 %v3097_v7 }
 0x8f8   : > { %2899 = vmatpush3.bf16.msra.mxu0 %v3031_v58 }
 0x8f9   : > { %2910 = vmatprep.subr.bf16.mxu0 %v3097_v7 }
 0x9ab   : > { %v1306_v27 = vpop.f32.mrf.mxu0 }
 0x9ac   : > { %v1312_v30 = vadd.f32 %v1306_v27, %v1149_v6 }
 0x9ad   : > { %v2882_v31 = vpop.f32.mrf.mxu0 }
 0x9ae   : > { %v1320_v32 = vadd.f32 %v2658_v28, %v1312_v30  ;;  %v2671_v31 = vld [vmem:[%s3652_s13] ss:$0 sm:$0xff] }
 0x9af   : > { %v1309_v33 = vpop.f32.mrf.mxu0 }
 0x9b0   : > { %v1321_v34 = vadd.f32 %v1320_v32, %v3222_v5  ;;  %v3026_v5 = vld [vmem:[%s3648_s9 + $0x8] sm:$0xff]   ;;  %v2672_v33 = vld [vmem:[%s3653_s14] ss:$0 sm:$0xff] }
 0x9b1   : > { %v2883_v35 = vpop.f32.mrf.mxu0  ;;  %2885 = vmatpush3.bf16.msra.mxu1 %v3026_v5 }
 0x9b2   : > { %v1324_v36 = vsel %vm602_vm0, %v1321_v34, 0.0  ;;  %2886 = vmatprep.subr.bf16.mxu1 %v3097_v7 }
 0x9b3   : > { %1325 = vadd.xlane.f32.xlu1 %v1324_v36 }
 0x9b5   : > { %2887 = vmatpush3.bf16.msra.mxu1 %v3027_v43 }
 0x9b6   : > { %1595 = vmatprep.subr.bf16.mxu1 %v3034_v22 }
 0xa3c   : > { %v1326_v37 = vpop.xlane.xlu1 %1325 }
 0xa3d   : > { %v1328_v38 = vmul.f32 0.03125, %v1326_v37 }
 0xa3f   : > { %v1329_v39 = vsub.f32 %v1321_v34, %v1328_v38  ;;  %v2677_v38 = vld [vmem:[%s3643_s4 + $0x2] sm:$0x3] }
 0xa41   : > { %v1330_v40 = vmul.f32 %v1329_v39, %v1329_v39 }
 0xa43   : > { %v1331_v41 = vsel %vm602_vm0, %v1330_v40, 0.0  ;;  %v1557_v40 = vrot.slane %v2677_v38, %v578_v12 }
 0xa44   : > { %1332 = vadd.xlane.f32.xlu1 %v1331_v41 }
 0xa55   : > { %1354 = vperm.xlu1 %3014, %v564_v42  }
 0xacd   : > { %v1333_v46 = vpop.xlane.xlu1 %1332 }
 0xace   : > { %v1334_v47 = vmul.f32 0.03125, %v1333_v46 }
 0xad0   : > { %v1335_v48 = vadd.f32 1e-05, %v1334_v47 }
 0xad1   : > { %v3405_v53 = vpop.permute.xlu1 %1354 }
 0xad2   : > { %3064 = vrsqrt.f32 %v1335_v48 }
 0xadf   : > { %v3065_v49 = vpop.eup %3064 }
 0xae0   : > { %v1337_v18 = vmul.f32 %v3065_v49, %v1329_v39  ;;  %v1553_v39 = vrot.slane %v2677_v38, %v574_v10 }
 0xae2   : > { %v1344_v52 = vmul.f32 %v2659_v50, %v1337_v18 }
 0xae4   : > { %v1351_v54 = vadd.f32 %v2660_v51, %v1344_v52 }
 0xae6   : > { %v1357_v55 = vmul.f32 %v3405_v53, %v1351_v54 }
 0xae8   : > { %v1358_v56 = vpack.c.bf16 %v1357_v55, %v1357_v55 }
 0xaea   : > { %2889 = vmatmul.mubr.msk.bf16.vlgmr.msra.gmra.mxu1 %vm602_vm0, %v1358_v56 }
 0xaeb   : > { %1615 = vmatprep.mubr.bf16.mxu1 %v3096_v2  ;;  %1596 = vmatpush1.bf16.msra.mxu1 %v3032_v23 }
 0xaec   : > { %1597 = vmatprep.subr.bf16.mxu1 %v3037_v24 }
 0xaef   : > { %1598 = vmatpush1.bf16.msra.mxu1 %v3035_v25  ;;  %v3038_v25 = vld [vmem:[%s3644_s5 + $0x20] sm:$0xff]  }
 0xaf0   : > { %2904 = vmatprep.subr.bf16.mxu1 %v3097_v7 }
 0xbaa   : > { %v1419_v60 = vpop.f32.mrf.mxu1 }
 0xbab   : > { %v1420_v2 = vadd.f32 %v2661_v59, %v1419_v60 }
 0xbac   : > { %v2890_v61 = vpop.f32.mrf.mxu1 }
 0xbad   : > { %v1425_v62 = vmax.f32 %v1420_v2, 0.0 }
 0xbae   : > { %v1422_v63 = vpop.f32.mrf.mxu1 }
 0xbaf   : > { %v1426_v0 = vpack.c.bf16 %v1425_v62, %v1425_v62 }
 0xbb0   : > { %v2891_v1 = vpop.f32.mrf.mxu1 }
 0xbb1   : > { %2901 = vmatmul.mubr.msk.bf16.vlgmr.msra.gmra.mxu0 %vm1466_vm5, %v1426_v0 }
 0xbb2   : > { %2912 = vmatprep.mubr.msk.bf16.mxu0 %vm3098_vm1, %v3097_v7 }
 0xc71   : > { %v1504_v4 = vpop.f32.mrf.mxu0 }
 0xc72   : > { %v1505_v6 = vadd.f32 %v2665_v3, %v1504_v4 }
 0xc73   : > { %v2902_v8 = vpop.f32.mrf.mxu0 }
 0xc74   : > { %v1510_v11 = vadd.f32 %v1505_v6, %v1357_v55 }
 0xc75   : > { %v1507_v13 = vpop.f32.mrf.mxu0 }
 0xc76   : > { %v1513_v14 = vsel %vm602_vm0, %v1510_v11, 0.0 }
 0xc77   : > { %1514 = vadd.xlane.f32.xlu0 %v1513_v14  ;;  %v2903_v15 = vpop.f32.mrf.mxu0 }
 0xd00   : > { %v1515_v16 = vpop.xlane.xlu0 %1514 }
 0xd01   : > { %v1516_v17 = vmul.f32 0.03125, %v1515_v16 }
 0xd03   : > { %v1517_v21 = vsub.f32 %v1510_v11, %v1516_v17 }
 0xd05   : > { %v1518_v19 = vmul.f32 %v1517_v21, %v1517_v21 }
 0xd07   : > { %v1519_v20 = vsel %vm602_vm0, %v1518_v19, 0.0 }
 0xd08   : > { %1520 = vadd.xlane.f32.xlu1 %v1519_v20 }
 0xd91   : > { %v1521_v26 = vpop.xlane.xlu1 %1520 }
 0xd92   : > { %v1522_v27 = vmul.f32 0.03125, %v1521_v26  ;;  %v3039_v26 = vld [vmem:[%s3644_s5 + $0x28] sm:$0xff]  }
 0xd94   : > { %v1523_v28 = vadd.f32 1e-05, %v1522_v27 }
 0xd96   : > { %3066 = vrsqrt.f32 %v1523_v28 }
 0xda3   : > { %v3067_v30 = vpop.eup %3066 }
 0xda4   : > { %v1525_v32 = vmul.f32 %v3067_v30, %v1517_v21 }
 0xda6   : > { %v1532_v34 = vmul.f32 %v2671_v31, %v1525_v32 }
 0xda8   : > { %v1539_v35 = vadd.f32 %v2672_v33, %v1532_v34 }
 0xdaa   : > { %v3449_v36 = vmul.f32 %v1539_v35, %v3405_v53 }
 0xdac   : > { %v1541_v37 = vpack.c.bf16 %v3449_v36, %v3449_v36 }
 0xdae   : > { %2682 = vmatmul.mubr.msk.bf16.vlgmr.msra.gmra.mxu1 %vm602_vm0, %v1541_v37 }
 0xdaf   : > { %2906 = vmatprep.mubr.msk.bf16.mxu1 %vm3098_vm1, %v3097_v7 }
 0xe6e   : > { %v1617_v41 = vpop.f32.mrf.mxu1 }
 0xe6f   : > { %v1618_v42 = vadd.f32 %v1617_v41, %v1553_v39 }
 0xe70   : > { %v1619_v5 = vpop.f32.mrf.mxu1 }
 0xe71   : > { %v3463_v43 = vpack.c.bf16 %v1618_v42, %v1618_v42  ;;  %v1620_v44 = vadd.f32 %v1619_v5, %v1557_v40 }
 0xe72   : > { %v1621_v45 = vpop.f32.mrf.mxu1 }
 0xe73   : > { %v3465_v46 = vpack.c.bf16 %v1620_v44, %v1620_v44  ;;  %1747 = vrot.lane.b32.xlu1 %v3463_v43, %s3101_s27  ;;  %1636 = vrot.lane.b32.xlu0 %v3463_v43, %s3100_s26  ;;  %s3667_s26 = smov 96   ;;  %s3668_s27 = smov 32  }
 0xe74   : > { %v1622_v47 = vpop.f32.mrf.mxu1 }
 0xe75   : > { %v1702_v9 = vsel %vm730_vm2, %v3465_v46, 0 }
 0xe76   : > { %2911 = vmatpush3.bf16.msra.mxu0 %v1702_v9 }
 0xe77   : > { %1745 = vrot.lane.b32.xlu0 %v3463_v43, %s3666_s28  ;;  %2922 = vmatprep.subr.bf16.mxu0 %v3097_v7 }
 0xee5   : > { %v1637_v10 = vpop.permute.xlu0 %1636  ;;  %v1748_v48 = vpop.permute.xlu1 %1747 }
 0xee6   : > { %v1642_v12 = vsel %vm666_vm3, %v1637_v10, 0  ;;  %v1753_v49 = vsel %vm666_vm3, %v1748_v48, 0 }
 0xee7   : > { %2905 = vmatpush3.bf16.xpose.msra.mxu1 %v1642_v12 }
 0xee8   : > { %2916 = vmatprep.subr.bf16.mxu1 %v3097_v7 }
 0xee9   : > { %v1746_v50 = vpop.permute.xlu0 %1745 }
 0xeee   : > { %2907 = vmatmul.mubr.msk.bf16.vlgmr.msra.gmra.mxu1 %vm666_vm3, %v3463_v43 }
 0xeef   : > { %2917 = vmatpush3.bf16.xpose.msra.mxu1 %v1753_v49  ;;  %2918 = vmatprep.mubr.msk.bf16.mxu1 %vm3098_vm1, %v3097_v7 }
 0xef0   : > { %2928 = vmatprep.subr.bf16.mxu1 %v3097_v7 }
 0xef6   : > { %2919 = vmatmul.mubr.msk.bf16.vlgmr.msra.gmra.mxu1 %vm666_vm3, %v1746_v50 }
 0xef7   : > { %2930 = vmatprep.mubr.msk.bf16.mxu1 %vm3098_vm1, %v3097_v7  ;;  %2929 = vmatpush3.bf16.msra.mxu1 %v3039_v26 }
 0xef8   : > { %2940 = vmatprep.subr.bf16.mxu1 %v3097_v7 }
 0xfae   : > { %v1678_v18 = vpop.f32.mrf.mxu1 }
 0xfaf   : > { %v1679_v51 = vadd.f32 %v3272_v29, %v1678_v18 }
 0xfb0   : > { %v2908_v52 = vpop.f32.mrf.mxu1 }
 0xfb1   : > { %v1684_v54 = vsel %vm713_vm4, %v1679_v51, -inf }
 0xfb2   : > { %1685 = vmax.xlane.f32.xlu0 %v1684_v54  ;;  %v1681_v55 = vpop.f32.mrf.mxu1 }
 0xfb4   : > { %v2909_v56 = vpop.f32.mrf.mxu1 }
 0xfb6   : > { %v1789_v57 = vpop.f32.mrf.mxu1 }
 0xfb7   : > { %v1790_v58 = vadd.f32 %v3272_v29, %v1789_v57 }
 0xfb8   : > { %v2920_v59 = vpop.f32.mrf.mxu1 }
 0xfb9   : > { %v1795_v60 = vsel %vm713_vm4, %v1790_v58, -inf }
 0xfba   : > { %1796 = vmax.xlane.f32.xlu1 %v1795_v60  ;;  %v1792_v2 = vpop.f32.mrf.mxu1 }
 0xfbc   : > { %v2921_v61 = vpop.f32.mrf.mxu1 }
 0xfcb   : > { %1810 = vrot.lane.b32.xlu1 %v3465_v46, %s3666_s28 }
 0xfcf   : > { %1957 = vrot.lane.b32.xlu1 %v3463_v43, %s3667_s26 }
0x103b   : > { %v1686_v62 = vpop.xlane.xlu0 %1685 }
0x103c   : > { %v1687_v63 = vsub.f32 %v1679_v51, %v1686_v62 }
0x103e   : > { %v1688_v0 = vmul.f32 1.442695, %v1687_v63 }
0x1040   : > { %3068 = vpow2.f32 %v1688_v0 }
0x1043   : > { %v1797_v1 = vpop.xlane.xlu1 %1796 }
0x1044   : > { %v1798_v3 = vsub.f32 %v1790_v58, %v1797_v1 }
0x1046   : > { %v1799_v4 = vmul.f32 1.442695, %v1798_v3 }
0x1047   : > { %v1811_v21 = vpop.permute.xlu1 %1810 }
0x1048   : > { %3070 = vpow2.f32 %v1799_v4  ;;  %v1816_v20 = vsel %vm730_vm2, %v1811_v21, 0  ;;  %v3040_v4 = vld [vmem:[%s3644_s5 + $0x30] sm:$0xff]  }
0x104b   : > { %v1958_v41 = vpop.permute.xlu1 %1957 }
0x104d   : > { %v3069_v6 = vpop.eup %3068 }
0x104e   : > { %v1690_v8 = vsel %vm713_vm4, %v3069_v6, 0.0 }
0x104f   : > { %1691 = vadd.xlane.f32.xlu0 %v1690_v8 }
0x1055   : > { %v3071_v11 = vpop.eup %3070 }
0x1056   : > { %v1801_v13 = vsel %vm713_vm4, %v3071_v11, 0.0 }
0x1057   : > { %1802 = vadd.xlane.f32.xlu0 %v1801_v13 }
0x106d   : > { %1959 = vrot.lane.b32.xlu0 %v3463_v43, %s3668_s27 }
0x10d8   : > { %v1692_v14 = vpop.xlane.xlu0 %1691 }
0x10d9   : > { %3072 = vrcp.f32 %v1692_v14 }
0x10e0   : > { %v1803_v15 = vpop.xlane.xlu0 %1802 }
0x10e1   : > { %3074 = vrcp.f32 %v1803_v15 }
0x10e4   : > { %v1960_v33 = vpop.permute.xlu0 %1959 }
0x10e5   : > { %v1965_v38 = vsel %vm666_vm3, %v1960_v33, 0 }
0x10e6   : > { %v3073_v16 = vpop.eup %3072 }
0x10e7   : > { %v1694_v17 = vmul.f32 %v3073_v16, %v3069_v6 }
0x10e9   : > { %2692 = vst.msk [vmem:[%s3290_s24 + $0x20] sm:$0xff] %vm713_vm4, %v1694_v17  ;;  %v1697_v19 = vpack.c.bf16 %v1694_v17, %v1694_v17 }
0x10eb   : > { %2913 = vmatmul.mubr.msk.bf16.vlgmr.msra.gmra.mxu0 %vm713_vm4, %v1697_v19 }
0x10ec   : > { %2923 = vmatpush3.bf16.msra.mxu0 %v1816_v20  ;;  %2924 = vmatprep.mubr.msk.bf16.mxu0 %vm3098_vm1, %v3097_v7 }
0x10ed   : > { %2934 = vmatprep.subr.bf16.mxu0 %v3097_v7 }
0x10ee   : > { %v3075_v22 = vpop.eup %3074 }
0x10ef   : > { %v1805_v23 = vmul.f32 %v3075_v22, %v3071_v11 }
0x10f1   : > { %2695 = vst.msk [vmem:[%s3290_s24 + $0x28] sm:$0xff] %vm713_vm4, %v1805_v23  ;;  %v1808_v24 = vpack.c.bf16 %v1805_v23, %v1805_v23 }
0x10f3   : > { %2925 = vmatmul.mubr.msk.bf16.vlgmr.msra.gmra.mxu0 %vm713_vm4, %v1808_v24 }
0x10f4   : > { %2936 = vmatprep.mubr.msk.bf16.mxu0 %vm3098_vm1, %v3097_v7  ;;  %2935 = vmatpush3.bf16.msra.mxu0 %v3038_v25 }
0x10f5   : > { %2946 = vmatprep.subr.bf16.mxu0 %v3097_v7 }
0x11ab   : > { %v1738_v27 = vpop.f32.mrf.mxu0 }
0x11ac   : > { %v1744_v28 = vpack.c.bf16 %v1738_v27, %v1738_v27 }
0x11ad   : > { %v2914_v30 = vpop.f32.mrf.mxu0 }
0x11ae   : > { %2937 = vmatmul.mubr.msk.bf16.vlgmr.msra.gmra.mxu0 %vm666_vm3, %v1744_v28 }
0x11af   : > { %v1741_v31 = vpop.f32.mrf.mxu0  ;;  %2948 = vmatprep.mubr.msk.bf16.mxu0 %vm3098_vm1, %v3097_v7 }
0x11b1   : > { %v2915_v32 = vpop.f32.mrf.mxu0 }
0x11b3   : > { %v1852_v34 = vpop.f32.mrf.mxu0 }
0x11b4   : > { %v1858_v35 = vpack.c.bf16 %v1852_v34, %v1852_v34 }
0x11b5   : > { %v2926_v37 = vpop.f32.mrf.mxu0 }
0x11b6   : > { %2931 = vmatmul.mubr.msk.bf16.vlgmr.msra.gmra.mxu1 %vm666_vm3, %v1858_v35 }
0x11b7   : > { %2941 = vmatpush3.bf16.xpose.msra.mxu1 %v1965_v38  ;;  %v1855_v39 = vpop.f32.mrf.mxu0  ;;  %2942 = vmatprep.mubr.msk.bf16.mxu1 %vm3098_vm1, %v3097_v7 }
0x11b8   : > { %2952 = vmatprep.subr.bf16.mxu1 %v3097_v7 }
0x11b9   : > { %v2927_v40 = vpop.f32.mrf.mxu0 }
0x11be   : > { %2943 = vmatmul.mubr.msk.bf16.vlgmr.msra.gmra.mxu1 %vm666_vm3, %v1958_v41 }
0x11bf   : > { %2954 = vmatprep.mubr.msk.bf16.mxu1 %vm3098_vm1, %v3097_v7  ;;  %2953 = vmatpush3.bf16.msra.mxu1 %v3040_v4 }
0x11c0   : > { %2964 = vmatprep.subr.bf16.mxu1 %v3097_v7 }
0x126e   : > { %v1951_v42 = vpop.f32.mrf.mxu0 }
0x1270   : > { %v2938_v5 = vpop.f32.mrf.mxu0 }
0x1272   : > { %v1954_v44 = vpop.f32.mrf.mxu0 }
0x1274   : > { %v2939_v45 = vpop.f32.mrf.mxu0 }
0x1275   : > { %v2712_v45 = vld [vmem:[%s3645_s6 + $0x1] ss:$0 sm:$0xff] }
0x1276   : > { %v1902_v47 = vpop.f32.mrf.mxu1 }
0x1277   : > { %v3530_v9 = vadd.f32 %v1951_v42, %v1902_v47 }
0x1278   : > { %v2932_v10 = vpop.f32.mrf.mxu1 }
0x127a   : > { %v1905_v12 = vpop.f32.mrf.mxu1 }
0x127c   : > { %v2933_v48 = vpop.f32.mrf.mxu1 }
0x127e   : > { %v2001_v49 = vpop.f32.mrf.mxu1 }
0x127f   : > { %v2002_v50 = vadd.f32 %v3272_v29, %v2001_v49 }
0x1280   : > { %v2944_v18 = vpop.f32.mrf.mxu1 }
0x1281   : > { %v2007_v51 = vsel %vm713_vm4, %v2002_v50, -inf }
0x1282   : > { %2008 = vmax.xlane.f32.xlu1 %v2007_v51  ;;  %v2004_v52 = vpop.f32.mrf.mxu1 }
0x1284   : > { %v2945_v54 = vpop.f32.mrf.mxu1 }
0x1293   : > { %2122 = vrot.lane.b32.xlu1 %v3463_v43, %s3669_s20 }
0x1297   : > { %2120 = vrot.lane.b32.xlu1 %v3463_v43, %s3670_s25 }
0x130b   : > { %v2009_v55 = vpop.xlane.xlu1 %2008 }
0x130c   : > { %v2010_v56 = vsub.f32 %v2002_v50, %v2009_v55 }
0x130e   : > { %v2011_v57 = vmul.f32 1.442695, %v2010_v56  ;;  %v3042_v56 = vld [vmem:[%s3648_s9 + $0x18] sm:$0xff]  }
0x130f   : > { %v2123_v63 = vpop.permute.xlu1 %2122 }
0x1310   : > { %3076 = vpow2.f32 %v2011_v57  ;;  %v2128_v1 = vsel %vm666_vm3, %v2123_v63, 0  ;;  %v3044_v57 = vld [vmem:[%s3650_s11 + $0x38] sm:$0xff]   ;;  %v2716_v63 = vld [vmem:[%s3647_s8 + $0x1] ss:$0 sm:$0xff] }
0x1313   : > { %v2121_v3 = vpop.permute.xlu1 %2120 }
0x131d   : > { %v3077_v58 = vpop.eup %3076 }
0x131e   : > { %v2013_v59 = vsel %vm713_vm4, %v3077_v58, 0.0 }
0x131f   : > { %2014 = vadd.xlane.f32.xlu0 %v2013_v59 }
0x1335   : > { %2021 = vrot.lane.b32.xlu0 %v3465_v46, %s3667_s26  ;;  %s2630_s26 = sshll.u32 %s3672_s22, 2 }
0x1336   : > { %s555_s29 = scalar_lea.vmem %s3654_s15, %s2630_s26 }
0x13a8   : > { %v2015_v60 = vpop.xlane.xlu0 %2014 }
0x13a9   : > { %3078 = vrcp.f32 %v2015_v60 }
0x13ac   : > { %v2022_v2 = vpop.permute.xlu0 %2021 }
0x13ad   : > { %v2027_v61 = vsel %vm730_vm2, %v2022_v2, 0 }
0x13ae   : > { %2947 = vmatpush3.bf16.msra.mxu0 %v2027_v61 }
0x13af   : > { %2958 = vmatprep.subr.bf16.mxu0 %v3097_v7 }
0x13b6   : > { %v3079_v43 = vpop.eup %3078 }
0x13b7   : > { %v2017_v62 = vmul.f32 %v3079_v43, %v3077_v58  ;;  %v3045_v58 = vld [vmem:[%s3650_s11 + $0x30] sm:$0xff]   ;;  %v2715_v43 = vld [vmem:[%s3646_s7 + $0x1] ss:$0 sm:$0xff] }
0x13b9   : > { %2702 = vst.msk [vmem:[%s3290_s24 + $0x30] sm:$0xff] %vm713_vm4, %v2017_v62  ;;  %v2020_v0 = vpack.c.bf16 %v2017_v62, %v2017_v62 }
0x13bb   : > { %2949 = vmatmul.mubr.msk.bf16.vlgmr.msra.gmra.mxu0 %vm713_vm4, %v2020_v0 }
0x13bc   : > { %2959 = vmatpush3.bf16.xpose.msra.mxu0 %v2128_v1  ;;  %2960 = vmatprep.mubr.msk.bf16.mxu0 %vm3098_vm1, %v3097_v7 }
0x13bd   : > { %2970 = vmatprep.subr.bf16.mxu0 %v3097_v7 }
0x13c3   : > { %2961 = vmatmul.mubr.msk.bf16.vlgmr.msra.gmra.mxu0 %vm666_vm3, %v2121_v3 }
0x13c4   : > { %2972 = vmatprep.mubr.msk.bf16.mxu0 %vm3098_vm1, %v3097_v7 }
0x147b   : > { %v2063_v6 = vpop.f32.mrf.mxu0 }
0x147c   : > { %v2069_v8 = vpack.c.bf16 %v2063_v6, %v2063_v6  ;;  %v3046_v6 = vld [vmem:[%s3650_s11 + $0x28] sm:$0xff]  }
0x147d   : > { %v2950_v11 = vpop.f32.mrf.mxu0 }
0x147e   : > { %2955 = vmatmul.mubr.msk.bf16.vlgmr.msra.gmra.mxu1 %vm666_vm3, %v2069_v8  ;;  %v3047_v8 = vld [vmem:[%s3650_s11 + $0x20] sm:$0xff]  }
0x147f   : > { %v2066_v13 = vpop.f32.mrf.mxu0  ;;  %2966 = vmatprep.mubr.msk.bf16.mxu1 %vm3098_vm1, %v3097_v7  ;;  %v2722_v11 = vld [vmem:[%s3649_s10 + $0x1] ss:$0 sm:$0xff] }
0x1481   : > { %v2951_v14 = vpop.f32.mrf.mxu0 }
0x1483   : > { %v2164_v15 = vpop.f32.mrf.mxu0 }
0x1484   : > { %v2165_v16 = vadd.f32 %v3272_v29, %v2164_v15 }
0x1485   : > { %v2962_v17 = vpop.f32.mrf.mxu0 }
0x1486   : > { %v2170_v21 = vsel %vm713_vm4, %v2165_v16, -inf }
0x1487   : > { %2171 = vmax.xlane.f32.xlu0 %v2170_v21  ;;  %v2167_v19 = vpop.f32.mrf.mxu0 }
0x1489   : > { %v2963_v20 = vpop.f32.mrf.mxu0 }
0x149d   : > { %2184 = vrot.lane.b32.xlu0 %v3465_v46, %s3670_s25  ;;  %v3041_v46 = vld [vmem:[%s3644_s5 + $0x38] sm:$0xff]  }
0x149e   : > { %2971 = vmatpush3.bf16.msra.mxu0 %v3041_v46 }
0x149f   : > { %2984 = vmatprep.subr.bf16.mxu0 %v3097_v7 }
0x1510   : > { %v2172_v22 = vpop.xlane.xlu0 %2171 }
0x1511   : > { %v2173_v23 = vsub.f32 %v2165_v16, %v2172_v22 }
0x1513   : > { %v2174_v24 = vmul.f32 1.442695, %v2173_v23 }
0x1514   : > { %v2185_v25 = vpop.permute.xlu0 %2184 }
0x1515   : > { %3080 = vpow2.f32 %v2174_v24  ;;  %v2190_v26 = vsel %vm730_vm2, %v2185_v25, 0 }
0x1516   : > { %2965 = vmatpush3.bf16.msra.mxu1 %v2190_v26 }
0x1517   : > { %2976 = vmatprep.subr.bf16.mxu1 %v3097_v7 }
0x1522   : > { %v3081_v29 = vpop.eup %3080 }
0x1523   : > { %v2176_v27 = vsel %vm713_vm4, %v3081_v29, 0.0 }
0x1524   : > { %2177 = vadd.xlane.f32.xlu1 %v2176_v27 }
0x153e   : > { %v2113_v28 = vpop.f32.mrf.mxu1 }
0x153f   : > { %v2119_v30 = vadd.f32 %v2113_v28, %v3530_v9 }
0x1540   : > { %v2956_v31 = vpop.f32.mrf.mxu1 }
0x1542   : > { %v2116_v32 = vpop.f32.mrf.mxu1 }
0x1544   : > { %v2957_v33 = vpop.f32.mrf.mxu1 }
0x15ad   : > { %v2178_v34 = vpop.xlane.xlu1 %2177 }
0x15ae   : > { %3082 = vrcp.f32 %v2178_v34 }
0x15bb   : > { %v3083_v35 = vpop.eup %3082 }
0x15bc   : > { %v2180_v37 = vmul.f32 %v3083_v35, %v3081_v29 }
0x15be   : > { %2707 = vst.msk [vmem:[%s3290_s24 + $0x38] sm:$0xff] %vm713_vm4, %v2180_v37  ;;  %v2183_v38 = vpack.c.bf16 %v2180_v37, %v2180_v37  ;;  %v2743_v37 = vld [vmem:[%s3652_s13 + $0x1] ss:$0 sm:$0xff] }
0x15c0   : > { %2967 = vmatmul.mubr.msk.bf16.vlgmr.msra.gmra.mxu1 %vm713_vm4, %v2183_v38 }
0x15c1   : > { %2980 = vmatprep.mubr.msk.bf16.mxu1 %vm3098_vm1, %v3097_v7  ;;  %2977 = vmatpush3.bf16.msra.mxu1 %v3042_v56 }
0x15c2   : > { %2978 = vmatprep.subr.bf16.mxu1 %v3097_v7 }
0x1680   : > { %v2226_v39 = vpop.f32.mrf.mxu1 }
0x1681   : > { %v2232_v40 = vpack.c.bf16 %v2226_v39, %v2226_v39  ;;  %v2744_v39 = vld [vmem:[%s3653_s14 + $0x1] ss:$0 sm:$0xff] }
0x1682   : > { %v2968_v41 = vpop.f32.mrf.mxu1 }
0x1683   : > { %2973 = vmatmul.mubr.msk.bf16.vlgmr.msra.gmra.mxu0 %vm666_vm3, %v2232_v40 }
0x1684   : > { %v2229_v42 = vpop.f32.mrf.mxu1  ;;  %2992 = vmatprep.mubr.msk.bf16.mxu0 %vm3098_vm1, %v3097_v7  ;;  %2985 = vmatpush3.bf16.msra.mxu0 %v3044_v57 }
0x1685   : > { %2986 = vmatprep.subr.bf16.mxu0 %v3097_v7 }
0x1686   : > { %v2969_v5 = vpop.f32.mrf.mxu1 }
0x1688   : > { %2987 = vmatpush3.bf16.msra.mxu0 %v3045_v58 }
0x1689   : > { %2988 = vmatprep.subr.bf16.mxu0 %v3097_v7 }
0x168c   : > { %2989 = vmatpush3.bf16.msra.mxu0 %v3046_v6 }
0x168d   : > { %2990 = vmatprep.subr.bf16.mxu0 %v3097_v7  ;;  %v2735_v7 = vld [vmem:[%s3651_s12 + $0x1] ss:$0 sm:$0xff] }
0x1690   : > { %2991 = vmatpush3.bf16.msra.mxu0 %v3047_v8 }
0x1743   : > { %v2276_v44 = vpop.f32.mrf.mxu0 }
0x1744   : > { %v2282_v47 = vadd.f32 %v2276_v44, %v2119_v30 }
0x1745   : > { %v2974_v9 = vpop.f32.mrf.mxu0 }
0x1746   : > { %v2291_v10 = vadd.f32 %v2712_v45, %v2282_v47 }
0x1747   : > { %v2279_v12 = vpop.f32.mrf.mxu0 }
0x1748   : > { %v2292_v48 = vadd.f32 %v2291_v10, %v3449_v36  ;;  %v3043_v36 = vld [vmem:[%s3648_s9 + $0x10] sm:$0xff]  }
0x1749   : > { %v2975_v49 = vpop.f32.mrf.mxu0  ;;  %2979 = vmatpush3.bf16.msra.mxu1 %v3043_v36 }
0x174a   : > { %v2297_v50 = vsel %vm602_vm0, %v2292_v48, 0.0 }
0x174b   : > { %2298 = vadd.xlane.f32.xlu1 %v2297_v50 }
0x17d4   : > { %v2299_v18 = vpop.xlane.xlu1 %2298 }
0x17d5   : > { %v2300_v51 = vmul.f32 0.03125, %v2299_v18 }
0x17d7   : > { %v2301_v52 = vsub.f32 %v2292_v48, %v2300_v51 }
0x17d9   : > { %v2302_v54 = vmul.f32 %v2301_v52, %v2301_v52 }
0x17db   : > { %v2303_v55 = vsel %vm602_vm0, %v2302_v54, 0.0 }
0x17dc   : > { %2304 = vadd.xlane.f32.xlu1 %v2303_v55 }
0x1865   : > { %v2305_v59 = vpop.xlane.xlu1 %2304 }
0x1866   : > { %v2306_v60 = vmul.f32 0.03125, %v2305_v59 }
0x1868   : > { %v2307_v2 = vadd.f32 1e-05, %v2306_v60 }
0x186a   : > { %3084 = vrsqrt.f32 %v2307_v2 }
0x1877   : > { %v3085_v61 = vpop.eup %3084 }
0x1878   : > { %v2309_v62 = vmul.f32 %v3085_v61, %v2301_v52 }
0x187a   : > { %v2316_v0 = vmul.f32 %v2715_v43, %v2309_v62 }
0x187c   : > { %v2323_v1 = vadd.f32 %v2716_v63, %v2316_v0 }
0x187e   : > { %v2324_v3 = vmul.f32 %v2323_v1, %v3405_v53 }
0x1880   : > { %v2325_v4 = vpack.c.bf16 %v2324_v3, %v2324_v3 }
0x1882   : > { %2981 = vmatmul.mubr.msk.bf16.vlgmr.msra.gmra.mxu1 %vm602_vm0, %v2325_v4 }
0x1942   : > { %v2388_v13 = vpop.f32.mrf.mxu1 }
0x1943   : > { %v2389_v14 = vadd.f32 %v2722_v11, %v2388_v13 }
0x1944   : > { %v2982_v15 = vpop.f32.mrf.mxu1 }
0x1945   : > { %v2394_v16 = vmax.f32 %v2389_v14, 0.0 }
0x1946   : > { %v2391_v17 = vpop.f32.mrf.mxu1 }
0x1947   : > { %v2395_v21 = vpack.c.bf16 %v2394_v16, %v2394_v16 }
0x1948   : > { %v2983_v19 = vpop.f32.mrf.mxu1 }
0x1949   : > { %2993 = vmatmul.mubr.msk.bf16.vlgmr.msra.gmra.mxu0 %vm1466_vm5, %v2395_v21 }
0x1a09   : > { %v2474_v20 = vpop.f32.mrf.mxu0 }
0x1a0a   : > { %v2475_v22 = vadd.f32 %v2735_v7, %v2474_v20 }
0x1a0b   : > { %v2994_v23 = vpop.f32.mrf.mxu0 }
0x1a0c   : > { %v2480_v24 = vadd.f32 %v2475_v22, %v2324_v3 }
0x1a0d   : > { %v2477_v25 = vpop.f32.mrf.mxu0 }
0x1a0e   : > { %v2485_v26 = vsel %vm602_vm0, %v2480_v24, 0.0 }
0x1a0f   : > { %2486 = vadd.xlane.f32.xlu1 %v2485_v26  ;;  %v2995_v29 = vpop.f32.mrf.mxu0 }
0x1a98   : > { %v2487_v27 = vpop.xlane.xlu1 %2486 }
0x1a99   : > { %v2488_v28 = vmul.f32 0.03125, %v2487_v27 }
0x1a9b   : > { %v2489_v30 = vsub.f32 %v2480_v24, %v2488_v28 }
0x1a9d   : > { %v2490_v31 = vmul.f32 %v2489_v30, %v2489_v30 }
0x1a9f   : > { %v2491_v46 = vsel %vm602_vm0, %v2490_v31, 0.0 }
0x1aa0   : > { %2492 = vadd.xlane.f32.xlu1 %v2491_v46 }
0x1b29   : > { %v2493_v32 = vpop.xlane.xlu1 %2492 }
0x1b2a   : > { %v2494_v33 = vmul.f32 0.03125, %v2493_v32 }
0x1b2c   : > { %v2495_v34 = vadd.f32 1e-05, %v2494_v33 }
0x1b2e   : > { %3086 = vrsqrt.f32 %v2495_v34 }
0x1b3b   : > { %v3087_v35 = vpop.eup %3086 }
0x1b3c   : > { %v2497_v38 = vmul.f32 %v3087_v35, %v2489_v30 }
0x1b3e   : > { %v2504_v40 = vmul.f32 %v2743_v37, %v2497_v38 }
0x1b40   : > { %v2511_v41 = vadd.f32 %v2744_v39, %v2504_v40 }
0x1b42   : > { %v2512_v42 = vmul.f32 %v2511_v41, %v3405_v53 }
0x1b44   : > { %v2513_v5 = vpack.c.bf16 %v2512_v42, %v2512_v42 }
0x1b46   : > { %2515 = vst.msk [vmem:[%s555_s29] sm:$0xf] %vm2514_vm6, %v2513_v5 }
0x1b47 PF: > { %s27_s21 = sadd.s32 1, %s3094_s21  }
0x1b48   : > { %p24_p4 = scmp.ge.s32.totalorder %s27_s21, 4  }
0x1b4a   :  { %26 = sbr.rel (!%p24_p4) target bundleno = 2 (0x2), region = 147 }

// kernel: fwd.6
= control target key start
LH: loop header
LB: loop body
LE: loop exit
PB: predicated region body
PF: predicated region fallthrough
CT: control target
= control target key end

     0   :  { %s6070_s6 = smov 1   ;;  %s6071_s10 = smov 2   ;;  %s6964_s0 = inlined_call_operand.smem [shape: u32[33], index: -1, kind: input, shape index: {}] }
   0x1   :  { %s6121_s5 = sld [smem:[%s6964_s0]]   ;;  %s6072_s14 = smov 3  }
   0x2   :  { %s6126_s9 = sld [smem:[%s6964_s0 + %s6070_s6]]   ;;  %s6073_s18 = smov 4  }
   0x3   :  { %s6131_s13 = sld [smem:[%s6964_s0 + %s6071_s10]]   ;;  %s6074_s22 = smov 5  }
   0x4   :  { %s6136_s17 = sld [smem:[%s6964_s0 + %s6072_s14]]   ;;  %s6075_s26 = smov 6  }
   0x5   :  { %s6141_s21 = sld [smem:[%s6964_s0 + %s6073_s18]]   ;;  %s6076_s30 = smov 7  }
   0x6   :  { %s6146_s25 = sld [smem:[%s6964_s0 + %s6074_s22]]   ;;  %s6077_s4 = smov 8  }
   0x7   :  { %6991 = sst [smem:[#allocation2_spill]] %s6121_s5  ;;  %s6078_s10 = smov 9  }
   0x8   :  { %6992 = sst [smem:[#allocation3_spill]] %s6126_s9  ;;  %s6079_s15 = smov 10  }
   0x9   :  { %6993 = sst [smem:[#allocation4_spill]] %s6131_s13  ;;  %s6080_s20 = smov 11  }
   0xa   :  { %6994 = sst [smem:[#allocation5_spill]] %s6136_s17  ;;  %s6082_s1 = smov 13  }
   0xb   :  { %6995 = sst [smem:[#allocation6_spill]] %s6141_s21  ;;  %s6083_s7 = smov 14  }
   0xc   :  { %6996 = sst [smem:[#allocation7_spill]] %s6146_s25  ;;  %s6085_s22 = smov 16  }
   0xd   :  { %s6151_s29 = sld [smem:[%s6964_s0 + %s6075_s26]]   ;;  %s6081_s26 = smov 12  }
   0xe   :  { %s6156_s3 = sld [smem:[%s6964_s0 + %s6076_s30]]   ;;  %s6086_s28 = smov 17  }
   0xf   :  { %s6161_s8 = sld [smem:[%s6964_s0 + %s6077_s4]]  }
  0x10   :  { %s6166_s14 = sld [smem:[%s6964_s0 + %s6078_s10]]  }
  0x11   :  { %s6171_s19 = sld [smem:[%s6964_s0 + %s6079_s15]]   ;;  %s6084_s15 = smov 15  }
  0x12   :  { %s6176_s24 = sld [smem:[%s6964_s0 + %s6080_s20]]  }
  0x13   :  { %6997 = sst [smem:[#allocation8_spill]] %s6151_s29 }
  0x14   :  { %6998 = sst [smem:[#allocation9_spill]] %s6156_s3 }
  0x15   :  { %s6181_s30 = sld [smem:[%s6964_s0 + %s6081_s26]]  }
  0x16   :  { %s6186_s6 = sld [smem:[%s6964_s0 + %s6082_s1]]  }
  0x17   :  { %s6191_s12 = sld [smem:[%s6964_s0 + %s6083_s7]]   ;;  %s6087_s7 = smov 18  }
  0x18   :  { %s6196_s20 = sld [smem:[%s6964_s0 + %s6084_s15]]   ;;  %s6088_s15 = smov 19  }
  0x19   :  { %s6201_s27 = sld [smem:[%s6964_s0 + %s6085_s22]]   ;;  %s6089_s22 = smov 20  }
  0x1a   :  { %s6206_s4 = sld [smem:[%s6964_s0 + %s6086_s28]]   ;;  %s6090_s28 = smov 21  }
  0x1b   :  { %s6211_s25 = sld [smem:[%s6964_s0 + %s6087_s7]]   ;;  %s6091_s7 = smov 22  }
  0x1c   :  { %s6216_s13 = sld [smem:[%s6964_s0 + %s6088_s15]]   ;;  %s6092_s15 = smov 23  }
  0x1d   :  { %s6221_s21 = sld [smem:[%s6964_s0 + %s6089_s22]]   ;;  %s6093_s22 = smov 24  }
  0x20   :  { %6999 = sst [smem:[#allocation10_spill]] %s6206_s4 }
  0x21   :  { %7000 = sst [smem:[#allocation11_spill]] %s6211_s25 }
  0x22   :  { %7001 = sst [smem:[#allocation12_spill]] %s6216_s13 }
  0x23   :  { %7002 = sst [smem:[#allocation13_spill]] %s6221_s21 }
  0x24   :  { %s6226_s4 = sld [smem:[%s6964_s0 + %s6090_s28]]   ;;  %s6094_s28 = smov 25  }
  0x25   :  { %s6231_s25 = sld [smem:[%s6964_s0 + %s6091_s7]]   ;;  %s6095_s7 = smov 26  }
  0x26   :  { %s6236_s13 = sld [smem:[%s6964_s0 + %s6092_s15]]   ;;  %s6096_s15 = smov 27  }
  0x27   :  { %s6241_s21 = sld [smem:[%s6964_s0 + %s6093_s22]]   ;;  %s6097_s22 = smov 28  }
  0x2a   :  { %7003 = sst [smem:[#allocation14_spill]] %s6226_s4 }
  0x2b   :  { %7004 = sst [smem:[#allocation15_spill]] %s6231_s25 }
  0x2c   :  { %7005 = sst [smem:[#allocation16_spill]] %s6236_s13 }
  0x2d   :  { %7006 = sst [smem:[#allocation17_spill]] %s6241_s21 }
  0x2e   :  { %s6246_s4 = sld [smem:[%s6964_s0 + %s6094_s28]]   ;;  %s6098_s28 = smov 29  }
  0x2f   :  { %s6251_s25 = sld [smem:[%s6964_s0 + %s6095_s7]]   ;;  %s6099_s7 = smov 30  }
  0x30   :  { %s6256_s13 = sld [smem:[%s6964_s0 + %s6096_s15]]   ;;  %s6100_s15 = smov 31  }
  0x31   :  { %s6261_s21 = sld [smem:[%s6964_s0 + %s6097_s22]]   ;;  %s6101_s22 = smov 32  }
  0x34   :  { %7007 = sst [smem:[#allocation18_spill]] %s6246_s4 }
  0x35   :  { %7008 = sst [smem:[#allocation19_spill]] %s6251_s25 }
  0x36   :  { %7009 = sst [smem:[#allocation20_spill]] %s6256_s13 }
  0x37   :  { %7010 = sst [smem:[#allocation21_spill]] %s6261_s21 }
  0x38   :  { %s6266_s4 = sld [smem:[%s6964_s0 + %s6098_s28]]   ;;  %s6283_s28 = smov 0  }
  0x39   :  { %s6271_s25 = sld [smem:[%s6964_s0 + %s6099_s7]]  }
  0x3a   :  { %s6276_s13 = sld [smem:[%s6964_s0 + %s6100_s15]]  }
  0x3b   :  { %s6281_s21 = sld [smem:[%s6964_s0 + %s6101_s22]]  }
  0x3e   :  { %7011 = sst [smem:[#allocation22_spill]] %s6266_s4 }
  0x3f   :  { %7012 = sst [smem:[#allocation23_spill]] %s6271_s25 }
  0x40   :  { %7013 = sst [smem:[#allocation24_spill]] %s6276_s13 }
  0x41   :  { %7014 = sst [smem:[#allocation25_spill]] %s6281_s21 }
  0x42 LB: > { %s7015_s3 = sld [smem:[#allocation9_spill]]  ;;  %s5142_s1 = sadd.s32 4294967295, %s6068_s28   ;;  %s6068_s28 = sphi %s6283_s28, %s76_s28  }
  0x43   : > { %7016 = sst [smem:[#allocation26_spill]] %s6068_s28  ;;  %p5146_p0 = scmp.ge.s32.totalorder %s6068_s28, 1 }
  0x44   : > { %p952_p1 = scmp.lt.s32.totalorder %s6068_s28, 3 }
  0x46   : > { %p953_p2 = pnand %p5146_p0, %p952_p1 }
  0x48   : > { %956 = sbr.rel (%p953_p2) target bundleno = 12561 (0x3111), region = 136 }
  0x4d   : > { %v5930_v0 = vld [vmem:[%s7015_s3 + $0x14] ss:$8 sps:$4 sm:$0xff]   ;;  %s7017_s5 = sld [smem:[#allocation2_spill]]  ;;  %p1068_p3 = scmp.lt.s32.totalorder %s5142_s1, 1  ;;  %v5932_v1 = vld [vmem:[%s7015_s3 + $0x10] ss:$8 sps:$4 sm:$0xff]   ;;  %v1117_v8 = vlaneseq }
  0x4e   : > { %v6102_v2 = vmov 0   ;;  %1186 = vmatprep.subr.bf16.mxu1 %v5930_v0  ;;  %v5933_v3 = vld [vmem:[%s7015_s3 + $0x4] ss:$8 sps:$4 sm:$0xff]   ;;  %v6103_v4 = vmov 0.0   ;;  %v5935_v5 = vld [vmem:[%s7015_s3] ss:$8 sps:$4 sm:$0xff]  }
  0x4f   : > { %1206 = vmatprep.mubr.bf16.mxu1 %v6102_v2  ;;  %5928 = vset.pattern.permute.xlu1 %v6102_v2  ;;  %s7055_s1 = smov (!%p1068_p3, %s5142_s1), 1  ;;  %vm1170_vm0 = vcmask 261120   ;;  %v6311_v9 = vshrl.u32 %v1117_v8, 7  ;;  %v1138_v11 = vld [vmem:[%s6161_s8] sm:$0x3]  ;;  %vm6104_vm1 = vmmov 0  }
  0x50   : > { %5507 = vmatprep.subr.bf16.mxu0 %v6103_v4  ;;  %1187 = vmatpush1.bf16.msra.mxu1 %v5932_v1  ;;  %s5147_s0 = sshll.u32 %s7055_s1, 3  ;;  %vm1293_vm2 = vcmask 1042432   ;;  %vm1294_vm3 = vcmask 1043456   ;;  %v6105_v17 = vmov 65535   ;;  %s6981_s7 = smov 112   ;;  %vm1228_vm4 = vcmask 130048  }
  0x51   : > { %5929 = vset.pattern.permute.xlu0 %v6102_v2  ;;  %1188 = vmatprep.subr.bf16.mxu1 %v5933_v3  ;;  %v1142_v10 = vsub.s32 0, %v6311_v9  ;;  %v1146_v12 = vsub.s32 1, %v6311_v9  ;;  %v1295_v18 = vsel %vm1293_vm2, 4294967295, %v6105_v17  ;;  %s6979_s10 = smov 64   ;;  %s6980_s11 = smov 48   ;;  %v1120_v32 = vand.u32 127, %v1117_v8 }
  0x52   : > { %5509 = vmatprep.mubr.msk.bf16.mxu0 %vm6104_vm1, %v6103_v4  ;;  %v6327_v23 = vsel %vm1294_vm3, %v1295_v18, 0  ;;  %s7018_s17 = sld [smem:[#allocation5_spill]]  ;;  %vm1275_vm6 = vcmask 55296   ;;  %s6978_s16 = smov 32   ;;  %vm1289_vm7 = vcmask 56320   ;;  %v5937_v8 = vld [vmem:[%s6166_s14 + $0x8] sm:$0xff]  }
  0x53   : > { %s1071_s2 = scalar_lea.vmem %s7017_s5, %s5147_s0  ;;  %v1143_v13 = vrot.slane %v1138_v11, %v1142_v10  ;;  %v1147_v14 = vrot.slane %v1138_v11, %v1146_v12  ;;  %vm1121_vm5 = vcmp.gt.s32.totalorder %v1120_v32, %v6311_v9  ;;  %s7019_s25 = sld [smem:[#allocation23_spill]]  ;;  %vm1890_vm8 = vcmask 260096  }
  0x54   : > { %v6305_v6 = vld [vmem:[%s1071_s2] sm:$0x7f]  ;;  %1189 = vmatpush1.bf16.msra.mxu1 %v5935_v5  ;;  %v1122_v33 = vsel %vm1121_vm5, -1e+09, %v6103_v4  ;;  %s6986_s18 = smov 96   ;;  %s5368_s22 = sshll.u32 %s7055_s1, 6 }
  0x55   : > { %v1133_v7 = vpack.c.bf16 %v6305_v6, %v6305_v6  ;;  %5501 = vmatprep.subr.bf16.mxu1 %v6103_v4  ;;  %s6984_s26 = smov 80   ;;  %s6977_s2 = smov 16   ;;  %vm2187_vm9 = vcmask 63488   ;;  %vm2204_vm10 = vcmask 64512   ;;  %vm2941_vm11 = vcmask 523264  }
  0x56   : > { %s7020_s29 = sld [smem:[#allocation8_spill]]  ;;  %s7030_s5 = smov 96   ;;  %vm4889_vm12 = vcmask 257024   ;;  %vm4890_vm13 = vsmask.f32 3328 }
  0x57   : > { %5163 = vmatmul.mubr.msk.bf16.vlgmr.msra.gmra.mxu1 %vm1170_vm0, %v1133_v7  ;;  %v5936_v7 = vld [vmem:[%s6166_s14] sm:$0xff]   ;;  %s7021_s9 = sld [smem:[#allocation3_spill]]  ;;  %vm4891_vm14 = vmand %vm4889_vm12, %vm4890_vm13 }
  0x58   : > { %5503 = vmatprep.mubr.msk.bf16.mxu1 %vm6104_vm1, %v6103_v4  ;;  %s1082_s15 = scalar_lea.vmem %s7018_s17, %s7055_s1  ;;  %s7026_s13 = sld [smem:[#allocation24_spill]] }
  0x59   : > { %v5158_v34 = vld [vmem:[%s1082_s15] ss:$0 sm:$0xff]  ;;  %s6371_s23 = scalar_lea.vmem %s7019_s25, %s5368_s22  ;;  %s6457_s22 = sshll.u32 %s7055_s1, 2 }
  0x5a   : > { %v6355_v35 = vadd.f32 %v5158_v34, %v1122_v33  ;;  %7022 = sst [smem:[#allocation27_spill]] %s6457_s22 }
  0x5b   : > { %s7032_s21 = sld [smem:[#allocation25_spill]] }
  0x5c   : > { %s1092_s15 = scalar_lea.vmem %s7020_s29, %s5147_s0  ;;  %s7023_s0 = sld [smem:[#allocation6_spill]] }
  0x5d   : > { %s7038_s25 = sld [smem:[#allocation14_spill]] }
  0x5e   : > { %s7039_s29 = sld [smem:[#allocation15_spill]] }
  0x5f   : > { %s7040_s28 = sld [smem:[#allocation17_spill]] }
 0x117   : > { %v1208_v15 = vpop.f32.mrf.mxu1 }
 0x118   : > { %v1209_v16 = vadd.f32 %v1208_v15, %v1143_v13 }
 0x119   : > { %v1210_v19 = vpop.f32.mrf.mxu1 }
 0x11a   : > { %v6324_v20 = vpack.c.bf16 %v1209_v16, %v1209_v16  ;;  %v1211_v21 = vadd.f32 %v1210_v19, %v1147_v14 }
 0x11b   : > { %v1212_v22 = vpop.f32.mrf.mxu1 }
 0x11c   : > { %v6329_v24 = vpack.c.bf16 %v1211_v21, %v1211_v21  ;;  %1341 = vrot.lane.b32.xlu1 %v6324_v20, %s6981_s7  ;;  %1226 = vrot.lane.b32.xlu0 %v6324_v20, %s6979_s10 }
 0x11d   : > { %v1213_v25 = vpop.f32.mrf.mxu1 }
 0x11e   : > { %v1298_v26 = vand.u32 %v6327_v23, %v6329_v24 }
 0x120   : > { %5508 = vmatpush3.bf16.msra.mxu0 %v1298_v26  ;;  %1343 = vrot.lane.b32.xlu0 %v6324_v20, %s6980_s11  ;;  %s6983_s11 = sshll.u32 %s7055_s1, 5 }
 0x121   : > { %5519 = vmatprep.subr.bf16.mxu0 %v6103_v4 }
 0x18e   : > { %v1227_v27 = vpop.permute.xlu0 %1226  ;;  %v1342_v31 = vpop.permute.xlu1 %1341 }
 0x18f   : > { %v1233_v28 = vsel %vm1228_vm4, %v1227_v27, 0 }
 0x190   : > { %5502 = vmatpush3.bf16.xpose.msra.mxu1 %v1233_v28 }
 0x191   : > { %5513 = vmatprep.subr.bf16.mxu1 %v6103_v4 }
 0x192   : > { %v1344_v29 = vpop.permute.xlu0 %1343 }
 0x193   : > { %v1349_v30 = vsel %vm1228_vm4, %v1344_v29, 0 }
 0x197   : > { %5504 = vmatmul.mubr.msk.bf16.vlgmr.msra.gmra.mxu1 %vm1228_vm4, %v6324_v20 }
 0x198   : > { %5514 = vmatpush3.bf16.xpose.msra.mxu1 %v1349_v30  ;;  %5515 = vmatprep.mubr.msk.bf16.mxu1 %vm6104_vm1, %v6103_v4 }
 0x199   : > { %5525 = vmatprep.subr.bf16.mxu1 %v6103_v4 }
 0x19f   : > { %5516 = vmatmul.mubr.msk.bf16.vlgmr.msra.gmra.mxu1 %vm1228_vm4, %v1342_v31 }
 0x1a0   : > { %5527 = vmatprep.mubr.msk.bf16.mxu1 %vm6104_vm1, %v6103_v4  ;;  %5526 = vmatpush3.bf16.msra.mxu1 %v5937_v8 }
 0x1a1   : > { %5537 = vmatprep.subr.bf16.mxu1 %v6103_v4 }
 0x257   : > { %v1269_v36 = vpop.f32.mrf.mxu1 }
 0x258   : > { %v1270_v37 = vadd.f32 %v1269_v36, %v6355_v35 }
 0x259   : > { %v5505_v38 = vpop.f32.mrf.mxu1 }
 0x25a   : > { %v1276_v39 = vsel %vm1275_vm6, %v1270_v37, -inf }
 0x25b   : > { %1277 = vmax.xlane.f32.xlu1 %v1276_v39  ;;  %v1272_v40 = vpop.f32.mrf.mxu1 }
 0x25d   : > { %v5506_v41 = vpop.f32.mrf.mxu1 }
 0x25f   : > { %v1385_v42 = vpop.f32.mrf.mxu1 }
 0x260   : > { %v1386_v43 = vadd.f32 %v1385_v42, %v6355_v35 }
 0x261   : > { %v5517_v44 = vpop.f32.mrf.mxu1 }
 0x262   : > { %v1391_v45 = vsel %vm1275_vm6, %v1386_v43, -inf }
 0x263   : > { %1392 = vmax.xlane.f32.xlu0 %v1391_v45  ;;  %v1388_v46 = vpop.f32.mrf.mxu1 }
 0x265   : > { %v5518_v47 = vpop.f32.mrf.mxu1 }
 0x2e4   : > { %v1278_v48 = vpop.xlane.xlu1 %1277 }
 0x2e5   : > { %v1279_v49 = vsub.f32 %v1270_v37, %v1278_v48 }
 0x2e7   : > { %v1280_v50 = vmul.f32 1.442695, %v1279_v49 }
 0x2e9   : > { %5982 = vpow2.f32 %v1280_v50 }
 0x2ec   : > { %v1393_v51 = vpop.xlane.xlu0 %1392 }
 0x2ed   : > { %v1394_v52 = vsub.f32 %v1386_v43, %v1393_v51 }
 0x2ef   : > { %v1395_v53 = vmul.f32 1.442695, %v1394_v52 }
 0x2f1   : > { %5984 = vpow2.f32 %v1395_v53 }
 0x2f6   : > { %v5983_v54 = vpop.eup %5982 }
 0x2f7   : > { %v1282_v55 = vsel %vm1275_vm6, %v5983_v54, 0.0 }
 0x2f8   : > { %1283 = vadd.xlane.f32.xlu0 %v1282_v55 }
 0x2fe   : > { %v5985_v56 = vpop.eup %5984 }
 0x2ff   : > { %v1397_v57 = vsel %vm1275_vm6, %v5985_v56, 0.0 }
 0x300   : > { %1398 = vadd.xlane.f32.xlu1 %v1397_v57  ;;  %v5938_v57 = vld [vmem:[%s6166_s14 + $0x10] sm:$0xff]  }
 0x30e   : > { %1406 = vrot.lane.b32.xlu0 %v6329_v24, %s6981_s7 }
 0x311   : > { %1555 = vrot.lane.b32.xlu1 %v6324_v20, %s6978_s16  ;;  %s7024_s16 = sld [smem:[#allocation10_spill]] }
 0x315   : > { %1553 = vrot.lane.b32.xlu1 %v6324_v20, %s6986_s18 }
 0x381   : > { %v1284_v58 = vpop.xlane.xlu0 %1283 }
 0x382   : > { %5986 = vrcp.f32 %v1284_v58 }
 0x385   : > { %v1407_v61 = vpop.permute.xlu0 %1406 }
 0x386   : > { %v1412_v0 = vand.u32 %v1407_v61, %v6327_v23 }
 0x389   : > { %v1399_v59 = vpop.xlane.xlu1 %1398 }
 0x38a   : > { %5988 = vrcp.f32 %v1399_v59 }
 0x38d   : > { %v1556_v17 = vpop.permute.xlu1 %1555 }
 0x38e   : > { %v1561_v22 = vsel %vm1228_vm4, %v1556_v17, 0 }
 0x38f   : > { %v5987_v60 = vpop.eup %5986 }
 0x390   : > { %v1286_v62 = vmul.f32 %v5987_v60, %v5983_v54 }
 0x391   : > { %v1554_v27 = vpop.permute.xlu1 %1553 }
 0x392   : > { %1287 = vst.msk [vmem:[%s6371_s23] sm:$0x7f] %vm1275_vm6, %v1286_v62  ;;  %v1288_v63 = vpack.c.bf16 %v1286_v62, %v1286_v62 }
 0x394   : > { %5510 = vmatmul.mubr.msk.bf16.vlgmr.msra.gmra.mxu0 %vm1289_vm7, %v1288_v63 }
 0x395   : > { %5520 = vmatpush3.bf16.msra.mxu0 %v1412_v0  ;;  %5521 = vmatprep.mubr.msk.bf16.mxu0 %vm6104_vm1, %v6103_v4 }
 0x396   : > { %5531 = vmatprep.subr.bf16.mxu0 %v6103_v4 }
 0x397   : > { %v5989_v1 = vpop.eup %5988 }
 0x398   : > { %v1401_v3 = vmul.f32 %v5989_v1, %v5985_v56 }
 0x39a   : > { %5167 = vst.msk [vmem:[%s6371_s23 + $0x8] sm:$0x7f] %vm1275_vm6, %v1401_v3  ;;  %v1404_v5 = vpack.c.bf16 %v1401_v3, %v1401_v3 }
 0x39c   : > { %5522 = vmatmul.mubr.msk.bf16.vlgmr.msra.gmra.mxu0 %vm1289_vm7, %v1404_v5 }
 0x39d   : > { %5533 = vmatprep.mubr.msk.bf16.mxu0 %vm6104_vm1, %v6103_v4  ;;  %5532 = vmatpush3.bf16.msra.mxu0 %v5936_v7 }
 0x39e   : > { %5543 = vmatprep.subr.bf16.mxu0 %v6103_v4 }
 0x454   : > { %v1334_v11 = vpop.f32.mrf.mxu0 }
 0x455   : > { %v1340_v13 = vpack.c.bf16 %v1334_v11, %v1334_v11 }
 0x456   : > { %v5511_v14 = vpop.f32.mrf.mxu0 }
 0x457   : > { %5534 = vmatmul.mubr.msk.bf16.vlgmr.msra.gmra.mxu0 %vm1228_vm4, %v1340_v13 }
 0x458   : > { %v1337_v15 = vpop.f32.mrf.mxu0  ;;  %5545 = vmatprep.mubr.msk.bf16.mxu0 %vm6104_vm1, %v6103_v4 }
 0x45a   : > { %v5512_v16 = vpop.f32.mrf.mxu0 }
 0x45c   : > { %v1448_v18 = vpop.f32.mrf.mxu0 }
 0x45d   : > { %v1454_v19 = vpack.c.bf16 %v1448_v18, %v1448_v18 }
 0x45e   : > { %v5523_v21 = vpop.f32.mrf.mxu0 }
 0x45f   : > { %5528 = vmatmul.mubr.msk.bf16.vlgmr.msra.gmra.mxu1 %vm1228_vm4, %v1454_v19  ;;  %v5939_v19 = vld [vmem:[%s6166_s14 + $0x18] sm:$0xff]  }
 0x460   : > { %5538 = vmatpush3.bf16.xpose.msra.mxu1 %v1561_v22  ;;  %v1451_v25 = vpop.f32.mrf.mxu0  ;;  %5539 = vmatprep.mubr.msk.bf16.mxu1 %vm6104_vm1, %v6103_v4 }
 0x461   : > { %5549 = vmatprep.subr.bf16.mxu1 %v6103_v4 }
 0x462   : > { %v5524_v26 = vpop.f32.mrf.mxu0 }
 0x467   : > { %5540 = vmatmul.mubr.msk.bf16.vlgmr.msra.gmra.mxu1 %vm1228_vm4, %v1554_v27 }
 0x468   : > { %5551 = vmatprep.mubr.msk.bf16.mxu1 %vm6104_vm1, %v6103_v4  ;;  %5550 = vmatpush3.bf16.msra.mxu1 %v5938_v57 }
 0x469   : > { %5561 = vmatprep.subr.bf16.mxu1 %v6103_v4 }
 0x517   : > { %v1547_v28 = vpop.f32.mrf.mxu0 }
 0x519   : > { %v5535_v29 = vpop.f32.mrf.mxu0 }
 0x51b   : > { %v1550_v30 = vpop.f32.mrf.mxu0 }
 0x51d   : > { %v5536_v31 = vpop.f32.mrf.mxu0 }
 0x51f   : > { %v1498_v32 = vpop.f32.mrf.mxu1 }
 0x520   : > { %v6400_v33 = vadd.f32 %v1547_v28, %v1498_v32 }
 0x521   : > { %v5529_v34 = vpop.f32.mrf.mxu1 }
 0x523   : > { %v1501_v36 = vpop.f32.mrf.mxu1 }
 0x525   : > { %v5530_v37 = vpop.f32.mrf.mxu1 }
 0x526   : > { %v5183_v37 = vld [vmem:[%s6171_s19] ss:$0 sm:$0xff] }
 0x527   : > { %v1597_v38 = vpop.f32.mrf.mxu1 }
 0x528   : > { %v1598_v39 = vadd.f32 %v1597_v38, %v6355_v35 }
 0x529   : > { %v5541_v40 = vpop.f32.mrf.mxu1 }
 0x52a   : > { %v1603_v41 = vsel %vm1275_vm6, %v1598_v39, -inf }
 0x52b   : > { %1604 = vmax.xlane.f32.xlu0 %v1603_v41  ;;  %v1600_v42 = vpop.f32.mrf.mxu1 }
 0x52d   : > { %v5542_v43 = vpop.f32.mrf.mxu1 }
 0x541   : > { %1617 = vrot.lane.b32.xlu0 %v6329_v24, %s6986_s18 }
 0x545   : > { %1716 = vrot.lane.b32.xlu0 %v6324_v20, %s6984_s26 }
 0x5b4   : > { %v1605_v44 = vpop.xlane.xlu0 %1604 }
 0x5b5   : > { %v1606_v45 = vsub.f32 %v1598_v39, %v1605_v44 }
 0x5b7   : > { %v1607_v46 = vmul.f32 1.442695, %v1606_v45 }
 0x5b8   : > { %v1618_v47 = vpop.permute.xlu0 %1617 }
 0x5b9   : > { %5990 = vpow2.f32 %v1607_v46  ;;  %v1623_v48 = vand.u32 %v1618_v47, %v6327_v23 }
 0x5bb   : > { %5544 = vmatpush3.bf16.msra.mxu0 %v1623_v48 }
 0x5bc   : > { %5555 = vmatprep.subr.bf16.mxu0 %v6103_v4 }
 0x5c6   : > { %v5991_v49 = vpop.eup %5990 }
 0x5c7   : > { %v1609_v50 = vsel %vm1275_vm6, %v5991_v49, 0.0 }
 0x5c8   : > { %1610 = vadd.xlane.f32.xlu1 %v1609_v50  ;;  %v1116_v50 = vld [vmem:[%s1092_s15] sm:$0x7f]  ;;  %s6508_s15 = scalar_lea.vmem %s7023_s0, %s7055_s1  ;;  %s7025_s0 = sld [smem:[#allocation4_spill]] }
 0x5ce   : > { %s6520_s10 = scalar_lea.vmem %s7025_s0, %s6457_s22  ;;  %s7027_s0 = sld [smem:[#allocation12_spill]] }
 0x5d9   : > { %1718 = vrot.lane.b32.xlu1 %v6324_v20, %s6977_s2  ;;  %v1717_v20 = vpop.permute.xlu0 %1716  ;;  %s6461_s2 = scalar_lea.vmem %s7021_s9, %s6457_s22  ;;  %s7031_s9 = smov 80  }
 0x5da   : > { %s7041_s22 = sld [smem:[#allocation19_spill]] }
 0x651   : > { %v1611_v51 = vpop.xlane.xlu1 %1610 }
 0x652   : > { %5992 = vrcp.f32 %v1611_v51  ;;  %v5941_v51 = vld [vmem:[%s6196_s20] sm:$0xff]  }
 0x655   : > { %v1719_v54 = vpop.permute.xlu1 %1718 }
 0x656   : > { %v1724_v56 = vsel %vm1228_vm4, %v1719_v54, 0  ;;  %v5943_v54 = vld [vmem:[%s6186_s6] sm:$0xff]  }
 0x65f   : > { %v5993_v52 = vpop.eup %5992 }
 0x660   : > { %v1613_v53 = vmul.f32 %v5993_v52, %v5991_v49  ;;  %v1114_v52 = vld [vmem:[%s6461_s2] sm:$0xf] }
 0x662   : > { %5174 = vst.msk [vmem:[%s6371_s23 + $0x10] sm:$0x7f] %vm1275_vm6, %v1613_v53  ;;  %v1616_v55 = vpack.c.bf16 %v1613_v53, %v1613_v53  ;;  %v5942_v53 = vld [vmem:[%s6186_s6 + $0x8] sm:$0xff]  }
 0x664   : > { %5546 = vmatmul.mubr.msk.bf16.vlgmr.msra.gmra.mxu0 %vm1289_vm7, %v1616_v55 }
 0x665   : > { %5556 = vmatpush3.bf16.xpose.msra.mxu0 %v1724_v56  ;;  %5557 = vmatprep.mubr.msk.bf16.mxu0 %vm6104_vm1, %v6103_v4 }
 0x666   : > { %5567 = vmatprep.subr.bf16.mxu0 %v6103_v4 }
 0x66c   : > { %5558 = vmatmul.mubr.msk.bf16.vlgmr.msra.gmra.mxu0 %vm1228_vm4, %v1717_v20 }
 0x66d   : > { %5569 = vmatprep.mubr.msk.bf16.mxu0 %vm6104_vm1, %v6103_v4  ;;  %5568 = vmatpush3.bf16.msra.mxu0 %v5939_v19 }
 0x66e   : > { %5581 = vmatprep.subr.bf16.mxu0 %v6103_v4 }
 0x724   : > { %v1659_v58 = vpop.f32.mrf.mxu0 }
 0x725   : > { %v1665_v59 = vpack.c.bf16 %v1659_v58, %v1659_v58  ;;  %v5184_v58 = vld [vmem:[%s6176_s24] ss:$0 sm:$0xff] }
 0x726   : > { %v5547_v60 = vpop.f32.mrf.mxu0 }
 0x727   : > { %5552 = vmatmul.mubr.msk.bf16.vlgmr.msra.gmra.mxu1 %vm1228_vm4, %v1665_v59  ;;  %v5185_v60 = vld [vmem:[%s6181_s30] ss:$0 sm:$0xff] }
 0x728   : > { %v1662_v61 = vpop.f32.mrf.mxu0  ;;  %5563 = vmatprep.mubr.msk.bf16.mxu1 %vm6104_vm1, %v6103_v4 }
 0x72a   : > { %v5548_v62 = vpop.f32.mrf.mxu0 }
 0x72c   : > { %v1760_v63 = vpop.f32.mrf.mxu0 }
 0x72d   : > { %v1761_v0 = vadd.f32 %v1760_v63, %v6355_v35 }
 0x72e   : > { %v5559_v1 = vpop.f32.mrf.mxu0 }
 0x72f   : > { %v1766_v3 = vsel %vm1275_vm6, %v1761_v0, -inf }
 0x730   : > { %1767 = vmax.xlane.f32.xlu1 %v1766_v3  ;;  %v1763_v5 = vpop.f32.mrf.mxu0  ;;  %v5190_v3 = vld [vmem:[%s6201_s27] ss:$0 sm:$0xff] }
 0x732   : > { %v5560_v7 = vpop.f32.mrf.mxu0 }
 0x7b9   : > { %v1768_v8 = vpop.xlane.xlu1 %1767 }
 0x7ba   : > { %v1769_v11 = vsub.f32 %v1761_v0, %v1768_v8 }
 0x7bc   : > { %v1770_v13 = vmul.f32 1.442695, %v1769_v11 }
 0x7be   : > { %5994 = vpow2.f32 %v1770_v13 }
 0x7cb   : > { %v5995_v14 = vpop.eup %5994 }
 0x7cc   : > { %v1772_v15 = vsel %vm1275_vm6, %v5995_v14, 0.0 }
 0x7cd   : > { %1773 = vadd.xlane.f32.xlu0 %v1772_v15 }
 0x7e3   : > { %1780 = vrot.lane.b32.xlu0 %v6329_v24, %s6984_s26 }
 0x7e7   : > { %v1709_v16 = vpop.f32.mrf.mxu1 }
 0x7e8   : > { %v1715_v17 = vadd.f32 %v1709_v16, %v6400_v33  ;;  %v5186_v16 = vld [vmem:[%s6191_s12] ss:$0 sm:$0xff] }
 0x7e9   : > { %v5553_v18 = vpop.f32.mrf.mxu1 }
 0x7eb   : > { %v1712_v21 = vpop.f32.mrf.mxu1 }
 0x7ed   : > { %v5554_v22 = vpop.f32.mrf.mxu1 }
 0x856   : > { %v1774_v25 = vpop.xlane.xlu0 %1773 }
 0x857   : > { %5996 = vrcp.f32 %v1774_v25 }
 0x85a   : > { %v1781_v26 = vpop.permute.xlu0 %1780 }
 0x85b   : > { %v1786_v27 = vand.u32 %v1781_v26, %v6327_v23 }
 0x85d   : > { %5562 = vmatpush3.bf16.msra.mxu1 %v1786_v27 }
 0x85e   : > { %5573 = vmatprep.subr.bf16.mxu1 %v6103_v4 }
 0x864   : > { %v5997_v24 = vpop.eup %5996 }
 0x865   : > { %v1776_v28 = vmul.f32 %v5997_v24, %v5995_v14 }
 0x867   : > { %5179 = vst.msk [vmem:[%s6371_s23 + $0x18] sm:$0x7f] %vm1275_vm6, %v1776_v28  ;;  %v1779_v29 = vpack.c.bf16 %v1776_v28, %v1776_v28  ;;  %v5198_v28 = vld [vmem:[%s6508_s15] ss:$0 sm:$0xff] }
 0x869   : > { %5564 = vmatmul.mubr.msk.bf16.vlgmr.msra.gmra.mxu1 %vm1289_vm7, %v1779_v29 }
 0x86a   : > { %5577 = vmatprep.mubr.msk.bf16.mxu1 %vm6104_vm1, %v6103_v4  ;;  %5574 = vmatpush3.bf16.msra.mxu1 %v5942_v53 }
 0x86b   : > { %5575 = vmatprep.subr.bf16.mxu1 %v6103_v4 }
 0x86e   : > { %5576 = vmatpush3.bf16.msra.mxu1 %v5943_v54 }
 0x86f   : > { %5589 = vmatprep.subr.bf16.mxu1 %v6103_v4 }
 0x929   : > { %v1822_v30 = vpop.f32.mrf.mxu1 }
 0x92a   : > { %v1828_v31 = vpack.c.bf16 %v1822_v30, %v1822_v30 }
 0x92b   : > { %v5565_v32 = vpop.f32.mrf.mxu1 }
 0x92c   : > { %5570 = vmatmul.mubr.msk.bf16.vlgmr.msra.gmra.mxu0 %vm1228_vm4, %v1828_v31 }
 0x92d   : > { %v1825_v33 = vpop.f32.mrf.mxu1  ;;  %5585 = vmatprep.mubr.msk.bf16.mxu0 %vm6104_vm1, %v6103_v4 }
 0x92f   : > { %v5566_v34 = vpop.f32.mrf.mxu1 }
 0x9ec   : > { %v1872_v36 = vpop.f32.mrf.mxu0 }
 0x9ed   : > { %v1878_v38 = vadd.f32 %v1872_v36, %v1715_v17 }
 0x9ee   : > { %v5571_v39 = vpop.f32.mrf.mxu0 }
 0x9ef   : > { %v1886_v40 = vadd.f32 %v5183_v37, %v1878_v38 }
 0x9f0   : > { %v1875_v41 = vpop.f32.mrf.mxu0 }
 0x9f1   : > { %v1887_v42 = vadd.f32 %v1886_v40, %v6305_v6  ;;  %v5940_v6 = vld [vmem:[%s6196_s20 + $0x8] sm:$0xff]  }
 0x9f2   : > { %v5572_v43 = vpop.f32.mrf.mxu0  ;;  %5582 = vmatpush3.bf16.msra.mxu0 %v5940_v6 }
 0x9f3   : > { %v1891_v44 = vsel %vm1890_vm8, %v1887_v42, 0.0  ;;  %5583 = vmatprep.subr.bf16.mxu0 %v6103_v4 }
 0x9f4   : > { %1892 = vadd.xlane.f32.xlu1 %v1891_v44 }
 0x9f6   : > { %5584 = vmatpush3.bf16.msra.mxu0 %v5941_v51 }
 0x9f7   : > { %5597 = vmatprep.subr.bf16.mxu0 %v6103_v4 }
 0x9f9   : > { %5586 = vmatmul.mubr.msk.bf16.vlgmr.msra.gmra.mxu0 %vm1170_vm0, %v1114_v52 }
 0x9fa   : > { %5599 = vmatprep.mubr.msk.bf16.mxu0 %vm6104_vm1, %v6103_v4 }
 0xa7d   : > { %v1893_v45 = vpop.xlane.xlu1 %1892 }
 0xa7e   : > { %v1895_v46 = vmul.f32 0.03125, %v1893_v45 }
 0xa80   : > { %v1896_v47 = vsub.f32 %v1887_v42, %v1895_v46 }
 0xa82   : > { %v1897_v48 = vmul.f32 %v1896_v47, %v1896_v47 }
 0xa84   : > { %v1898_v49 = vsel %vm1890_vm8, %v1897_v48, 0.0  ;;  %v5945_v48 = vld [vmem:[%s7024_s16] sm:$0xff]  }
 0xa85   : > { %1899 = vadd.xlane.f32.xlu1 %v1898_v49  ;;  %v1115_v49 = vld [vmem:[%s6520_s10] sm:$0xf] }
 0xa96   : > { %1921 = vperm.xlu1 %5928, %v1116_v50  }
 0xab9   : > { %v2053_v5 = vpop.f32.mrf.mxu0 }
 0xaba   : > { %v2054_v7 = vadd.f32 %v5190_v3, %v2053_v5 }
 0xabb   : > { %v5587_v8 = vpop.f32.mrf.mxu0 }
 0xabc   : > { %v6485_v11 = vpack.c.bf16 %v2054_v7, %v2054_v7 }
 0xabd   : > { %v2056_v13 = vpop.f32.mrf.mxu0 }
 0xabe   : > { %2255 = vrot.lane.b32.xlu0 %v6485_v11, %s6981_s7  ;;  %v2145_v14 = vsel %vm1228_vm4, %v6485_v11, 0  ;;  %v5946_v13 = vld [vmem:[%s7027_s0] sm:$0xff]  }
 0xabf   : > { %v5588_v15 = vpop.f32.mrf.mxu0  ;;  %5598 = vmatpush3.bf16.xpose.msra.mxu0 %v2145_v14 }
 0xac0   : > { %5609 = vmatprep.subr.bf16.mxu0 %v6103_v4 }
 0xb0e   : > { %v1900_v55 = vpop.xlane.xlu1 %1899 }
 0xb0f   : > { %v1901_v56 = vmul.f32 0.03125, %v1900_v55 }
 0xb11   : > { %v1902_v20 = vadd.f32 1e-05, %v1901_v56 }
 0xb12   : > { %v6474_v62 = vpop.permute.xlu1 %1921 }
 0xb13   : > { %5998 = vrsqrt.f32 %v1902_v20 }
 0xb20   : > { %v5999_v57 = vpop.eup %5998 }
 0xb21   : > { %v1904_v59 = vmul.f32 %v5999_v57, %v1896_v47  ;;  %v5944_v47 = vld [vmem:[%s7024_s16 + $0x8] sm:$0xff]  }
 0xb23   : > { %v1911_v61 = vmul.f32 %v5184_v58, %v1904_v59 }
 0xb25   : > { %v1918_v63 = vadd.f32 %v5185_v60, %v1911_v61 }
 0xb27   : > { %v6477_v0 = vmul.f32 %v6474_v62, %v1918_v63 }
 0xb29   : > { %v1925_v1 = vpack.c.bf16 %v6477_v0, %v6477_v0 }
 0xb2b   : > { %5578 = vmatmul.mubr.msk.bf16.vlgmr.msra.gmra.mxu1 %vm1170_vm0, %v1925_v1  ;;  %v5947_v1 = vld [vmem:[%s7027_s0 + $0x8] sm:$0xff]  }
 0xb2c   : > { %5593 = vmatprep.mubr.msk.bf16.mxu1 %vm6104_vm1, %v6103_v4  ;;  %5590 = vmatpush3.bf16.msra.mxu1 %v5944_v47 }
 0xb2d   : > { %5591 = vmatprep.subr.bf16.mxu1 %v6103_v4 }
 0xb30   : > { %v2256_v18 = vpop.permute.xlu0 %2255  ;;  %5592 = vmatpush3.bf16.msra.mxu1 %v5945_v48 }
 0xb31   : > { %v2261_v25 = vsel %vm1228_vm4, %v2256_v18, 0  ;;  %5603 = vmatprep.subr.bf16.mxu1 %v6103_v4 }
 0xb33   : > { %5594 = vmatmul.mubr.msk.bf16.vlgmr.msra.gmra.mxu1 %vm1170_vm0, %v1115_v49 }
 0xb34   : > { %5605 = vmatprep.mubr.msk.bf16.mxu1 %vm6104_vm1, %v6103_v4 }
 0xbeb   : > { %v1986_v17 = vpop.f32.mrf.mxu1 }
 0xbec   : > { %v1987_v19 = vadd.f32 %v5186_v16, %v1986_v17 }
 0xbed   : > { %v5579_v21 = vpop.f32.mrf.mxu1 }
 0xbee   : > { %v6493_v22 = vpack.c.bf16 %v1987_v19, %v1987_v19 }
 0xbef   : > { %v1989_v26 = vpop.f32.mrf.mxu1 }
 0xbf0   : > { %2253 = vrot.lane.b32.xlu0 %v6493_v22, %s6981_s7  ;;  %5600 = vmatmul.mubr.msk.bf16.vlgmr.msra.gmra.mxu0 %vm1228_vm4, %v6493_v22  ;;  %s6539_s7 = scalar_lea.vmem %s7026_s13, %s6983_s11  ;;  %s7028_s11 = sld [smem:[#allocation11_spill]] }
 0xbf1   : > { %v5580_v27 = vpop.f32.mrf.mxu1  ;;  %5610 = vmatpush3.bf16.xpose.msra.mxu0 %v2261_v25  ;;  %5611 = vmatprep.mubr.msk.bf16.mxu0 %vm6104_vm1, %v6103_v4  ;;  %s7034_s13 = sshll.u32 %s7055_s1, 5 }
 0xbf2   : > { %5621 = vmatprep.subr.bf16.mxu0 %v6103_v4  ;;  %s6594_s17 = scalar_lea.vmem %s7032_s21, %s7034_s13  ;;  %s7035_s13 = sld [smem:[#allocation13_spill]] }
 0xbf3   : > { %v2120_v59 = vpop.f32.mrf.mxu1  ;;  %s7037_s21 = sld [smem:[#allocation18_spill]] }
 0xbf5   : > { %v5595_v60 = vpop.f32.mrf.mxu1 }
 0xbf6   : > { %v5194_v21 = vld [vmem:[%s7028_s11] ss:$0 sm:$0xff]  ;;  %v5948_v60 = vld [vmem:[%s7027_s0 + $0x10] sm:$0xff]  }
 0xbf7   : > { %v2123_v61 = vpop.f32.mrf.mxu1  ;;  %v2121_v25 = vadd.f32 %v5194_v21, %v2120_v59 }
 0xbf9   : > { %v5596_v63 = vpop.f32.mrf.mxu1  ;;  %v6561_v26 = vpack.c.bf16 %v2121_v25, %v2121_v25 }
 0xc62   : > { %v2254_v24 = vpop.permute.xlu0 %2253 }
 0xc63   : > { %5612 = vmatmul.mubr.msk.bf16.vlgmr.msra.gmra.mxu0 %vm1228_vm4, %v2254_v24 }
 0xc64   : > { %5623 = vmatprep.mubr.msk.bf16.mxu0 %vm6104_vm1, %v6103_v4  ;;  %5622 = vmatpush3.bf16.msra.mxu0 %v5947_v1 }
 0xc65   : > { %5633 = vmatprep.subr.bf16.mxu0 %v6103_v4 }
 0xcb0   : > { %v2181_v29 = vpop.f32.mrf.mxu0 }
 0xcb1   : > { %v2182_v30 = vadd.f32 %v5198_v28, %v2181_v29  ;;  %v2476_v29 = vsel %vm1228_vm4, %v6561_v26, 0 }
 0xcb2   : > { %v5601_v31 = vpop.f32.mrf.mxu0 }
 0xcb3   : > { %v2188_v32 = vsel %vm2187_vm9, %v2182_v30, -inf }
 0xcb4   : > { %2189 = vmax.xlane.f32.xlu1 %v2188_v32  ;;  %v2184_v33 = vpop.f32.mrf.mxu0 }
 0xcb6   : > { %v5602_v34 = vpop.f32.mrf.mxu0 }
 0xd23   : > { %v2297_v36 = vpop.f32.mrf.mxu0 }
 0xd24   : > { %v2298_v37 = vadd.f32 %v5198_v28, %v2297_v36 }
 0xd25   : > { %v5613_v38 = vpop.f32.mrf.mxu0 }
 0xd26   : > { %v2303_v39 = vsel %vm2187_vm9, %v2298_v37, -inf }
 0xd27   : > { %2304 = vmax.xlane.f32.xlu0 %v2303_v39  ;;  %v2300_v40 = vpop.f32.mrf.mxu0 }
 0xd29   : > { %v5614_v41 = vpop.f32.mrf.mxu0 }
 0xd3d   : > { %v2190_v42 = vpop.xlane.xlu1 %2189 }
 0xd3e   : > { %v2191_v43 = vsub.f32 %v2182_v30, %v2190_v42 }
 0xd40   : > { %v2192_v44 = vmul.f32 1.442695, %v2191_v43 }
 0xd42   : > { %6000 = vpow2.f32 %v2192_v44 }
 0xd4f   : > { %v6001_v45 = vpop.eup %6000 }
 0xd50   : > { %v2194_v46 = vsel %vm2187_vm9, %v6001_v45, 0.0 }
 0xd51   : > { %2195 = vadd.xlane.f32.xlu0 %v2194_v46 }
 0xd67   : > { %2202 = vrot.lane.b32.xlu0 %v6485_v11, %s6986_s18 }
 0xdb0   : > { %v2305_v50 = vpop.xlane.xlu0 %2304 }
 0xdb1   : > { %v2306_v6 = vsub.f32 %v2298_v37, %v2305_v50 }
 0xdb3   : > { %v2307_v51 = vmul.f32 1.442695, %v2306_v6 }
 0xdb5   : > { %6002 = vpow2.f32 %v2307_v51 }
 0xdc2   : > { %v6003_v52 = vpop.eup %6002 }
 0xdc3   : > { %v2309_v53 = vsel %vm2187_vm9, %v6003_v52, 0.0 }
 0xdc4   : > { %2310 = vadd.xlane.f32.xlu1 %v2309_v53 }
 0xdd5   : > { %2317 = vrot.lane.b32.xlu1 %v6485_v11, %s6984_s26  ;;  %s7029_s26 = sld [smem:[#allocation7_spill]] }
 0xdd9   : > { %2470 = vrot.lane.b32.xlu1 %v6493_v22, %s6986_s18 }
 0xdda   : > { %v2196_v54 = vpop.xlane.xlu0 %2195 }
 0xddb   : > { %6004 = vrcp.f32 %v2196_v54  ;;  %s6578_s18 = scalar_lea.vmem %s7029_s26, %s7055_s1  ;;  %s7033_s26 = smov 112  }
 0xddc   : > { %v5208_v42 = vld [vmem:[%s6578_s18] ss:$0 sm:$0xff]  ;;  %s7036_s1 = sld [smem:[#allocation16_spill]] }
 0xdde   : > { %v2203_v55 = vpop.permute.xlu0 %2202 }
 0xddf   : > { %v2209_v56 = vsel %vm1294_vm3, %v2203_v55, 0 }
 0xde0   : > { %5604 = vmatpush3.bf16.msra.mxu1 %v2209_v56 }
 0xde1   : > { %5615 = vmatprep.subr.bf16.mxu1 %v6103_v4 }
 0xde8   : > { %v6005_v20 = vpop.eup %6004 }
 0xde9   : > { %v2198_v57 = vmul.f32 %v6005_v20, %v6001_v45 }
 0xdeb   : > { %2199 = vst.msk [vmem:[%s6539_s7] sm:$0x7f] %vm2187_vm9, %v2198_v57  ;;  %v2200_v58 = vpack.c.bf16 %v2198_v57, %v2198_v57 }
 0xded   : > { %5606 = vmatmul.mubr.msk.bf16.vlgmr.msra.gmra.mxu1 %vm2204_vm10, %v2200_v58 }
 0xdee   : > { %5617 = vmatprep.mubr.msk.bf16.mxu1 %vm6104_vm1, %v6103_v4 }
 0xe4d   : > { %v2311_v3 = vpop.xlane.xlu1 %2310 }
 0xe4e   : > { %6006 = vrcp.f32 %v2311_v3 }
 0xe51   : > { %v2318_v5 = vpop.permute.xlu1 %2317 }
 0xe52   : > { %v2323_v7 = vsel %vm1294_vm3, %v2318_v5, 0 }
 0xe53   : > { %5616 = vmatpush3.bf16.msra.mxu1 %v2323_v7 }
 0xe54   : > { %5627 = vmatprep.subr.bf16.mxu1 %v6103_v4 }
 0xe55   : > { %v2471_v32 = vpop.permute.xlu1 %2470 }
 0xe5b   : > { %v6007_v8 = vpop.eup %6006 }
 0xe5c   : > { %v2313_v11 = vmul.f32 %v6007_v8, %v6003_v52 }
 0xe5e   : > { %5202 = vst.msk [vmem:[%s6539_s7 + $0x8] sm:$0x7f] %vm2187_vm9, %v2313_v11  ;;  %v2316_v14 = vpack.c.bf16 %v2313_v11, %v2313_v11 }
 0xe60   : > { %5618 = vmatmul.mubr.msk.bf16.vlgmr.msra.gmra.mxu1 %vm2204_vm10, %v2316_v14 }
 0xe61   : > { %5628 = vmatpush3.bf16.msra.mxu1 %v5946_v13  ;;  %5629 = vmatprep.mubr.msk.bf16.mxu1 %vm6104_vm1, %v6103_v4 }
 0xe62   : > { %5639 = vmatprep.subr.bf16.mxu1 %v6103_v4 }
 0xead   : > { %v2245_v15 = vpop.f32.mrf.mxu1 }
 0xeae   : > { %v2251_v16 = vpack.c.bf16 %v2245_v15, %v2245_v15 }
 0xeaf   : > { %v5607_v17 = vpop.f32.mrf.mxu1 }
 0xeb0   : > { %5630 = vmatmul.mubr.msk.bf16.vlgmr.msra.gmra.mxu1 %vm1228_vm4, %v2251_v16 }
 0xeb1   : > { %v2248_v18 = vpop.f32.mrf.mxu1  ;;  %5641 = vmatprep.mubr.msk.bf16.mxu1 %vm6104_vm1, %v6103_v4 }
 0xeb3   : > { %v5608_v19 = vpop.f32.mrf.mxu1 }
 0xf20   : > { %v2359_v27 = vpop.f32.mrf.mxu1 }
 0xf21   : > { %v2365_v24 = vpack.c.bf16 %v2359_v27, %v2359_v27 }
 0xf22   : > { %v5619_v28 = vpop.f32.mrf.mxu1 }
 0xf23   : > { %5624 = vmatmul.mubr.msk.bf16.vlgmr.msra.gmra.mxu0 %vm1228_vm4, %v2365_v24 }
 0xf24   : > { %5634 = vmatpush3.bf16.xpose.msra.mxu0 %v2476_v29  ;;  %v2362_v30 = vpop.f32.mrf.mxu1  ;;  %5635 = vmatprep.mubr.msk.bf16.mxu0 %vm6104_vm1, %v6103_v4  ;;  %v5949_v29 = vld [vmem:[%s7027_s0 + $0x18] sm:$0xff]  }
 0xf25   : > { %5645 = vmatprep.subr.bf16.mxu0 %v6103_v4 }
 0xf26   : > { %v5620_v31 = vpop.f32.mrf.mxu1 }
 0xf2b   : > { %5636 = vmatmul.mubr.msk.bf16.vlgmr.msra.gmra.mxu0 %vm1228_vm4, %v2471_v32 }
 0xf2c   : > { %5647 = vmatprep.mubr.msk.bf16.mxu0 %vm6104_vm1, %v6103_v4  ;;  %5646 = vmatpush3.bf16.msra.mxu0 %v5948_v60 }
 0xf2d   : > { %5657 = vmatprep.subr.bf16.mxu0 %v6103_v4 }
 0xf70   : > { %v6572_v33 = vpop.f32.mrf.mxu1 }
 0xf72   : > { %v5631_v34 = vpop.f32.mrf.mxu1 }
 0xf74   : > { %v2461_v36 = vpop.f32.mrf.mxu1 }
 0xf76   : > { %v5632_v37 = vpop.f32.mrf.mxu1 }
 0xfe3   : > { %v6574_v38 = vpop.f32.mrf.mxu0 }
 0xfe4   : > { %v2459_v25 = vadd.f32 %v6572_v33, %v6574_v38 }
 0xfe5   : > { %v5625_v39 = vpop.f32.mrf.mxu0 }
 0xfe7   : > { %v2412_v40 = vpop.f32.mrf.mxu0 }
 0xfe9   : > { %v5626_v41 = vpop.f32.mrf.mxu0 }
 0xfeb   : > { %v2512_v43 = vpop.f32.mrf.mxu0 }
 0xfec   : > { %v2513_v44 = vadd.f32 %v5208_v42, %v2512_v43 }
 0xfed   : > { %v5637_v45 = vpop.f32.mrf.mxu0 }
 0xfee   : > { %v2518_v46 = vsel %vm2187_vm9, %v2513_v44, -inf }
 0xfef   : > { %2519 = vmax.xlane.f32.xlu0 %v2518_v46  ;;  %v2515_v47 = vpop.f32.mrf.mxu0 }
 0xff1   : > { %v5638_v48 = vpop.f32.mrf.mxu0 }
0x1005   : > { %2532 = vrot.lane.b32.xlu0 %v6561_v26, %s7030_s5 }
0x1009   : > { %2631 = vrot.lane.b32.xlu0 %v6493_v22, %s7031_s9 }
0x1078   : > { %v2520_v49 = vpop.xlane.xlu0 %2519 }
0x1079   : > { %v2521_v50 = vsub.f32 %v2513_v44, %v2520_v49  ;;  %v5218_v44 = vld [vmem:[%s7035_s13] ss:$0 sm:$0xff] }
0x107b   : > { %v2522_v6 = vmul.f32 1.442695, %v2521_v50 }
0x107c   : > { %v2533_v51 = vpop.permute.xlu0 %2532 }
0x107d   : > { %6008 = vpow2.f32 %v2522_v6  ;;  %v2538_v52 = vsel %vm1294_vm3, %v2533_v51, 0 }
0x107e   : > { %5640 = vmatpush3.bf16.msra.mxu1 %v2538_v52 }
0x107f   : > { %5651 = vmatprep.subr.bf16.mxu1 %v6103_v4 }
0x1080   : > { %v2632_v59 = vpop.permute.xlu0 %2631 }
0x108a   : > { %v6009_v53 = vpop.eup %6008 }
0x108b   : > { %v2524_v54 = vsel %vm2187_vm9, %v6009_v53, 0.0 }
0x108c   : > { %2525 = vadd.xlane.f32.xlu1 %v2524_v54 }
0x109d   : > { %2633 = vrot.lane.b32.xlu1 %v6561_v26, %s7033_s26 }
0x1115   : > { %v2526_v22 = vpop.xlane.xlu1 %2525 }
0x1116   : > { %6010 = vrcp.f32 %v2526_v22 }
0x1119   : > { %v2634_v20 = vpop.permute.xlu1 %2633 }
0x111a   : > { %v2639_v58 = vsel %vm1228_vm4, %v2634_v20, 0  ;;  %v5953_v20 = vld [vmem:[%s7037_s21 + $0x10] sm:$0xff]  }
0x1123   : > { %v6011_v55 = vpop.eup %6010 }
0x1124   : > { %v2528_v56 = vmul.f32 %v6011_v55, %v6009_v53  ;;  %v5950_v55 = vld [vmem:[%s7036_s1 + $0x8] sm:$0xff]  }
0x1126   : > { %2529 = vst.msk [vmem:[%s6594_s17] sm:$0x7f] %vm2187_vm9, %v2528_v56  ;;  %v2530_v57 = vpack.c.bf16 %v2528_v56, %v2528_v56  ;;  %v5951_v56 = vld [vmem:[%s7036_s1] sm:$0xff]  }
0x1128   : > { %5642 = vmatmul.mubr.msk.bf16.vlgmr.msra.gmra.mxu1 %vm2204_vm10, %v2530_v57 }
0x1129   : > { %5652 = vmatpush3.bf16.xpose.msra.mxu1 %v2639_v58  ;;  %5653 = vmatprep.mubr.msk.bf16.mxu1 %vm6104_vm1, %v6103_v4 }
0x112a   : > { %5663 = vmatprep.subr.bf16.mxu1 %v6103_v4 }
0x1130   : > { %5654 = vmatmul.mubr.msk.bf16.vlgmr.msra.gmra.mxu1 %vm1228_vm4, %v2632_v59 }
0x1131   : > { %5665 = vmatprep.mubr.msk.bf16.mxu1 %vm6104_vm1, %v6103_v4  ;;  %5664 = vmatpush3.bf16.msra.mxu1 %v5949_v29 }
0x1132   : > { %5677 = vmatprep.subr.bf16.mxu1 %v6103_v4 }
0x11e8   : > { %v2574_v61 = vpop.f32.mrf.mxu1 }
0x11e9   : > { %v2580_v63 = vpack.c.bf16 %v2574_v61, %v2574_v61  ;;  %v5219_v61 = vld [vmem:[%s7038_s25] ss:$0 sm:$0xff] }
0x11ea   : > { %v5643_v1 = vpop.f32.mrf.mxu1 }
0x11eb   : > { %5648 = vmatmul.mubr.msk.bf16.vlgmr.msra.gmra.mxu0 %vm1228_vm4, %v2580_v63  ;;  %v5220_v1 = vld [vmem:[%s7039_s29] ss:$0 sm:$0xff] }
0x11ec   : > { %v2577_v3 = vpop.f32.mrf.mxu1  ;;  %5659 = vmatprep.mubr.msk.bf16.mxu0 %vm6104_vm1, %v6103_v4 }
0x11ee   : > { %v5644_v5 = vpop.f32.mrf.mxu1 }
0x11f0   : > { %v2675_v7 = vpop.f32.mrf.mxu1 }
0x11f1   : > { %v2676_v8 = vadd.f32 %v5208_v42, %v2675_v7 }
0x11f2   : > { %v5655_v11 = vpop.f32.mrf.mxu1 }
0x11f3   : > { %v2681_v13 = vsel %vm2187_vm9, %v2676_v8, -inf  ;;  %v5954_v11 = vld [vmem:[%s7037_s21 + $0x8] sm:$0xff]  }
0x11f4   : > { %2682 = vmax.xlane.f32.xlu1 %v2681_v13  ;;  %v2678_v14 = vpop.f32.mrf.mxu1  ;;  %v5955_v13 = vld [vmem:[%s7037_s21] sm:$0xff]  }
0x11f5   : > { %v5221_v14 = vld [vmem:[%s7040_s28] ss:$0 sm:$0xff]  ;;  %s7042_s28 = sld [smem:[#allocation20_spill]] }
0x11f6   : > { %v5656_v15 = vpop.f32.mrf.mxu1 }
0x11fb   : > { %s7043_s4 = smov %s7042_s28 }
0x127d   : > { %v2683_v16 = vpop.xlane.xlu1 %2682 }
0x127e   : > { %v2684_v17 = vsub.f32 %v2676_v8, %v2683_v16 }
0x1280   : > { %v2685_v18 = vmul.f32 1.442695, %v2684_v17 }
0x1282   : > { %6012 = vpow2.f32 %v2685_v18 }
0x128f   : > { %v6013_v19 = vpop.eup %6012 }
0x1290   : > { %v2687_v21 = vsel %vm2187_vm9, %v6013_v19, 0.0 }
0x1291   : > { %2688 = vadd.xlane.f32.xlu0 %v2687_v21 }
0x12a7   : > { %2695 = vrot.lane.b32.xlu0 %v6561_v26, %s7031_s9 }
0x12ab   : > { %v2624_v27 = vpop.f32.mrf.mxu0 }
0x12ac   : > { %v2630_v24 = vadd.f32 %v2624_v27, %v2459_v25 }
0x12ad   : > { %v5649_v28 = vpop.f32.mrf.mxu0 }
0x12af   : > { %v2627_v30 = vpop.f32.mrf.mxu0 }
0x12b1   : > { %v5650_v31 = vpop.f32.mrf.mxu0 }
0x131a   : > { %v2689_v32 = vpop.xlane.xlu0 %2688 }
0x131b   : > { %6014 = vrcp.f32 %v2689_v32 }
0x131e   : > { %v2696_v34 = vpop.permute.xlu0 %2695 }
0x131f   : > { %v2701_v36 = vsel %vm1294_vm3, %v2696_v34, 0 }
0x1320   : > { %5658 = vmatpush3.bf16.msra.mxu0 %v2701_v36 }
0x1321   : > { %5669 = vmatprep.subr.bf16.mxu0 %v6103_v4 }
0x1328   : > { %v6015_v26 = vpop.eup %6014 }
0x1329   : > { %v2691_v33 = vmul.f32 %v6015_v26, %v6013_v19 }
0x132b   : > { %5214 = vst.msk [vmem:[%s6594_s17 + $0x8] sm:$0x7f] %vm2187_vm9, %v2691_v33  ;;  %v2694_v37 = vpack.c.bf16 %v2691_v33, %v2691_v33 }
0x132d   : > { %5660 = vmatmul.mubr.msk.bf16.vlgmr.msra.gmra.mxu0 %vm2204_vm10, %v2694_v37 }
0x132e   : > { %5673 = vmatprep.mubr.msk.bf16.mxu0 %vm6104_vm1, %v6103_v4  ;;  %5670 = vmatpush3.bf16.msra.mxu0 %v5950_v55 }
0x132f   : > { %5671 = vmatprep.subr.bf16.mxu0 %v6103_v4 }
0x1332   : > { %5672 = vmatpush3.bf16.msra.mxu0 %v5951_v56 }
0x13ed   : > { %v2737_v38 = vpop.f32.mrf.mxu0 }
0x13ee   : > { %v2743_v39 = vpack.c.bf16 %v2737_v38, %v2737_v38  ;;  %v5958_v38 = vld [vmem:[%s7015_s3 + $0x34] ss:$8 sps:$4 sm:$0xff]  }
0x13ef   : > { %v5661_v40 = vpop.f32.mrf.mxu0  ;;  %3070 = vmatprep.subr.bf16.mxu0 %v5958_v38 }
0x13f0   : > { %5666 = vmatmul.mubr.msk.bf16.vlgmr.msra.gmra.mxu1 %vm1228_vm4, %v2743_v39  ;;  %v5956_v39 = vld [vmem:[%s7015_s3 + $0x30] ss:$8 sps:$4 sm:$0xff]   ;;  %v5961_v40 = vld [vmem:[%s7015_s3 + $0x24] ss:$8 sps:$4 sm:$0xff]  }
0x13f1   : > { %v2740_v41 = vpop.f32.mrf.mxu0  ;;  %5685 = vmatprep.mubr.msk.bf16.mxu1 %vm6104_vm1, %v6103_v4 }
0x13f2   : > { %v5959_v41 = vld [vmem:[%s7015_s3 + $0x20] ss:$8 sps:$4 sm:$0xff]   ;;  %s7046_s3 = smov 64  }
0x13f3   : > { %v5662_v42 = vpop.f32.mrf.mxu0 }
0x14b0   : > { %v2787_v43 = vpop.f32.mrf.mxu1 }
0x14b1   : > { %v2793_v45 = vadd.f32 %v2787_v43, %v2630_v24 }
0x14b2   : > { %v5667_v46 = vpop.f32.mrf.mxu1 }
0x14b3   : > { %v2801_v47 = vadd.f32 %v5218_v44, %v2793_v45  ;;  %v5231_v46 = vld [vmem:[%s7042_s28] ss:$0 sm:$0xff]  ;;  %s7045_s28 = smov 48  }
0x14b4   : > { %v2790_v48 = vpop.f32.mrf.mxu1 }
0x14b5   : > { %v2802_v49 = vadd.f32 %v2801_v47, %v6477_v0  ;;  %v5952_v0 = vld [vmem:[%s7037_s21 + $0x18] sm:$0xff]  }
0x14b6   : > { %v5668_v50 = vpop.f32.mrf.mxu1  ;;  %5678 = vmatpush3.bf16.msra.mxu1 %v5952_v0 }
0x14b7   : > { %v2805_v6 = vsel %vm1890_vm8, %v2802_v49, 0.0  ;;  %5679 = vmatprep.subr.bf16.mxu1 %v6103_v4 }
0x14b8   : > { %2806 = vadd.xlane.f32.xlu1 %v2805_v6 }
0x14ba   : > { %5680 = vmatpush3.bf16.msra.mxu1 %v5953_v20 }
0x14bb   : > { %5681 = vmatprep.subr.bf16.mxu1 %v6103_v4 }
0x14be   : > { %5682 = vmatpush3.bf16.msra.mxu1 %v5954_v11 }
0x14bf   : > { %5683 = vmatprep.subr.bf16.mxu1 %v6103_v4 }
0x14c2   : > { %5684 = vmatpush3.bf16.msra.mxu1 %v5955_v13 }
0x14c3   : > { %5695 = vmatprep.subr.bf16.mxu1 %v6103_v4 }
0x1541   : > { %v2807_v51 = vpop.xlane.xlu1 %2806 }
0x1542   : > { %v2808_v52 = vmul.f32 0.03125, %v2807_v51 }
0x1544   : > { %v2809_v53 = vsub.f32 %v2802_v49, %v2808_v52  ;;  %v5237_v52 = vld [vmem:[%s6161_s8 + $0x2] sm:$0x3] }
0x1546   : > { %v2810_v54 = vmul.f32 %v2809_v53, %v2809_v53 }
0x1548   : > { %v2811_v22 = vsel %vm1890_vm8, %v2810_v54, 0.0  ;;  %v3032_v54 = vrot.slane %v5237_v52, %v1146_v12 }
0x1549   : > { %2812 = vadd.xlane.f32.xlu1 %v2811_v22 }
0x15d2   : > { %v2813_v57 = vpop.xlane.xlu1 %2812 }
0x15d3   : > { %v2814_v58 = vmul.f32 0.03125, %v2813_v57 }
0x15d5   : > { %v2815_v59 = vadd.f32 1e-05, %v2814_v58 }
0x15d7   : > { %6016 = vrsqrt.f32 %v2815_v59 }
0x15e4   : > { %v6017_v60 = vpop.eup %6016 }
0x15e5   : > { %v2817_v63 = vmul.f32 %v6017_v60, %v2809_v53  ;;  %v3028_v53 = vrot.slane %v5237_v52, %v1142_v10 }
0x15e7   : > { %v2824_v3 = vmul.f32 %v5219_v61, %v2817_v63 }
0x15e9   : > { %v2831_v5 = vadd.f32 %v5220_v1, %v2824_v3 }
0x15eb   : > { %v2832_v7 = vmul.f32 %v2831_v5, %v6474_v62 }
0x15ed   : > { %v2833_v8 = vpack.c.bf16 %v2832_v7, %v2832_v7 }
0x15ef   : > { %5674 = vmatmul.mubr.msk.bf16.vlgmr.msra.gmra.mxu0 %vm1170_vm0, %v2833_v8 }
0x15f0   : > { %3090 = vmatprep.mubr.bf16.mxu0 %v6102_v2  ;;  %v5225_v2 = vld [vmem:[%s7041_s22] ss:$0 sm:$0xff]  ;;  %s7044_s22 = sld [smem:[#allocation21_spill]]  ;;  %3071 = vmatpush1.bf16.msra.mxu0 %v5956_v39 }
0x15f1   : > { %3072 = vmatprep.subr.bf16.mxu0 %v5961_v40 }
0x15f4   : > { %3073 = vmatpush1.bf16.msra.mxu0 %v5959_v41 }
0x15f5   : > { %5689 = vmatprep.subr.bf16.mxu0 %v6103_v4 }
0x15f6   : > { %v5232_v48 = vld [vmem:[%s7044_s22] ss:$0 sm:$0xff] }
0x16af   : > { %v2894_v15 = vpop.f32.mrf.mxu0 }
0x16b0   : > { %v2895_v16 = vadd.f32 %v5221_v14, %v2894_v15 }
0x16b1   : > { %v5675_v17 = vpop.f32.mrf.mxu0 }
0x16b2   : > { %v2900_v18 = vmax.f32 %v2895_v16, 0.0 }
0x16b3   : > { %v2897_v19 = vpop.f32.mrf.mxu0 }
0x16b4   : > { %v2901_v21 = vpack.c.bf16 %v2900_v18, %v2900_v18 }
0x16b5   : > { %v5676_v25 = vpop.f32.mrf.mxu0 }
0x16b6   : > { %5686 = vmatmul.mubr.msk.bf16.vlgmr.msra.gmra.mxu1 %vm2941_vm11, %v2901_v21 }
0x16b7   : > { %5697 = vmatprep.mubr.msk.bf16.mxu1 %vm6104_vm1, %v6103_v4 }
0x1776   : > { %v2979_v27 = vpop.f32.mrf.mxu1 }
0x1777   : > { %v2980_v24 = vadd.f32 %v5225_v2, %v2979_v27 }
0x1778   : > { %v5687_v28 = vpop.f32.mrf.mxu1 }
0x1779   : > { %v2985_v29 = vadd.f32 %v2980_v24, %v2832_v7 }
0x177a   : > { %v2982_v30 = vpop.f32.mrf.mxu1 }
0x177b   : > { %v2988_v31 = vsel %vm1890_vm8, %v2985_v29, 0.0 }
0x177c   : > { %2989 = vadd.xlane.f32.xlu1 %v2988_v31  ;;  %v5688_v32 = vpop.f32.mrf.mxu1 }
0x1805   : > { %v2990_v34 = vpop.xlane.xlu1 %2989 }
0x1806   : > { %v2991_v36 = vmul.f32 0.03125, %v2990_v34 }
0x1808   : > { %v2992_v26 = vsub.f32 %v2985_v29, %v2991_v36 }
0x180a   : > { %v2993_v33 = vmul.f32 %v2992_v26, %v2992_v26 }
0x180c   : > { %v2994_v37 = vsel %vm1890_vm8, %v2993_v33, 0.0 }
0x180d   : > { %2995 = vadd.xlane.f32.xlu1 %v2994_v37 }
0x1896   : > { %v2996_v42 = vpop.xlane.xlu1 %2995 }
0x1897   : > { %v2997_v43 = vmul.f32 0.03125, %v2996_v42  ;;  %v5962_v42 = vld [vmem:[%s6166_s14 + $0x20] sm:$0xff]  }
0x1899   : > { %v2998_v44 = vadd.f32 1e-05, %v2997_v43  ;;  %v5963_v43 = vld [vmem:[%s6166_s14 + $0x28] sm:$0xff]  }
0x189b   : > { %6018 = vrsqrt.f32 %v2998_v44 }
0x18a8   : > { %v6019_v45 = vpop.eup %6018 }
0x18a9   : > { %v3000_v47 = vmul.f32 %v6019_v45, %v2992_v26 }
0x18ab   : > { %v3007_v49 = vmul.f32 %v5231_v46, %v3000_v47 }
0x18ad   : > { %v3014_v50 = vadd.f32 %v5232_v48, %v3007_v49 }
0x18af   : > { %v6664_v6 = vmul.f32 %v3014_v50, %v6474_v62 }
0x18b1   : > { %v3016_v51 = vpack.c.bf16 %v6664_v6, %v6664_v6 }
0x18b3   : > { %5242 = vmatmul.mubr.msk.bf16.vlgmr.msra.gmra.mxu0 %vm1170_vm0, %v3016_v51 }
0x18b4   : > { %5691 = vmatprep.mubr.msk.bf16.mxu0 %vm6104_vm1, %v6103_v4 }
0x1973   : > { %v3092_v22 = vpop.f32.mrf.mxu0 }
0x1974   : > { %v3093_v55 = vadd.f32 %v3092_v22, %v3028_v53 }
0x1975   : > { %v3094_v56 = vpop.f32.mrf.mxu0 }
0x1976   : > { %v6676_v0 = vpack.c.bf16 %v3093_v55, %v3093_v55  ;;  %v3095_v20 = vadd.f32 %v3094_v56, %v3032_v54 }
0x1977   : > { %v3096_v57 = vpop.f32.mrf.mxu0 }
0x1978   : > { %v6678_v58 = vpack.c.bf16 %v3095_v20, %v3095_v20  ;;  %3222 = vrot.lane.b32.xlu0 %v6676_v0, %s7045_s28  ;;  %3111 = vrot.lane.b32.xlu1 %v6676_v0, %s7046_s3  ;;  %s7047_s3 = smov 32   ;;  %s7048_s28 = smov 16  }
0x1979   : > { %v3097_v59 = vpop.f32.mrf.mxu0 }
0x197a   : > { %v3177_v9 = vand.u32 %v6678_v58, %v6327_v23 }
0x197c   : > { %5696 = vmatpush3.bf16.msra.mxu1 %v3177_v9  ;;  %3220 = vrot.lane.b32.xlu0 %v6676_v0, %s7033_s26 }
0x197d   : > { %5707 = vmatprep.subr.bf16.mxu1 %v6103_v4 }
0x19ea   : > { %v3112_v10 = vpop.permute.xlu1 %3111  ;;  %v3223_v60 = vpop.permute.xlu0 %3222 }
0x19eb   : > { %v3117_v12 = vsel %vm1228_vm4, %v3112_v10, 0  ;;  %v3228_v61 = vsel %vm1228_vm4, %v3223_v60, 0 }
0x19ec   : > { %5690 = vmatpush3.bf16.xpose.msra.mxu0 %v3117_v12 }
0x19ed   : > { %5701 = vmatprep.subr.bf16.mxu0 %v6103_v4 }
0x19ee   : > { %v3221_v63 = vpop.permute.xlu0 %3220 }
0x19f3   : > { %5692 = vmatmul.mubr.msk.bf16.vlgmr.msra.gmra.mxu0 %vm1228_vm4, %v6676_v0 }
0x19f4   : > { %5702 = vmatpush3.bf16.xpose.msra.mxu0 %v3228_v61  ;;  %5703 = vmatprep.mubr.msk.bf16.mxu0 %vm6104_vm1, %v6103_v4 }
0x19f5   : > { %5713 = vmatprep.subr.bf16.mxu0 %v6103_v4 }
0x19fb   : > { %5704 = vmatmul.mubr.msk.bf16.vlgmr.msra.gmra.mxu0 %vm1228_vm4, %v3221_v63 }
0x19fc   : > { %5715 = vmatprep.mubr.msk.bf16.mxu0 %vm6104_vm1, %v6103_v4  ;;  %5714 = vmatpush3.bf16.msra.mxu0 %v5963_v43 }
0x19fd   : > { %5725 = vmatprep.subr.bf16.mxu0 %v6103_v4 }
0x1ab3   : > { %v3153_v1 = vpop.f32.mrf.mxu0 }
0x1ab4   : > { %v3154_v3 = vadd.f32 %v3153_v1, %v6355_v35 }
0x1ab5   : > { %v5693_v5 = vpop.f32.mrf.mxu0 }
0x1ab6   : > { %v3159_v7 = vsel %vm1275_vm6, %v3154_v3, -inf }
0x1ab7   : > { %3160 = vmax.xlane.f32.xlu0 %v3159_v7  ;;  %v3156_v8 = vpop.f32.mrf.mxu0 }
0x1ab9   : > { %v5694_v11 = vpop.f32.mrf.mxu0 }
0x1abb   : > { %v3264_v13 = vpop.f32.mrf.mxu0 }
0x1abc   : > { %v3265_v14 = vadd.f32 %v3264_v13, %v6355_v35 }
0x1abd   : > { %v5705_v15 = vpop.f32.mrf.mxu0 }
0x1abe   : > { %v3270_v16 = vsel %vm1275_vm6, %v3265_v14, -inf }
0x1abf   : > { %3271 = vmax.xlane.f32.xlu1 %v3270_v16  ;;  %v3267_v17 = vpop.f32.mrf.mxu0 }
0x1ac1   : > { %v5706_v18 = vpop.f32.mrf.mxu0 }
0x1ad0   : > { %3434 = vrot.lane.b32.xlu1 %v6676_v0, %s7047_s3 }
0x1ad4   : > { %3432 = vrot.lane.b32.xlu1 %v6676_v0, %s7030_s5 }
0x1b40   : > { %v3161_v19 = vpop.xlane.xlu0 %3160 }
0x1b41   : > { %v3162_v21 = vsub.f32 %v3154_v3, %v3161_v19 }
0x1b43   : > { %v3163_v25 = vmul.f32 1.442695, %v3162_v21 }
0x1b45   : > { %6020 = vpow2.f32 %v3163_v25 }
0x1b48   : > { %v3272_v2 = vpop.xlane.xlu1 %3271 }
0x1b49   : > { %v3273_v27 = vsub.f32 %v3265_v14, %v3272_v2 }
0x1b4b   : > { %v3274_v24 = vmul.f32 1.442695, %v3273_v27 }
0x1b4c   : > { %v3435_v49 = vpop.permute.xlu1 %3434 }
0x1b4d   : > { %6022 = vpow2.f32 %v3274_v24  ;;  %v3440_v53 = vsel %vm1228_vm4, %v3435_v49, 0 }
0x1b50   : > { %v3433_v55 = vpop.permute.xlu1 %3432 }
0x1b52   : > { %v6021_v28 = vpop.eup %6020 }
0x1b53   : > { %v3165_v29 = vsel %vm1275_vm6, %v6021_v28, 0.0 }
0x1b54   : > { %3166 = vadd.xlane.f32.xlu0 %v3165_v29 }
0x1b5a   : > { %v6023_v30 = vpop.eup %6022 }
0x1b5b   : > { %v3276_v31 = vsel %vm1275_vm6, %v6023_v30, 0.0 }
0x1b5c   : > { %3277 = vadd.xlane.f32.xlu0 %v3276_v31 }
0x1b72   : > { %3285 = vrot.lane.b32.xlu0 %v6678_v58, %s7033_s26 }
0x1bdd   : > { %v3167_v32 = vpop.xlane.xlu0 %3166 }
0x1bde   : > { %6024 = vrcp.f32 %v3167_v32 }
0x1be5   : > { %v3278_v34 = vpop.xlane.xlu0 %3277 }
0x1be6   : > { %6026 = vrcp.f32 %v3278_v34 }
0x1be9   : > { %v3286_v26 = vpop.permute.xlu0 %3285 }
0x1bea   : > { %v3291_v38 = vand.u32 %v3286_v26, %v6327_v23 }
0x1beb   : > { %v6025_v36 = vpop.eup %6024 }
0x1bec   : > { %v3169_v33 = vmul.f32 %v6025_v36, %v6021_v28  ;;  %v5964_v28 = vld [vmem:[%s6166_s14 + $0x30] sm:$0xff]  }
0x1bee   : > { %5252 = vst.msk [vmem:[%s6371_s23 + $0x20] sm:$0x7f] %vm1275_vm6, %v3169_v33  ;;  %v3172_v37 = vpack.c.bf16 %v3169_v33, %v3169_v33 }
0x1bf0   : > { %5698 = vmatmul.mubr.msk.bf16.vlgmr.msra.gmra.mxu1 %vm1289_vm7, %v3172_v37 }
0x1bf1   : > { %5708 = vmatpush3.bf16.msra.mxu1 %v3291_v38  ;;  %5709 = vmatprep.mubr.msk.bf16.mxu1 %vm6104_vm1, %v6103_v4 }
0x1bf2   : > { %5719 = vmatprep.subr.bf16.mxu1 %v6103_v4 }
0x1bf3   : > { %v6027_v39 = vpop.eup %6026 }
0x1bf4   : > { %v3280_v40 = vmul.f32 %v6027_v39, %v6023_v30 }
0x1bf6   : > { %5255 = vst.msk [vmem:[%s6371_s23 + $0x28] sm:$0x7f] %vm1275_vm6, %v3280_v40  ;;  %v3283_v41 = vpack.c.bf16 %v3280_v40, %v3280_v40 }
0x1bf8   : > { %5710 = vmatmul.mubr.msk.bf16.vlgmr.msra.gmra.mxu1 %vm1289_vm7, %v3283_v41 }
0x1bf9   : > { %5721 = vmatprep.mubr.msk.bf16.mxu1 %vm6104_vm1, %v6103_v4  ;;  %5720 = vmatpush3.bf16.msra.mxu1 %v5962_v42 }
0x1bfa   : > { %5731 = vmatprep.subr.bf16.mxu1 %v6103_v4 }
0x1cb0   : > { %v3213_v44 = vpop.f32.mrf.mxu1 }
0x1cb1   : > { %v3219_v45 = vpack.c.bf16 %v3213_v44, %v3213_v44 }
0x1cb2   : > { %v5699_v46 = vpop.f32.mrf.mxu1 }
0x1cb3   : > { %5722 = vmatmul.mubr.msk.bf16.vlgmr.msra.gmra.mxu1 %vm1228_vm4, %v3219_v45 }
0x1cb4   : > { %v3216_v47 = vpop.f32.mrf.mxu1  ;;  %5733 = vmatprep.mubr.msk.bf16.mxu1 %vm6104_vm1, %v6103_v4 }
0x1cb5   : > { %v5965_v47 = vld [vmem:[%s6166_s14 + $0x38] sm:$0xff]  }
0x1cb6   : > { %v5700_v48 = vpop.f32.mrf.mxu1 }
0x1cb8   : > { %v3327_v50 = vpop.f32.mrf.mxu1 }
0x1cb9   : > { %v3333_v51 = vpack.c.bf16 %v3327_v50, %v3327_v50 }
0x1cba   : > { %v5711_v52 = vpop.f32.mrf.mxu1 }
0x1cbb   : > { %5716 = vmatmul.mubr.msk.bf16.vlgmr.msra.gmra.mxu0 %vm1228_vm4, %v3333_v51 }
0x1cbc   : > { %5726 = vmatpush3.bf16.xpose.msra.mxu0 %v3440_v53  ;;  %v3330_v54 = vpop.f32.mrf.mxu1  ;;  %5727 = vmatprep.mubr.msk.bf16.mxu0 %vm6104_vm1, %v6103_v4 }
0x1cbd   : > { %5737 = vmatprep.subr.bf16.mxu0 %v6103_v4 }
0x1cbe   : > { %v5712_v22 = vpop.f32.mrf.mxu1 }
0x1cc3   : > { %5728 = vmatmul.mubr.msk.bf16.vlgmr.msra.gmra.mxu0 %vm1228_vm4, %v3433_v55 }
0x1cc4   : > { %5739 = vmatprep.mubr.msk.bf16.mxu0 %vm6104_vm1, %v6103_v4  ;;  %5738 = vmatpush3.bf16.msra.mxu0 %v5964_v28 }
0x1cc5   : > { %5749 = vmatprep.subr.bf16.mxu0 %v6103_v4 }
0x1d73   : > { %v3426_v56 = vpop.f32.mrf.mxu1 }
0x1d75   : > { %v5723_v20 = vpop.f32.mrf.mxu1 }
0x1d77   : > { %v3429_v57 = vpop.f32.mrf.mxu1 }
0x1d79   : > { %v5724_v59 = vpop.f32.mrf.mxu1 }
0x1d7a   : > { %v5272_v59 = vld [vmem:[%s6171_s19 + $0x1] ss:$0 sm:$0xff] }
0x1d7b   : > { %v3377_v9 = vpop.f32.mrf.mxu0 }
0x1d7c   : > { %v6739_v10 = vadd.f32 %v3426_v56, %v3377_v9 }
0x1d7d   : > { %v5717_v12 = vpop.f32.mrf.mxu0 }
0x1d7f   : > { %v3380_v60 = vpop.f32.mrf.mxu0 }
0x1d81   : > { %v5718_v61 = vpop.f32.mrf.mxu0 }
0x1d83   : > { %v3476_v63 = vpop.f32.mrf.mxu0 }
0x1d84   : > { %v3477_v1 = vadd.f32 %v3476_v63, %v6355_v35 }
0x1d85   : > { %v5729_v3 = vpop.f32.mrf.mxu0 }
0x1d86   : > { %v3482_v5 = vsel %vm1275_vm6, %v3477_v1, -inf }
0x1d87   : > { %3483 = vmax.xlane.f32.xlu0 %v3482_v5  ;;  %v3479_v7 = vpop.f32.mrf.mxu0 }
0x1d89   : > { %v5730_v8 = vpop.f32.mrf.mxu0 }
0x1d9d   : > { %3496 = vrot.lane.b32.xlu0 %v6678_v58, %s7030_s5 }
0x1da1   : > { %3595 = vrot.lane.b32.xlu0 %v6676_v0, %s7031_s9 }
0x1e10   : > { %v3484_v11 = vpop.xlane.xlu0 %3483 }
0x1e11   : > { %v3485_v13 = vsub.f32 %v3477_v1, %v3484_v11 }
0x1e13   : > { %v3486_v14 = vmul.f32 1.442695, %v3485_v13  ;;  %v5966_v13 = vld [vmem:[%s6196_s20 + $0x18] sm:$0xff]  }
0x1e14   : > { %v3497_v15 = vpop.permute.xlu0 %3496 }
0x1e15   : > { %6028 = vpow2.f32 %v3486_v14  ;;  %v3502_v16 = vand.u32 %v3497_v15, %v6327_v23  ;;  %v5967_v14 = vld [vmem:[%s6196_s20 + $0x10] sm:$0xff]   ;;  %v5968_v15 = vld [vmem:[%s6186_s6 + $0x18] sm:$0xff]  }
0x1e17   : > { %5732 = vmatpush3.bf16.msra.mxu1 %v3502_v16  ;;  %v5969_v16 = vld [vmem:[%s6186_s6 + $0x10] sm:$0xff]  }
0x1e18   : > { %5743 = vmatprep.subr.bf16.mxu1 %v6103_v4 }
0x1e22   : > { %v6029_v17 = vpop.eup %6028 }
0x1e23   : > { %v3488_v18 = vsel %vm1275_vm6, %v6029_v17, 0.0 }
0x1e24   : > { %3489 = vadd.xlane.f32.xlu1 %v3488_v18 }
0x1e35   : > { %3597 = vrot.lane.b32.xlu1 %v6676_v0, %s7048_s28  ;;  %v3596_v0 = vpop.permute.xlu0 %3595 }
0x1ead   : > { %v3490_v19 = vpop.xlane.xlu1 %3489 }
0x1eae   : > { %6030 = vrcp.f32 %v3490_v19 }
0x1eb1   : > { %v3598_v2 = vpop.permute.xlu1 %3597 }
0x1eb2   : > { %v3603_v24 = vsel %vm1228_vm4, %v3598_v2, 0 }
0x1ebb   : > { %v6031_v21 = vpop.eup %6030 }
0x1ebc   : > { %v3492_v25 = vmul.f32 %v6031_v21, %v6029_v17 }
0x1ebe   : > { %5262 = vst.msk [vmem:[%s6371_s23 + $0x30] sm:$0x7f] %vm1275_vm6, %v3492_v25  ;;  %v3495_v27 = vpack.c.bf16 %v3492_v25, %v3492_v25  ;;  %v5275_v25 = vld [vmem:[%s6176_s24 + $0x1] ss:$0 sm:$0xff] }
0x1ec0   : > { %5734 = vmatmul.mubr.msk.bf16.vlgmr.msra.gmra.mxu1 %vm1289_vm7, %v3495_v27  ;;  %v5276_v27 = vld [vmem:[%s6181_s30 + $0x1] ss:$0 sm:$0xff] }
0x1ec1   : > { %5744 = vmatpush3.bf16.xpose.msra.mxu1 %v3603_v24  ;;  %5745 = vmatprep.mubr.msk.bf16.mxu1 %vm6104_vm1, %v6103_v4 }
0x1ec2   : > { %5755 = vmatprep.subr.bf16.mxu1 %v6103_v4 }
0x1ec8   : > { %5746 = vmatmul.mubr.msk.bf16.vlgmr.msra.gmra.mxu1 %vm1228_vm4, %v3596_v0 }
0x1ec9   : > { %5757 = vmatprep.mubr.msk.bf16.mxu1 %vm6104_vm1, %v6103_v4  ;;  %5756 = vmatpush3.bf16.msra.mxu1 %v5965_v47 }
0x1eca   : > { %5769 = vmatprep.subr.bf16.mxu1 %v6103_v4 }
0x1f80   : > { %v3538_v29 = vpop.f32.mrf.mxu1 }
0x1f81   : > { %v3544_v30 = vpack.c.bf16 %v3538_v29, %v3538_v29 }
0x1f82   : > { %v5735_v31 = vpop.f32.mrf.mxu1 }
0x1f83   : > { %5740 = vmatmul.mubr.msk.bf16.vlgmr.msra.gmra.mxu0 %vm1228_vm4, %v3544_v30  ;;  %v5291_v30 = vld [vmem:[%s6201_s27 + $0x1] ss:$0 sm:$0xff] }
0x1f84   : > { %v3541_v32 = vpop.f32.mrf.mxu1  ;;  %5751 = vmatprep.mubr.msk.bf16.mxu0 %vm6104_vm1, %v6103_v4 }
0x1f86   : > { %v5736_v34 = vpop.f32.mrf.mxu1 }
0x1f88   : > { %v3639_v36 = vpop.f32.mrf.mxu1 }
0x1f89   : > { %v3640_v26 = vadd.f32 %v3639_v36, %v6355_v35 }
0x1f8a   : > { %v5747_v33 = vpop.f32.mrf.mxu1 }
0x1f8b   : > { %v3645_v37 = vsel %vm1275_vm6, %v3640_v26, -inf }
0x1f8c   : > { %3646 = vmax.xlane.f32.xlu1 %v3645_v37  ;;  %v3642_v38 = vpop.f32.mrf.mxu1 }
0x1f8d   : > { %v5282_v38 = vld [vmem:[%s6191_s12 + $0x1] ss:$0 sm:$0xff] }
0x1f8e   : > { %v5748_v39 = vpop.f32.mrf.mxu1 }
0x2015   : > { %v3647_v40 = vpop.xlane.xlu1 %3646 }
0x2016   : > { %v3648_v41 = vsub.f32 %v3640_v26, %v3647_v40 }
0x2018   : > { %v3649_v42 = vmul.f32 1.442695, %v3648_v41 }
0x201a   : > { %6032 = vpow2.f32 %v3649_v42 }
0x2027   : > { %v6033_v43 = vpop.eup %6032 }
0x2028   : > { %v3651_v44 = vsel %vm1275_vm6, %v6033_v43, 0.0 }
0x2029   : > { %3652 = vadd.xlane.f32.xlu0 %v3651_v44 }
0x203f   : > { %3659 = vrot.lane.b32.xlu0 %v6678_v58, %s7031_s9 }
0x2043   : > { %v3588_v45 = vpop.f32.mrf.mxu0 }
0x2044   : > { %v3594_v35 = vadd.f32 %v3588_v45, %v6739_v10 }
0x2045   : > { %v5741_v46 = vpop.f32.mrf.mxu0 }
0x2047   : > { %v3591_v48 = vpop.f32.mrf.mxu0 }
0x2048   : > { %v6059_v48 = vld [vmem:[%s6508_s15] ss:$0 sm:$0xff] }
0x2049   : > { %v5742_v49 = vpop.f32.mrf.mxu0 }
0x20b2   : > { %v3653_v50 = vpop.xlane.xlu0 %3652 }
0x20b3   : > { %6034 = vrcp.f32 %v3653_v50 }
0x20b6   : > { %v3660_v51 = vpop.permute.xlu0 %3659 }
0x20b7   : > { %v3665_v52 = vand.u32 %v3660_v51, %v6327_v23 }
0x20b9   : > { %5750 = vmatpush3.bf16.msra.mxu0 %v3665_v52 }
0x20ba   : > { %5761 = vmatprep.subr.bf16.mxu0 %v6103_v4 }
0x20c0   : > { %v6035_v58 = vpop.eup %6034 }
0x20c1   : > { %v3655_v53 = vmul.f32 %v6035_v58, %v6033_v43 }
0x20c3   : > { %5267 = vst.msk [vmem:[%s6371_s23 + $0x38] sm:$0x7f] %vm1275_vm6, %v3655_v53  ;;  %v3658_v54 = vpack.c.bf16 %v3655_v53, %v3655_v53  ;;  %v5970_v53 = vld [vmem:[%s7024_s16 + $0x18] sm:$0xff]  }
0x20c5   : > { %5752 = vmatmul.mubr.msk.bf16.vlgmr.msra.gmra.mxu0 %vm1289_vm7, %v3658_v54 }
0x20c6   : > { %5765 = vmatprep.mubr.msk.bf16.mxu0 %vm6104_vm1, %v6103_v4  ;;  %5762 = vmatpush3.bf16.msra.mxu0 %v5968_v15 }
0x20c7   : > { %5763 = vmatprep.subr.bf16.mxu0 %v6103_v4 }
0x20ca   : > { %5764 = vmatpush3.bf16.msra.mxu0 %v5969_v16 }
0x20cb   : > { %5777 = vmatprep.subr.bf16.mxu0 %v6103_v4 }
0x2185   : > { %v3701_v22 = vpop.f32.mrf.mxu0 }
0x2186   : > { %v3707_v55 = vpack.c.bf16 %v3701_v22, %v3701_v22 }
0x2187   : > { %v5753_v56 = vpop.f32.mrf.mxu0 }
0x2188   : > { %5758 = vmatmul.mubr.msk.bf16.vlgmr.msra.gmra.mxu1 %vm1228_vm4, %v3707_v55 }
0x2189   : > { %v3704_v23 = vpop.f32.mrf.mxu0  ;;  %5773 = vmatprep.mubr.msk.bf16.mxu1 %vm6104_vm1, %v6103_v4  ;;  %5770 = vmatpush3.bf16.msra.mxu1 %v5966_v13 }
0x218a   : > { %5771 = vmatprep.subr.bf16.mxu1 %v6103_v4 }
0x218b   : > { %v5754_v20 = vpop.f32.mrf.mxu0 }
0x218d   : > { %5772 = vmatpush3.bf16.msra.mxu1 %v5967_v14 }
0x218e   : > { %5785 = vmatprep.subr.bf16.mxu1 %v6103_v4 }
0x2248   : > { %v3751_v57 = vpop.f32.mrf.mxu1 }
0x2249   : > { %v3757_v9 = vadd.f32 %v3751_v57, %v3594_v35  ;;  %v5971_v57 = vld [vmem:[%s7024_s16 + $0x10] sm:$0xff]  }
0x224a   : > { %v5759_v10 = vpop.f32.mrf.mxu1 }
0x224b   : > { %v3766_v12 = vadd.f32 %v5272_v59, %v3757_v9  ;;  %v6060_v59 = vld [vmem:[%s6520_s10] sm:$0xf] }
0x224c   : > { %v3754_v60 = vpop.f32.mrf.mxu1 }
0x224d   : > { %v3767_v61 = vadd.f32 %v3766_v12, %v6664_v6  ;;  %v6058_v6 = vld [vmem:[%s6461_s2] sm:$0xf] }
0x224e   : > { %v5760_v63 = vpop.f32.mrf.mxu1  ;;  %5774 = vmatmul.mubr.msk.bf16.vlgmr.msra.gmra.mxu1 %vm1170_vm0, %v6058_v6 }
0x224f   : > { %v3772_v1 = vsel %vm1890_vm8, %v3767_v61, 0.0  ;;  %5787 = vmatprep.mubr.msk.bf16.mxu1 %vm6104_vm1, %v6103_v4 }
0x2250   : > { %3773 = vadd.xlane.f32.xlu1 %v3772_v1 }
0x22d9   : > { %v3774_v3 = vpop.xlane.xlu1 %3773 }
0x22da   : > { %v3775_v5 = vmul.f32 0.03125, %v3774_v3 }
0x22dc   : > { %v3776_v7 = vsub.f32 %v3767_v61, %v3775_v5 }
0x22de   : > { %v3777_v8 = vmul.f32 %v3776_v7, %v3776_v7 }
0x22e0   : > { %v3778_v11 = vsel %vm1890_vm8, %v3777_v8, 0.0 }
0x22e1   : > { %3779 = vadd.xlane.f32.xlu1 %v3778_v11 }
0x230e   : > { %v3929_v31 = vpop.f32.mrf.mxu1 }
0x230f   : > { %v3930_v32 = vadd.f32 %v5291_v30, %v3929_v31 }
0x2310   : > { %v5775_v34 = vpop.f32.mrf.mxu1 }
0x2311   : > { %v6812_v36 = vpack.c.bf16 %v3930_v32, %v3930_v32 }
0x2312   : > { %v3932_v26 = vpop.f32.mrf.mxu1 }
0x2313   : > { %4124 = vrot.lane.b32.xlu1 %v6812_v36, %s7033_s26  ;;  %v4015_v33 = vsel %vm1228_vm4, %v6812_v36, 0 }
0x2314   : > { %v5776_v37 = vpop.f32.mrf.mxu1  ;;  %5786 = vmatpush3.bf16.xpose.msra.mxu1 %v4015_v33  ;;  %v5300_v33 = vld [vmem:[%s7028_s11 + $0x1] ss:$0 sm:$0xff] }
0x2315   : > { %5797 = vmatprep.subr.bf16.mxu1 %v6103_v4 }
0x236a   : > { %v3780_v17 = vpop.xlane.xlu1 %3779 }
0x236b   : > { %v3781_v18 = vmul.f32 0.03125, %v3780_v17 }
0x236d   : > { %v3782_v19 = vadd.f32 1e-05, %v3781_v18 }
0x236f   : > { %6036 = vrsqrt.f32 %v3782_v19 }
0x237c   : > { %v6037_v21 = vpop.eup %6036 }
0x237d   : > { %v3784_v2 = vmul.f32 %v6037_v21, %v3776_v7  ;;  %v5973_v21 = vld [vmem:[%s7027_s0 + $0x28] sm:$0xff]  }
0x237f   : > { %v3791_v24 = vmul.f32 %v5275_v25, %v3784_v2 }
0x2381   : > { %v3798_v0 = vadd.f32 %v5276_v27, %v3791_v24 }
0x2383   : > { %v6804_v28 = vmul.f32 %v3798_v0, %v6474_v62 }
0x2385   : > { %v3800_v29 = vpack.c.bf16 %v6804_v28, %v6804_v28  ;;  %v4125_v40 = vpop.permute.xlu1 %4124 }
0x2386   : > { %v4130_v44 = vsel %vm1228_vm4, %v4125_v40, 0 }
0x2387   : > { %5766 = vmatmul.mubr.msk.bf16.vlgmr.msra.gmra.mxu0 %vm1170_vm0, %v3800_v29  ;;  %v5972_v29 = vld [vmem:[%s7027_s0 + $0x20] sm:$0xff]  }
0x2388   : > { %5781 = vmatprep.mubr.msk.bf16.mxu0 %vm6104_vm1, %v6103_v4  ;;  %5778 = vmatpush3.bf16.msra.mxu0 %v5970_v53 }
0x2389   : > { %5779 = vmatprep.subr.bf16.mxu0 %v6103_v4 }
0x238c   : > { %5780 = vmatpush3.bf16.msra.mxu0 %v5971_v57 }
0x238d   : > { %5791 = vmatprep.subr.bf16.mxu0 %v6103_v4 }
0x238f   : > { %5782 = vmatmul.mubr.msk.bf16.vlgmr.msra.gmra.mxu0 %vm1170_vm0, %v6060_v59 }
0x2390   : > { %5793 = vmatprep.mubr.msk.bf16.mxu0 %vm6104_vm1, %v6103_v4 }
0x2447   : > { %v3863_v39 = vpop.f32.mrf.mxu0 }
0x2448   : > { %v3864_v41 = vadd.f32 %v5282_v38, %v3863_v39 }
0x2449   : > { %v5767_v42 = vpop.f32.mrf.mxu0 }
0x244a   : > { %v6820_v43 = vpack.c.bf16 %v3864_v41, %v3864_v41 }
0x244b   : > { %v3866_v45 = vpop.f32.mrf.mxu0 }
0x244c   : > { %4122 = vrot.lane.b32.xlu0 %v6820_v43, %s7033_s26  ;;  %5788 = vmatmul.mubr.msk.bf16.vlgmr.msra.gmra.mxu1 %vm1228_vm4, %v6820_v43 }
0x244d   : > { %v5768_v35 = vpop.f32.mrf.mxu0  ;;  %5798 = vmatpush3.bf16.xpose.msra.mxu1 %v4130_v44  ;;  %5799 = vmatprep.mubr.msk.bf16.mxu1 %vm6104_vm1, %v6103_v4 }
0x244e   : > { %5809 = vmatprep.subr.bf16.mxu1 %v6103_v4 }
0x244f   : > { %v3995_v16 = vpop.f32.mrf.mxu0 }
0x2450   : > { %v3996_v37 = vadd.f32 %v5300_v33, %v3995_v16 }
0x2451   : > { %v5783_v17 = vpop.f32.mrf.mxu0 }
0x2452   : > { %v6874_v38 = vpack.c.bf16 %v3996_v37, %v3996_v37  ;;  %v5975_v37 = vld [vmem:[%s7027_s0 + $0x38] sm:$0xff]  }
0x2453   : > { %v3998_v18 = vpop.f32.mrf.mxu0 }
0x2454   : > { %v4339_v42 = vsel %vm1228_vm4, %v6874_v38, 0 }
0x2455   : > { %v5784_v19 = vpop.f32.mrf.mxu0 }
0x24be   : > { %v4123_v46 = vpop.permute.xlu0 %4122 }
0x24bf   : > { %5800 = vmatmul.mubr.msk.bf16.vlgmr.msra.gmra.mxu1 %vm1228_vm4, %v4123_v46 }
0x24c0   : > { %5811 = vmatprep.mubr.msk.bf16.mxu1 %vm6104_vm1, %v6103_v4  ;;  %5810 = vmatpush3.bf16.msra.mxu1 %v5973_v21 }
0x24c1   : > { %5821 = vmatprep.subr.bf16.mxu1 %v6103_v4 }
0x250c   : > { %v4051_v47 = vpop.f32.mrf.mxu1 }
0x250d   : > { %v4052_v49 = vadd.f32 %v6059_v48, %v4051_v47 }
0x250e   : > { %v5789_v50 = vpop.f32.mrf.mxu1 }
0x250f   : > { %v4057_v51 = vsel %vm2187_vm9, %v4052_v49, -inf }
0x2510   : > { %4058 = vmax.xlane.f32.xlu0 %v4057_v51  ;;  %v4054_v52 = vpop.f32.mrf.mxu1 }
0x2512   : > { %v5790_v58 = vpop.f32.mrf.mxu1 }
0x257f   : > { %v4166_v54 = vpop.f32.mrf.mxu1 }
0x2580   : > { %v4167_v22 = vadd.f32 %v6059_v48, %v4166_v54  ;;  %v6061_v54 = vld [vmem:[%s6578_s18] ss:$0 sm:$0xff] }
0x2581   : > { %v5801_v55 = vpop.f32.mrf.mxu1 }
0x2582   : > { %v4172_v56 = vsel %vm2187_vm9, %v4167_v22, -inf }
0x2583   : > { %4173 = vmax.xlane.f32.xlu1 %v4172_v56  ;;  %v4169_v23 = vpop.f32.mrf.mxu1 }
0x2585   : > { %v5802_v20 = vpop.f32.mrf.mxu1 }
0x2594   : > { %4072 = vrot.lane.b32.xlu1 %v6812_v36, %s7030_s5 }
0x2598   : > { %4333 = vrot.lane.b32.xlu1 %v6820_v43, %s7030_s5 }
0x2599   : > { %v4059_v9 = vpop.xlane.xlu0 %4058 }
0x259a   : > { %v4060_v10 = vsub.f32 %v4052_v49, %v4059_v9 }
0x259c   : > { %v4061_v12 = vmul.f32 1.442695, %v4060_v10 }
0x259e   : > { %6038 = vpow2.f32 %v4061_v12 }
0x25ab   : > { %v6039_v60 = vpop.eup %6038 }
0x25ac   : > { %v4063_v61 = vsel %vm2187_vm9, %v6039_v60, 0.0 }
0x25ad   : > { %4064 = vadd.xlane.f32.xlu0 %v4063_v61 }
0x260c   : > { %v4174_v63 = vpop.xlane.xlu1 %4173 }
0x260d   : > { %v4175_v1 = vsub.f32 %v4167_v22, %v4174_v63 }
0x260f   : > { %v4176_v3 = vmul.f32 1.442695, %v4175_v1 }
0x2610   : > { %v4073_v5 = vpop.permute.xlu1 %4072 }
0x2611   : > { %6040 = vpow2.f32 %v4176_v3  ;;  %v4078_v7 = vsel %vm1294_vm3, %v4073_v5, 0 }
0x2612   : > { %5792 = vmatpush3.bf16.msra.mxu0 %v4078_v7 }
0x2613   : > { %5803 = vmatprep.subr.bf16.mxu0 %v6103_v4 }
0x2614   : > { %v4334_v35 = vpop.permute.xlu1 %4333 }
0x261e   : > { %v6041_v8 = vpop.eup %6040 }
0x261f   : > { %v4178_v11 = vsel %vm2187_vm9, %v6041_v8, 0.0 }
0x2620   : > { %4179 = vadd.xlane.f32.xlu0 %v4178_v11  ;;  %v5974_v11 = vld [vmem:[%s7027_s0 + $0x30] sm:$0xff]  }
0x2636   : > { %v4065_v13 = vpop.xlane.xlu0 %4064  ;;  %4186 = vrot.lane.b32.xlu0 %v6812_v36, %s7031_s9 }
0x2637   : > { %6042 = vrcp.f32 %v4065_v13 }
0x2644   : > { %v6043_v14 = vpop.eup %6042 }
0x2645   : > { %v4067_v6 = vmul.f32 %v6043_v14, %v6039_v60 }
0x2647   : > { %5313 = vst.msk [vmem:[%s6539_s7 + $0x10] sm:$0x7f] %vm2187_vm9, %v4067_v6  ;;  %v4070_v15 = vpack.c.bf16 %v4067_v6, %v4067_v6 }
0x2649   : > { %5794 = vmatmul.mubr.msk.bf16.vlgmr.msra.gmra.mxu0 %vm2204_vm10, %v4070_v15 }
0x264a   : > { %5805 = vmatprep.mubr.msk.bf16.mxu0 %vm6104_vm1, %v6103_v4 }
0x26a9   : > { %v4180_v25 = vpop.xlane.xlu0 %4179 }
0x26aa   : > { %6044 = vrcp.f32 %v4180_v25 }
0x26ad   : > { %v4187_v2 = vpop.permute.xlu0 %4186 }
0x26ae   : > { %v4192_v27 = vsel %vm1294_vm3, %v4187_v2, 0 }
0x26af   : > { %5804 = vmatpush3.bf16.msra.mxu0 %v4192_v27 }
0x26b0   : > { %5815 = vmatprep.subr.bf16.mxu0 %v6103_v4 }
0x26b7   : > { %v6045_v24 = vpop.eup %6044 }
0x26b8   : > { %v4182_v0 = vmul.f32 %v6045_v24, %v6041_v8 }
0x26ba   : > { %5316 = vst.msk [vmem:[%s6539_s7 + $0x18] sm:$0x7f] %vm2187_vm9, %v4182_v0  ;;  %v4185_v30 = vpack.c.bf16 %v4182_v0, %v4182_v0  ;;  %s7052_s7 = sld [smem:[#allocation22_spill]] }
0x26bc   : > { %5806 = vmatmul.mubr.msk.bf16.vlgmr.msra.gmra.mxu0 %vm2204_vm10, %v4185_v30 }
0x26bd   : > { %5816 = vmatpush3.bf16.msra.mxu0 %v5972_v29  ;;  %5817 = vmatprep.mubr.msk.bf16.mxu0 %vm6104_vm1, %v6103_v4 }
0x26be   : > { %5827 = vmatprep.subr.bf16.mxu0 %v6103_v4 }
0x2709   : > { %v4114_v31 = vpop.f32.mrf.mxu0 }
0x270a   : > { %v4120_v32 = vpack.c.bf16 %v4114_v31, %v4114_v31 }
0x270b   : > { %v5795_v34 = vpop.f32.mrf.mxu0 }
0x270c   : > { %5818 = vmatmul.mubr.msk.bf16.vlgmr.msra.gmra.mxu0 %vm1228_vm4, %v4120_v32 }
0x270d   : > { %v4117_v36 = vpop.f32.mrf.mxu0  ;;  %5829 = vmatprep.mubr.msk.bf16.mxu0 %vm6104_vm1, %v6103_v4 }
0x270f   : > { %v5796_v26 = vpop.f32.mrf.mxu0 }
0x277c   : > { %v4228_v39 = vpop.f32.mrf.mxu0 }
0x277d   : > { %v4234_v40 = vpack.c.bf16 %v4228_v39, %v4228_v39 }
0x277e   : > { %v5807_v41 = vpop.f32.mrf.mxu0 }
0x277f   : > { %5812 = vmatmul.mubr.msk.bf16.vlgmr.msra.gmra.mxu1 %vm1228_vm4, %v4234_v40 }
0x2780   : > { %5822 = vmatpush3.bf16.xpose.msra.mxu1 %v4339_v42  ;;  %v4231_v44 = vpop.f32.mrf.mxu0  ;;  %5823 = vmatprep.mubr.msk.bf16.mxu1 %vm6104_vm1, %v6103_v4 }
0x2781   : > { %5833 = vmatprep.subr.bf16.mxu1 %v6103_v4 }
0x2782   : > { %v5808_v45 = vpop.f32.mrf.mxu0 }
0x2787   : > { %5824 = vmatmul.mubr.msk.bf16.vlgmr.msra.gmra.mxu1 %vm1228_vm4, %v4334_v35 }
0x2788   : > { %5835 = vmatprep.mubr.msk.bf16.mxu1 %vm6104_vm1, %v6103_v4  ;;  %5834 = vmatpush3.bf16.msra.mxu1 %v5974_v11 }
0x2789   : > { %5845 = vmatprep.subr.bf16.mxu1 %v6103_v4 }
0x27cc   : > { %v6885_v46 = vpop.f32.mrf.mxu0 }
0x27ce   : > { %v5819_v47 = vpop.f32.mrf.mxu0 }
0x27d0   : > { %v4330_v48 = vpop.f32.mrf.mxu0 }
0x27d2   : > { %v5820_v49 = vpop.f32.mrf.mxu0 }
0x283f   : > { %v6887_v50 = vpop.f32.mrf.mxu1 }
0x2840   : > { %v4328_v34 = vadd.f32 %v6885_v46, %v6887_v50  ;;  %v5333_v50 = vld [vmem:[%s7035_s13 + $0x1] ss:$0 sm:$0xff] }
0x2841   : > { %v5813_v51 = vpop.f32.mrf.mxu1 }
0x2843   : > { %v4281_v52 = vpop.f32.mrf.mxu1 }
0x2845   : > { %v5814_v58 = vpop.f32.mrf.mxu1 }
0x2847   : > { %v4375_v53 = vpop.f32.mrf.mxu1 }
0x2848   : > { %v4376_v22 = vadd.f32 %v6061_v54, %v4375_v53 }
0x2849   : > { %v5825_v55 = vpop.f32.mrf.mxu1 }
0x284a   : > { %v4381_v56 = vsel %vm2187_vm9, %v4376_v22, -inf }
0x284b   : > { %4382 = vmax.xlane.f32.xlu1 %v4381_v56  ;;  %v4378_v23 = vpop.f32.mrf.mxu1 }
0x284d   : > { %v5826_v20 = vpop.f32.mrf.mxu1 }
0x285c   : > { %4497 = vrot.lane.b32.xlu1 %v6874_v38, %s7033_s26 }
0x2860   : > { %4495 = vrot.lane.b32.xlu1 %v6820_v43, %s7031_s9 }
0x28d4   : > { %v4383_v57 = vpop.xlane.xlu1 %4382 }
0x28d5   : > { %v4384_v59 = vsub.f32 %v4376_v22, %v4383_v57 }
0x28d7   : > { %v4385_v9 = vmul.f32 1.442695, %v4384_v59 }
0x28d8   : > { %v4498_v3 = vpop.permute.xlu1 %4497 }
0x28d9   : > { %6046 = vpow2.f32 %v4385_v9  ;;  %v4503_v7 = vsel %vm1228_vm4, %v4498_v3, 0  ;;  %v5976_v9 = vld [vmem:[%s7036_s1 + $0x18] sm:$0xff]  }
0x28dc   : > { %v4496_v8 = vpop.permute.xlu1 %4495 }
0x28e6   : > { %v6047_v10 = vpop.eup %6046 }
0x28e7   : > { %v4387_v12 = vsel %vm2187_vm9, %v6047_v10, 0.0 }
0x28e8   : > { %4388 = vadd.xlane.f32.xlu0 %v4387_v12  ;;  %v5979_v12 = vld [vmem:[%s7037_s21 + $0x30] sm:$0xff]  }
0x28fe   : > { %4396 = vrot.lane.b32.xlu0 %v6874_v38, %s7030_s5  ;;  %s7049_s5 = sld [smem:[#allocation17_spill]] }
0x2971   : > { %v4389_v60 = vpop.xlane.xlu0 %4388 }
0x2972   : > { %6048 = vrcp.f32 %v4389_v60 }
0x2975   : > { %v4397_v61 = vpop.permute.xlu0 %4396 }
0x2976   : > { %v4402_v63 = vsel %vm1294_vm3, %v4397_v61, 0 }
0x2977   : > { %5828 = vmatpush3.bf16.msra.mxu0 %v4402_v63 }
0x2978   : > { %5839 = vmatprep.subr.bf16.mxu0 %v6103_v4 }
0x297f   : > { %v6049_v43 = vpop.eup %6048 }
0x2980   : > { %v4391_v1 = vmul.f32 %v6049_v43, %v6047_v10  ;;  %v5977_v10 = vld [vmem:[%s7036_s1 + $0x10] sm:$0xff]  }
0x2982   : > { %5323 = vst.msk [vmem:[%s6594_s17 + $0x10] sm:$0x7f] %vm2187_vm9, %v4391_v1  ;;  %v4394_v5 = vpack.c.bf16 %v4391_v1, %v4391_v1  ;;  %v5336_v1 = vld [vmem:[%s7038_s25 + $0x1] ss:$0 sm:$0xff] }
0x2984   : > { %5830 = vmatmul.mubr.msk.bf16.vlgmr.msra.gmra.mxu0 %vm2204_vm10, %v4394_v5  ;;  %v5337_v5 = vld [vmem:[%s7039_s29 + $0x1] ss:$0 sm:$0xff] }
0x2985   : > { %5840 = vmatpush3.bf16.xpose.msra.mxu0 %v4503_v7  ;;  %5841 = vmatprep.mubr.msk.bf16.mxu0 %vm6104_vm1, %v6103_v4 }
0x2986   : > { %5851 = vmatprep.subr.bf16.mxu0 %v6103_v4 }
0x298c   : > { %5842 = vmatmul.mubr.msk.bf16.vlgmr.msra.gmra.mxu0 %vm1228_vm4, %v4496_v8 }
0x298d   : > { %5853 = vmatprep.mubr.msk.bf16.mxu0 %vm6104_vm1, %v6103_v4  ;;  %5852 = vmatpush3.bf16.msra.mxu0 %v5975_v37 }
0x298e   : > { %5865 = vmatprep.subr.bf16.mxu0 %v6103_v4 }
0x2a44   : > { %v4438_v13 = vpop.f32.mrf.mxu0 }
0x2a45   : > { %v4444_v14 = vpack.c.bf16 %v4438_v13, %v4438_v13 }
0x2a46   : > { %v5831_v6 = vpop.f32.mrf.mxu0 }
0x2a47   : > { %5836 = vmatmul.mubr.msk.bf16.vlgmr.msra.gmra.mxu1 %vm1228_vm4, %v4444_v14  ;;  %v5980_v14 = vld [vmem:[%s7037_s21 + $0x28] sm:$0xff]   ;;  %v5981_v6 = vld [vmem:[%s7037_s21 + $0x20] sm:$0xff]  }
0x2a48   : > { %v4441_v15 = vpop.f32.mrf.mxu0  ;;  %5847 = vmatprep.mubr.msk.bf16.mxu1 %vm6104_vm1, %v6103_v4 }
0x2a49   : > { %v5343_v15 = vld [vmem:[%s7049_s5 + $0x1] ss:$0 sm:$0xff] }
0x2a4a   : > { %v5832_v16 = vpop.f32.mrf.mxu0 }
0x2a4c   : > { %v4539_v17 = vpop.f32.mrf.mxu0 }
0x2a4d   : > { %v4540_v18 = vadd.f32 %v6061_v54, %v4539_v17 }
0x2a4e   : > { %v5843_v19 = vpop.f32.mrf.mxu0 }
0x2a4f   : > { %v4545_v21 = vsel %vm2187_vm9, %v4540_v18, -inf }
0x2a50   : > { %4546 = vmax.xlane.f32.xlu0 %v4545_v21  ;;  %v4542_v25 = vpop.f32.mrf.mxu0 }
0x2a52   : > { %v5844_v2 = vpop.f32.mrf.mxu0 }
0x2a66   : > { %4559 = vrot.lane.b32.xlu0 %v6874_v38, %s7031_s9  ;;  %s7050_s9 = sld [smem:[#allocation19_spill]] }
0x2ad9   : > { %v4547_v27 = vpop.xlane.xlu0 %4546 }
0x2ada   : > { %v4548_v24 = vsub.f32 %v4540_v18, %v4547_v27  ;;  %v5356_v27 = vld [vmem:[%s7050_s9 + $0x1] ss:$0 sm:$0xff] }
0x2adc   : > { %v4549_v0 = vmul.f32 1.442695, %v4548_v24 }
0x2add   : > { %v4560_v29 = vpop.permute.xlu0 %4559 }
0x2ade   : > { %6050 = vpow2.f32 %v4549_v0  ;;  %v4565_v30 = vsel %vm1294_vm3, %v4560_v29, 0 }
0x2adf   : > { %5846 = vmatpush3.bf16.msra.mxu1 %v4565_v30 }
0x2ae0   : > { %5857 = vmatprep.subr.bf16.mxu1 %v6103_v4 }
0x2aeb   : > { %v6051_v31 = vpop.eup %6050 }
0x2aec   : > { %v4551_v32 = vsel %vm2187_vm9, %v6051_v31, 0.0 }
0x2aed   : > { %4552 = vadd.xlane.f32.xlu1 %v4551_v32 }
0x2b07   : > { %v4488_v36 = vpop.f32.mrf.mxu1 }
0x2b08   : > { %v4494_v26 = vadd.f32 %v4488_v36, %v4328_v34 }
0x2b09   : > { %v5837_v33 = vpop.f32.mrf.mxu1 }
0x2b0b   : > { %v4491_v38 = vpop.f32.mrf.mxu1 }
0x2b0d   : > { %v5838_v39 = vpop.f32.mrf.mxu1 }
0x2b76   : > { %v4553_v40 = vpop.xlane.xlu1 %4552 }
0x2b77   : > { %6052 = vrcp.f32 %v4553_v40 }
0x2b84   : > { %v6053_v41 = vpop.eup %6052 }
0x2b85   : > { %v4555_v42 = vmul.f32 %v6053_v41, %v6051_v31 }
0x2b87   : > { %5328 = vst.msk [vmem:[%s6594_s17 + $0x18] sm:$0x7f] %vm2187_vm9, %v4555_v42  ;;  %v4558_v44 = vpack.c.bf16 %v4555_v42, %v4555_v42  ;;  %s7051_s17 = sld [smem:[#allocation27_spill]]  ;;  %v5364_v42 = vld [vmem:[%s7043_s4 + $0x1] ss:$0 sm:$0xff] }
0x2b89   : > { %5848 = vmatmul.mubr.msk.bf16.vlgmr.msra.gmra.mxu1 %vm2204_vm10, %v4558_v44 }
0x2b8a   : > { %5861 = vmatprep.mubr.msk.bf16.mxu1 %vm6104_vm1, %v6103_v4  ;;  %5858 = vmatpush3.bf16.msra.mxu1 %v5976_v9 }
0x2b8b   : > { %5859 = vmatprep.subr.bf16.mxu1 %v6103_v4 }
0x2b8d   : > { %s1096_s10 = scalar_lea.vmem %s7052_s7, %s7051_s17 }
0x2b8e   : > { %5860 = vmatpush3.bf16.msra.mxu1 %v5977_v10 }
0x2c49   : > { %v4601_v45 = vpop.f32.mrf.mxu1 }
0x2c4a   : > { %v4607_v35 = vpack.c.bf16 %v4601_v45, %v4601_v45  ;;  %v5365_v45 = vld [vmem:[%s7044_s22 + $0x1] ss:$0 sm:$0xff] }
0x2c4b   : > { %v5849_v46 = vpop.f32.mrf.mxu1 }
0x2c4c   : > { %5854 = vmatmul.mubr.msk.bf16.vlgmr.msra.gmra.mxu0 %vm1228_vm4, %v4607_v35 }
0x2c4d   : > { %v4604_v47 = vpop.f32.mrf.mxu1  ;;  %5873 = vmatprep.mubr.msk.bf16.mxu0 %vm6104_vm1, %v6103_v4 }
0x2c4f   : > { %v5850_v48 = vpop.f32.mrf.mxu1 }
0x2c50   : > { %v4892_v48 = vld [vmem:[%s1096_s10] sm:$0xf] }
0x2d0c   : > { %v4651_v49 = vpop.f32.mrf.mxu0 }
0x2d0d   : > { %v4657_v51 = vadd.f32 %v4651_v49, %v4494_v26 }
0x2d0e   : > { %v5855_v52 = vpop.f32.mrf.mxu0 }
0x2d0f   : > { %v4666_v58 = vadd.f32 %v5333_v50, %v4657_v51 }
0x2d10   : > { %v4654_v53 = vpop.f32.mrf.mxu0 }
0x2d11   : > { %v4667_v54 = vadd.f32 %v4666_v58, %v6804_v28  ;;  %v5978_v28 = vld [vmem:[%s7037_s21 + $0x38] sm:$0xff]  }
0x2d12   : > { %v5856_v22 = vpop.f32.mrf.mxu0  ;;  %5866 = vmatpush3.bf16.msra.mxu0 %v5978_v28 }
0x2d13   : > { %v4672_v55 = vsel %vm1890_vm8, %v4667_v54, 0.0  ;;  %5867 = vmatprep.subr.bf16.mxu0 %v6103_v4 }
0x2d14   : > { %4673 = vadd.xlane.f32.xlu1 %v4672_v55 }
0x2d16   : > { %5868 = vmatpush3.bf16.msra.mxu0 %v5979_v12 }
0x2d17   : > { %5869 = vmatprep.subr.bf16.mxu0 %v6103_v4 }
0x2d1a   : > { %5870 = vmatpush3.bf16.msra.mxu0 %v5980_v14 }
0x2d1b   : > { %5871 = vmatprep.subr.bf16.mxu0 %v6103_v4 }
0x2d1e   : > { %5872 = vmatpush3.bf16.msra.mxu0 %v5981_v6 }
0x2d9d   : > { %v4674_v56 = vpop.xlane.xlu1 %4673 }
0x2d9e   : > { %v4675_v23 = vmul.f32 0.03125, %v4674_v56 }
0x2da0   : > { %v4676_v20 = vsub.f32 %v4667_v54, %v4675_v23 }
0x2da2   : > { %v4677_v57 = vmul.f32 %v4676_v20, %v4676_v20 }
0x2da4   : > { %v4678_v59 = vsel %vm1890_vm8, %v4677_v57, 0.0 }
0x2da5   : > { %4679 = vadd.xlane.f32.xlu1 %v4678_v59 }
0x2e2e   : > { %v4680_v60 = vpop.xlane.xlu1 %4679 }
0x2e2f   : > { %v4681_v61 = vmul.f32 0.03125, %v4680_v60 }
0x2e31   : > { %v4682_v63 = vadd.f32 1e-05, %v4681_v61 }
0x2e33   : > { %6054 = vrsqrt.f32 %v4682_v63 }
0x2e40   : > { %v6055_v43 = vpop.eup %6054 }
0x2e41   : > { %v4684_v3 = vmul.f32 %v6055_v43, %v4676_v20 }
0x2e43   : > { %v4691_v7 = vmul.f32 %v5336_v1, %v4684_v3 }
0x2e45   : > { %v4698_v8 = vadd.f32 %v5337_v5, %v4691_v7 }
0x2e47   : > { %v4699_v11 = vmul.f32 %v4698_v8, %v6474_v62 }
0x2e49   : > { %v4700_v13 = vpack.c.bf16 %v4699_v11, %v4699_v11 }
0x2e4b   : > { %5862 = vmatmul.mubr.msk.bf16.vlgmr.msra.gmra.mxu1 %vm1170_vm0, %v4700_v13 }
0x2f0b   : > { %v4763_v16 = vpop.f32.mrf.mxu1 }
0x2f0c   : > { %v4764_v17 = vadd.f32 %v5343_v15, %v4763_v16 }
0x2f0d   : > { %v5863_v18 = vpop.f32.mrf.mxu1 }
0x2f0e   : > { %v4769_v19 = vmax.f32 %v4764_v17, 0.0 }
0x2f0f   : > { %v4766_v21 = vpop.f32.mrf.mxu1 }
0x2f10   : > { %v4770_v25 = vpack.c.bf16 %v4769_v19, %v4769_v19 }
0x2f11   : > { %v5864_v2 = vpop.f32.mrf.mxu1 }
0x2f12   : > { %5874 = vmatmul.mubr.msk.bf16.vlgmr.msra.gmra.mxu0 %vm2941_vm11, %v4770_v25 }
0x2fd2   : > { %v4849_v24 = vpop.f32.mrf.mxu0 }
0x2fd3   : > { %v4850_v0 = vadd.f32 %v5356_v27, %v4849_v24 }
0x2fd4   : > { %v5875_v29 = vpop.f32.mrf.mxu0 }
0x2fd5   : > { %v4855_v30 = vadd.f32 %v4850_v0, %v4699_v11 }
0x2fd6   : > { %v4852_v31 = vpop.f32.mrf.mxu0 }
0x2fd7   : > { %v4860_v4 = vsel %vm1890_vm8, %v4855_v30, 0.0 }
0x2fd8   : > { %4861 = vadd.xlane.f32.xlu1 %v4860_v4  ;;  %v5876_v32 = vpop.f32.mrf.mxu0 }
0x3061   : > { %v4862_v34 = vpop.xlane.xlu1 %4861 }
0x3062   : > { %v4863_v36 = vmul.f32 0.03125, %v4862_v34 }
0x3064   : > { %v4864_v26 = vsub.f32 %v4855_v30, %v4863_v36 }
0x3066   : > { %v4865_v33 = vmul.f32 %v4864_v26, %v4864_v26 }
0x3068   : > { %v4866_v37 = vsel %vm1890_vm8, %v4865_v33, 0.0 }
0x3069   : > { %4867 = vadd.xlane.f32.xlu1 %v4866_v37 }
0x30f2   : > { %v4868_v38 = vpop.xlane.xlu1 %4867 }
0x30f3   : > { %v4869_v39 = vmul.f32 0.03125, %v4868_v38 }
0x30f5   : > { %v4870_v40 = vadd.f32 1e-05, %v4869_v39 }
0x30f7   : > { %6056 = vrsqrt.f32 %v4870_v40 }
0x3104   : > { %v6057_v41 = vpop.eup %6056 }
0x3105   : > { %v4872_v44 = vmul.f32 %v6057_v41, %v4864_v26 }
0x3107   : > { %v4879_v35 = vmul.f32 %v5364_v42, %v4872_v44 }
0x3109   : > { %v4886_v46 = vadd.f32 %v5365_v45, %v4879_v35 }
0x310b   : > { %v4887_v47 = vmul.f32 %v4886_v46, %v6474_v62 }
0x310d   : > { %v4888_v49 = vpack.c.bf16 %v4887_v47, %v4887_v47 }
0x310f   : > { %v4893_v50 = vsel %vm4891_vm14, %v4888_v49, %v4892_v48 }
0x3110   : > { %4894 = vst [vmem:[%s1096_s10] sm:$0xf] %v4893_v50 }
0x3111 PF: > { %s7053_s18 = sld [smem:[#allocation26_spill]] }
0x3117   : > { %s76_s28 = sadd.s32 1, %s7053_s18  }
0x3118   : > { %p73_p4 = scmp.ge.s32.totalorder %s76_s28, 4  }
0x311a   :  { %75 = sbr.rel (!%p73_p4) target bundleno = 66 (0x42), region = 287 }

</bundles_post_ra>
